<compile_context>
chip_gen: v5e
topology: v5e:2x2
jax: 0.10.0
libtpu: 0.0.40
codegen_flags: <defaults>
</compile_context>

<pallas_src>
import functools

import jax
import jax.numpy as jnp
import numpy as np
from jax import lax
from jax.experimental import pallas as pl
from jax.experimental.pallas import tpu as pltpu


# ------------------------------ fused kernel ---------------------------------

def _branchnet_kernel(
    x_ref,                                    # (rows, DIN)  time-major, row-padded
    wx1_ref, wh1_ref, bx1_ref, bhn1_ref,      # GRU1 (gate-major: (3, ., H))
    wx2_ref, wh2_ref, bx2_ref, bhn2_ref,      # GRU2
    rvw_ref, rvb_ref,                         # repeat-vector Linear
    wx3_ref, wh3_ref, bx3_ref, bhn3_ref,      # GRU3
    wx4_ref, wh4_ref, bx4_ref, bhn4_ref,      # GRU4
    fcw_ref, fcb_ref,                         # output Linear (fcw: (OUT, H))
    out_ref,                                  # (OUT, rows)  lane-dense store
    seq_ref, proj_ref,                        # scratch: (rows, H), (3, rows, H)
    *, T, BTP, H, DIN):
  """Whole BranchNet forward for one batch tile; intermediates stay in VMEM.

  PyTorch GRU semantics (gate order r, z, n):
    r = sigmoid(x@Wxr + bir + h@Whr + bhr)
    z = sigmoid(x@Wxz + biz + h@Whz + bhz)
    n = tanh   (x@Wxn + bin + r * (h@Whn + bhn))
    h = (1 - z) * n + z * h
  bir+bhr / biz+bhz / bin are folded into the x-projection biases (bx);
  bhn is kept separate (it is multiplied by r).
  """

  def gates(xr, xz, xn, hr, hz, hn, h, bhn_b):
    r = jax.nn.sigmoid(xr + hr)
    z = jax.nn.sigmoid(xz + hz)
    n = jnp.tanh(xn + r * (hn + bhn_b))
    return (1.0 - z) * n + z * h

  def run_gru(wh_ref, bhn_ref, read_xp, store_seq):
    whr, whz, whn = wh_ref[0], wh_ref[1], wh_ref[2]      # hoisted weight loads
    bhn_b = jnp.broadcast_to(bhn_ref[...], (BTP, H))     # hoisted bias bcast
    h = jnp.zeros((BTP, H), jnp.float32)
    # Static unroll: T is small and known at trace time (see TODO for long T).
    for t in range(T):
      hr = jnp.dot(h, whr, preferred_element_type=jnp.float32)
      hz = jnp.dot(h, whz, preferred_element_type=jnp.float32)
      hn = jnp.dot(h, whn, preferred_element_type=jnp.float32)
      xr, xz, xn = read_xp(t)
      h = gates(xr, xz, xn, hr, hz, hn, h, bhn_b)
      if store_seq:
        seq_ref[t * BTP:(t + 1) * BTP, :] = h            # 8-aligned row slab
    return h

  def project_seq(src, wx_ref, bx_ref):
    # Whole-sequence input projection, one lane-dense matmul per gate.
    for g in range(3):
      proj_ref[g, :, :] = (jnp.dot(src, wx_ref[g],
                                   preferred_element_type=jnp.float32)
                           + bx_ref[g])

  def read_proj(t):
    lo, hi = t * BTP, (t + 1) * BTP
    return (proj_ref[0, lo:hi, :], proj_ref[1, lo:hi, :], proj_ref[2, lo:hi, :])

  # ---- GRU1: hoisted input projection over the whole sequence ---------------
  x_all = x_ref[...]
  if DIN == 1:
    # K=1 contraction would burn a full MXU pass -> VPU broadcast multiply-add.
    for g in range(3):
      proj_ref[g, :, :] = x_all * wx1_ref[g] + bx1_ref[g]
  else:
    project_seq(x_all, wx1_ref, bx1_ref)
  run_gru(wh1_ref, bhn1_ref, read_proj, store_seq=True)

  # ---- GRU2: project GRU1's whole output sequence, keep only last h ---------
  project_seq(seq_ref[...], wx2_ref, bx2_ref)
  h2_last = run_gru(wh2_ref, bhn2_ref, read_proj, store_seq=False)

  # ---- repeat-vector Linear on the last hidden state -------------------------
  rv = (jnp.dot(h2_last, rvw_ref[...],
                preferred_element_type=jnp.float32) + rvb_ref[...])     # (BTP, H)

  # ---- GRU3: input constant over time -> project exactly once ----------------
  xp3 = tuple(jnp.dot(rv, wx3_ref[g], preferred_element_type=jnp.float32)
              + bx3_ref[g] for g in range(3))
  run_gru(wh3_ref, bhn3_ref, lambda t: xp3, store_seq=True)

  # ---- GRU4 -------------------------------------------------------------------
  project_seq(seq_ref[...], wx4_ref, bx4_ref)
  run_gru(wh4_ref, bhn4_ref, read_proj, store_seq=True)

  # ---- output Linear: lane-dense (OUT, rows) store ----------------------------
  out_ref[...] = (lax.dot_general(fcw_ref[...], seq_ref[...],
                                  (((1,), (1,)), ((), ())),
                                  preferred_element_type=jnp.float32)
                  + fcb_ref[...])


# -------------------------------- wrapper -------------------------------------

def _choose_batch_tile(batch):
  """Batch-tile rows for the parallel grid (multiple of 8 when possible)."""
  if batch % 8 == 0:
    for cand in (512, 256, 128, 64, 32, 16, 8):
      if batch % cand == 0:
        return cand
  return batch                     # small / odd batches: single tile


def _vmem_limit_bytes():
  """Generation-aware VMEM budget: ~3/4 of physical, never the whole thing."""
  try:
    cap = int(pltpu.get_tpu_info().vmem_capacity_bytes)
  except Exception:                # pragma: no cover - fallback if query fails
    cap = 64 * 1024 * 1024
  return max(32 * 1024 * 1024, (cap * 3) // 4)


def _const_spec(shape):
  """Full-array block with a constant index_map (weights DMA'd once)."""
  zeros = (0,) * len(shape)
  return pl.BlockSpec(shape, lambda i, _z=zeros: _z)


def branchnet_forward(params, x_btd):
  """x_btd: (B, T, N_input_fn), PyTorch batch_first. Returns (B, T, output_size)."""
  B, T, DIN = x_btd.shape
  H = params["gru1"]["wh"].shape[-1]
  OUT = params["fc_w"].shape[0]

  bt = _choose_batch_tile(B)
  n_tiles = B // bt
  btp = ((bt + 7) // 8) * 8        # sublane-aligned per-timestep row slab
  rows = T * btp

  # Boundary layout plumbing only (tiny tensors): time-major, batch-tiled,
  # zero-padded to btp rows per step.
  x_tm = jnp.transpose(x_btd.astype(jnp.float32), (1, 0, 2))          # (T, B, DIN)
  x_tm = x_tm.reshape(T, n_tiles, bt, DIN).transpose(1, 0, 2, 3)      # (nt,T,bt,DIN)
  if btp != bt:
    x_tm = jnp.pad(x_tm, ((0, 0), (0, 0), (0, btp - bt), (0, 0)))
  x_prep = x_tm.reshape(n_tiles, rows, DIN)

  kernel = functools.partial(_branchnet_kernel, T=T, BTP=btp, H=H, DIN=DIN)

  g1, g2, g3, g4 = params["gru1"], params["gru2"], params["gru3"], params["gru4"]
  weight_args = (
      g1["wx"], g1["wh"], g1["bx"], g1["bhn"],
      g2["wx"], g2["wh"], g2["bx"], g2["bhn"],
      params["rv_w"], params["rv_b"],
      g3["wx"], g3["wh"], g3["bx"], g3["bhn"],
      g4["wx"], g4["wh"], g4["bx"], g4["bhn"],
      params["fc_w"], params["fc_b"])

  in_specs = [pl.BlockSpec((None, rows, DIN), lambda i: (i, 0, 0))]
  in_specs += [_const_spec(w.shape) for w in weight_args]

  out_prep = pl.pallas_call(
      kernel,
      out_shape=jax.ShapeDtypeStruct((n_tiles, OUT, rows), jnp.float32),
      grid=(n_tiles,),
      in_specs=in_specs,
      out_specs=pl.BlockSpec((None, OUT, rows), lambda i: (i, 0, 0)),
      scratch_shapes=[pltpu.VMEM((rows, H), jnp.float32),
                      pltpu.VMEM((3, rows, H), jnp.float32)],
      compiler_params=pltpu.CompilerParams(
          dimension_semantics=("parallel",),
          vmem_limit_bytes=_vmem_limit_bytes()),
  )(x_prep, *weight_args)

  out = out_prep.reshape(n_tiles, OUT, T, btp)[:, :, :, :bt]   # drop row padding
  return jnp.transpose(out, (0, 3, 2, 1)).reshape(B, T, OUT)


# --------------------------- parameter construction ---------------------------

def init_gru_params(key, din, h):
  """Gate-major GRU params (PyTorch gate order r, z, n; U(-1/sqrt(h), 1/sqrt(h)))."""
  k = 1.0 / float(np.sqrt(h))
  ks = jax.random.split(key, 12)
  u = lambda kk, shape: jax.random.uniform(kk, shape, jnp.float32, -k, k)
  wx = jnp.stack([u(ks[0], (din, h)), u(ks[1], (din, h)), u(ks[2], (din, h))])  # (3,din,h)
  wh = jnp.stack([u(ks[3], (h, h)), u(ks[4], (h, h)), u(ks[5], (h, h))])        # (3,h,h)
  bi = [u(ks[6], (1, h)), u(ks[7], (1, h)), u(ks[8], (1, h))]
  bh = [u(ks[9], (1, h)), u(ks[10], (1, h)), u(ks[11], (1, h))]
  bx = jnp.stack([bi[0] + bh[0], bi[1] + bh[1], bi[2]])                          # (3,1,h)
  return dict(wx=wx, wh=wh, bx=bx, bhn=bh[2])


def init_branchnet(key, hidden_size=32, output_size=1, n_input_fn=1):
  k1, k2, k3, k4, k5, k6 = jax.random.split(key, 6)
  kb = 1.0 / float(np.sqrt(hidden_size))
  k5w, k5b = jax.random.split(k5)
  rv_w = jax.random.uniform(k5w, (hidden_size, hidden_size), jnp.float32, -kb, kb)
  rv_b = jax.random.uniform(k5b, (1, hidden_size), jnp.float32, -kb, kb)
  k6w, k6b = jax.random.split(k6)
  fc_w = jax.random.uniform(k6w, (output_size, hidden_size), jnp.float32, -kb, kb)
  fc_b = jax.random.uniform(k6b, (output_size, 1), jnp.float32, -kb, kb)
  return dict(
      gru1=init_gru_params(k1, n_input_fn, hidden_size),
      gru2=init_gru_params(k2, hidden_size, hidden_size),
      gru3=init_gru_params(k3, hidden_size, hidden_size),
      gru4=init_gru_params(k4, hidden_size, hidden_size),
      rv_w=rv_w, rv_b=rv_b, fc_w=fc_w, fc_b=fc_b)


# ----------------------------- pure-JAX reference ------------------------------

def _ref_gru(x_tbd, p):
  B = x_tbd.shape[1]
  H = p["wh"].shape[-1]

  def step(h, xt):
    xr = xt @ p["wx"][0] + p["bx"][0]
    xz = xt @ p["wx"][1] + p["bx"][1]
    xn = xt @ p["wx"][2] + p["bx"][2]
    hr = h @ p["wh"][0]
    hz = h @ p["wh"][1]
    hn = h @ p["wh"][2]
    r = jax.nn.sigmoid(xr + hr)
    z = jax.nn.sigmoid(xz + hz)
    n = jnp.tanh(xn + r * (hn + p["bhn"]))
    h_new = (1.0 - z) * n + z * h
    return h_new, h_new

  _, ys = lax.scan(step, jnp.zeros((B, H), jnp.float32), x_tbd)
  return ys


def _ref_forward(params, x_btd):
  B, T, _ = x_btd.shape
  x = jnp.transpose(x_btd, (1, 0, 2)).astype(jnp.float32)    # (T, B, Din)
  h = _ref_gru(x, params["gru1"])
  h = _ref_gru(h, params["gru2"])
  rv = h[-1] @ params["rv_w"] + params["rv_b"]               # (B, H)
  rep = jnp.broadcast_to(rv[None], (T,) + rv.shape)
  h = _ref_gru(rep, params["gru3"])
  h = _ref_gru(h, params["gru4"])
  out = jnp.einsum("tbh,oh->tbo", h, params["fc_w"]) + params["fc_b"][:, 0]
  return jnp.transpose(out, (1, 0, 2))                       # (B, T, OUT)


# ------------------------------------ main -------------------------------------

if __name__ == "__main__":
  HIDDEN = 32    # module default is 256; small for the demo
  OUT = 1        # output_size
  DIN = 1        # N_input_fn
  B, T = 2, 8

  key = jax.random.PRNGKey(0)
  kp, kx = jax.random.split(key)
  params = init_branchnet(kp, HIDDEN, OUT, DIN)
  x = jax.random.normal(kx, (B, T, DIN), jnp.float32)

  fwd = jax.jit(branchnet_forward)
  y = fwd(params, x)
  jax.block_until_ready(y)
  assert y.shape == (B, T, OUT), y.shape

  y_ref = _ref_forward(params, x)
  np.testing.assert_allclose(np.asarray(y), np.asarray(y_ref),
                             rtol=1e-2, atol=1e-2)

  print("KERNEL_OK")
</pallas_src>

<mosaic_0001>
module attributes {stable_mosaic.version = 11 : i64} {
  func.func @_branchnet_kernel(%arg0: i32, %arg1: memref<1x64x1xf32, #tpu.memory_space<vmem>>, %arg2: memref<3x1x32xf32, #tpu.memory_space<vmem>>, %arg3: memref<3x32x32xf32, #tpu.memory_space<vmem>>, %arg4: memref<3x1x32xf32, #tpu.memory_space<vmem>>, %arg5: memref<1x32xf32, #tpu.memory_space<vmem>>, %arg6: memref<3x32x32xf32, #tpu.memory_space<vmem>>, %arg7: memref<3x32x32xf32, #tpu.memory_space<vmem>>, %arg8: memref<3x1x32xf32, #tpu.memory_space<vmem>>, %arg9: memref<1x32xf32, #tpu.memory_space<vmem>>, %arg10: memref<32x32xf32, #tpu.memory_space<vmem>>, %arg11: memref<1x32xf32, #tpu.memory_space<vmem>>, %arg12: memref<3x32x32xf32, #tpu.memory_space<vmem>>, %arg13: memref<3x32x32xf32, #tpu.memory_space<vmem>>, %arg14: memref<3x1x32xf32, #tpu.memory_space<vmem>>, %arg15: memref<1x32xf32, #tpu.memory_space<vmem>>, %arg16: memref<3x32x32xf32, #tpu.memory_space<vmem>>, %arg17: memref<3x32x32xf32, #tpu.memory_space<vmem>>, %arg18: memref<3x1x32xf32, #tpu.memory_space<vmem>>, %arg19: memref<1x32xf32, #tpu.memory_space<vmem>>, %arg20: memref<1x32xf32, #tpu.memory_space<vmem>>, %arg21: memref<1x1xf32, #tpu.memory_space<vmem>>, %arg22: memref<1x1x64xf32, #tpu.memory_space<vmem>>, %arg23: memref<64x32xf32, #tpu.memory_space<vmem>>, %arg24: memref<3x64x32xf32, #tpu.memory_space<vmem>>) attributes {dimension_semantics = [#tpu.dimension_semantics<parallel>], iteration_bounds = array<i64: 1>, scalar_prefetch = 0 : i64, scratch_operands = 2 : i64, tpu.core_type = #tpu.core_type<tc>, window_params = [{transform_indices = @transform_0, window_bounds = array<i64: 1, 64, 1>}, {pipeline_mode = #tpu.pipeline_mode<synchronous>, transform_indices = @transform_1, window_bounds = array<i64: 3, 1, 32>}, {pipeline_mode = #tpu.pipeline_mode<synchronous>, transform_indices = @transform_2, window_bounds = array<i64: 3, 32, 32>}, {pipeline_mode = #tpu.pipeline_mode<synchronous>, transform_indices = @transform_3, window_bounds = array<i64: 3, 1, 32>}, {pipeline_mode = #tpu.pipeline_mode<synchronous>, transform_indices = @transform_4, window_bounds = array<i64: 1, 32>}, {pipeline_mode = #tpu.pipeline_mode<synchronous>, transform_indices = @transform_5, window_bounds = array<i64: 3, 32, 32>}, {pipeline_mode = #tpu.pipeline_mode<synchronous>, transform_indices = @transform_6, window_bounds = array<i64: 3, 32, 32>}, {pipeline_mode = #tpu.pipeline_mode<synchronous>, transform_indices = @transform_7, window_bounds = array<i64: 3, 1, 32>}, {pipeline_mode = #tpu.pipeline_mode<synchronous>, transform_indices = @transform_8, window_bounds = array<i64: 1, 32>}, {pipeline_mode = #tpu.pipeline_mode<synchronous>, transform_indices = @transform_9, window_bounds = array<i64: 32, 32>}, {pipeline_mode = #tpu.pipeline_mode<synchronous>, transform_indices = @transform_10, window_bounds = array<i64: 1, 32>}, {pipeline_mode = #tpu.pipeline_mode<synchronous>, transform_indices = @transform_11, window_bounds = array<i64: 3, 32, 32>}, {pipeline_mode = #tpu.pipeline_mode<synchronous>, transform_indices = @transform_12, window_bounds = array<i64: 3, 32, 32>}, {pipeline_mode = #tpu.pipeline_mode<synchronous>, transform_indices = @transform_13, window_bounds = array<i64: 3, 1, 32>}, {pipeline_mode = #tpu.pipeline_mode<synchronous>, transform_indices = @transform_14, window_bounds = array<i64: 1, 32>}, {pipeline_mode = #tpu.pipeline_mode<synchronous>, transform_indices = @transform_15, window_bounds = array<i64: 3, 32, 32>}, {pipeline_mode = #tpu.pipeline_mode<synchronous>, transform_indices = @transform_16, window_bounds = array<i64: 3, 32, 32>}, {pipeline_mode = #tpu.pipeline_mode<synchronous>, transform_indices = @transform_17, window_bounds = array<i64: 3, 1, 32>}, {pipeline_mode = #tpu.pipeline_mode<synchronous>, transform_indices = @transform_18, window_bounds = array<i64: 1, 32>}, {pipeline_mode = #tpu.pipeline_mode<synchronous>, transform_indices = @transform_19, window_bounds = array<i64: 1, 32>}, {pipeline_mode = #tpu.pipeline_mode<synchronous>, transform_indices = @transform_20, window_bounds = array<i64: 1, 1>}, {transform_indices = @transform_21, window_bounds = array<i64: 1, 1, 64>}]} {
    %c0 = arith.constant 0 : index
    %c0_0 = arith.constant 0 : index
    %c0_1 = arith.constant 0 : index
    %0 = vector.load %arg1[%c0, %c0_0, %c0_1] : memref<1x64x1xf32, #tpu.memory_space<vmem>>, vector<1x64x1xf32>
    %1 = vector.shape_cast %0 : vector<1x64x1xf32> to vector<64x1xf32>
    %c0_2 = arith.constant 0 : index
    %c0_3 = arith.constant 0 : index
    %c0_4 = arith.constant 0 : index
    %2 = vector.load %arg2[%c0_2, %c0_3, %c0_4] : memref<3x1x32xf32, #tpu.memory_space<vmem>>, vector<1x1x32xf32>
    %3 = vector.shape_cast %2 : vector<1x1x32xf32> to vector<1x32xf32>
    %4 = vector.broadcast %1 : vector<64x1xf32> to vector<64x32xf32>
    %5 = vector.broadcast %3 : vector<1x32xf32> to vector<64x32xf32>
    %6 = arith.mulf %4, %5 : vector<64x32xf32>
    %c0_5 = arith.constant 0 : index
    %c0_6 = arith.constant 0 : index
    %c0_7 = arith.constant 0 : index
    %7 = vector.load %arg4[%c0_5, %c0_6, %c0_7] : memref<3x1x32xf32, #tpu.memory_space<vmem>>, vector<1x1x32xf32>
    %8 = vector.shape_cast %7 : vector<1x1x32xf32> to vector<1x32xf32>
    %9 = vector.broadcast %8 : vector<1x32xf32> to vector<64x32xf32>
    %10 = arith.addf %6, %9 : vector<64x32xf32>
    %c0_8 = arith.constant 0 : index
    %c0_9 = arith.constant 0 : index
    %c0_10 = arith.constant 0 : index
    %11 = vector.load %arg24[%c0_8, %c0_9, %c0_10] : memref<3x64x32xf32, #tpu.memory_space<vmem>>, vector<1x64x32xf32>
    %12 = vector.shape_cast %11 : vector<1x64x32xf32> to vector<64x32xf32>
    %13 = vector.shape_cast %10 : vector<64x32xf32> to vector<1x64x32xf32>
    tpu.vector_store %arg24[%c0_8, %c0_9, %c0_10], %13 {strides = array<i32>} : memref<3x64x32xf32, #tpu.memory_space<vmem>>, vector<1x64x32xf32>,
    %c1 = arith.constant 1 : index
    %c0_11 = arith.constant 0 : index
    %c0_12 = arith.constant 0 : index
    %14 = vector.load %arg2[%c1, %c0_11, %c0_12] : memref<3x1x32xf32, #tpu.memory_space<vmem>>, vector<1x1x32xf32>
    %15 = vector.shape_cast %14 : vector<1x1x32xf32> to vector<1x32xf32>
    %16 = vector.broadcast %1 : vector<64x1xf32> to vector<64x32xf32>
    %17 = vector.broadcast %15 : vector<1x32xf32> to vector<64x32xf32>
    %18 = arith.mulf %16, %17 : vector<64x32xf32>
    %c1_13 = arith.constant 1 : index
    %c0_14 = arith.constant 0 : index
    %c0_15 = arith.constant 0 : index
    %19 = vector.load %arg4[%c1_13, %c0_14, %c0_15] : memref<3x1x32xf32, #tpu.memory_space<vmem>>, vector<1x1x32xf32>
    %20 = vector.shape_cast %19 : vector<1x1x32xf32> to vector<1x32xf32>
    %21 = vector.broadcast %20 : vector<1x32xf32> to vector<64x32xf32>
    %22 = arith.addf %18, %21 : vector<64x32xf32>
    %c1_16 = arith.constant 1 : index
    %c0_17 = arith.constant 0 : index
    %c0_18 = arith.constant 0 : index
    %23 = vector.load %arg24[%c1_16, %c0_17, %c0_18] : memref<3x64x32xf32, #tpu.memory_space<vmem>>, vector<1x64x32xf32>
    %24 = vector.shape_cast %23 : vector<1x64x32xf32> to vector<64x32xf32>
    %25 = vector.shape_cast %22 : vector<64x32xf32> to vector<1x64x32xf32>
    tpu.vector_store %arg24[%c1_16, %c0_17, %c0_18], %25 {strides = array<i32>} : memref<3x64x32xf32, #tpu.memory_space<vmem>>, vector<1x64x32xf32>,
    %c2 = arith.constant 2 : index
    %c0_19 = arith.constant 0 : index
    %c0_20 = arith.constant 0 : index
    %26 = vector.load %arg2[%c2, %c0_19, %c0_20] : memref<3x1x32xf32, #tpu.memory_space<vmem>>, vector<1x1x32xf32>
    %27 = vector.shape_cast %26 : vector<1x1x32xf32> to vector<1x32xf32>
    %28 = vector.broadcast %1 : vector<64x1xf32> to vector<64x32xf32>
    %29 = vector.broadcast %27 : vector<1x32xf32> to vector<64x32xf32>
    %30 = arith.mulf %28, %29 : vector<64x32xf32>
    %c2_21 = arith.constant 2 : index
    %c0_22 = arith.constant 0 : index
    %c0_23 = arith.constant 0 : index
    %31 = vector.load %arg4[%c2_21, %c0_22, %c0_23] : memref<3x1x32xf32, #tpu.memory_space<vmem>>, vector<1x1x32xf32>
    %32 = vector.shape_cast %31 : vector<1x1x32xf32> to vector<1x32xf32>
    %33 = vector.broadcast %32 : vector<1x32xf32> to vector<64x32xf32>
    %34 = arith.addf %30, %33 : vector<64x32xf32>
    %c2_24 = arith.constant 2 : index
    %c0_25 = arith.constant 0 : index
    %c0_26 = arith.constant 0 : index
    %35 = vector.load %arg24[%c2_24, %c0_25, %c0_26] : memref<3x64x32xf32, #tpu.memory_space<vmem>>, vector<1x64x32xf32>
    %36 = vector.shape_cast %35 : vector<1x64x32xf32> to vector<64x32xf32>
    %37 = vector.shape_cast %34 : vector<64x32xf32> to vector<1x64x32xf32>
    tpu.vector_store %arg24[%c2_24, %c0_25, %c0_26], %37 {strides = array<i32>} : memref<3x64x32xf32, #tpu.memory_space<vmem>>, vector<1x64x32xf32>,
    %c0_27 = arith.constant 0 : index
    %c0_28 = arith.constant 0 : index
    %c0_29 = arith.constant 0 : index
    %38 = vector.load %arg3[%c0_27, %c0_28, %c0_29] : memref<3x32x32xf32, #tpu.memory_space<vmem>>, vector<1x32x32xf32>
    %39 = vector.shape_cast %38 : vector<1x32x32xf32> to vector<32x32xf32>
    %c1_30 = arith.constant 1 : index
    %c0_31 = arith.constant 0 : index
    %c0_32 = arith.constant 0 : index
    %40 = vector.load %arg3[%c1_30, %c0_31, %c0_32] : memref<3x32x32xf32, #tpu.memory_space<vmem>>, vector<1x32x32xf32>
    %41 = vector.shape_cast %40 : vector<1x32x32xf32> to vector<32x32xf32>
    %c2_33 = arith.constant 2 : index
    %c0_34 = arith.constant 0 : index
    %c0_35 = arith.constant 0 : index
    %42 = vector.load %arg3[%c2_33, %c0_34, %c0_35] : memref<3x32x32xf32, #tpu.memory_space<vmem>>, vector<1x32x32xf32>
    %43 = vector.shape_cast %42 : vector<1x32x32xf32> to vector<32x32xf32>
    %c0_36 = arith.constant 0 : index
    %c0_37 = arith.constant 0 : index
    %44 = vector.load %arg5[%c0_36, %c0_37] : memref<1x32xf32, #tpu.memory_space<vmem>>, vector<1x32xf32>
    %45 = vector.shape_cast %44 : vector<1x32xf32> to vector<1x32xf32>
    %46 = vector.broadcast %45 : vector<1x32xf32> to vector<8x32xf32>
    %cst = arith.constant 0.000000e+00 : f32
    %47 = vector.broadcast %cst : f32 to vector<8x32xf32>
    %cst_38 = arith.constant dense<0.000000e+00> : vector<8x32xf32>
    %48 = tpu.matmul %47, %39, %cst_38 {dimension_numbers = #tpu.dot_dimension_numbers<[1], [0], [0], [1], [0, 0, 1, 1], [], []>} : vector<8x32xf32>, vector<32x32xf32>, vector<8x32xf32> -> vector<8x32xf32>
    %cst_39 = arith.constant dense<0.000000e+00> : vector<8x32xf32>
    %49 = tpu.matmul %47, %41, %cst_39 {dimension_numbers = #tpu.dot_dimension_numbers<[1], [0], [0], [1], [0, 0, 1, 1], [], []>} : vector<8x32xf32>, vector<32x32xf32>, vector<8x32xf32> -> vector<8x32xf32>
    %cst_40 = arith.constant dense<0.000000e+00> : vector<8x32xf32>
    %50 = tpu.matmul %47, %43, %cst_40 {dimension_numbers = #tpu.dot_dimension_numbers<[1], [0], [0], [1], [0, 0, 1, 1], [], []>} : vector<8x32xf32>, vector<32x32xf32>, vector<8x32xf32> -> vector<8x32xf32>
    %c0_41 = arith.constant 0 : index
    %c0_42 = arith.constant 0 : index
    %c0_43 = arith.constant 0 : index
    %51 = vector.load %arg24[%c0_41, %c0_42, %c0_43] : memref<3x64x32xf32, #tpu.memory_space<vmem>>, vector<1x8x32xf32>
    %52 = vector.shape_cast %51 : vector<1x8x32xf32> to vector<8x32xf32>
    %c1_44 = arith.constant 1 : index
    %c0_45 = arith.constant 0 : index
    %c0_46 = arith.constant 0 : index
    %53 = vector.load %arg24[%c1_44, %c0_45, %c0_46] : memref<3x64x32xf32, #tpu.memory_space<vmem>>, vector<1x8x32xf32>
    %54 = vector.shape_cast %53 : vector<1x8x32xf32> to vector<8x32xf32>
    %c2_47 = arith.constant 2 : index
    %c0_48 = arith.constant 0 : index
    %c0_49 = arith.constant 0 : index
    %55 = vector.load %arg24[%c2_47, %c0_48, %c0_49] : memref<3x64x32xf32, #tpu.memory_space<vmem>>, vector<1x8x32xf32>
    %56 = vector.shape_cast %55 : vector<1x8x32xf32> to vector<8x32xf32>
    %57 = arith.addf %52, %48 : vector<8x32xf32>
    %58 = arith.negf %57 : vector<8x32xf32>
    %59 = math.exp %58 : vector<8x32xf32>
    %cst_50 = arith.constant 1.000000e+00 : f32
    %60 = vector.broadcast %cst_50 : f32 to vector<8x32xf32>
    %61 = arith.addf %60, %59 : vector<8x32xf32>
    %62 = arith.divf %60, %61 : vector<8x32xf32>
    %63 = arith.addf %54, %49 : vector<8x32xf32>
    %64 = arith.negf %63 : vector<8x32xf32>
    %65 = math.exp %64 : vector<8x32xf32>
    %cst_51 = arith.constant 1.000000e+00 : f32
    %66 = vector.broadcast %cst_51 : f32 to vector<8x32xf32>
    %67 = arith.addf %66, %65 : vector<8x32xf32>
    %68 = arith.divf %66, %67 : vector<8x32xf32>
    %69 = arith.addf %50, %46 : vector<8x32xf32>
    %70 = arith.mulf %62, %69 : vector<8x32xf32>
    %71 = arith.addf %56, %70 : vector<8x32xf32>
    %72 = math.tanh %71 : vector<8x32xf32>
    %cst_52 = arith.constant 1.000000e+00 : f32
    %73 = vector.broadcast %cst_52 : f32 to vector<8x32xf32>
    %74 = arith.subf %73, %68 : vector<8x32xf32>
    %75 = arith.mulf %74, %72 : vector<8x32xf32>
    %76 = arith.mulf %68, %47 : vector<8x32xf32>
    %77 = arith.addf %75, %76 : vector<8x32xf32>
    %c0_53 = arith.constant 0 : index
    %c0_54 = arith.constant 0 : index
    %78 = vector.load %arg23[%c0_53, %c0_54] : memref<64x32xf32, #tpu.memory_space<vmem>>, vector<8x32xf32>
    tpu.vector_store %arg23[%c0_53, %c0_54], %77 {strides = array<i32>} : memref<64x32xf32, #tpu.memory_space<vmem>>, vector<8x32xf32>,
    %cst_55 = arith.constant dense<0.000000e+00> : vector<8x32xf32>
    %79 = tpu.matmul %77, %39, %cst_55 {dimension_numbers = #tpu.dot_dimension_numbers<[1], [0], [0], [1], [0, 0, 1, 1], [], []>} : vector<8x32xf32>, vector<32x32xf32>, vector<8x32xf32> -> vector<8x32xf32>
    %cst_56 = arith.constant dense<0.000000e+00> : vector<8x32xf32>
    %80 = tpu.matmul %77, %41, %cst_56 {dimension_numbers = #tpu.dot_dimension_numbers<[1], [0], [0], [1], [0, 0, 1, 1], [], []>} : vector<8x32xf32>, vector<32x32xf32>, vector<8x32xf32> -> vector<8x32xf32>
    %cst_57 = arith.constant dense<0.000000e+00> : vector<8x32xf32>
    %81 = tpu.matmul %77, %43, %cst_57 {dimension_numbers = #tpu.dot_dimension_numbers<[1], [0], [0], [1], [0, 0, 1, 1], [], []>} : vector<8x32xf32>, vector<32x32xf32>, vector<8x32xf32> -> vector<8x32xf32>
    %c0_58 = arith.constant 0 : index
    %c8 = arith.constant 8 : index
    %c0_59 = arith.constant 0 : index
    %82 = vector.load %arg24[%c0_58, %c8, %c0_59] : memref<3x64x32xf32, #tpu.memory_space<vmem>>, vector<1x8x32xf32>
    %83 = vector.shape_cast %82 : vector<1x8x32xf32> to vector<8x32xf32>
    %c1_60 = arith.constant 1 : index
    %c8_61 = arith.constant 8 : index
    %c0_62 = arith.constant 0 : index
    %84 = vector.load %arg24[%c1_60, %c8_61, %c0_62] : memref<3x64x32xf32, #tpu.memory_space<vmem>>, vector<1x8x32xf32>
    %85 = vector.shape_cast %84 : vector<1x8x32xf32> to vector<8x32xf32>
    %c2_63 = arith.constant 2 : index
    %c8_64 = arith.constant 8 : index
    %c0_65 = arith.constant 0 : index
    %86 = vector.load %arg24[%c2_63, %c8_64, %c0_65] : memref<3x64x32xf32, #tpu.memory_space<vmem>>, vector<1x8x32xf32>
    %87 = vector.shape_cast %86 : vector<1x8x32xf32> to vector<8x32xf32>
    %88 = arith.addf %83, %79 : vector<8x32xf32>
    %89 = arith.negf %88 : vector<8x32xf32>
    %90 = math.exp %89 : vector<8x32xf32>
    %cst_66 = arith.constant 1.000000e+00 : f32
    %91 = vector.broadcast %cst_66 : f32 to vector<8x32xf32>
    %92 = arith.addf %91, %90 : vector<8x32xf32>
    %93 = arith.divf %91, %92 : vector<8x32xf32>
    %94 = arith.addf %85, %80 : vector<8x32xf32>
    %95 = arith.negf %94 : vector<8x32xf32>
    %96 = math.exp %95 : vector<8x32xf32>
    %cst_67 = arith.constant 1.000000e+00 : f32
    %97 = vector.broadcast %cst_67 : f32 to vector<8x32xf32>
    %98 = arith.addf %97, %96 : vector<8x32xf32>
    %99 = arith.divf %97, %98 : vector<8x32xf32>
    %100 = arith.addf %81, %46 : vector<8x32xf32>
    %101 = arith.mulf %93, %100 : vector<8x32xf32>
    %102 = arith.addf %87, %101 : vector<8x32xf32>
    %103 = math.tanh %102 : vector<8x32xf32>
    %cst_68 = arith.constant 1.000000e+00 : f32
    %104 = vector.broadcast %cst_68 : f32 to vector<8x32xf32>
    %105 = arith.subf %104, %99 : vector<8x32xf32>
    %106 = arith.mulf %105, %103 : vector<8x32xf32>
    %107 = arith.mulf %99, %77 : vector<8x32xf32>
    %108 = arith.addf %106, %107 : vector<8x32xf32>
    %c8_69 = arith.constant 8 : index
    %c0_70 = arith.constant 0 : index
    %109 = vector.load %arg23[%c8_69, %c0_70] : memref<64x32xf32, #tpu.memory_space<vmem>>, vector<8x32xf32>
    tpu.vector_store %arg23[%c8_69, %c0_70], %108 {strides = array<i32>} : memref<64x32xf32, #tpu.memory_space<vmem>>, vector<8x32xf32>,
    %cst_71 = arith.constant dense<0.000000e+00> : vector<8x32xf32>
    %110 = tpu.matmul %108, %39, %cst_71 {dimension_numbers = #tpu.dot_dimension_numbers<[1], [0], [0], [1], [0, 0, 1, 1], [], []>} : vector<8x32xf32>, vector<32x32xf32>, vector<8x32xf32> -> vector<8x32xf32>
    %cst_72 = arith.constant dense<0.000000e+00> : vector<8x32xf32>
    %111 = tpu.matmul %108, %41, %cst_72 {dimension_numbers = #tpu.dot_dimension_numbers<[1], [0], [0], [1], [0, 0, 1, 1], [], []>} : vector<8x32xf32>, vector<32x32xf32>, vector<8x32xf32> -> vector<8x32xf32>
    %cst_73 = arith.constant dense<0.000000e+00> : vector<8x32xf32>
    %112 = tpu.matmul %108, %43, %cst_73 {dimension_numbers = #tpu.dot_dimension_numbers<[1], [0], [0], [1], [0, 0, 1, 1], [], []>} : vector<8x32xf32>, vector<32x32xf32>, vector<8x32xf32> -> vector<8x32xf32>
    %c0_74 = arith.constant 0 : index
    %c16 = arith.constant 16 : index
    %c0_75 = arith.constant 0 : index
    %113 = vector.load %arg24[%c0_74, %c16, %c0_75] : memref<3x64x32xf32, #tpu.memory_space<vmem>>, vector<1x8x32xf32>
    %114 = vector.shape_cast %113 : vector<1x8x32xf32> to vector<8x32xf32>
    %c1_76 = arith.constant 1 : index
    %c16_77 = arith.constant 16 : index
    %c0_78 = arith.constant 0 : index
    %115 = vector.load %arg24[%c1_76, %c16_77, %c0_78] : memref<3x64x32xf32, #tpu.memory_space<vmem>>, vector<1x8x32xf32>
    %116 = vector.shape_cast %115 : vector<1x8x32xf32> to vector<8x32xf32>
    %c2_79 = arith.constant 2 : index
    %c16_80 = arith.constant 16 : index
    %c0_81 = arith.constant 0 : index
    %117 = vector.load %arg24[%c2_79, %c16_80, %c0_81] : memref<3x64x32xf32, #tpu.memory_space<vmem>>, vector<1x8x32xf32>
    %118 = vector.shape_cast %117 : vector<1x8x32xf32> to vector<8x32xf32>
    %119 = arith.addf %114, %110 : vector<8x32xf32>
    %120 = arith.negf %119 : vector<8x32xf32>
    %121 = math.exp %120 : vector<8x32xf32>
    %cst_82 = arith.constant 1.000000e+00 : f32
    %122 = vector.broadcast %cst_82 : f32 to vector<8x32xf32>
    %123 = arith.addf %122, %121 : vector<8x32xf32>
    %124 = arith.divf %122, %123 : vector<8x32xf32>
    %125 = arith.addf %116, %111 : vector<8x32xf32>
    %126 = arith.negf %125 : vector<8x32xf32>
    %127 = math.exp %126 : vector<8x32xf32>
    %cst_83 = arith.constant 1.000000e+00 : f32
    %128 = vector.broadcast %cst_83 : f32 to vector<8x32xf32>
    %129 = arith.addf %128, %127 : vector<8x32xf32>
    %130 = arith.divf %128, %129 : vector<8x32xf32>
    %131 = arith.addf %112, %46 : vector<8x32xf32>
    %132 = arith.mulf %124, %131 : vector<8x32xf32>
    %133 = arith.addf %118, %132 : vector<8x32xf32>
    %134 = math.tanh %133 : vector<8x32xf32>
    %cst_84 = arith.constant 1.000000e+00 : f32
    %135 = vector.broadcast %cst_84 : f32 to vector<8x32xf32>
    %136 = arith.subf %135, %130 : vector<8x32xf32>
    %137 = arith.mulf %136, %134 : vector<8x32xf32>
    %138 = arith.mulf %130, %108 : vector<8x32xf32>
    %139 = arith.addf %137, %138 : vector<8x32xf32>
    %c16_85 = arith.constant 16 : index
    %c0_86 = arith.constant 0 : index
    %140 = vector.load %arg23[%c16_85, %c0_86] : memref<64x32xf32, #tpu.memory_space<vmem>>, vector<8x32xf32>
    tpu.vector_store %arg23[%c16_85, %c0_86], %139 {strides = array<i32>} : memref<64x32xf32, #tpu.memory_space<vmem>>, vector<8x32xf32>,
    %cst_87 = arith.constant dense<0.000000e+00> : vector<8x32xf32>
    %141 = tpu.matmul %139, %39, %cst_87 {dimension_numbers = #tpu.dot_dimension_numbers<[1], [0], [0], [1], [0, 0, 1, 1], [], []>} : vector<8x32xf32>, vector<32x32xf32>, vector<8x32xf32> -> vector<8x32xf32>
    %cst_88 = arith.constant dense<0.000000e+00> : vector<8x32xf32>
    %142 = tpu.matmul %139, %41, %cst_88 {dimension_numbers = #tpu.dot_dimension_numbers<[1], [0], [0], [1], [0, 0, 1, 1], [], []>} : vector<8x32xf32>, vector<32x32xf32>, vector<8x32xf32> -> vector<8x32xf32>
    %cst_89 = arith.constant dense<0.000000e+00> : vector<8x32xf32>
    %143 = tpu.matmul %139, %43, %cst_89 {dimension_numbers = #tpu.dot_dimension_numbers<[1], [0], [0], [1], [0, 0, 1, 1], [], []>} : vector<8x32xf32>, vector<32x32xf32>, vector<8x32xf32> -> vector<8x32xf32>
    %c0_90 = arith.constant 0 : index
    %c24 = arith.constant 24 : index
    %c0_91 = arith.constant 0 : index
    %144 = vector.load %arg24[%c0_90, %c24, %c0_91] : memref<3x64x32xf32, #tpu.memory_space<vmem>>, vector<1x8x32xf32>
    %145 = vector.shape_cast %144 : vector<1x8x32xf32> to vector<8x32xf32>
    %c1_92 = arith.constant 1 : index
    %c24_93 = arith.constant 24 : index
    %c0_94 = arith.constant 0 : index
    %146 = vector.load %arg24[%c1_92, %c24_93, %c0_94] : memref<3x64x32xf32, #tpu.memory_space<vmem>>, vector<1x8x32xf32>
    %147 = vector.shape_cast %146 : vector<1x8x32xf32> to vector<8x32xf32>
    %c2_95 = arith.constant 2 : index
    %c24_96 = arith.constant 24 : index
    %c0_97 = arith.constant 0 : index
    %148 = vector.load %arg24[%c2_95, %c24_96, %c0_97] : memref<3x64x32xf32, #tpu.memory_space<vmem>>, vector<1x8x32xf32>
    %149 = vector.shape_cast %148 : vector<1x8x32xf32> to vector<8x32xf32>
    %150 = arith.addf %145, %141 : vector<8x32xf32>
    %151 = arith.negf %150 : vector<8x32xf32>
    %152 = math.exp %151 : vector<8x32xf32>
    %cst_98 = arith.constant 1.000000e+00 : f32
    %153 = vector.broadcast %cst_98 : f32 to vector<8x32xf32>
    %154 = arith.addf %153, %152 : vector<8x32xf32>
    %155 = arith.divf %153, %154 : vector<8x32xf32>
    %156 = arith.addf %147, %142 : vector<8x32xf32>
    %157 = arith.negf %156 : vector<8x32xf32>
    %158 = math.exp %157 : vector<8x32xf32>
    %cst_99 = arith.constant 1.000000e+00 : f32
    %159 = vector.broadcast %cst_99 : f32 to vector<8x32xf32>
    %160 = arith.addf %159, %158 : vector<8x32xf32>
    %161 = arith.divf %159, %160 : vector<8x32xf32>
    %162 = arith.addf %143, %46 : vector<8x32xf32>
    %163 = arith.mulf %155, %162 : vector<8x32xf32>
    %164 = arith.addf %149, %163 : vector<8x32xf32>
    %165 = math.tanh %164 : vector<8x32xf32>
    %cst_100 = arith.constant 1.000000e+00 : f32
    %166 = vector.broadcast %cst_100 : f32 to vector<8x32xf32>
    %167 = arith.subf %166, %161 : vector<8x32xf32>
    %168 = arith.mulf %167, %165 : vector<8x32xf32>
    %169 = arith.mulf %161, %139 : vector<8x32xf32>
    %170 = arith.addf %168, %169 : vector<8x32xf32>
    %c24_101 = arith.constant 24 : index
    %c0_102 = arith.constant 0 : index
    %171 = vector.load %arg23[%c24_101, %c0_102] : memref<64x32xf32, #tpu.memory_space<vmem>>, vector<8x32xf32>
    tpu.vector_store %arg23[%c24_101, %c0_102], %170 {strides = array<i32>} : memref<64x32xf32, #tpu.memory_space<vmem>>, vector<8x32xf32>,
    %cst_103 = arith.constant dense<0.000000e+00> : vector<8x32xf32>
    %172 = tpu.matmul %170, %39, %cst_103 {dimension_numbers = #tpu.dot_dimension_numbers<[1], [0], [0], [1], [0, 0, 1, 1], [], []>} : vector<8x32xf32>, vector<32x32xf32>, vector<8x32xf32> -> vector<8x32xf32>
    %cst_104 = arith.constant dense<0.000000e+00> : vector<8x32xf32>
    %173 = tpu.matmul %170, %41, %cst_104 {dimension_numbers = #tpu.dot_dimension_numbers<[1], [0], [0], [1], [0, 0, 1, 1], [], []>} : vector<8x32xf32>, vector<32x32xf32>, vector<8x32xf32> -> vector<8x32xf32>
    %cst_105 = arith.constant dense<0.000000e+00> : vector<8x32xf32>
    %174 = tpu.matmul %170, %43, %cst_105 {dimension_numbers = #tpu.dot_dimension_numbers<[1], [0], [0], [1], [0, 0, 1, 1], [], []>} : vector<8x32xf32>, vector<32x32xf32>, vector<8x32xf32> -> vector<8x32xf32>
    %c0_106 = arith.constant 0 : index
    %c32 = arith.constant 32 : index
    %c0_107 = arith.constant 0 : index
    %175 = vector.load %arg24[%c0_106, %c32, %c0_107] : memref<3x64x32xf32, #tpu.memory_space<vmem>>, vector<1x8x32xf32>
    %176 = vector.shape_cast %175 : vector<1x8x32xf32> to vector<8x32xf32>
    %c1_108 = arith.constant 1 : index
    %c32_109 = arith.constant 32 : index
    %c0_110 = arith.constant 0 : index
    %177 = vector.load %arg24[%c1_108, %c32_109, %c0_110] : memref<3x64x32xf32, #tpu.memory_space<vmem>>, vector<1x8x32xf32>
    %178 = vector.shape_cast %177 : vector<1x8x32xf32> to vector<8x32xf32>
    %c2_111 = arith.constant 2 : index
    %c32_112 = arith.constant 32 : index
    %c0_113 = arith.constant 0 : index
    %179 = vector.load %arg24[%c2_111, %c32_112, %c0_113] : memref<3x64x32xf32, #tpu.memory_space<vmem>>, vector<1x8x32xf32>
    %180 = vector.shape_cast %179 : vector<1x8x32xf32> to vector<8x32xf32>
    %181 = arith.addf %176, %172 : vector<8x32xf32>
    %182 = arith.negf %181 : vector<8x32xf32>
    %183 = math.exp %182 : vector<8x32xf32>
    %cst_114 = arith.constant 1.000000e+00 : f32
    %184 = vector.broadcast %cst_114 : f32 to vector<8x32xf32>
    %185 = arith.addf %184, %183 : vector<8x32xf32>
    %186 = arith.divf %184, %185 : vector<8x32xf32>
    %187 = arith.addf %178, %173 : vector<8x32xf32>
    %188 = arith.negf %187 : vector<8x32xf32>
    %189 = math.exp %188 : vector<8x32xf32>
    %cst_115 = arith.constant 1.000000e+00 : f32
    %190 = vector.broadcast %cst_115 : f32 to vector<8x32xf32>
    %191 = arith.addf %190, %189 : vector<8x32xf32>
    %192 = arith.divf %190, %191 : vector<8x32xf32>
    %193 = arith.addf %174, %46 : vector<8x32xf32>
    %194 = arith.mulf %186, %193 : vector<8x32xf32>
    %195 = arith.addf %180, %194 : vector<8x32xf32>
    %196 = math.tanh %195 : vector<8x32xf32>
    %cst_116 = arith.constant 1.000000e+00 : f32
    %197 = vector.broadcast %cst_116 : f32 to vector<8x32xf32>
    %198 = arith.subf %197, %192 : vector<8x32xf32>
    %199 = arith.mulf %198, %196 : vector<8x32xf32>
    %200 = arith.mulf %192, %170 : vector<8x32xf32>
    %201 = arith.addf %199, %200 : vector<8x32xf32>
    %c32_117 = arith.constant 32 : index
    %c0_118 = arith.constant 0 : index
    %202 = vector.load %arg23[%c32_117, %c0_118] : memref<64x32xf32, #tpu.memory_space<vmem>>, vector<8x32xf32>
    tpu.vector_store %arg23[%c32_117, %c0_118], %201 {strides = array<i32>} : memref<64x32xf32, #tpu.memory_space<vmem>>, vector<8x32xf32>,
    %cst_119 = arith.constant dense<0.000000e+00> : vector<8x32xf32>
    %203 = tpu.matmul %201, %39, %cst_119 {dimension_numbers = #tpu.dot_dimension_numbers<[1], [0], [0], [1], [0, 0, 1, 1], [], []>} : vector<8x32xf32>, vector<32x32xf32>, vector<8x32xf32> -> vector<8x32xf32>
    %cst_120 = arith.constant dense<0.000000e+00> : vector<8x32xf32>
    %204 = tpu.matmul %201, %41, %cst_120 {dimension_numbers = #tpu.dot_dimension_numbers<[1], [0], [0], [1], [0, 0, 1, 1], [], []>} : vector<8x32xf32>, vector<32x32xf32>, vector<8x32xf32> -> vector<8x32xf32>
    %cst_121 = arith.constant dense<0.000000e+00> : vector<8x32xf32>
    %205 = tpu.matmul %201, %43, %cst_121 {dimension_numbers = #tpu.dot_dimension_numbers<[1], [0], [0], [1], [0, 0, 1, 1], [], []>} : vector<8x32xf32>, vector<32x32xf32>, vector<8x32xf32> -> vector<8x32xf32>
    %c0_122 = arith.constant 0 : index
    %c40 = arith.constant 40 : index
    %c0_123 = arith.constant 0 : index
    %206 = vector.load %arg24[%c0_122, %c40, %c0_123] : memref<3x64x32xf32, #tpu.memory_space<vmem>>, vector<1x8x32xf32>
    %207 = vector.shape_cast %206 : vector<1x8x32xf32> to vector<8x32xf32>
    %c1_124 = arith.constant 1 : index
    %c40_125 = arith.constant 40 : index
    %c0_126 = arith.constant 0 : index
    %208 = vector.load %arg24[%c1_124, %c40_125, %c0_126] : memref<3x64x32xf32, #tpu.memory_space<vmem>>, vector<1x8x32xf32>
    %209 = vector.shape_cast %208 : vector<1x8x32xf32> to vector<8x32xf32>
    %c2_127 = arith.constant 2 : index
    %c40_128 = arith.constant 40 : index
    %c0_129 = arith.constant 0 : index
    %210 = vector.load %arg24[%c2_127, %c40_128, %c0_129] : memref<3x64x32xf32, #tpu.memory_space<vmem>>, vector<1x8x32xf32>
    %211 = vector.shape_cast %210 : vector<1x8x32xf32> to vector<8x32xf32>
    %212 = arith.addf %207, %203 : vector<8x32xf32>
    %213 = arith.negf %212 : vector<8x32xf32>
    %214 = math.exp %213 : vector<8x32xf32>
    %cst_130 = arith.constant 1.000000e+00 : f32
    %215 = vector.broadcast %cst_130 : f32 to vector<8x32xf32>
    %216 = arith.addf %215, %214 : vector<8x32xf32>
    %217 = arith.divf %215, %216 : vector<8x32xf32>
    %218 = arith.addf %209, %204 : vector<8x32xf32>
    %219 = arith.negf %218 : vector<8x32xf32>
    %220 = math.exp %219 : vector<8x32xf32>
    %cst_131 = arith.constant 1.000000e+00 : f32
    %221 = vector.broadcast %cst_131 : f32 to vector<8x32xf32>
    %222 = arith.addf %221, %220 : vector<8x32xf32>
    %223 = arith.divf %221, %222 : vector<8x32xf32>
    %224 = arith.addf %205, %46 : vector<8x32xf32>
    %225 = arith.mulf %217, %224 : vector<8x32xf32>
    %226 = arith.addf %211, %225 : vector<8x32xf32>
    %227 = math.tanh %226 : vector<8x32xf32>
    %cst_132 = arith.constant 1.000000e+00 : f32
    %228 = vector.broadcast %cst_132 : f32 to vector<8x32xf32>
    %229 = arith.subf %228, %223 : vector<8x32xf32>
    %230 = arith.mulf %229, %227 : vector<8x32xf32>
    %231 = arith.mulf %223, %201 : vector<8x32xf32>
    %232 = arith.addf %230, %231 : vector<8x32xf32>
    %c40_133 = arith.constant 40 : index
    %c0_134 = arith.constant 0 : index
    %233 = vector.load %arg23[%c40_133, %c0_134] : memref<64x32xf32, #tpu.memory_space<vmem>>, vector<8x32xf32>
    tpu.vector_store %arg23[%c40_133, %c0_134], %232 {strides = array<i32>} : memref<64x32xf32, #tpu.memory_space<vmem>>, vector<8x32xf32>,
    %cst_135 = arith.constant dense<0.000000e+00> : vector<8x32xf32>
    %234 = tpu.matmul %232, %39, %cst_135 {dimension_numbers = #tpu.dot_dimension_numbers<[1], [0], [0], [1], [0, 0, 1, 1], [], []>} : vector<8x32xf32>, vector<32x32xf32>, vector<8x32xf32> -> vector<8x32xf32>
    %cst_136 = arith.constant dense<0.000000e+00> : vector<8x32xf32>
    %235 = tpu.matmul %232, %41, %cst_136 {dimension_numbers = #tpu.dot_dimension_numbers<[1], [0], [0], [1], [0, 0, 1, 1], [], []>} : vector<8x32xf32>, vector<32x32xf32>, vector<8x32xf32> -> vector<8x32xf32>
    %cst_137 = arith.constant dense<0.000000e+00> : vector<8x32xf32>
    %236 = tpu.matmul %232, %43, %cst_137 {dimension_numbers = #tpu.dot_dimension_numbers<[1], [0], [0], [1], [0, 0, 1, 1], [], []>} : vector<8x32xf32>, vector<32x32xf32>, vector<8x32xf32> -> vector<8x32xf32>
    %c0_138 = arith.constant 0 : index
    %c48 = arith.constant 48 : index
    %c0_139 = arith.constant 0 : index
    %237 = vector.load %arg24[%c0_138, %c48, %c0_139] : memref<3x64x32xf32, #tpu.memory_space<vmem>>, vector<1x8x32xf32>
    %238 = vector.shape_cast %237 : vector<1x8x32xf32> to vector<8x32xf32>
    %c1_140 = arith.constant 1 : index
    %c48_141 = arith.constant 48 : index
    %c0_142 = arith.constant 0 : index
    %239 = vector.load %arg24[%c1_140, %c48_141, %c0_142] : memref<3x64x32xf32, #tpu.memory_space<vmem>>, vector<1x8x32xf32>
    %240 = vector.shape_cast %239 : vector<1x8x32xf32> to vector<8x32xf32>
    %c2_143 = arith.constant 2 : index
    %c48_144 = arith.constant 48 : index
    %c0_145 = arith.constant 0 : index
    %241 = vector.load %arg24[%c2_143, %c48_144, %c0_145] : memref<3x64x32xf32, #tpu.memory_space<vmem>>, vector<1x8x32xf32>
    %242 = vector.shape_cast %241 : vector<1x8x32xf32> to vector<8x32xf32>
    %243 = arith.addf %238, %234 : vector<8x32xf32>
    %244 = arith.negf %243 : vector<8x32xf32>
    %245 = math.exp %244 : vector<8x32xf32>
    %cst_146 = arith.constant 1.000000e+00 : f32
    %246 = vector.broadcast %cst_146 : f32 to vector<8x32xf32>
    %247 = arith.addf %246, %245 : vector<8x32xf32>
    %248 = arith.divf %246, %247 : vector<8x32xf32>
    %249 = arith.addf %240, %235 : vector<8x32xf32>
    %250 = arith.negf %249 : vector<8x32xf32>
    %251 = math.exp %250 : vector<8x32xf32>
    %cst_147 = arith.constant 1.000000e+00 : f32
    %252 = vector.broadcast %cst_147 : f32 to vector<8x32xf32>
    %253 = arith.addf %252, %251 : vector<8x32xf32>
    %254 = arith.divf %252, %253 : vector<8x32xf32>
    %255 = arith.addf %236, %46 : vector<8x32xf32>
    %256 = arith.mulf %248, %255 : vector<8x32xf32>
    %257 = arith.addf %242, %256 : vector<8x32xf32>
    %258 = math.tanh %257 : vector<8x32xf32>
    %cst_148 = arith.constant 1.000000e+00 : f32
    %259 = vector.broadcast %cst_148 : f32 to vector<8x32xf32>
    %260 = arith.subf %259, %254 : vector<8x32xf32>
    %261 = arith.mulf %260, %258 : vector<8x32xf32>
    %262 = arith.mulf %254, %232 : vector<8x32xf32>
    %263 = arith.addf %261, %262 : vector<8x32xf32>
    %c48_149 = arith.constant 48 : index
    %c0_150 = arith.constant 0 : index
    %264 = vector.load %arg23[%c48_149, %c0_150] : memref<64x32xf32, #tpu.memory_space<vmem>>, vector<8x32xf32>
    tpu.vector_store %arg23[%c48_149, %c0_150], %263 {strides = array<i32>} : memref<64x32xf32, #tpu.memory_space<vmem>>, vector<8x32xf32>,
    %cst_151 = arith.constant dense<0.000000e+00> : vector<8x32xf32>
    %265 = tpu.matmul %263, %39, %cst_151 {dimension_numbers = #tpu.dot_dimension_numbers<[1], [0], [0], [1], [0, 0, 1, 1], [], []>} : vector<8x32xf32>, vector<32x32xf32>, vector<8x32xf32> -> vector<8x32xf32>
    %cst_152 = arith.constant dense<0.000000e+00> : vector<8x32xf32>
    %266 = tpu.matmul %263, %41, %cst_152 {dimension_numbers = #tpu.dot_dimension_numbers<[1], [0], [0], [1], [0, 0, 1, 1], [], []>} : vector<8x32xf32>, vector<32x32xf32>, vector<8x32xf32> -> vector<8x32xf32>
    %cst_153 = arith.constant dense<0.000000e+00> : vector<8x32xf32>
    %267 = tpu.matmul %263, %43, %cst_153 {dimension_numbers = #tpu.dot_dimension_numbers<[1], [0], [0], [1], [0, 0, 1, 1], [], []>} : vector<8x32xf32>, vector<32x32xf32>, vector<8x32xf32> -> vector<8x32xf32>
    %c0_154 = arith.constant 0 : index
    %c56 = arith.constant 56 : index
    %c0_155 = arith.constant 0 : index
    %268 = vector.load %arg24[%c0_154, %c56, %c0_155] : memref<3x64x32xf32, #tpu.memory_space<vmem>>, vector<1x8x32xf32>
    %269 = vector.shape_cast %268 : vector<1x8x32xf32> to vector<8x32xf32>
    %c1_156 = arith.constant 1 : index
    %c56_157 = arith.constant 56 : index
    %c0_158 = arith.constant 0 : index
    %270 = vector.load %arg24[%c1_156, %c56_157, %c0_158] : memref<3x64x32xf32, #tpu.memory_space<vmem>>, vector<1x8x32xf32>
    %271 = vector.shape_cast %270 : vector<1x8x32xf32> to vector<8x32xf32>
    %c2_159 = arith.constant 2 : index
    %c56_160 = arith.constant 56 : index
    %c0_161 = arith.constant 0 : index
    %272 = vector.load %arg24[%c2_159, %c56_160, %c0_161] : memref<3x64x32xf32, #tpu.memory_space<vmem>>, vector<1x8x32xf32>
    %273 = vector.shape_cast %272 : vector<1x8x32xf32> to vector<8x32xf32>
    %274 = arith.addf %269, %265 : vector<8x32xf32>
    %275 = arith.negf %274 : vector<8x32xf32>
    %276 = math.exp %275 : vector<8x32xf32>
    %cst_162 = arith.constant 1.000000e+00 : f32
    %277 = vector.broadcast %cst_162 : f32 to vector<8x32xf32>
    %278 = arith.addf %277, %276 : vector<8x32xf32>
    %279 = arith.divf %277, %278 : vector<8x32xf32>
    %280 = arith.addf %271, %266 : vector<8x32xf32>
    %281 = arith.negf %280 : vector<8x32xf32>
    %282 = math.exp %281 : vector<8x32xf32>
    %cst_163 = arith.constant 1.000000e+00 : f32
    %283 = vector.broadcast %cst_163 : f32 to vector<8x32xf32>
    %284 = arith.addf %283, %282 : vector<8x32xf32>
    %285 = arith.divf %283, %284 : vector<8x32xf32>
    %286 = arith.addf %267, %46 : vector<8x32xf32>
    %287 = arith.mulf %279, %286 : vector<8x32xf32>
    %288 = arith.addf %273, %287 : vector<8x32xf32>
    %289 = math.tanh %288 : vector<8x32xf32>
    %cst_164 = arith.constant 1.000000e+00 : f32
    %290 = vector.broadcast %cst_164 : f32 to vector<8x32xf32>
    %291 = arith.subf %290, %285 : vector<8x32xf32>
    %292 = arith.mulf %291, %289 : vector<8x32xf32>
    %293 = arith.mulf %285, %263 : vector<8x32xf32>
    %294 = arith.addf %292, %293 : vector<8x32xf32>
    %c56_165 = arith.constant 56 : index
    %c0_166 = arith.constant 0 : index
    %295 = vector.load %arg23[%c56_165, %c0_166] : memref<64x32xf32, #tpu.memory_space<vmem>>, vector<8x32xf32>
    tpu.vector_store %arg23[%c56_165, %c0_166], %294 {strides = array<i32>} : memref<64x32xf32, #tpu.memory_space<vmem>>, vector<8x32xf32>,
    %c0_167 = arith.constant 0 : index
    %c0_168 = arith.constant 0 : index
    %296 = vector.load %arg23[%c0_167, %c0_168] : memref<64x32xf32, #tpu.memory_space<vmem>>, vector<64x32xf32>
    %c0_169 = arith.constant 0 : index
    %c0_170 = arith.constant 0 : index
    %c0_171 = arith.constant 0 : index
    %297 = vector.load %arg6[%c0_169, %c0_170, %c0_171] : memref<3x32x32xf32, #tpu.memory_space<vmem>>, vector<1x32x32xf32>
    %298 = vector.shape_cast %297 : vector<1x32x32xf32> to vector<32x32xf32>
    %cst_172 = arith.constant dense<0.000000e+00> : vector<64x32xf32>
    %299 = tpu.matmul %296, %298, %cst_172 {dimension_numbers = #tpu.dot_dimension_numbers<[1], [0], [0], [1], [0, 0, 1, 1], [], []>} : vector<64x32xf32>, vector<32x32xf32>, vector<64x32xf32> -> vector<64x32xf32>
    %c0_173 = arith.constant 0 : index
    %c0_174 = arith.constant 0 : index
    %c0_175 = arith.constant 0 : index
    %300 = vector.load %arg8[%c0_173, %c0_174, %c0_175] : memref<3x1x32xf32, #tpu.memory_space<vmem>>, vector<1x1x32xf32>
    %301 = vector.shape_cast %300 : vector<1x1x32xf32> to vector<1x32xf32>
    %302 = vector.broadcast %301 : vector<1x32xf32> to vector<64x32xf32>
    %303 = arith.addf %299, %302 : vector<64x32xf32>
    %c0_176 = arith.constant 0 : index
    %c0_177 = arith.constant 0 : index
    %c0_178 = arith.constant 0 : index
    %304 = vector.load %arg24[%c0_176, %c0_177, %c0_178] : memref<3x64x32xf32, #tpu.memory_space<vmem>>, vector<1x64x32xf32>
    %305 = vector.shape_cast %304 : vector<1x64x32xf32> to vector<64x32xf32>
    %306 = vector.shape_cast %303 : vector<64x32xf32> to vector<1x64x32xf32>
    tpu.vector_store %arg24[%c0_176, %c0_177, %c0_178], %306 {strides = array<i32>} : memref<3x64x32xf32, #tpu.memory_space<vmem>>, vector<1x64x32xf32>,
    %c1_179 = arith.constant 1 : index
    %c0_180 = arith.constant 0 : index
    %c0_181 = arith.constant 0 : index
    %307 = vector.load %arg6[%c1_179, %c0_180, %c0_181] : memref<3x32x32xf32, #tpu.memory_space<vmem>>, vector<1x32x32xf32>
    %308 = vector.shape_cast %307 : vector<1x32x32xf32> to vector<32x32xf32>
    %cst_182 = arith.constant dense<0.000000e+00> : vector<64x32xf32>
    %309 = tpu.matmul %296, %308, %cst_182 {dimension_numbers = #tpu.dot_dimension_numbers<[1], [0], [0], [1], [0, 0, 1, 1], [], []>} : vector<64x32xf32>, vector<32x32xf32>, vector<64x32xf32> -> vector<64x32xf32>
    %c1_183 = arith.constant 1 : index
    %c0_184 = arith.constant 0 : index
    %c0_185 = arith.constant 0 : index
    %310 = vector.load %arg8[%c1_183, %c0_184, %c0_185] : memref<3x1x32xf32, #tpu.memory_space<vmem>>, vector<1x1x32xf32>
    %311 = vector.shape_cast %310 : vector<1x1x32xf32> to vector<1x32xf32>
    %312 = vector.broadcast %311 : vector<1x32xf32> to vector<64x32xf32>
    %313 = arith.addf %309, %312 : vector<64x32xf32>
    %c1_186 = arith.constant 1 : index
    %c0_187 = arith.constant 0 : index
    %c0_188 = arith.constant 0 : index
    %314 = vector.load %arg24[%c1_186, %c0_187, %c0_188] : memref<3x64x32xf32, #tpu.memory_space<vmem>>, vector<1x64x32xf32>
    %315 = vector.shape_cast %314 : vector<1x64x32xf32> to vector<64x32xf32>
    %316 = vector.shape_cast %313 : vector<64x32xf32> to vector<1x64x32xf32>
    tpu.vector_store %arg24[%c1_186, %c0_187, %c0_188], %316 {strides = array<i32>} : memref<3x64x32xf32, #tpu.memory_space<vmem>>, vector<1x64x32xf32>,
    %c2_189 = arith.constant 2 : index
    %c0_190 = arith.constant 0 : index
    %c0_191 = arith.constant 0 : index
    %317 = vector.load %arg6[%c2_189, %c0_190, %c0_191] : memref<3x32x32xf32, #tpu.memory_space<vmem>>, vector<1x32x32xf32>
    %318 = vector.shape_cast %317 : vector<1x32x32xf32> to vector<32x32xf32>
    %cst_192 = arith.constant dense<0.000000e+00> : vector<64x32xf32>
    %319 = tpu.matmul %296, %318, %cst_192 {dimension_numbers = #tpu.dot_dimension_numbers<[1], [0], [0], [1], [0, 0, 1, 1], [], []>} : vector<64x32xf32>, vector<32x32xf32>, vector<64x32xf32> -> vector<64x32xf32>
    %c2_193 = arith.constant 2 : index
    %c0_194 = arith.constant 0 : index
    %c0_195 = arith.constant 0 : index
    %320 = vector.load %arg8[%c2_193, %c0_194, %c0_195] : memref<3x1x32xf32, #tpu.memory_space<vmem>>, vector<1x1x32xf32>
    %321 = vector.shape_cast %320 : vector<1x1x32xf32> to vector<1x32xf32>
    %322 = vector.broadcast %321 : vector<1x32xf32> to vector<64x32xf32>
    %323 = arith.addf %319, %322 : vector<64x32xf32>
    %c2_196 = arith.constant 2 : index
    %c0_197 = arith.constant 0 : index
    %c0_198 = arith.constant 0 : index
    %324 = vector.load %arg24[%c2_196, %c0_197, %c0_198] : memref<3x64x32xf32, #tpu.memory_space<vmem>>, vector<1x64x32xf32>
    %325 = vector.shape_cast %324 : vector<1x64x32xf32> to vector<64x32xf32>
    %326 = vector.shape_cast %323 : vector<64x32xf32> to vector<1x64x32xf32>
    tpu.vector_store %arg24[%c2_196, %c0_197, %c0_198], %326 {strides = array<i32>} : memref<3x64x32xf32, #tpu.memory_space<vmem>>, vector<1x64x32xf32>,
    %c0_199 = arith.constant 0 : index
    %c0_200 = arith.constant 0 : index
    %c0_201 = arith.constant 0 : index
    %327 = vector.load %arg7[%c0_199, %c0_200, %c0_201] : memref<3x32x32xf32, #tpu.memory_space<vmem>>, vector<1x32x32xf32>
    %328 = vector.shape_cast %327 : vector<1x32x32xf32> to vector<32x32xf32>
    %c1_202 = arith.constant 1 : index
    %c0_203 = arith.constant 0 : index
    %c0_204 = arith.constant 0 : index
    %329 = vector.load %arg7[%c1_202, %c0_203, %c0_204] : memref<3x32x32xf32, #tpu.memory_space<vmem>>, vector<1x32x32xf32>
    %330 = vector.shape_cast %329 : vector<1x32x32xf32> to vector<32x32xf32>
    %c2_205 = arith.constant 2 : index
    %c0_206 = arith.constant 0 : index
    %c0_207 = arith.constant 0 : index
    %331 = vector.load %arg7[%c2_205, %c0_206, %c0_207] : memref<3x32x32xf32, #tpu.memory_space<vmem>>, vector<1x32x32xf32>
    %332 = vector.shape_cast %331 : vector<1x32x32xf32> to vector<32x32xf32>
    %c0_208 = arith.constant 0 : index
    %c0_209 = arith.constant 0 : index
    %333 = vector.load %arg9[%c0_208, %c0_209] : memref<1x32xf32, #tpu.memory_space<vmem>>, vector<1x32xf32>
    %334 = vector.shape_cast %333 : vector<1x32xf32> to vector<1x32xf32>
    %335 = vector.broadcast %334 : vector<1x32xf32> to vector<8x32xf32>
    %cst_210 = arith.constant 0.000000e+00 : f32
    %336 = vector.broadcast %cst_210 : f32 to vector<8x32xf32>
    %cst_211 = arith.constant dense<0.000000e+00> : vector<8x32xf32>
    %337 = tpu.matmul %336, %328, %cst_211 {dimension_numbers = #tpu.dot_dimension_numbers<[1], [0], [0], [1], [0, 0, 1, 1], [], []>} : vector<8x32xf32>, vector<32x32xf32>, vector<8x32xf32> -> vector<8x32xf32>
    %cst_212 = arith.constant dense<0.000000e+00> : vector<8x32xf32>
    %338 = tpu.matmul %336, %330, %cst_212 {dimension_numbers = #tpu.dot_dimension_numbers<[1], [0], [0], [1], [0, 0, 1, 1], [], []>} : vector<8x32xf32>, vector<32x32xf32>, vector<8x32xf32> -> vector<8x32xf32>
    %cst_213 = arith.constant dense<0.000000e+00> : vector<8x32xf32>
    %339 = tpu.matmul %336, %332, %cst_213 {dimension_numbers = #tpu.dot_dimension_numbers<[1], [0], [0], [1], [0, 0, 1, 1], [], []>} : vector<8x32xf32>, vector<32x32xf32>, vector<8x32xf32> -> vector<8x32xf32>
    %c0_214 = arith.constant 0 : index
    %c0_215 = arith.constant 0 : index
    %c0_216 = arith.constant 0 : index
    %340 = vector.load %arg24[%c0_214, %c0_215, %c0_216] : memref<3x64x32xf32, #tpu.memory_space<vmem>>, vector<1x8x32xf32>
    %341 = vector.shape_cast %340 : vector<1x8x32xf32> to vector<8x32xf32>
    %c1_217 = arith.constant 1 : index
    %c0_218 = arith.constant 0 : index
    %c0_219 = arith.constant 0 : index
    %342 = vector.load %arg24[%c1_217, %c0_218, %c0_219] : memref<3x64x32xf32, #tpu.memory_space<vmem>>, vector<1x8x32xf32>
    %343 = vector.shape_cast %342 : vector<1x8x32xf32> to vector<8x32xf32>
    %c2_220 = arith.constant 2 : index
    %c0_221 = arith.constant 0 : index
    %c0_222 = arith.constant 0 : index
    %344 = vector.load %arg24[%c2_220, %c0_221, %c0_222] : memref<3x64x32xf32, #tpu.memory_space<vmem>>, vector<1x8x32xf32>
    %345 = vector.shape_cast %344 : vector<1x8x32xf32> to vector<8x32xf32>
    %346 = arith.addf %341, %337 : vector<8x32xf32>
    %347 = arith.negf %346 : vector<8x32xf32>
    %348 = math.exp %347 : vector<8x32xf32>
    %cst_223 = arith.constant 1.000000e+00 : f32
    %349 = vector.broadcast %cst_223 : f32 to vector<8x32xf32>
    %350 = arith.addf %349, %348 : vector<8x32xf32>
    %351 = arith.divf %349, %350 : vector<8x32xf32>
    %352 = arith.addf %343, %338 : vector<8x32xf32>
    %353 = arith.negf %352 : vector<8x32xf32>
    %354 = math.exp %353 : vector<8x32xf32>
    %cst_224 = arith.constant 1.000000e+00 : f32
    %355 = vector.broadcast %cst_224 : f32 to vector<8x32xf32>
    %356 = arith.addf %355, %354 : vector<8x32xf32>
    %357 = arith.divf %355, %356 : vector<8x32xf32>
    %358 = arith.addf %339, %335 : vector<8x32xf32>
    %359 = arith.mulf %351, %358 : vector<8x32xf32>
    %360 = arith.addf %345, %359 : vector<8x32xf32>
    %361 = math.tanh %360 : vector<8x32xf32>
    %cst_225 = arith.constant 1.000000e+00 : f32
    %362 = vector.broadcast %cst_225 : f32 to vector<8x32xf32>
    %363 = arith.subf %362, %357 : vector<8x32xf32>
    %364 = arith.mulf %363, %361 : vector<8x32xf32>
    %365 = arith.mulf %357, %336 : vector<8x32xf32>
    %366 = arith.addf %364, %365 : vector<8x32xf32>
    %cst_226 = arith.constant dense<0.000000e+00> : vector<8x32xf32>
    %367 = tpu.matmul %366, %328, %cst_226 {dimension_numbers = #tpu.dot_dimension_numbers<[1], [0], [0], [1], [0, 0, 1, 1], [], []>} : vector<8x32xf32>, vector<32x32xf32>, vector<8x32xf32> -> vector<8x32xf32>
    %cst_227 = arith.constant dense<0.000000e+00> : vector<8x32xf32>
    %368 = tpu.matmul %366, %330, %cst_227 {dimension_numbers = #tpu.dot_dimension_numbers<[1], [0], [0], [1], [0, 0, 1, 1], [], []>} : vector<8x32xf32>, vector<32x32xf32>, vector<8x32xf32> -> vector<8x32xf32>
    %cst_228 = arith.constant dense<0.000000e+00> : vector<8x32xf32>
    %369 = tpu.matmul %366, %332, %cst_228 {dimension_numbers = #tpu.dot_dimension_numbers<[1], [0], [0], [1], [0, 0, 1, 1], [], []>} : vector<8x32xf32>, vector<32x32xf32>, vector<8x32xf32> -> vector<8x32xf32>
    %c0_229 = arith.constant 0 : index
    %c8_230 = arith.constant 8 : index
    %c0_231 = arith.constant 0 : index
    %370 = vector.load %arg24[%c0_229, %c8_230, %c0_231] : memref<3x64x32xf32, #tpu.memory_space<vmem>>, vector<1x8x32xf32>
    %371 = vector.shape_cast %370 : vector<1x8x32xf32> to vector<8x32xf32>
    %c1_232 = arith.constant 1 : index
    %c8_233 = arith.constant 8 : index
    %c0_234 = arith.constant 0 : index
    %372 = vector.load %arg24[%c1_232, %c8_233, %c0_234] : memref<3x64x32xf32, #tpu.memory_space<vmem>>, vector<1x8x32xf32>
    %373 = vector.shape_cast %372 : vector<1x8x32xf32> to vector<8x32xf32>
    %c2_235 = arith.constant 2 : index
    %c8_236 = arith.constant 8 : index
    %c0_237 = arith.constant 0 : index
    %374 = vector.load %arg24[%c2_235, %c8_236, %c0_237] : memref<3x64x32xf32, #tpu.memory_space<vmem>>, vector<1x8x32xf32>
    %375 = vector.shape_cast %374 : vector<1x8x32xf32> to vector<8x32xf32>
    %376 = arith.addf %371, %367 : vector<8x32xf32>
    %377 = arith.negf %376 : vector<8x32xf32>
    %378 = math.exp %377 : vector<8x32xf32>
    %cst_238 = arith.constant 1.000000e+00 : f32
    %379 = vector.broadcast %cst_238 : f32 to vector<8x32xf32>
    %380 = arith.addf %379, %378 : vector<8x32xf32>
    %381 = arith.divf %379, %380 : vector<8x32xf32>
    %382 = arith.addf %373, %368 : vector<8x32xf32>
    %383 = arith.negf %382 : vector<8x32xf32>
    %384 = math.exp %383 : vector<8x32xf32>
    %cst_239 = arith.constant 1.000000e+00 : f32
    %385 = vector.broadcast %cst_239 : f32 to vector<8x32xf32>
    %386 = arith.addf %385, %384 : vector<8x32xf32>
    %387 = arith.divf %385, %386 : vector<8x32xf32>
    %388 = arith.addf %369, %335 : vector<8x32xf32>
    %389 = arith.mulf %381, %388 : vector<8x32xf32>
    %390 = arith.addf %375, %389 : vector<8x32xf32>
    %391 = math.tanh %390 : vector<8x32xf32>
    %cst_240 = arith.constant 1.000000e+00 : f32
    %392 = vector.broadcast %cst_240 : f32 to vector<8x32xf32>
    %393 = arith.subf %392, %387 : vector<8x32xf32>
    %394 = arith.mulf %393, %391 : vector<8x32xf32>
    %395 = arith.mulf %387, %366 : vector<8x32xf32>
    %396 = arith.addf %394, %395 : vector<8x32xf32>
    %cst_241 = arith.constant dense<0.000000e+00> : vector<8x32xf32>
    %397 = tpu.matmul %396, %328, %cst_241 {dimension_numbers = #tpu.dot_dimension_numbers<[1], [0], [0], [1], [0, 0, 1, 1], [], []>} : vector<8x32xf32>, vector<32x32xf32>, vector<8x32xf32> -> vector<8x32xf32>
    %cst_242 = arith.constant dense<0.000000e+00> : vector<8x32xf32>
    %398 = tpu.matmul %396, %330, %cst_242 {dimension_numbers = #tpu.dot_dimension_numbers<[1], [0], [0], [1], [0, 0, 1, 1], [], []>} : vector<8x32xf32>, vector<32x32xf32>, vector<8x32xf32> -> vector<8x32xf32>
    %cst_243 = arith.constant dense<0.000000e+00> : vector<8x32xf32>
    %399 = tpu.matmul %396, %332, %cst_243 {dimension_numbers = #tpu.dot_dimension_numbers<[1], [0], [0], [1], [0, 0, 1, 1], [], []>} : vector<8x32xf32>, vector<32x32xf32>, vector<8x32xf32> -> vector<8x32xf32>
    %c0_244 = arith.constant 0 : index
    %c16_245 = arith.constant 16 : index
    %c0_246 = arith.constant 0 : index
    %400 = vector.load %arg24[%c0_244, %c16_245, %c0_246] : memref<3x64x32xf32, #tpu.memory_space<vmem>>, vector<1x8x32xf32>
    %401 = vector.shape_cast %400 : vector<1x8x32xf32> to vector<8x32xf32>
    %c1_247 = arith.constant 1 : index
    %c16_248 = arith.constant 16 : index
    %c0_249 = arith.constant 0 : index
    %402 = vector.load %arg24[%c1_247, %c16_248, %c0_249] : memref<3x64x32xf32, #tpu.memory_space<vmem>>, vector<1x8x32xf32>
    %403 = vector.shape_cast %402 : vector<1x8x32xf32> to vector<8x32xf32>
    %c2_250 = arith.constant 2 : index
    %c16_251 = arith.constant 16 : index
    %c0_252 = arith.constant 0 : index
    %404 = vector.load %arg24[%c2_250, %c16_251, %c0_252] : memref<3x64x32xf32, #tpu.memory_space<vmem>>, vector<1x8x32xf32>
    %405 = vector.shape_cast %404 : vector<1x8x32xf32> to vector<8x32xf32>
    %406 = arith.addf %401, %397 : vector<8x32xf32>
    %407 = arith.negf %406 : vector<8x32xf32>
    %408 = math.exp %407 : vector<8x32xf32>
    %cst_253 = arith.constant 1.000000e+00 : f32
    %409 = vector.broadcast %cst_253 : f32 to vector<8x32xf32>
    %410 = arith.addf %409, %408 : vector<8x32xf32>
    %411 = arith.divf %409, %410 : vector<8x32xf32>
    %412 = arith.addf %403, %398 : vector<8x32xf32>
    %413 = arith.negf %412 : vector<8x32xf32>
    %414 = math.exp %413 : vector<8x32xf32>
    %cst_254 = arith.constant 1.000000e+00 : f32
    %415 = vector.broadcast %cst_254 : f32 to vector<8x32xf32>
    %416 = arith.addf %415, %414 : vector<8x32xf32>
    %417 = arith.divf %415, %416 : vector<8x32xf32>
    %418 = arith.addf %399, %335 : vector<8x32xf32>
    %419 = arith.mulf %411, %418 : vector<8x32xf32>
    %420 = arith.addf %405, %419 : vector<8x32xf32>
    %421 = math.tanh %420 : vector<8x32xf32>
    %cst_255 = arith.constant 1.000000e+00 : f32
    %422 = vector.broadcast %cst_255 : f32 to vector<8x32xf32>
    %423 = arith.subf %422, %417 : vector<8x32xf32>
    %424 = arith.mulf %423, %421 : vector<8x32xf32>
    %425 = arith.mulf %417, %396 : vector<8x32xf32>
    %426 = arith.addf %424, %425 : vector<8x32xf32>
    %cst_256 = arith.constant dense<0.000000e+00> : vector<8x32xf32>
    %427 = tpu.matmul %426, %328, %cst_256 {dimension_numbers = #tpu.dot_dimension_numbers<[1], [0], [0], [1], [0, 0, 1, 1], [], []>} : vector<8x32xf32>, vector<32x32xf32>, vector<8x32xf32> -> vector<8x32xf32>
    %cst_257 = arith.constant dense<0.000000e+00> : vector<8x32xf32>
    %428 = tpu.matmul %426, %330, %cst_257 {dimension_numbers = #tpu.dot_dimension_numbers<[1], [0], [0], [1], [0, 0, 1, 1], [], []>} : vector<8x32xf32>, vector<32x32xf32>, vector<8x32xf32> -> vector<8x32xf32>
    %cst_258 = arith.constant dense<0.000000e+00> : vector<8x32xf32>
    %429 = tpu.matmul %426, %332, %cst_258 {dimension_numbers = #tpu.dot_dimension_numbers<[1], [0], [0], [1], [0, 0, 1, 1], [], []>} : vector<8x32xf32>, vector<32x32xf32>, vector<8x32xf32> -> vector<8x32xf32>
    %c0_259 = arith.constant 0 : index
    %c24_260 = arith.constant 24 : index
    %c0_261 = arith.constant 0 : index
    %430 = vector.load %arg24[%c0_259, %c24_260, %c0_261] : memref<3x64x32xf32, #tpu.memory_space<vmem>>, vector<1x8x32xf32>
    %431 = vector.shape_cast %430 : vector<1x8x32xf32> to vector<8x32xf32>
    %c1_262 = arith.constant 1 : index
    %c24_263 = arith.constant 24 : index
    %c0_264 = arith.constant 0 : index
    %432 = vector.load %arg24[%c1_262, %c24_263, %c0_264] : memref<3x64x32xf32, #tpu.memory_space<vmem>>, vector<1x8x32xf32>
    %433 = vector.shape_cast %432 : vector<1x8x32xf32> to vector<8x32xf32>
    %c2_265 = arith.constant 2 : index
    %c24_266 = arith.constant 24 : index
    %c0_267 = arith.constant 0 : index
    %434 = vector.load %arg24[%c2_265, %c24_266, %c0_267] : memref<3x64x32xf32, #tpu.memory_space<vmem>>, vector<1x8x32xf32>
    %435 = vector.shape_cast %434 : vector<1x8x32xf32> to vector<8x32xf32>
    %436 = arith.addf %431, %427 : vector<8x32xf32>
    %437 = arith.negf %436 : vector<8x32xf32>
    %438 = math.exp %437 : vector<8x32xf32>
    %cst_268 = arith.constant 1.000000e+00 : f32
    %439 = vector.broadcast %cst_268 : f32 to vector<8x32xf32>
    %440 = arith.addf %439, %438 : vector<8x32xf32>
    %441 = arith.divf %439, %440 : vector<8x32xf32>
    %442 = arith.addf %433, %428 : vector<8x32xf32>
    %443 = arith.negf %442 : vector<8x32xf32>
    %444 = math.exp %443 : vector<8x32xf32>
    %cst_269 = arith.constant 1.000000e+00 : f32
    %445 = vector.broadcast %cst_269 : f32 to vector<8x32xf32>
    %446 = arith.addf %445, %444 : vector<8x32xf32>
    %447 = arith.divf %445, %446 : vector<8x32xf32>
    %448 = arith.addf %429, %335 : vector<8x32xf32>
    %449 = arith.mulf %441, %448 : vector<8x32xf32>
    %450 = arith.addf %435, %449 : vector<8x32xf32>
    %451 = math.tanh %450 : vector<8x32xf32>
    %cst_270 = arith.constant 1.000000e+00 : f32
    %452 = vector.broadcast %cst_270 : f32 to vector<8x32xf32>
    %453 = arith.subf %452, %447 : vector<8x32xf32>
    %454 = arith.mulf %453, %451 : vector<8x32xf32>
    %455 = arith.mulf %447, %426 : vector<8x32xf32>
    %456 = arith.addf %454, %455 : vector<8x32xf32>
    %cst_271 = arith.constant dense<0.000000e+00> : vector<8x32xf32>
    %457 = tpu.matmul %456, %328, %cst_271 {dimension_numbers = #tpu.dot_dimension_numbers<[1], [0], [0], [1], [0, 0, 1, 1], [], []>} : vector<8x32xf32>, vector<32x32xf32>, vector<8x32xf32> -> vector<8x32xf32>
    %cst_272 = arith.constant dense<0.000000e+00> : vector<8x32xf32>
    %458 = tpu.matmul %456, %330, %cst_272 {dimension_numbers = #tpu.dot_dimension_numbers<[1], [0], [0], [1], [0, 0, 1, 1], [], []>} : vector<8x32xf32>, vector<32x32xf32>, vector<8x32xf32> -> vector<8x32xf32>
    %cst_273 = arith.constant dense<0.000000e+00> : vector<8x32xf32>
    %459 = tpu.matmul %456, %332, %cst_273 {dimension_numbers = #tpu.dot_dimension_numbers<[1], [0], [0], [1], [0, 0, 1, 1], [], []>} : vector<8x32xf32>, vector<32x32xf32>, vector<8x32xf32> -> vector<8x32xf32>
    %c0_274 = arith.constant 0 : index
    %c32_275 = arith.constant 32 : index
    %c0_276 = arith.constant 0 : index
    %460 = vector.load %arg24[%c0_274, %c32_275, %c0_276] : memref<3x64x32xf32, #tpu.memory_space<vmem>>, vector<1x8x32xf32>
    %461 = vector.shape_cast %460 : vector<1x8x32xf32> to vector<8x32xf32>
    %c1_277 = arith.constant 1 : index
    %c32_278 = arith.constant 32 : index
    %c0_279 = arith.constant 0 : index
    %462 = vector.load %arg24[%c1_277, %c32_278, %c0_279] : memref<3x64x32xf32, #tpu.memory_space<vmem>>, vector<1x8x32xf32>
    %463 = vector.shape_cast %462 : vector<1x8x32xf32> to vector<8x32xf32>
    %c2_280 = arith.constant 2 : index
    %c32_281 = arith.constant 32 : index
    %c0_282 = arith.constant 0 : index
    %464 = vector.load %arg24[%c2_280, %c32_281, %c0_282] : memref<3x64x32xf32, #tpu.memory_space<vmem>>, vector<1x8x32xf32>
    %465 = vector.shape_cast %464 : vector<1x8x32xf32> to vector<8x32xf32>
    %466 = arith.addf %461, %457 : vector<8x32xf32>
    %467 = arith.negf %466 : vector<8x32xf32>
    %468 = math.exp %467 : vector<8x32xf32>
    %cst_283 = arith.constant 1.000000e+00 : f32
    %469 = vector.broadcast %cst_283 : f32 to vector<8x32xf32>
    %470 = arith.addf %469, %468 : vector<8x32xf32>
    %471 = arith.divf %469, %470 : vector<8x32xf32>
    %472 = arith.addf %463, %458 : vector<8x32xf32>
    %473 = arith.negf %472 : vector<8x32xf32>
    %474 = math.exp %473 : vector<8x32xf32>
    %cst_284 = arith.constant 1.000000e+00 : f32
    %475 = vector.broadcast %cst_284 : f32 to vector<8x32xf32>
    %476 = arith.addf %475, %474 : vector<8x32xf32>
    %477 = arith.divf %475, %476 : vector<8x32xf32>
    %478 = arith.addf %459, %335 : vector<8x32xf32>
    %479 = arith.mulf %471, %478 : vector<8x32xf32>
    %480 = arith.addf %465, %479 : vector<8x32xf32>
    %481 = math.tanh %480 : vector<8x32xf32>
    %cst_285 = arith.constant 1.000000e+00 : f32
    %482 = vector.broadcast %cst_285 : f32 to vector<8x32xf32>
    %483 = arith.subf %482, %477 : vector<8x32xf32>
    %484 = arith.mulf %483, %481 : vector<8x32xf32>
    %485 = arith.mulf %477, %456 : vector<8x32xf32>
    %486 = arith.addf %484, %485 : vector<8x32xf32>
    %cst_286 = arith.constant dense<0.000000e+00> : vector<8x32xf32>
    %487 = tpu.matmul %486, %328, %cst_286 {dimension_numbers = #tpu.dot_dimension_numbers<[1], [0], [0], [1], [0, 0, 1, 1], [], []>} : vector<8x32xf32>, vector<32x32xf32>, vector<8x32xf32> -> vector<8x32xf32>
    %cst_287 = arith.constant dense<0.000000e+00> : vector<8x32xf32>
    %488 = tpu.matmul %486, %330, %cst_287 {dimension_numbers = #tpu.dot_dimension_numbers<[1], [0], [0], [1], [0, 0, 1, 1], [], []>} : vector<8x32xf32>, vector<32x32xf32>, vector<8x32xf32> -> vector<8x32xf32>
    %cst_288 = arith.constant dense<0.000000e+00> : vector<8x32xf32>
    %489 = tpu.matmul %486, %332, %cst_288 {dimension_numbers = #tpu.dot_dimension_numbers<[1], [0], [0], [1], [0, 0, 1, 1], [], []>} : vector<8x32xf32>, vector<32x32xf32>, vector<8x32xf32> -> vector<8x32xf32>
    %c0_289 = arith.constant 0 : index
    %c40_290 = arith.constant 40 : index
    %c0_291 = arith.constant 0 : index
    %490 = vector.load %arg24[%c0_289, %c40_290, %c0_291] : memref<3x64x32xf32, #tpu.memory_space<vmem>>, vector<1x8x32xf32>
    %491 = vector.shape_cast %490 : vector<1x8x32xf32> to vector<8x32xf32>
    %c1_292 = arith.constant 1 : index
    %c40_293 = arith.constant 40 : index
    %c0_294 = arith.constant 0 : index
    %492 = vector.load %arg24[%c1_292, %c40_293, %c0_294] : memref<3x64x32xf32, #tpu.memory_space<vmem>>, vector<1x8x32xf32>
    %493 = vector.shape_cast %492 : vector<1x8x32xf32> to vector<8x32xf32>
    %c2_295 = arith.constant 2 : index
    %c40_296 = arith.constant 40 : index
    %c0_297 = arith.constant 0 : index
    %494 = vector.load %arg24[%c2_295, %c40_296, %c0_297] : memref<3x64x32xf32, #tpu.memory_space<vmem>>, vector<1x8x32xf32>
    %495 = vector.shape_cast %494 : vector<1x8x32xf32> to vector<8x32xf32>
    %496 = arith.addf %491, %487 : vector<8x32xf32>
    %497 = arith.negf %496 : vector<8x32xf32>
    %498 = math.exp %497 : vector<8x32xf32>
    %cst_298 = arith.constant 1.000000e+00 : f32
    %499 = vector.broadcast %cst_298 : f32 to vector<8x32xf32>
    %500 = arith.addf %499, %498 : vector<8x32xf32>
    %501 = arith.divf %499, %500 : vector<8x32xf32>
    %502 = arith.addf %493, %488 : vector<8x32xf32>
    %503 = arith.negf %502 : vector<8x32xf32>
    %504 = math.exp %503 : vector<8x32xf32>
    %cst_299 = arith.constant 1.000000e+00 : f32
    %505 = vector.broadcast %cst_299 : f32 to vector<8x32xf32>
    %506 = arith.addf %505, %504 : vector<8x32xf32>
    %507 = arith.divf %505, %506 : vector<8x32xf32>
    %508 = arith.addf %489, %335 : vector<8x32xf32>
    %509 = arith.mulf %501, %508 : vector<8x32xf32>
    %510 = arith.addf %495, %509 : vector<8x32xf32>
    %511 = math.tanh %510 : vector<8x32xf32>
    %cst_300 = arith.constant 1.000000e+00 : f32
    %512 = vector.broadcast %cst_300 : f32 to vector<8x32xf32>
    %513 = arith.subf %512, %507 : vector<8x32xf32>
    %514 = arith.mulf %513, %511 : vector<8x32xf32>
    %515 = arith.mulf %507, %486 : vector<8x32xf32>
    %516 = arith.addf %514, %515 : vector<8x32xf32>
    %cst_301 = arith.constant dense<0.000000e+00> : vector<8x32xf32>
    %517 = tpu.matmul %516, %328, %cst_301 {dimension_numbers = #tpu.dot_dimension_numbers<[1], [0], [0], [1], [0, 0, 1, 1], [], []>} : vector<8x32xf32>, vector<32x32xf32>, vector<8x32xf32> -> vector<8x32xf32>
    %cst_302 = arith.constant dense<0.000000e+00> : vector<8x32xf32>
    %518 = tpu.matmul %516, %330, %cst_302 {dimension_numbers = #tpu.dot_dimension_numbers<[1], [0], [0], [1], [0, 0, 1, 1], [], []>} : vector<8x32xf32>, vector<32x32xf32>, vector<8x32xf32> -> vector<8x32xf32>
    %cst_303 = arith.constant dense<0.000000e+00> : vector<8x32xf32>
    %519 = tpu.matmul %516, %332, %cst_303 {dimension_numbers = #tpu.dot_dimension_numbers<[1], [0], [0], [1], [0, 0, 1, 1], [], []>} : vector<8x32xf32>, vector<32x32xf32>, vector<8x32xf32> -> vector<8x32xf32>
    %c0_304 = arith.constant 0 : index
    %c48_305 = arith.constant 48 : index
    %c0_306 = arith.constant 0 : index
    %520 = vector.load %arg24[%c0_304, %c48_305, %c0_306] : memref<3x64x32xf32, #tpu.memory_space<vmem>>, vector<1x8x32xf32>
    %521 = vector.shape_cast %520 : vector<1x8x32xf32> to vector<8x32xf32>
    %c1_307 = arith.constant 1 : index
    %c48_308 = arith.constant 48 : index
    %c0_309 = arith.constant 0 : index
    %522 = vector.load %arg24[%c1_307, %c48_308, %c0_309] : memref<3x64x32xf32, #tpu.memory_space<vmem>>, vector<1x8x32xf32>
    %523 = vector.shape_cast %522 : vector<1x8x32xf32> to vector<8x32xf32>
    %c2_310 = arith.constant 2 : index
    %c48_311 = arith.constant 48 : index
    %c0_312 = arith.constant 0 : index
    %524 = vector.load %arg24[%c2_310, %c48_311, %c0_312] : memref<3x64x32xf32, #tpu.memory_space<vmem>>, vector<1x8x32xf32>
    %525 = vector.shape_cast %524 : vector<1x8x32xf32> to vector<8x32xf32>
    %526 = arith.addf %521, %517 : vector<8x32xf32>
    %527 = arith.negf %526 : vector<8x32xf32>
    %528 = math.exp %527 : vector<8x32xf32>
    %cst_313 = arith.constant 1.000000e+00 : f32
    %529 = vector.broadcast %cst_313 : f32 to vector<8x32xf32>
    %530 = arith.addf %529, %528 : vector<8x32xf32>
    %531 = arith.divf %529, %530 : vector<8x32xf32>
    %532 = arith.addf %523, %518 : vector<8x32xf32>
    %533 = arith.negf %532 : vector<8x32xf32>
    %534 = math.exp %533 : vector<8x32xf32>
    %cst_314 = arith.constant 1.000000e+00 : f32
    %535 = vector.broadcast %cst_314 : f32 to vector<8x32xf32>
    %536 = arith.addf %535, %534 : vector<8x32xf32>
    %537 = arith.divf %535, %536 : vector<8x32xf32>
    %538 = arith.addf %519, %335 : vector<8x32xf32>
    %539 = arith.mulf %531, %538 : vector<8x32xf32>
    %540 = arith.addf %525, %539 : vector<8x32xf32>
    %541 = math.tanh %540 : vector<8x32xf32>
    %cst_315 = arith.constant 1.000000e+00 : f32
    %542 = vector.broadcast %cst_315 : f32 to vector<8x32xf32>
    %543 = arith.subf %542, %537 : vector<8x32xf32>
    %544 = arith.mulf %543, %541 : vector<8x32xf32>
    %545 = arith.mulf %537, %516 : vector<8x32xf32>
    %546 = arith.addf %544, %545 : vector<8x32xf32>
    %cst_316 = arith.constant dense<0.000000e+00> : vector<8x32xf32>
    %547 = tpu.matmul %546, %328, %cst_316 {dimension_numbers = #tpu.dot_dimension_numbers<[1], [0], [0], [1], [0, 0, 1, 1], [], []>} : vector<8x32xf32>, vector<32x32xf32>, vector<8x32xf32> -> vector<8x32xf32>
    %cst_317 = arith.constant dense<0.000000e+00> : vector<8x32xf32>
    %548 = tpu.matmul %546, %330, %cst_317 {dimension_numbers = #tpu.dot_dimension_numbers<[1], [0], [0], [1], [0, 0, 1, 1], [], []>} : vector<8x32xf32>, vector<32x32xf32>, vector<8x32xf32> -> vector<8x32xf32>
    %cst_318 = arith.constant dense<0.000000e+00> : vector<8x32xf32>
    %549 = tpu.matmul %546, %332, %cst_318 {dimension_numbers = #tpu.dot_dimension_numbers<[1], [0], [0], [1], [0, 0, 1, 1], [], []>} : vector<8x32xf32>, vector<32x32xf32>, vector<8x32xf32> -> vector<8x32xf32>
    %c0_319 = arith.constant 0 : index
    %c56_320 = arith.constant 56 : index
    %c0_321 = arith.constant 0 : index
    %550 = vector.load %arg24[%c0_319, %c56_320, %c0_321] : memref<3x64x32xf32, #tpu.memory_space<vmem>>, vector<1x8x32xf32>
    %551 = vector.shape_cast %550 : vector<1x8x32xf32> to vector<8x32xf32>
    %c1_322 = arith.constant 1 : index
    %c56_323 = arith.constant 56 : index
    %c0_324 = arith.constant 0 : index
    %552 = vector.load %arg24[%c1_322, %c56_323, %c0_324] : memref<3x64x32xf32, #tpu.memory_space<vmem>>, vector<1x8x32xf32>
    %553 = vector.shape_cast %552 : vector<1x8x32xf32> to vector<8x32xf32>
    %c2_325 = arith.constant 2 : index
    %c56_326 = arith.constant 56 : index
    %c0_327 = arith.constant 0 : index
    %554 = vector.load %arg24[%c2_325, %c56_326, %c0_327] : memref<3x64x32xf32, #tpu.memory_space<vmem>>, vector<1x8x32xf32>
    %555 = vector.shape_cast %554 : vector<1x8x32xf32> to vector<8x32xf32>
    %556 = arith.addf %551, %547 : vector<8x32xf32>
    %557 = arith.negf %556 : vector<8x32xf32>
    %558 = math.exp %557 : vector<8x32xf32>
    %cst_328 = arith.constant 1.000000e+00 : f32
    %559 = vector.broadcast %cst_328 : f32 to vector<8x32xf32>
    %560 = arith.addf %559, %558 : vector<8x32xf32>
    %561 = arith.divf %559, %560 : vector<8x32xf32>
    %562 = arith.addf %553, %548 : vector<8x32xf32>
    %563 = arith.negf %562 : vector<8x32xf32>
    %564 = math.exp %563 : vector<8x32xf32>
    %cst_329 = arith.constant 1.000000e+00 : f32
    %565 = vector.broadcast %cst_329 : f32 to vector<8x32xf32>
    %566 = arith.addf %565, %564 : vector<8x32xf32>
    %567 = arith.divf %565, %566 : vector<8x32xf32>
    %568 = arith.addf %549, %335 : vector<8x32xf32>
    %569 = arith.mulf %561, %568 : vector<8x32xf32>
    %570 = arith.addf %555, %569 : vector<8x32xf32>
    %571 = math.tanh %570 : vector<8x32xf32>
    %cst_330 = arith.constant 1.000000e+00 : f32
    %572 = vector.broadcast %cst_330 : f32 to vector<8x32xf32>
    %573 = arith.subf %572, %567 : vector<8x32xf32>
    %574 = arith.mulf %573, %571 : vector<8x32xf32>
    %575 = arith.mulf %567, %546 : vector<8x32xf32>
    %576 = arith.addf %574, %575 : vector<8x32xf32>
    %c0_331 = arith.constant 0 : index
    %c0_332 = arith.constant 0 : index
    %577 = vector.load %arg10[%c0_331, %c0_332] : memref<32x32xf32, #tpu.memory_space<vmem>>, vector<32x32xf32>
    %cst_333 = arith.constant dense<0.000000e+00> : vector<8x32xf32>
    %578 = tpu.matmul %576, %577, %cst_333 {dimension_numbers = #tpu.dot_dimension_numbers<[1], [0], [0], [1], [0, 0, 1, 1], [], []>} : vector<8x32xf32>, vector<32x32xf32>, vector<8x32xf32> -> vector<8x32xf32>
    %c0_334 = arith.constant 0 : index
    %c0_335 = arith.constant 0 : index
    %579 = vector.load %arg11[%c0_334, %c0_335] : memref<1x32xf32, #tpu.memory_space<vmem>>, vector<1x32xf32>
    %580 = vector.broadcast %579 : vector<1x32xf32> to vector<8x32xf32>
    %581 = arith.addf %578, %580 : vector<8x32xf32>
    %c0_336 = arith.constant 0 : index
    %c0_337 = arith.constant 0 : index
    %c0_338 = arith.constant 0 : index
    %582 = vector.load %arg12[%c0_336, %c0_337, %c0_338] : memref<3x32x32xf32, #tpu.memory_space<vmem>>, vector<1x32x32xf32>
    %583 = vector.shape_cast %582 : vector<1x32x32xf32> to vector<32x32xf32>
    %cst_339 = arith.constant dense<0.000000e+00> : vector<8x32xf32>
    %584 = tpu.matmul %581, %583, %cst_339 {dimension_numbers = #tpu.dot_dimension_numbers<[1], [0], [0], [1], [0, 0, 1, 1], [], []>} : vector<8x32xf32>, vector<32x32xf32>, vector<8x32xf32> -> vector<8x32xf32>
    %c0_340 = arith.constant 0 : index
    %c0_341 = arith.constant 0 : index
    %c0_342 = arith.constant 0 : index
    %585 = vector.load %arg14[%c0_340, %c0_341, %c0_342] : memref<3x1x32xf32, #tpu.memory_space<vmem>>, vector<1x1x32xf32>
    %586 = vector.shape_cast %585 : vector<1x1x32xf32> to vector<1x32xf32>
    %587 = vector.broadcast %586 : vector<1x32xf32> to vector<8x32xf32>
    %588 = arith.addf %584, %587 : vector<8x32xf32>
    %c1_343 = arith.constant 1 : index
    %c0_344 = arith.constant 0 : index
    %c0_345 = arith.constant 0 : index
    %589 = vector.load %arg12[%c1_343, %c0_344, %c0_345] : memref<3x32x32xf32, #tpu.memory_space<vmem>>, vector<1x32x32xf32>
    %590 = vector.shape_cast %589 : vector<1x32x32xf32> to vector<32x32xf32>
    %cst_346 = arith.constant dense<0.000000e+00> : vector<8x32xf32>
    %591 = tpu.matmul %581, %590, %cst_346 {dimension_numbers = #tpu.dot_dimension_numbers<[1], [0], [0], [1], [0, 0, 1, 1], [], []>} : vector<8x32xf32>, vector<32x32xf32>, vector<8x32xf32> -> vector<8x32xf32>
    %c1_347 = arith.constant 1 : index
    %c0_348 = arith.constant 0 : index
    %c0_349 = arith.constant 0 : index
    %592 = vector.load %arg14[%c1_347, %c0_348, %c0_349] : memref<3x1x32xf32, #tpu.memory_space<vmem>>, vector<1x1x32xf32>
    %593 = vector.shape_cast %592 : vector<1x1x32xf32> to vector<1x32xf32>
    %594 = vector.broadcast %593 : vector<1x32xf32> to vector<8x32xf32>
    %595 = arith.addf %591, %594 : vector<8x32xf32>
    %c2_350 = arith.constant 2 : index
    %c0_351 = arith.constant 0 : index
    %c0_352 = arith.constant 0 : index
    %596 = vector.load %arg12[%c2_350, %c0_351, %c0_352] : memref<3x32x32xf32, #tpu.memory_space<vmem>>, vector<1x32x32xf32>
    %597 = vector.shape_cast %596 : vector<1x32x32xf32> to vector<32x32xf32>
    %cst_353 = arith.constant dense<0.000000e+00> : vector<8x32xf32>
    %598 = tpu.matmul %581, %597, %cst_353 {dimension_numbers = #tpu.dot_dimension_numbers<[1], [0], [0], [1], [0, 0, 1, 1], [], []>} : vector<8x32xf32>, vector<32x32xf32>, vector<8x32xf32> -> vector<8x32xf32>
    %c2_354 = arith.constant 2 : index
    %c0_355 = arith.constant 0 : index
    %c0_356 = arith.constant 0 : index
    %599 = vector.load %arg14[%c2_354, %c0_355, %c0_356] : memref<3x1x32xf32, #tpu.memory_space<vmem>>, vector<1x1x32xf32>
    %600 = vector.shape_cast %599 : vector<1x1x32xf32> to vector<1x32xf32>
    %601 = vector.broadcast %600 : vector<1x32xf32> to vector<8x32xf32>
    %602 = arith.addf %598, %601 : vector<8x32xf32>
    %c0_357 = arith.constant 0 : index
    %c0_358 = arith.constant 0 : index
    %c0_359 = arith.constant 0 : index
    %603 = vector.load %arg13[%c0_357, %c0_358, %c0_359] : memref<3x32x32xf32, #tpu.memory_space<vmem>>, vector<1x32x32xf32>
    %604 = vector.shape_cast %603 : vector<1x32x32xf32> to vector<32x32xf32>
    %c1_360 = arith.constant 1 : index
    %c0_361 = arith.constant 0 : index
    %c0_362 = arith.constant 0 : index
    %605 = vector.load %arg13[%c1_360, %c0_361, %c0_362] : memref<3x32x32xf32, #tpu.memory_space<vmem>>, vector<1x32x32xf32>
    %606 = vector.shape_cast %605 : vector<1x32x32xf32> to vector<32x32xf32>
    %c2_363 = arith.constant 2 : index
    %c0_364 = arith.constant 0 : index
    %c0_365 = arith.constant 0 : index
    %607 = vector.load %arg13[%c2_363, %c0_364, %c0_365] : memref<3x32x32xf32, #tpu.memory_space<vmem>>, vector<1x32x32xf32>
    %608 = vector.shape_cast %607 : vector<1x32x32xf32> to vector<32x32xf32>
    %c0_366 = arith.constant 0 : index
    %c0_367 = arith.constant 0 : index
    %609 = vector.load %arg15[%c0_366, %c0_367] : memref<1x32xf32, #tpu.memory_space<vmem>>, vector<1x32xf32>
    %610 = vector.shape_cast %609 : vector<1x32xf32> to vector<1x32xf32>
    %611 = vector.broadcast %610 : vector<1x32xf32> to vector<8x32xf32>
    %cst_368 = arith.constant 0.000000e+00 : f32
    %612 = vector.broadcast %cst_368 : f32 to vector<8x32xf32>
    %cst_369 = arith.constant dense<0.000000e+00> : vector<8x32xf32>
    %613 = tpu.matmul %612, %604, %cst_369 {dimension_numbers = #tpu.dot_dimension_numbers<[1], [0], [0], [1], [0, 0, 1, 1], [], []>} : vector<8x32xf32>, vector<32x32xf32>, vector<8x32xf32> -> vector<8x32xf32>
    %cst_370 = arith.constant dense<0.000000e+00> : vector<8x32xf32>
    %614 = tpu.matmul %612, %606, %cst_370 {dimension_numbers = #tpu.dot_dimension_numbers<[1], [0], [0], [1], [0, 0, 1, 1], [], []>} : vector<8x32xf32>, vector<32x32xf32>, vector<8x32xf32> -> vector<8x32xf32>
    %cst_371 = arith.constant dense<0.000000e+00> : vector<8x32xf32>
    %615 = tpu.matmul %612, %608, %cst_371 {dimension_numbers = #tpu.dot_dimension_numbers<[1], [0], [0], [1], [0, 0, 1, 1], [], []>} : vector<8x32xf32>, vector<32x32xf32>, vector<8x32xf32> -> vector<8x32xf32>
    %616 = arith.addf %588, %613 : vector<8x32xf32>
    %617 = arith.negf %616 : vector<8x32xf32>
    %618 = math.exp %617 : vector<8x32xf32>
    %cst_372 = arith.constant 1.000000e+00 : f32
    %619 = vector.broadcast %cst_372 : f32 to vector<8x32xf32>
    %620 = arith.addf %619, %618 : vector<8x32xf32>
    %621 = arith.divf %619, %620 : vector<8x32xf32>
    %622 = arith.addf %595, %614 : vector<8x32xf32>
    %623 = arith.negf %622 : vector<8x32xf32>
    %624 = math.exp %623 : vector<8x32xf32>
    %cst_373 = arith.constant 1.000000e+00 : f32
    %625 = vector.broadcast %cst_373 : f32 to vector<8x32xf32>
    %626 = arith.addf %625, %624 : vector<8x32xf32>
    %627 = arith.divf %625, %626 : vector<8x32xf32>
    %628 = arith.addf %615, %611 : vector<8x32xf32>
    %629 = arith.mulf %621, %628 : vector<8x32xf32>
    %630 = arith.addf %602, %629 : vector<8x32xf32>
    %631 = math.tanh %630 : vector<8x32xf32>
    %cst_374 = arith.constant 1.000000e+00 : f32
    %632 = vector.broadcast %cst_374 : f32 to vector<8x32xf32>
    %633 = arith.subf %632, %627 : vector<8x32xf32>
    %634 = arith.mulf %633, %631 : vector<8x32xf32>
    %635 = arith.mulf %627, %612 : vector<8x32xf32>
    %636 = arith.addf %634, %635 : vector<8x32xf32>
    %c0_375 = arith.constant 0 : index
    %c0_376 = arith.constant 0 : index
    %637 = vector.load %arg23[%c0_375, %c0_376] : memref<64x32xf32, #tpu.memory_space<vmem>>, vector<8x32xf32>
    tpu.vector_store %arg23[%c0_375, %c0_376], %636 {strides = array<i32>} : memref<64x32xf32, #tpu.memory_space<vmem>>, vector<8x32xf32>,
    %cst_377 = arith.constant dense<0.000000e+00> : vector<8x32xf32>
    %638 = tpu.matmul %636, %604, %cst_377 {dimension_numbers = #tpu.dot_dimension_numbers<[1], [0], [0], [1], [0, 0, 1, 1], [], []>} : vector<8x32xf32>, vector<32x32xf32>, vector<8x32xf32> -> vector<8x32xf32>
    %cst_378 = arith.constant dense<0.000000e+00> : vector<8x32xf32>
    %639 = tpu.matmul %636, %606, %cst_378 {dimension_numbers = #tpu.dot_dimension_numbers<[1], [0], [0], [1], [0, 0, 1, 1], [], []>} : vector<8x32xf32>, vector<32x32xf32>, vector<8x32xf32> -> vector<8x32xf32>
    %cst_379 = arith.constant dense<0.000000e+00> : vector<8x32xf32>
    %640 = tpu.matmul %636, %608, %cst_379 {dimension_numbers = #tpu.dot_dimension_numbers<[1], [0], [0], [1], [0, 0, 1, 1], [], []>} : vector<8x32xf32>, vector<32x32xf32>, vector<8x32xf32> -> vector<8x32xf32>
    %641 = arith.addf %588, %638 : vector<8x32xf32>
    %642 = arith.negf %641 : vector<8x32xf32>
    %643 = math.exp %642 : vector<8x32xf32>
    %cst_380 = arith.constant 1.000000e+00 : f32
    %644 = vector.broadcast %cst_380 : f32 to vector<8x32xf32>
    %645 = arith.addf %644, %643 : vector<8x32xf32>
    %646 = arith.divf %644, %645 : vector<8x32xf32>
    %647 = arith.addf %595, %639 : vector<8x32xf32>
    %648 = arith.negf %647 : vector<8x32xf32>
    %649 = math.exp %648 : vector<8x32xf32>
    %cst_381 = arith.constant 1.000000e+00 : f32
    %650 = vector.broadcast %cst_381 : f32 to vector<8x32xf32>
    %651 = arith.addf %650, %649 : vector<8x32xf32>
    %652 = arith.divf %650, %651 : vector<8x32xf32>
    %653 = arith.addf %640, %611 : vector<8x32xf32>
    %654 = arith.mulf %646, %653 : vector<8x32xf32>
    %655 = arith.addf %602, %654 : vector<8x32xf32>
    %656 = math.tanh %655 : vector<8x32xf32>
    %cst_382 = arith.constant 1.000000e+00 : f32
    %657 = vector.broadcast %cst_382 : f32 to vector<8x32xf32>
    %658 = arith.subf %657, %652 : vector<8x32xf32>
    %659 = arith.mulf %658, %656 : vector<8x32xf32>
    %660 = arith.mulf %652, %636 : vector<8x32xf32>
    %661 = arith.addf %659, %660 : vector<8x32xf32>
    %c8_383 = arith.constant 8 : index
    %c0_384 = arith.constant 0 : index
    %662 = vector.load %arg23[%c8_383, %c0_384] : memref<64x32xf32, #tpu.memory_space<vmem>>, vector<8x32xf32>
    tpu.vector_store %arg23[%c8_383, %c0_384], %661 {strides = array<i32>} : memref<64x32xf32, #tpu.memory_space<vmem>>, vector<8x32xf32>,
    %cst_385 = arith.constant dense<0.000000e+00> : vector<8x32xf32>
    %663 = tpu.matmul %661, %604, %cst_385 {dimension_numbers = #tpu.dot_dimension_numbers<[1], [0], [0], [1], [0, 0, 1, 1], [], []>} : vector<8x32xf32>, vector<32x32xf32>, vector<8x32xf32> -> vector<8x32xf32>
    %cst_386 = arith.constant dense<0.000000e+00> : vector<8x32xf32>
    %664 = tpu.matmul %661, %606, %cst_386 {dimension_numbers = #tpu.dot_dimension_numbers<[1], [0], [0], [1], [0, 0, 1, 1], [], []>} : vector<8x32xf32>, vector<32x32xf32>, vector<8x32xf32> -> vector<8x32xf32>
    %cst_387 = arith.constant dense<0.000000e+00> : vector<8x32xf32>
    %665 = tpu.matmul %661, %608, %cst_387 {dimension_numbers = #tpu.dot_dimension_numbers<[1], [0], [0], [1], [0, 0, 1, 1], [], []>} : vector<8x32xf32>, vector<32x32xf32>, vector<8x32xf32> -> vector<8x32xf32>
    %666 = arith.addf %588, %663 : vector<8x32xf32>
    %667 = arith.negf %666 : vector<8x32xf32>
    %668 = math.exp %667 : vector<8x32xf32>
    %cst_388 = arith.constant 1.000000e+00 : f32
    %669 = vector.broadcast %cst_388 : f32 to vector<8x32xf32>
    %670 = arith.addf %669, %668 : vector<8x32xf32>
    %671 = arith.divf %669, %670 : vector<8x32xf32>
    %672 = arith.addf %595, %664 : vector<8x32xf32>
    %673 = arith.negf %672 : vector<8x32xf32>
    %674 = math.exp %673 : vector<8x32xf32>
    %cst_389 = arith.constant 1.000000e+00 : f32
    %675 = vector.broadcast %cst_389 : f32 to vector<8x32xf32>
    %676 = arith.addf %675, %674 : vector<8x32xf32>
    %677 = arith.divf %675, %676 : vector<8x32xf32>
    %678 = arith.addf %665, %611 : vector<8x32xf32>
    %679 = arith.mulf %671, %678 : vector<8x32xf32>
    %680 = arith.addf %602, %679 : vector<8x32xf32>
    %681 = math.tanh %680 : vector<8x32xf32>
    %cst_390 = arith.constant 1.000000e+00 : f32
    %682 = vector.broadcast %cst_390 : f32 to vector<8x32xf32>
    %683 = arith.subf %682, %677 : vector<8x32xf32>
    %684 = arith.mulf %683, %681 : vector<8x32xf32>
    %685 = arith.mulf %677, %661 : vector<8x32xf32>
    %686 = arith.addf %684, %685 : vector<8x32xf32>
    %c16_391 = arith.constant 16 : index
    %c0_392 = arith.constant 0 : index
    %687 = vector.load %arg23[%c16_391, %c0_392] : memref<64x32xf32, #tpu.memory_space<vmem>>, vector<8x32xf32>
    tpu.vector_store %arg23[%c16_391, %c0_392], %686 {strides = array<i32>} : memref<64x32xf32, #tpu.memory_space<vmem>>, vector<8x32xf32>,
    %cst_393 = arith.constant dense<0.000000e+00> : vector<8x32xf32>
    %688 = tpu.matmul %686, %604, %cst_393 {dimension_numbers = #tpu.dot_dimension_numbers<[1], [0], [0], [1], [0, 0, 1, 1], [], []>} : vector<8x32xf32>, vector<32x32xf32>, vector<8x32xf32> -> vector<8x32xf32>
    %cst_394 = arith.constant dense<0.000000e+00> : vector<8x32xf32>
    %689 = tpu.matmul %686, %606, %cst_394 {dimension_numbers = #tpu.dot_dimension_numbers<[1], [0], [0], [1], [0, 0, 1, 1], [], []>} : vector<8x32xf32>, vector<32x32xf32>, vector<8x32xf32> -> vector<8x32xf32>
    %cst_395 = arith.constant dense<0.000000e+00> : vector<8x32xf32>
    %690 = tpu.matmul %686, %608, %cst_395 {dimension_numbers = #tpu.dot_dimension_numbers<[1], [0], [0], [1], [0, 0, 1, 1], [], []>} : vector<8x32xf32>, vector<32x32xf32>, vector<8x32xf32> -> vector<8x32xf32>
    %691 = arith.addf %588, %688 : vector<8x32xf32>
    %692 = arith.negf %691 : vector<8x32xf32>
    %693 = math.exp %692 : vector<8x32xf32>
    %cst_396 = arith.constant 1.000000e+00 : f32
    %694 = vector.broadcast %cst_396 : f32 to vector<8x32xf32>
    %695 = arith.addf %694, %693 : vector<8x32xf32>
    %696 = arith.divf %694, %695 : vector<8x32xf32>
    %697 = arith.addf %595, %689 : vector<8x32xf32>
    %698 = arith.negf %697 : vector<8x32xf32>
    %699 = math.exp %698 : vector<8x32xf32>
    %cst_397 = arith.constant 1.000000e+00 : f32
    %700 = vector.broadcast %cst_397 : f32 to vector<8x32xf32>
    %701 = arith.addf %700, %699 : vector<8x32xf32>
    %702 = arith.divf %700, %701 : vector<8x32xf32>
    %703 = arith.addf %690, %611 : vector<8x32xf32>
    %704 = arith.mulf %696, %703 : vector<8x32xf32>
    %705 = arith.addf %602, %704 : vector<8x32xf32>
    %706 = math.tanh %705 : vector<8x32xf32>
    %cst_398 = arith.constant 1.000000e+00 : f32
    %707 = vector.broadcast %cst_398 : f32 to vector<8x32xf32>
    %708 = arith.subf %707, %702 : vector<8x32xf32>
    %709 = arith.mulf %708, %706 : vector<8x32xf32>
    %710 = arith.mulf %702, %686 : vector<8x32xf32>
    %711 = arith.addf %709, %710 : vector<8x32xf32>
    %c24_399 = arith.constant 24 : index
    %c0_400 = arith.constant 0 : index
    %712 = vector.load %arg23[%c24_399, %c0_400] : memref<64x32xf32, #tpu.memory_space<vmem>>, vector<8x32xf32>
    tpu.vector_store %arg23[%c24_399, %c0_400], %711 {strides = array<i32>} : memref<64x32xf32, #tpu.memory_space<vmem>>, vector<8x32xf32>,
    %cst_401 = arith.constant dense<0.000000e+00> : vector<8x32xf32>
    %713 = tpu.matmul %711, %604, %cst_401 {dimension_numbers = #tpu.dot_dimension_numbers<[1], [0], [0], [1], [0, 0, 1, 1], [], []>} : vector<8x32xf32>, vector<32x32xf32>, vector<8x32xf32> -> vector<8x32xf32>
    %cst_402 = arith.constant dense<0.000000e+00> : vector<8x32xf32>
    %714 = tpu.matmul %711, %606, %cst_402 {dimension_numbers = #tpu.dot_dimension_numbers<[1], [0], [0], [1], [0, 0, 1, 1], [], []>} : vector<8x32xf32>, vector<32x32xf32>, vector<8x32xf32> -> vector<8x32xf32>
    %cst_403 = arith.constant dense<0.000000e+00> : vector<8x32xf32>
    %715 = tpu.matmul %711, %608, %cst_403 {dimension_numbers = #tpu.dot_dimension_numbers<[1], [0], [0], [1], [0, 0, 1, 1], [], []>} : vector<8x32xf32>, vector<32x32xf32>, vector<8x32xf32> -> vector<8x32xf32>
    %716 = arith.addf %588, %713 : vector<8x32xf32>
    %717 = arith.negf %716 : vector<8x32xf32>
    %718 = math.exp %717 : vector<8x32xf32>
    %cst_404 = arith.constant 1.000000e+00 : f32
    %719 = vector.broadcast %cst_404 : f32 to vector<8x32xf32>
    %720 = arith.addf %719, %718 : vector<8x32xf32>
    %721 = arith.divf %719, %720 : vector<8x32xf32>
    %722 = arith.addf %595, %714 : vector<8x32xf32>
    %723 = arith.negf %722 : vector<8x32xf32>
    %724 = math.exp %723 : vector<8x32xf32>
    %cst_405 = arith.constant 1.000000e+00 : f32
    %725 = vector.broadcast %cst_405 : f32 to vector<8x32xf32>
    %726 = arith.addf %725, %724 : vector<8x32xf32>
    %727 = arith.divf %725, %726 : vector<8x32xf32>
    %728 = arith.addf %715, %611 : vector<8x32xf32>
    %729 = arith.mulf %721, %728 : vector<8x32xf32>
    %730 = arith.addf %602, %729 : vector<8x32xf32>
    %731 = math.tanh %730 : vector<8x32xf32>
    %cst_406 = arith.constant 1.000000e+00 : f32
    %732 = vector.broadcast %cst_406 : f32 to vector<8x32xf32>
    %733 = arith.subf %732, %727 : vector<8x32xf32>
    %734 = arith.mulf %733, %731 : vector<8x32xf32>
    %735 = arith.mulf %727, %711 : vector<8x32xf32>
    %736 = arith.addf %734, %735 : vector<8x32xf32>
    %c32_407 = arith.constant 32 : index
    %c0_408 = arith.constant 0 : index
    %737 = vector.load %arg23[%c32_407, %c0_408] : memref<64x32xf32, #tpu.memory_space<vmem>>, vector<8x32xf32>
    tpu.vector_store %arg23[%c32_407, %c0_408], %736 {strides = array<i32>} : memref<64x32xf32, #tpu.memory_space<vmem>>, vector<8x32xf32>,
    %cst_409 = arith.constant dense<0.000000e+00> : vector<8x32xf32>
    %738 = tpu.matmul %736, %604, %cst_409 {dimension_numbers = #tpu.dot_dimension_numbers<[1], [0], [0], [1], [0, 0, 1, 1], [], []>} : vector<8x32xf32>, vector<32x32xf32>, vector<8x32xf32> -> vector<8x32xf32>
    %cst_410 = arith.constant dense<0.000000e+00> : vector<8x32xf32>
    %739 = tpu.matmul %736, %606, %cst_410 {dimension_numbers = #tpu.dot_dimension_numbers<[1], [0], [0], [1], [0, 0, 1, 1], [], []>} : vector<8x32xf32>, vector<32x32xf32>, vector<8x32xf32> -> vector<8x32xf32>
    %cst_411 = arith.constant dense<0.000000e+00> : vector<8x32xf32>
    %740 = tpu.matmul %736, %608, %cst_411 {dimension_numbers = #tpu.dot_dimension_numbers<[1], [0], [0], [1], [0, 0, 1, 1], [], []>} : vector<8x32xf32>, vector<32x32xf32>, vector<8x32xf32> -> vector<8x32xf32>
    %741 = arith.addf %588, %738 : vector<8x32xf32>
    %742 = arith.negf %741 : vector<8x32xf32>
    %743 = math.exp %742 : vector<8x32xf32>
    %cst_412 = arith.constant 1.000000e+00 : f32
    %744 = vector.broadcast %cst_412 : f32 to vector<8x32xf32>
    %745 = arith.addf %744, %743 : vector<8x32xf32>
    %746 = arith.divf %744, %745 : vector<8x32xf32>
    %747 = arith.addf %595, %739 : vector<8x32xf32>
    %748 = arith.negf %747 : vector<8x32xf32>
    %749 = math.exp %748 : vector<8x32xf32>
    %cst_413 = arith.constant 1.000000e+00 : f32
    %750 = vector.broadcast %cst_413 : f32 to vector<8x32xf32>
    %751 = arith.addf %750, %749 : vector<8x32xf32>
    %752 = arith.divf %750, %751 : vector<8x32xf32>
    %753 = arith.addf %740, %611 : vector<8x32xf32>
    %754 = arith.mulf %746, %753 : vector<8x32xf32>
    %755 = arith.addf %602, %754 : vector<8x32xf32>
    %756 = math.tanh %755 : vector<8x32xf32>
    %cst_414 = arith.constant 1.000000e+00 : f32
    %757 = vector.broadcast %cst_414 : f32 to vector<8x32xf32>
    %758 = arith.subf %757, %752 : vector<8x32xf32>
    %759 = arith.mulf %758, %756 : vector<8x32xf32>
    %760 = arith.mulf %752, %736 : vector<8x32xf32>
    %761 = arith.addf %759, %760 : vector<8x32xf32>
    %c40_415 = arith.constant 40 : index
    %c0_416 = arith.constant 0 : index
    %762 = vector.load %arg23[%c40_415, %c0_416] : memref<64x32xf32, #tpu.memory_space<vmem>>, vector<8x32xf32>
    tpu.vector_store %arg23[%c40_415, %c0_416], %761 {strides = array<i32>} : memref<64x32xf32, #tpu.memory_space<vmem>>, vector<8x32xf32>,
    %cst_417 = arith.constant dense<0.000000e+00> : vector<8x32xf32>
    %763 = tpu.matmul %761, %604, %cst_417 {dimension_numbers = #tpu.dot_dimension_numbers<[1], [0], [0], [1], [0, 0, 1, 1], [], []>} : vector<8x32xf32>, vector<32x32xf32>, vector<8x32xf32> -> vector<8x32xf32>
    %cst_418 = arith.constant dense<0.000000e+00> : vector<8x32xf32>
    %764 = tpu.matmul %761, %606, %cst_418 {dimension_numbers = #tpu.dot_dimension_numbers<[1], [0], [0], [1], [0, 0, 1, 1], [], []>} : vector<8x32xf32>, vector<32x32xf32>, vector<8x32xf32> -> vector<8x32xf32>
    %cst_419 = arith.constant dense<0.000000e+00> : vector<8x32xf32>
    %765 = tpu.matmul %761, %608, %cst_419 {dimension_numbers = #tpu.dot_dimension_numbers<[1], [0], [0], [1], [0, 0, 1, 1], [], []>} : vector<8x32xf32>, vector<32x32xf32>, vector<8x32xf32> -> vector<8x32xf32>
    %766 = arith.addf %588, %763 : vector<8x32xf32>
    %767 = arith.negf %766 : vector<8x32xf32>
    %768 = math.exp %767 : vector<8x32xf32>
    %cst_420 = arith.constant 1.000000e+00 : f32
    %769 = vector.broadcast %cst_420 : f32 to vector<8x32xf32>
    %770 = arith.addf %769, %768 : vector<8x32xf32>
    %771 = arith.divf %769, %770 : vector<8x32xf32>
    %772 = arith.addf %595, %764 : vector<8x32xf32>
    %773 = arith.negf %772 : vector<8x32xf32>
    %774 = math.exp %773 : vector<8x32xf32>
    %cst_421 = arith.constant 1.000000e+00 : f32
    %775 = vector.broadcast %cst_421 : f32 to vector<8x32xf32>
    %776 = arith.addf %775, %774 : vector<8x32xf32>
    %777 = arith.divf %775, %776 : vector<8x32xf32>
    %778 = arith.addf %765, %611 : vector<8x32xf32>
    %779 = arith.mulf %771, %778 : vector<8x32xf32>
    %780 = arith.addf %602, %779 : vector<8x32xf32>
    %781 = math.tanh %780 : vector<8x32xf32>
    %cst_422 = arith.constant 1.000000e+00 : f32
    %782 = vector.broadcast %cst_422 : f32 to vector<8x32xf32>
    %783 = arith.subf %782, %777 : vector<8x32xf32>
    %784 = arith.mulf %783, %781 : vector<8x32xf32>
    %785 = arith.mulf %777, %761 : vector<8x32xf32>
    %786 = arith.addf %784, %785 : vector<8x32xf32>
    %c48_423 = arith.constant 48 : index
    %c0_424 = arith.constant 0 : index
    %787 = vector.load %arg23[%c48_423, %c0_424] : memref<64x32xf32, #tpu.memory_space<vmem>>, vector<8x32xf32>
    tpu.vector_store %arg23[%c48_423, %c0_424], %786 {strides = array<i32>} : memref<64x32xf32, #tpu.memory_space<vmem>>, vector<8x32xf32>,
    %cst_425 = arith.constant dense<0.000000e+00> : vector<8x32xf32>
    %788 = tpu.matmul %786, %604, %cst_425 {dimension_numbers = #tpu.dot_dimension_numbers<[1], [0], [0], [1], [0, 0, 1, 1], [], []>} : vector<8x32xf32>, vector<32x32xf32>, vector<8x32xf32> -> vector<8x32xf32>
    %cst_426 = arith.constant dense<0.000000e+00> : vector<8x32xf32>
    %789 = tpu.matmul %786, %606, %cst_426 {dimension_numbers = #tpu.dot_dimension_numbers<[1], [0], [0], [1], [0, 0, 1, 1], [], []>} : vector<8x32xf32>, vector<32x32xf32>, vector<8x32xf32> -> vector<8x32xf32>
    %cst_427 = arith.constant dense<0.000000e+00> : vector<8x32xf32>
    %790 = tpu.matmul %786, %608, %cst_427 {dimension_numbers = #tpu.dot_dimension_numbers<[1], [0], [0], [1], [0, 0, 1, 1], [], []>} : vector<8x32xf32>, vector<32x32xf32>, vector<8x32xf32> -> vector<8x32xf32>
    %791 = arith.addf %588, %788 : vector<8x32xf32>
    %792 = arith.negf %791 : vector<8x32xf32>
    %793 = math.exp %792 : vector<8x32xf32>
    %cst_428 = arith.constant 1.000000e+00 : f32
    %794 = vector.broadcast %cst_428 : f32 to vector<8x32xf32>
    %795 = arith.addf %794, %793 : vector<8x32xf32>
    %796 = arith.divf %794, %795 : vector<8x32xf32>
    %797 = arith.addf %595, %789 : vector<8x32xf32>
    %798 = arith.negf %797 : vector<8x32xf32>
    %799 = math.exp %798 : vector<8x32xf32>
    %cst_429 = arith.constant 1.000000e+00 : f32
    %800 = vector.broadcast %cst_429 : f32 to vector<8x32xf32>
    %801 = arith.addf %800, %799 : vector<8x32xf32>
    %802 = arith.divf %800, %801 : vector<8x32xf32>
    %803 = arith.addf %790, %611 : vector<8x32xf32>
    %804 = arith.mulf %796, %803 : vector<8x32xf32>
    %805 = arith.addf %602, %804 : vector<8x32xf32>
    %806 = math.tanh %805 : vector<8x32xf32>
    %cst_430 = arith.constant 1.000000e+00 : f32
    %807 = vector.broadcast %cst_430 : f32 to vector<8x32xf32>
    %808 = arith.subf %807, %802 : vector<8x32xf32>
    %809 = arith.mulf %808, %806 : vector<8x32xf32>
    %810 = arith.mulf %802, %786 : vector<8x32xf32>
    %811 = arith.addf %809, %810 : vector<8x32xf32>
    %c56_431 = arith.constant 56 : index
    %c0_432 = arith.constant 0 : index
    %812 = vector.load %arg23[%c56_431, %c0_432] : memref<64x32xf32, #tpu.memory_space<vmem>>, vector<8x32xf32>
    tpu.vector_store %arg23[%c56_431, %c0_432], %811 {strides = array<i32>} : memref<64x32xf32, #tpu.memory_space<vmem>>, vector<8x32xf32>,
    %c0_433 = arith.constant 0 : index
    %c0_434 = arith.constant 0 : index
    %813 = vector.load %arg23[%c0_433, %c0_434] : memref<64x32xf32, #tpu.memory_space<vmem>>, vector<64x32xf32>
    %c0_435 = arith.constant 0 : index
    %c0_436 = arith.constant 0 : index
    %c0_437 = arith.constant 0 : index
    %814 = vector.load %arg16[%c0_435, %c0_436, %c0_437] : memref<3x32x32xf32, #tpu.memory_space<vmem>>, vector<1x32x32xf32>
    %815 = vector.shape_cast %814 : vector<1x32x32xf32> to vector<32x32xf32>
    %cst_438 = arith.constant dense<0.000000e+00> : vector<64x32xf32>
    %816 = tpu.matmul %813, %815, %cst_438 {dimension_numbers = #tpu.dot_dimension_numbers<[1], [0], [0], [1], [0, 0, 1, 1], [], []>} : vector<64x32xf32>, vector<32x32xf32>, vector<64x32xf32> -> vector<64x32xf32>
    %c0_439 = arith.constant 0 : index
    %c0_440 = arith.constant 0 : index
    %c0_441 = arith.constant 0 : index
    %817 = vector.load %arg18[%c0_439, %c0_440, %c0_441] : memref<3x1x32xf32, #tpu.memory_space<vmem>>, vector<1x1x32xf32>
    %818 = vector.shape_cast %817 : vector<1x1x32xf32> to vector<1x32xf32>
    %819 = vector.broadcast %818 : vector<1x32xf32> to vector<64x32xf32>
    %820 = arith.addf %816, %819 : vector<64x32xf32>
    %c0_442 = arith.constant 0 : index
    %c0_443 = arith.constant 0 : index
    %c0_444 = arith.constant 0 : index
    %821 = vector.load %arg24[%c0_442, %c0_443, %c0_444] : memref<3x64x32xf32, #tpu.memory_space<vmem>>, vector<1x64x32xf32>
    %822 = vector.shape_cast %821 : vector<1x64x32xf32> to vector<64x32xf32>
    %823 = vector.shape_cast %820 : vector<64x32xf32> to vector<1x64x32xf32>
    tpu.vector_store %arg24[%c0_442, %c0_443, %c0_444], %823 {strides = array<i32>} : memref<3x64x32xf32, #tpu.memory_space<vmem>>, vector<1x64x32xf32>,
    %c1_445 = arith.constant 1 : index
    %c0_446 = arith.constant 0 : index
    %c0_447 = arith.constant 0 : index
    %824 = vector.load %arg16[%c1_445, %c0_446, %c0_447] : memref<3x32x32xf32, #tpu.memory_space<vmem>>, vector<1x32x32xf32>
    %825 = vector.shape_cast %824 : vector<1x32x32xf32> to vector<32x32xf32>
    %cst_448 = arith.constant dense<0.000000e+00> : vector<64x32xf32>
    %826 = tpu.matmul %813, %825, %cst_448 {dimension_numbers = #tpu.dot_dimension_numbers<[1], [0], [0], [1], [0, 0, 1, 1], [], []>} : vector<64x32xf32>, vector<32x32xf32>, vector<64x32xf32> -> vector<64x32xf32>
    %c1_449 = arith.constant 1 : index
    %c0_450 = arith.constant 0 : index
    %c0_451 = arith.constant 0 : index
    %827 = vector.load %arg18[%c1_449, %c0_450, %c0_451] : memref<3x1x32xf32, #tpu.memory_space<vmem>>, vector<1x1x32xf32>
    %828 = vector.shape_cast %827 : vector<1x1x32xf32> to vector<1x32xf32>
    %829 = vector.broadcast %828 : vector<1x32xf32> to vector<64x32xf32>
    %830 = arith.addf %826, %829 : vector<64x32xf32>
    %c1_452 = arith.constant 1 : index
    %c0_453 = arith.constant 0 : index
    %c0_454 = arith.constant 0 : index
    %831 = vector.load %arg24[%c1_452, %c0_453, %c0_454] : memref<3x64x32xf32, #tpu.memory_space<vmem>>, vector<1x64x32xf32>
    %832 = vector.shape_cast %831 : vector<1x64x32xf32> to vector<64x32xf32>
    %833 = vector.shape_cast %830 : vector<64x32xf32> to vector<1x64x32xf32>
    tpu.vector_store %arg24[%c1_452, %c0_453, %c0_454], %833 {strides = array<i32>} : memref<3x64x32xf32, #tpu.memory_space<vmem>>, vector<1x64x32xf32>,
    %c2_455 = arith.constant 2 : index
    %c0_456 = arith.constant 0 : index
    %c0_457 = arith.constant 0 : index
    %834 = vector.load %arg16[%c2_455, %c0_456, %c0_457] : memref<3x32x32xf32, #tpu.memory_space<vmem>>, vector<1x32x32xf32>
    %835 = vector.shape_cast %834 : vector<1x32x32xf32> to vector<32x32xf32>
    %cst_458 = arith.constant dense<0.000000e+00> : vector<64x32xf32>
    %836 = tpu.matmul %813, %835, %cst_458 {dimension_numbers = #tpu.dot_dimension_numbers<[1], [0], [0], [1], [0, 0, 1, 1], [], []>} : vector<64x32xf32>, vector<32x32xf32>, vector<64x32xf32> -> vector<64x32xf32>
    %c2_459 = arith.constant 2 : index
    %c0_460 = arith.constant 0 : index
    %c0_461 = arith.constant 0 : index
    %837 = vector.load %arg18[%c2_459, %c0_460, %c0_461] : memref<3x1x32xf32, #tpu.memory_space<vmem>>, vector<1x1x32xf32>
    %838 = vector.shape_cast %837 : vector<1x1x32xf32> to vector<1x32xf32>
    %839 = vector.broadcast %838 : vector<1x32xf32> to vector<64x32xf32>
    %840 = arith.addf %836, %839 : vector<64x32xf32>
    %c2_462 = arith.constant 2 : index
    %c0_463 = arith.constant 0 : index
    %c0_464 = arith.constant 0 : index
    %841 = vector.load %arg24[%c2_462, %c0_463, %c0_464] : memref<3x64x32xf32, #tpu.memory_space<vmem>>, vector<1x64x32xf32>
    %842 = vector.shape_cast %841 : vector<1x64x32xf32> to vector<64x32xf32>
    %843 = vector.shape_cast %840 : vector<64x32xf32> to vector<1x64x32xf32>
    tpu.vector_store %arg24[%c2_462, %c0_463, %c0_464], %843 {strides = array<i32>} : memref<3x64x32xf32, #tpu.memory_space<vmem>>, vector<1x64x32xf32>,
    %c0_465 = arith.constant 0 : index
    %c0_466 = arith.constant 0 : index
    %c0_467 = arith.constant 0 : index
    %844 = vector.load %arg17[%c0_465, %c0_466, %c0_467] : memref<3x32x32xf32, #tpu.memory_space<vmem>>, vector<1x32x32xf32>
    %845 = vector.shape_cast %844 : vector<1x32x32xf32> to vector<32x32xf32>
    %c1_468 = arith.constant 1 : index
    %c0_469 = arith.constant 0 : index
    %c0_470 = arith.constant 0 : index
    %846 = vector.load %arg17[%c1_468, %c0_469, %c0_470] : memref<3x32x32xf32, #tpu.memory_space<vmem>>, vector<1x32x32xf32>
    %847 = vector.shape_cast %846 : vector<1x32x32xf32> to vector<32x32xf32>
    %c2_471 = arith.constant 2 : index
    %c0_472 = arith.constant 0 : index
    %c0_473 = arith.constant 0 : index
    %848 = vector.load %arg17[%c2_471, %c0_472, %c0_473] : memref<3x32x32xf32, #tpu.memory_space<vmem>>, vector<1x32x32xf32>
    %849 = vector.shape_cast %848 : vector<1x32x32xf32> to vector<32x32xf32>
    %c0_474 = arith.constant 0 : index
    %c0_475 = arith.constant 0 : index
    %850 = vector.load %arg19[%c0_474, %c0_475] : memref<1x32xf32, #tpu.memory_space<vmem>>, vector<1x32xf32>
    %851 = vector.shape_cast %850 : vector<1x32xf32> to vector<1x32xf32>
    %852 = vector.broadcast %851 : vector<1x32xf32> to vector<8x32xf32>
    %cst_476 = arith.constant 0.000000e+00 : f32
    %853 = vector.broadcast %cst_476 : f32 to vector<8x32xf32>
    %cst_477 = arith.constant dense<0.000000e+00> : vector<8x32xf32>
    %854 = tpu.matmul %853, %845, %cst_477 {dimension_numbers = #tpu.dot_dimension_numbers<[1], [0], [0], [1], [0, 0, 1, 1], [], []>} : vector<8x32xf32>, vector<32x32xf32>, vector<8x32xf32> -> vector<8x32xf32>
    %cst_478 = arith.constant dense<0.000000e+00> : vector<8x32xf32>
    %855 = tpu.matmul %853, %847, %cst_478 {dimension_numbers = #tpu.dot_dimension_numbers<[1], [0], [0], [1], [0, 0, 1, 1], [], []>} : vector<8x32xf32>, vector<32x32xf32>, vector<8x32xf32> -> vector<8x32xf32>
    %cst_479 = arith.constant dense<0.000000e+00> : vector<8x32xf32>
    %856 = tpu.matmul %853, %849, %cst_479 {dimension_numbers = #tpu.dot_dimension_numbers<[1], [0], [0], [1], [0, 0, 1, 1], [], []>} : vector<8x32xf32>, vector<32x32xf32>, vector<8x32xf32> -> vector<8x32xf32>
    %c0_480 = arith.constant 0 : index
    %c0_481 = arith.constant 0 : index
    %c0_482 = arith.constant 0 : index
    %857 = vector.load %arg24[%c0_480, %c0_481, %c0_482] : memref<3x64x32xf32, #tpu.memory_space<vmem>>, vector<1x8x32xf32>
    %858 = vector.shape_cast %857 : vector<1x8x32xf32> to vector<8x32xf32>
    %c1_483 = arith.constant 1 : index
    %c0_484 = arith.constant 0 : index
    %c0_485 = arith.constant 0 : index
    %859 = vector.load %arg24[%c1_483, %c0_484, %c0_485] : memref<3x64x32xf32, #tpu.memory_space<vmem>>, vector<1x8x32xf32>
    %860 = vector.shape_cast %859 : vector<1x8x32xf32> to vector<8x32xf32>
    %c2_486 = arith.constant 2 : index
    %c0_487 = arith.constant 0 : index
    %c0_488 = arith.constant 0 : index
    %861 = vector.load %arg24[%c2_486, %c0_487, %c0_488] : memref<3x64x32xf32, #tpu.memory_space<vmem>>, vector<1x8x32xf32>
    %862 = vector.shape_cast %861 : vector<1x8x32xf32> to vector<8x32xf32>
    %863 = arith.addf %858, %854 : vector<8x32xf32>
    %864 = arith.negf %863 : vector<8x32xf32>
    %865 = math.exp %864 : vector<8x32xf32>
    %cst_489 = arith.constant 1.000000e+00 : f32
    %866 = vector.broadcast %cst_489 : f32 to vector<8x32xf32>
    %867 = arith.addf %866, %865 : vector<8x32xf32>
    %868 = arith.divf %866, %867 : vector<8x32xf32>
    %869 = arith.addf %860, %855 : vector<8x32xf32>
    %870 = arith.negf %869 : vector<8x32xf32>
    %871 = math.exp %870 : vector<8x32xf32>
    %cst_490 = arith.constant 1.000000e+00 : f32
    %872 = vector.broadcast %cst_490 : f32 to vector<8x32xf32>
    %873 = arith.addf %872, %871 : vector<8x32xf32>
    %874 = arith.divf %872, %873 : vector<8x32xf32>
    %875 = arith.addf %856, %852 : vector<8x32xf32>
    %876 = arith.mulf %868, %875 : vector<8x32xf32>
    %877 = arith.addf %862, %876 : vector<8x32xf32>
    %878 = math.tanh %877 : vector<8x32xf32>
    %cst_491 = arith.constant 1.000000e+00 : f32
    %879 = vector.broadcast %cst_491 : f32 to vector<8x32xf32>
    %880 = arith.subf %879, %874 : vector<8x32xf32>
    %881 = arith.mulf %880, %878 : vector<8x32xf32>
    %882 = arith.mulf %874, %853 : vector<8x32xf32>
    %883 = arith.addf %881, %882 : vector<8x32xf32>
    %c0_492 = arith.constant 0 : index
    %c0_493 = arith.constant 0 : index
    %884 = vector.load %arg23[%c0_492, %c0_493] : memref<64x32xf32, #tpu.memory_space<vmem>>, vector<8x32xf32>
    tpu.vector_store %arg23[%c0_492, %c0_493], %883 {strides = array<i32>} : memref<64x32xf32, #tpu.memory_space<vmem>>, vector<8x32xf32>,
    %cst_494 = arith.constant dense<0.000000e+00> : vector<8x32xf32>
    %885 = tpu.matmul %883, %845, %cst_494 {dimension_numbers = #tpu.dot_dimension_numbers<[1], [0], [0], [1], [0, 0, 1, 1], [], []>} : vector<8x32xf32>, vector<32x32xf32>, vector<8x32xf32> -> vector<8x32xf32>
    %cst_495 = arith.constant dense<0.000000e+00> : vector<8x32xf32>
    %886 = tpu.matmul %883, %847, %cst_495 {dimension_numbers = #tpu.dot_dimension_numbers<[1], [0], [0], [1], [0, 0, 1, 1], [], []>} : vector<8x32xf32>, vector<32x32xf32>, vector<8x32xf32> -> vector<8x32xf32>
    %cst_496 = arith.constant dense<0.000000e+00> : vector<8x32xf32>
    %887 = tpu.matmul %883, %849, %cst_496 {dimension_numbers = #tpu.dot_dimension_numbers<[1], [0], [0], [1], [0, 0, 1, 1], [], []>} : vector<8x32xf32>, vector<32x32xf32>, vector<8x32xf32> -> vector<8x32xf32>
    %c0_497 = arith.constant 0 : index
    %c8_498 = arith.constant 8 : index
    %c0_499 = arith.constant 0 : index
    %888 = vector.load %arg24[%c0_497, %c8_498, %c0_499] : memref<3x64x32xf32, #tpu.memory_space<vmem>>, vector<1x8x32xf32>
    %889 = vector.shape_cast %888 : vector<1x8x32xf32> to vector<8x32xf32>
    %c1_500 = arith.constant 1 : index
    %c8_501 = arith.constant 8 : index
    %c0_502 = arith.constant 0 : index
    %890 = vector.load %arg24[%c1_500, %c8_501, %c0_502] : memref<3x64x32xf32, #tpu.memory_space<vmem>>, vector<1x8x32xf32>
    %891 = vector.shape_cast %890 : vector<1x8x32xf32> to vector<8x32xf32>
    %c2_503 = arith.constant 2 : index
    %c8_504 = arith.constant 8 : index
    %c0_505 = arith.constant 0 : index
    %892 = vector.load %arg24[%c2_503, %c8_504, %c0_505] : memref<3x64x32xf32, #tpu.memory_space<vmem>>, vector<1x8x32xf32>
    %893 = vector.shape_cast %892 : vector<1x8x32xf32> to vector<8x32xf32>
    %894 = arith.addf %889, %885 : vector<8x32xf32>
    %895 = arith.negf %894 : vector<8x32xf32>
    %896 = math.exp %895 : vector<8x32xf32>
    %cst_506 = arith.constant 1.000000e+00 : f32
    %897 = vector.broadcast %cst_506 : f32 to vector<8x32xf32>
    %898 = arith.addf %897, %896 : vector<8x32xf32>
    %899 = arith.divf %897, %898 : vector<8x32xf32>
    %900 = arith.addf %891, %886 : vector<8x32xf32>
    %901 = arith.negf %900 : vector<8x32xf32>
    %902 = math.exp %901 : vector<8x32xf32>
    %cst_507 = arith.constant 1.000000e+00 : f32
    %903 = vector.broadcast %cst_507 : f32 to vector<8x32xf32>
    %904 = arith.addf %903, %902 : vector<8x32xf32>
    %905 = arith.divf %903, %904 : vector<8x32xf32>
    %906 = arith.addf %887, %852 : vector<8x32xf32>
    %907 = arith.mulf %899, %906 : vector<8x32xf32>
    %908 = arith.addf %893, %907 : vector<8x32xf32>
    %909 = math.tanh %908 : vector<8x32xf32>
    %cst_508 = arith.constant 1.000000e+00 : f32
    %910 = vector.broadcast %cst_508 : f32 to vector<8x32xf32>
    %911 = arith.subf %910, %905 : vector<8x32xf32>
    %912 = arith.mulf %911, %909 : vector<8x32xf32>
    %913 = arith.mulf %905, %883 : vector<8x32xf32>
    %914 = arith.addf %912, %913 : vector<8x32xf32>
    %c8_509 = arith.constant 8 : index
    %c0_510 = arith.constant 0 : index
    %915 = vector.load %arg23[%c8_509, %c0_510] : memref<64x32xf32, #tpu.memory_space<vmem>>, vector<8x32xf32>
    tpu.vector_store %arg23[%c8_509, %c0_510], %914 {strides = array<i32>} : memref<64x32xf32, #tpu.memory_space<vmem>>, vector<8x32xf32>,
    %cst_511 = arith.constant dense<0.000000e+00> : vector<8x32xf32>
    %916 = tpu.matmul %914, %845, %cst_511 {dimension_numbers = #tpu.dot_dimension_numbers<[1], [0], [0], [1], [0, 0, 1, 1], [], []>} : vector<8x32xf32>, vector<32x32xf32>, vector<8x32xf32> -> vector<8x32xf32>
    %cst_512 = arith.constant dense<0.000000e+00> : vector<8x32xf32>
    %917 = tpu.matmul %914, %847, %cst_512 {dimension_numbers = #tpu.dot_dimension_numbers<[1], [0], [0], [1], [0, 0, 1, 1], [], []>} : vector<8x32xf32>, vector<32x32xf32>, vector<8x32xf32> -> vector<8x32xf32>
    %cst_513 = arith.constant dense<0.000000e+00> : vector<8x32xf32>
    %918 = tpu.matmul %914, %849, %cst_513 {dimension_numbers = #tpu.dot_dimension_numbers<[1], [0], [0], [1], [0, 0, 1, 1], [], []>} : vector<8x32xf32>, vector<32x32xf32>, vector<8x32xf32> -> vector<8x32xf32>
    %c0_514 = arith.constant 0 : index
    %c16_515 = arith.constant 16 : index
    %c0_516 = arith.constant 0 : index
    %919 = vector.load %arg24[%c0_514, %c16_515, %c0_516] : memref<3x64x32xf32, #tpu.memory_space<vmem>>, vector<1x8x32xf32>
    %920 = vector.shape_cast %919 : vector<1x8x32xf32> to vector<8x32xf32>
    %c1_517 = arith.constant 1 : index
    %c16_518 = arith.constant 16 : index
    %c0_519 = arith.constant 0 : index
    %921 = vector.load %arg24[%c1_517, %c16_518, %c0_519] : memref<3x64x32xf32, #tpu.memory_space<vmem>>, vector<1x8x32xf32>
    %922 = vector.shape_cast %921 : vector<1x8x32xf32> to vector<8x32xf32>
    %c2_520 = arith.constant 2 : index
    %c16_521 = arith.constant 16 : index
    %c0_522 = arith.constant 0 : index
    %923 = vector.load %arg24[%c2_520, %c16_521, %c0_522] : memref<3x64x32xf32, #tpu.memory_space<vmem>>, vector<1x8x32xf32>
    %924 = vector.shape_cast %923 : vector<1x8x32xf32> to vector<8x32xf32>
    %925 = arith.addf %920, %916 : vector<8x32xf32>
    %926 = arith.negf %925 : vector<8x32xf32>
    %927 = math.exp %926 : vector<8x32xf32>
    %cst_523 = arith.constant 1.000000e+00 : f32
    %928 = vector.broadcast %cst_523 : f32 to vector<8x32xf32>
    %929 = arith.addf %928, %927 : vector<8x32xf32>
    %930 = arith.divf %928, %929 : vector<8x32xf32>
    %931 = arith.addf %922, %917 : vector<8x32xf32>
    %932 = arith.negf %931 : vector<8x32xf32>
    %933 = math.exp %932 : vector<8x32xf32>
    %cst_524 = arith.constant 1.000000e+00 : f32
    %934 = vector.broadcast %cst_524 : f32 to vector<8x32xf32>
    %935 = arith.addf %934, %933 : vector<8x32xf32>
    %936 = arith.divf %934, %935 : vector<8x32xf32>
    %937 = arith.addf %918, %852 : vector<8x32xf32>
    %938 = arith.mulf %930, %937 : vector<8x32xf32>
    %939 = arith.addf %924, %938 : vector<8x32xf32>
    %940 = math.tanh %939 : vector<8x32xf32>
    %cst_525 = arith.constant 1.000000e+00 : f32
    %941 = vector.broadcast %cst_525 : f32 to vector<8x32xf32>
    %942 = arith.subf %941, %936 : vector<8x32xf32>
    %943 = arith.mulf %942, %940 : vector<8x32xf32>
    %944 = arith.mulf %936, %914 : vector<8x32xf32>
    %945 = arith.addf %943, %944 : vector<8x32xf32>
    %c16_526 = arith.constant 16 : index
    %c0_527 = arith.constant 0 : index
    %946 = vector.load %arg23[%c16_526, %c0_527] : memref<64x32xf32, #tpu.memory_space<vmem>>, vector<8x32xf32>
    tpu.vector_store %arg23[%c16_526, %c0_527], %945 {strides = array<i32>} : memref<64x32xf32, #tpu.memory_space<vmem>>, vector<8x32xf32>,
    %cst_528 = arith.constant dense<0.000000e+00> : vector<8x32xf32>
    %947 = tpu.matmul %945, %845, %cst_528 {dimension_numbers = #tpu.dot_dimension_numbers<[1], [0], [0], [1], [0, 0, 1, 1], [], []>} : vector<8x32xf32>, vector<32x32xf32>, vector<8x32xf32> -> vector<8x32xf32>
    %cst_529 = arith.constant dense<0.000000e+00> : vector<8x32xf32>
    %948 = tpu.matmul %945, %847, %cst_529 {dimension_numbers = #tpu.dot_dimension_numbers<[1], [0], [0], [1], [0, 0, 1, 1], [], []>} : vector<8x32xf32>, vector<32x32xf32>, vector<8x32xf32> -> vector<8x32xf32>
    %cst_530 = arith.constant dense<0.000000e+00> : vector<8x32xf32>
    %949 = tpu.matmul %945, %849, %cst_530 {dimension_numbers = #tpu.dot_dimension_numbers<[1], [0], [0], [1], [0, 0, 1, 1], [], []>} : vector<8x32xf32>, vector<32x32xf32>, vector<8x32xf32> -> vector<8x32xf32>
    %c0_531 = arith.constant 0 : index
    %c24_532 = arith.constant 24 : index
    %c0_533 = arith.constant 0 : index
    %950 = vector.load %arg24[%c0_531, %c24_532, %c0_533] : memref<3x64x32xf32, #tpu.memory_space<vmem>>, vector<1x8x32xf32>
    %951 = vector.shape_cast %950 : vector<1x8x32xf32> to vector<8x32xf32>
    %c1_534 = arith.constant 1 : index
    %c24_535 = arith.constant 24 : index
    %c0_536 = arith.constant 0 : index
    %952 = vector.load %arg24[%c1_534, %c24_535, %c0_536] : memref<3x64x32xf32, #tpu.memory_space<vmem>>, vector<1x8x32xf32>
    %953 = vector.shape_cast %952 : vector<1x8x32xf32> to vector<8x32xf32>
    %c2_537 = arith.constant 2 : index
    %c24_538 = arith.constant 24 : index
    %c0_539 = arith.constant 0 : index
    %954 = vector.load %arg24[%c2_537, %c24_538, %c0_539] : memref<3x64x32xf32, #tpu.memory_space<vmem>>, vector<1x8x32xf32>
    %955 = vector.shape_cast %954 : vector<1x8x32xf32> to vector<8x32xf32>
    %956 = arith.addf %951, %947 : vector<8x32xf32>
    %957 = arith.negf %956 : vector<8x32xf32>
    %958 = math.exp %957 : vector<8x32xf32>
    %cst_540 = arith.constant 1.000000e+00 : f32
    %959 = vector.broadcast %cst_540 : f32 to vector<8x32xf32>
    %960 = arith.addf %959, %958 : vector<8x32xf32>
    %961 = arith.divf %959, %960 : vector<8x32xf32>
    %962 = arith.addf %953, %948 : vector<8x32xf32>
    %963 = arith.negf %962 : vector<8x32xf32>
    %964 = math.exp %963 : vector<8x32xf32>
    %cst_541 = arith.constant 1.000000e+00 : f32
    %965 = vector.broadcast %cst_541 : f32 to vector<8x32xf32>
    %966 = arith.addf %965, %964 : vector<8x32xf32>
    %967 = arith.divf %965, %966 : vector<8x32xf32>
    %968 = arith.addf %949, %852 : vector<8x32xf32>
    %969 = arith.mulf %961, %968 : vector<8x32xf32>
    %970 = arith.addf %955, %969 : vector<8x32xf32>
    %971 = math.tanh %970 : vector<8x32xf32>
    %cst_542 = arith.constant 1.000000e+00 : f32
    %972 = vector.broadcast %cst_542 : f32 to vector<8x32xf32>
    %973 = arith.subf %972, %967 : vector<8x32xf32>
    %974 = arith.mulf %973, %971 : vector<8x32xf32>
    %975 = arith.mulf %967, %945 : vector<8x32xf32>
    %976 = arith.addf %974, %975 : vector<8x32xf32>
    %c24_543 = arith.constant 24 : index
    %c0_544 = arith.constant 0 : index
    %977 = vector.load %arg23[%c24_543, %c0_544] : memref<64x32xf32, #tpu.memory_space<vmem>>, vector<8x32xf32>
    tpu.vector_store %arg23[%c24_543, %c0_544], %976 {strides = array<i32>} : memref<64x32xf32, #tpu.memory_space<vmem>>, vector<8x32xf32>,
    %cst_545 = arith.constant dense<0.000000e+00> : vector<8x32xf32>
    %978 = tpu.matmul %976, %845, %cst_545 {dimension_numbers = #tpu.dot_dimension_numbers<[1], [0], [0], [1], [0, 0, 1, 1], [], []>} : vector<8x32xf32>, vector<32x32xf32>, vector<8x32xf32> -> vector<8x32xf32>
    %cst_546 = arith.constant dense<0.000000e+00> : vector<8x32xf32>
    %979 = tpu.matmul %976, %847, %cst_546 {dimension_numbers = #tpu.dot_dimension_numbers<[1], [0], [0], [1], [0, 0, 1, 1], [], []>} : vector<8x32xf32>, vector<32x32xf32>, vector<8x32xf32> -> vector<8x32xf32>
    %cst_547 = arith.constant dense<0.000000e+00> : vector<8x32xf32>
    %980 = tpu.matmul %976, %849, %cst_547 {dimension_numbers = #tpu.dot_dimension_numbers<[1], [0], [0], [1], [0, 0, 1, 1], [], []>} : vector<8x32xf32>, vector<32x32xf32>, vector<8x32xf32> -> vector<8x32xf32>
    %c0_548 = arith.constant 0 : index
    %c32_549 = arith.constant 32 : index
    %c0_550 = arith.constant 0 : index
    %981 = vector.load %arg24[%c0_548, %c32_549, %c0_550] : memref<3x64x32xf32, #tpu.memory_space<vmem>>, vector<1x8x32xf32>
    %982 = vector.shape_cast %981 : vector<1x8x32xf32> to vector<8x32xf32>
    %c1_551 = arith.constant 1 : index
    %c32_552 = arith.constant 32 : index
    %c0_553 = arith.constant 0 : index
    %983 = vector.load %arg24[%c1_551, %c32_552, %c0_553] : memref<3x64x32xf32, #tpu.memory_space<vmem>>, vector<1x8x32xf32>
    %984 = vector.shape_cast %983 : vector<1x8x32xf32> to vector<8x32xf32>
    %c2_554 = arith.constant 2 : index
    %c32_555 = arith.constant 32 : index
    %c0_556 = arith.constant 0 : index
    %985 = vector.load %arg24[%c2_554, %c32_555, %c0_556] : memref<3x64x32xf32, #tpu.memory_space<vmem>>, vector<1x8x32xf32>
    %986 = vector.shape_cast %985 : vector<1x8x32xf32> to vector<8x32xf32>
    %987 = arith.addf %982, %978 : vector<8x32xf32>
    %988 = arith.negf %987 : vector<8x32xf32>
    %989 = math.exp %988 : vector<8x32xf32>
    %cst_557 = arith.constant 1.000000e+00 : f32
    %990 = vector.broadcast %cst_557 : f32 to vector<8x32xf32>
    %991 = arith.addf %990, %989 : vector<8x32xf32>
    %992 = arith.divf %990, %991 : vector<8x32xf32>
    %993 = arith.addf %984, %979 : vector<8x32xf32>
    %994 = arith.negf %993 : vector<8x32xf32>
    %995 = math.exp %994 : vector<8x32xf32>
    %cst_558 = arith.constant 1.000000e+00 : f32
    %996 = vector.broadcast %cst_558 : f32 to vector<8x32xf32>
    %997 = arith.addf %996, %995 : vector<8x32xf32>
    %998 = arith.divf %996, %997 : vector<8x32xf32>
    %999 = arith.addf %980, %852 : vector<8x32xf32>
    %1000 = arith.mulf %992, %999 : vector<8x32xf32>
    %1001 = arith.addf %986, %1000 : vector<8x32xf32>
    %1002 = math.tanh %1001 : vector<8x32xf32>
    %cst_559 = arith.constant 1.000000e+00 : f32
    %1003 = vector.broadcast %cst_559 : f32 to vector<8x32xf32>
    %1004 = arith.subf %1003, %998 : vector<8x32xf32>
    %1005 = arith.mulf %1004, %1002 : vector<8x32xf32>
    %1006 = arith.mulf %998, %976 : vector<8x32xf32>
    %1007 = arith.addf %1005, %1006 : vector<8x32xf32>
    %c32_560 = arith.constant 32 : index
    %c0_561 = arith.constant 0 : index
    %1008 = vector.load %arg23[%c32_560, %c0_561] : memref<64x32xf32, #tpu.memory_space<vmem>>, vector<8x32xf32>
    tpu.vector_store %arg23[%c32_560, %c0_561], %1007 {strides = array<i32>} : memref<64x32xf32, #tpu.memory_space<vmem>>, vector<8x32xf32>,
    %cst_562 = arith.constant dense<0.000000e+00> : vector<8x32xf32>
    %1009 = tpu.matmul %1007, %845, %cst_562 {dimension_numbers = #tpu.dot_dimension_numbers<[1], [0], [0], [1], [0, 0, 1, 1], [], []>} : vector<8x32xf32>, vector<32x32xf32>, vector<8x32xf32> -> vector<8x32xf32>
    %cst_563 = arith.constant dense<0.000000e+00> : vector<8x32xf32>
    %1010 = tpu.matmul %1007, %847, %cst_563 {dimension_numbers = #tpu.dot_dimension_numbers<[1], [0], [0], [1], [0, 0, 1, 1], [], []>} : vector<8x32xf32>, vector<32x32xf32>, vector<8x32xf32> -> vector<8x32xf32>
    %cst_564 = arith.constant dense<0.000000e+00> : vector<8x32xf32>
    %1011 = tpu.matmul %1007, %849, %cst_564 {dimension_numbers = #tpu.dot_dimension_numbers<[1], [0], [0], [1], [0, 0, 1, 1], [], []>} : vector<8x32xf32>, vector<32x32xf32>, vector<8x32xf32> -> vector<8x32xf32>
    %c0_565 = arith.constant 0 : index
    %c40_566 = arith.constant 40 : index
    %c0_567 = arith.constant 0 : index
    %1012 = vector.load %arg24[%c0_565, %c40_566, %c0_567] : memref<3x64x32xf32, #tpu.memory_space<vmem>>, vector<1x8x32xf32>
    %1013 = vector.shape_cast %1012 : vector<1x8x32xf32> to vector<8x32xf32>
    %c1_568 = arith.constant 1 : index
    %c40_569 = arith.constant 40 : index
    %c0_570 = arith.constant 0 : index
    %1014 = vector.load %arg24[%c1_568, %c40_569, %c0_570] : memref<3x64x32xf32, #tpu.memory_space<vmem>>, vector<1x8x32xf32>
    %1015 = vector.shape_cast %1014 : vector<1x8x32xf32> to vector<8x32xf32>
    %c2_571 = arith.constant 2 : index
    %c40_572 = arith.constant 40 : index
    %c0_573 = arith.constant 0 : index
    %1016 = vector.load %arg24[%c2_571, %c40_572, %c0_573] : memref<3x64x32xf32, #tpu.memory_space<vmem>>, vector<1x8x32xf32>
    %1017 = vector.shape_cast %1016 : vector<1x8x32xf32> to vector<8x32xf32>
    %1018 = arith.addf %1013, %1009 : vector<8x32xf32>
    %1019 = arith.negf %1018 : vector<8x32xf32>
    %1020 = math.exp %1019 : vector<8x32xf32>
    %cst_574 = arith.constant 1.000000e+00 : f32
    %1021 = vector.broadcast %cst_574 : f32 to vector<8x32xf32>
    %1022 = arith.addf %1021, %1020 : vector<8x32xf32>
    %1023 = arith.divf %1021, %1022 : vector<8x32xf32>
    %1024 = arith.addf %1015, %1010 : vector<8x32xf32>
    %1025 = arith.negf %1024 : vector<8x32xf32>
    %1026 = math.exp %1025 : vector<8x32xf32>
    %cst_575 = arith.constant 1.000000e+00 : f32
    %1027 = vector.broadcast %cst_575 : f32 to vector<8x32xf32>
    %1028 = arith.addf %1027, %1026 : vector<8x32xf32>
    %1029 = arith.divf %1027, %1028 : vector<8x32xf32>
    %1030 = arith.addf %1011, %852 : vector<8x32xf32>
    %1031 = arith.mulf %1023, %1030 : vector<8x32xf32>
    %1032 = arith.addf %1017, %1031 : vector<8x32xf32>
    %1033 = math.tanh %1032 : vector<8x32xf32>
    %cst_576 = arith.constant 1.000000e+00 : f32
    %1034 = vector.broadcast %cst_576 : f32 to vector<8x32xf32>
    %1035 = arith.subf %1034, %1029 : vector<8x32xf32>
    %1036 = arith.mulf %1035, %1033 : vector<8x32xf32>
    %1037 = arith.mulf %1029, %1007 : vector<8x32xf32>
    %1038 = arith.addf %1036, %1037 : vector<8x32xf32>
    %c40_577 = arith.constant 40 : index
    %c0_578 = arith.constant 0 : index
    %1039 = vector.load %arg23[%c40_577, %c0_578] : memref<64x32xf32, #tpu.memory_space<vmem>>, vector<8x32xf32>
    tpu.vector_store %arg23[%c40_577, %c0_578], %1038 {strides = array<i32>} : memref<64x32xf32, #tpu.memory_space<vmem>>, vector<8x32xf32>,
    %cst_579 = arith.constant dense<0.000000e+00> : vector<8x32xf32>
    %1040 = tpu.matmul %1038, %845, %cst_579 {dimension_numbers = #tpu.dot_dimension_numbers<[1], [0], [0], [1], [0, 0, 1, 1], [], []>} : vector<8x32xf32>, vector<32x32xf32>, vector<8x32xf32> -> vector<8x32xf32>
    %cst_580 = arith.constant dense<0.000000e+00> : vector<8x32xf32>
    %1041 = tpu.matmul %1038, %847, %cst_580 {dimension_numbers = #tpu.dot_dimension_numbers<[1], [0], [0], [1], [0, 0, 1, 1], [], []>} : vector<8x32xf32>, vector<32x32xf32>, vector<8x32xf32> -> vector<8x32xf32>
    %cst_581 = arith.constant dense<0.000000e+00> : vector<8x32xf32>
    %1042 = tpu.matmul %1038, %849, %cst_581 {dimension_numbers = #tpu.dot_dimension_numbers<[1], [0], [0], [1], [0, 0, 1, 1], [], []>} : vector<8x32xf32>, vector<32x32xf32>, vector<8x32xf32> -> vector<8x32xf32>
    %c0_582 = arith.constant 0 : index
    %c48_583 = arith.constant 48 : index
    %c0_584 = arith.constant 0 : index
    %1043 = vector.load %arg24[%c0_582, %c48_583, %c0_584] : memref<3x64x32xf32, #tpu.memory_space<vmem>>, vector<1x8x32xf32>
    %1044 = vector.shape_cast %1043 : vector<1x8x32xf32> to vector<8x32xf32>
    %c1_585 = arith.constant 1 : index
    %c48_586 = arith.constant 48 : index
    %c0_587 = arith.constant 0 : index
    %1045 = vector.load %arg24[%c1_585, %c48_586, %c0_587] : memref<3x64x32xf32, #tpu.memory_space<vmem>>, vector<1x8x32xf32>
    %1046 = vector.shape_cast %1045 : vector<1x8x32xf32> to vector<8x32xf32>
    %c2_588 = arith.constant 2 : index
    %c48_589 = arith.constant 48 : index
    %c0_590 = arith.constant 0 : index
    %1047 = vector.load %arg24[%c2_588, %c48_589, %c0_590] : memref<3x64x32xf32, #tpu.memory_space<vmem>>, vector<1x8x32xf32>
    %1048 = vector.shape_cast %1047 : vector<1x8x32xf32> to vector<8x32xf32>
    %1049 = arith.addf %1044, %1040 : vector<8x32xf32>
    %1050 = arith.negf %1049 : vector<8x32xf32>
    %1051 = math.exp %1050 : vector<8x32xf32>
    %cst_591 = arith.constant 1.000000e+00 : f32
    %1052 = vector.broadcast %cst_591 : f32 to vector<8x32xf32>
    %1053 = arith.addf %1052, %1051 : vector<8x32xf32>
    %1054 = arith.divf %1052, %1053 : vector<8x32xf32>
    %1055 = arith.addf %1046, %1041 : vector<8x32xf32>
    %1056 = arith.negf %1055 : vector<8x32xf32>
    %1057 = math.exp %1056 : vector<8x32xf32>
    %cst_592 = arith.constant 1.000000e+00 : f32
    %1058 = vector.broadcast %cst_592 : f32 to vector<8x32xf32>
    %1059 = arith.addf %1058, %1057 : vector<8x32xf32>
    %1060 = arith.divf %1058, %1059 : vector<8x32xf32>
    %1061 = arith.addf %1042, %852 : vector<8x32xf32>
    %1062 = arith.mulf %1054, %1061 : vector<8x32xf32>
    %1063 = arith.addf %1048, %1062 : vector<8x32xf32>
    %1064 = math.tanh %1063 : vector<8x32xf32>
    %cst_593 = arith.constant 1.000000e+00 : f32
    %1065 = vector.broadcast %cst_593 : f32 to vector<8x32xf32>
    %1066 = arith.subf %1065, %1060 : vector<8x32xf32>
    %1067 = arith.mulf %1066, %1064 : vector<8x32xf32>
    %1068 = arith.mulf %1060, %1038 : vector<8x32xf32>
    %1069 = arith.addf %1067, %1068 : vector<8x32xf32>
    %c48_594 = arith.constant 48 : index
    %c0_595 = arith.constant 0 : index
    %1070 = vector.load %arg23[%c48_594, %c0_595] : memref<64x32xf32, #tpu.memory_space<vmem>>, vector<8x32xf32>
    tpu.vector_store %arg23[%c48_594, %c0_595], %1069 {strides = array<i32>} : memref<64x32xf32, #tpu.memory_space<vmem>>, vector<8x32xf32>,
    %cst_596 = arith.constant dense<0.000000e+00> : vector<8x32xf32>
    %1071 = tpu.matmul %1069, %845, %cst_596 {dimension_numbers = #tpu.dot_dimension_numbers<[1], [0], [0], [1], [0, 0, 1, 1], [], []>} : vector<8x32xf32>, vector<32x32xf32>, vector<8x32xf32> -> vector<8x32xf32>
    %cst_597 = arith.constant dense<0.000000e+00> : vector<8x32xf32>
    %1072 = tpu.matmul %1069, %847, %cst_597 {dimension_numbers = #tpu.dot_dimension_numbers<[1], [0], [0], [1], [0, 0, 1, 1], [], []>} : vector<8x32xf32>, vector<32x32xf32>, vector<8x32xf32> -> vector<8x32xf32>
    %cst_598 = arith.constant dense<0.000000e+00> : vector<8x32xf32>
    %1073 = tpu.matmul %1069, %849, %cst_598 {dimension_numbers = #tpu.dot_dimension_numbers<[1], [0], [0], [1], [0, 0, 1, 1], [], []>} : vector<8x32xf32>, vector<32x32xf32>, vector<8x32xf32> -> vector<8x32xf32>
    %c0_599 = arith.constant 0 : index
    %c56_600 = arith.constant 56 : index
    %c0_601 = arith.constant 0 : index
    %1074 = vector.load %arg24[%c0_599, %c56_600, %c0_601] : memref<3x64x32xf32, #tpu.memory_space<vmem>>, vector<1x8x32xf32>
    %1075 = vector.shape_cast %1074 : vector<1x8x32xf32> to vector<8x32xf32>
    %c1_602 = arith.constant 1 : index
    %c56_603 = arith.constant 56 : index
    %c0_604 = arith.constant 0 : index
    %1076 = vector.load %arg24[%c1_602, %c56_603, %c0_604] : memref<3x64x32xf32, #tpu.memory_space<vmem>>, vector<1x8x32xf32>
    %1077 = vector.shape_cast %1076 : vector<1x8x32xf32> to vector<8x32xf32>
    %c2_605 = arith.constant 2 : index
    %c56_606 = arith.constant 56 : index
    %c0_607 = arith.constant 0 : index
    %1078 = vector.load %arg24[%c2_605, %c56_606, %c0_607] : memref<3x64x32xf32, #tpu.memory_space<vmem>>, vector<1x8x32xf32>
    %1079 = vector.shape_cast %1078 : vector<1x8x32xf32> to vector<8x32xf32>
    %1080 = arith.addf %1075, %1071 : vector<8x32xf32>
    %1081 = arith.negf %1080 : vector<8x32xf32>
    %1082 = math.exp %1081 : vector<8x32xf32>
    %cst_608 = arith.constant 1.000000e+00 : f32
    %1083 = vector.broadcast %cst_608 : f32 to vector<8x32xf32>
    %1084 = arith.addf %1083, %1082 : vector<8x32xf32>
    %1085 = arith.divf %1083, %1084 : vector<8x32xf32>
    %1086 = arith.addf %1077, %1072 : vector<8x32xf32>
    %1087 = arith.negf %1086 : vector<8x32xf32>
    %1088 = math.exp %1087 : vector<8x32xf32>
    %cst_609 = arith.constant 1.000000e+00 : f32
    %1089 = vector.broadcast %cst_609 : f32 to vector<8x32xf32>
    %1090 = arith.addf %1089, %1088 : vector<8x32xf32>
    %1091 = arith.divf %1089, %1090 : vector<8x32xf32>
    %1092 = arith.addf %1073, %852 : vector<8x32xf32>
    %1093 = arith.mulf %1085, %1092 : vector<8x32xf32>
    %1094 = arith.addf %1079, %1093 : vector<8x32xf32>
    %1095 = math.tanh %1094 : vector<8x32xf32>
    %cst_610 = arith.constant 1.000000e+00 : f32
    %1096 = vector.broadcast %cst_610 : f32 to vector<8x32xf32>
    %1097 = arith.subf %1096, %1091 : vector<8x32xf32>
    %1098 = arith.mulf %1097, %1095 : vector<8x32xf32>
    %1099 = arith.mulf %1091, %1069 : vector<8x32xf32>
    %1100 = arith.addf %1098, %1099 : vector<8x32xf32>
    %c56_611 = arith.constant 56 : index
    %c0_612 = arith.constant 0 : index
    %1101 = vector.load %arg23[%c56_611, %c0_612] : memref<64x32xf32, #tpu.memory_space<vmem>>, vector<8x32xf32>
    tpu.vector_store %arg23[%c56_611, %c0_612], %1100 {strides = array<i32>} : memref<64x32xf32, #tpu.memory_space<vmem>>, vector<8x32xf32>,
    %c0_613 = arith.constant 0 : index
    %c0_614 = arith.constant 0 : index
    %1102 = vector.load %arg20[%c0_613, %c0_614] : memref<1x32xf32, #tpu.memory_space<vmem>>, vector<1x32xf32>
    %c0_615 = arith.constant 0 : index
    %c0_616 = arith.constant 0 : index
    %1103 = vector.load %arg23[%c0_615, %c0_616] : memref<64x32xf32, #tpu.memory_space<vmem>>, vector<64x32xf32>
    %cst_617 = arith.constant dense<0.000000e+00> : vector<1x64xf32>
    %1104 = tpu.matmul %1102, %1103, %cst_617 {dimension_numbers = #tpu.dot_dimension_numbers<[1], [1], [0], [0], [0, 0, 1, 0], [], []>} : vector<1x32xf32>, vector<64x32xf32>, vector<1x64xf32> -> vector<1x64xf32>
    %c0_618 = arith.constant 0 : index
    %c0_619 = arith.constant 0 : index
    %1105 = vector.load %arg21[%c0_618, %c0_619] : memref<1x1xf32, #tpu.memory_space<vmem>>, vector<1x1xf32>
    %1106 = vector.broadcast %1105 : vector<1x1xf32> to vector<1x64xf32>
    %1107 = arith.addf %1104, %1106 : vector<1x64xf32>
    %c0_620 = arith.constant 0 : index
    %c0_621 = arith.constant 0 : index
    %c0_622 = arith.constant 0 : index
    %1108 = vector.load %arg22[%c0_620, %c0_621, %c0_622] : memref<1x1x64xf32, #tpu.memory_space<vmem>>, vector<1x1x64xf32>
    %1109 = vector.shape_cast %1108 : vector<1x1x64xf32> to vector<1x64xf32>
    %1110 = vector.shape_cast %1107 : vector<1x64xf32> to vector<1x1x64xf32>
    tpu.vector_store %arg22[%c0_620, %c0_621, %c0_622], %1110 {strides = array<i32>} : memref<1x1x64xf32, #tpu.memory_space<vmem>>, vector<1x1x64xf32>,
    return
  }
  func.func @transform_0(%arg0: i32) -> (i32, i32, i32) {
    %c0_i32 = arith.constant 0 : i32
    %c0_i32_0 = arith.constant 0 : i32
    %c0_i32_1 = arith.constant 0 : i32
    return %arg0, %c0_i32, %c0_i32_0 : i32, i32, i32
  }
  func.func @transform_1(%arg0: i32) -> (i32, i32, i32) {
    %c0_i32 = arith.constant 0 : i32
    %c0_i32_0 = arith.constant 0 : i32
    %c0_i32_1 = arith.constant 0 : i32
    %c0_i32_2 = arith.constant 0 : i32
    return %c0_i32, %c0_i32_0, %c0_i32_1 : i32, i32, i32
  }
  func.func @transform_2(%arg0: i32) -> (i32, i32, i32) {
    %c0_i32 = arith.constant 0 : i32
    %c0_i32_0 = arith.constant 0 : i32
    %c0_i32_1 = arith.constant 0 : i32
    %c0_i32_2 = arith.constant 0 : i32
    return %c0_i32, %c0_i32_0, %c0_i32_1 : i32, i32, i32
  }
  func.func @transform_3(%arg0: i32) -> (i32, i32, i32) {
    %c0_i32 = arith.constant 0 : i32
    %c0_i32_0 = arith.constant 0 : i32
    %c0_i32_1 = arith.constant 0 : i32
    %c0_i32_2 = arith.constant 0 : i32
    return %c0_i32, %c0_i32_0, %c0_i32_1 : i32, i32, i32
  }
  func.func @transform_4(%arg0: i32) -> (i32, i32) {
    %c0_i32 = arith.constant 0 : i32
    %c0_i32_0 = arith.constant 0 : i32
    %c0_i32_1 = arith.constant 0 : i32
    return %c0_i32, %c0_i32_0 : i32, i32
  }
  func.func @transform_5(%arg0: i32) -> (i32, i32, i32) {
    %c0_i32 = arith.constant 0 : i32
    %c0_i32_0 = arith.constant 0 : i32
    %c0_i32_1 = arith.constant 0 : i32
    %c0_i32_2 = arith.constant 0 : i32
    return %c0_i32, %c0_i32_0, %c0_i32_1 : i32, i32, i32
  }
  func.func @transform_6(%arg0: i32) -> (i32, i32, i32) {
    %c0_i32 = arith.constant 0 : i32
    %c0_i32_0 = arith.constant 0 : i32
    %c0_i32_1 = arith.constant 0 : i32
    %c0_i32_2 = arith.constant 0 : i32
    return %c0_i32, %c0_i32_0, %c0_i32_1 : i32, i32, i32
  }
  func.func @transform_7(%arg0: i32) -> (i32, i32, i32) {
    %c0_i32 = arith.constant 0 : i32
    %c0_i32_0 = arith.constant 0 : i32
    %c0_i32_1 = arith.constant 0 : i32
    %c0_i32_2 = arith.constant 0 : i32
    return %c0_i32, %c0_i32_0, %c0_i32_1 : i32, i32, i32
  }
  func.func @transform_8(%arg0: i32) -> (i32, i32) {
    %c0_i32 = arith.constant 0 : i32
    %c0_i32_0 = arith.constant 0 : i32
    %c0_i32_1 = arith.constant 0 : i32
    return %c0_i32, %c0_i32_0 : i32, i32
  }
  func.func @transform_9(%arg0: i32) -> (i32, i32) {
    %c0_i32 = arith.constant 0 : i32
    %c0_i32_0 = arith.constant 0 : i32
    %c0_i32_1 = arith.constant 0 : i32
    return %c0_i32, %c0_i32_0 : i32, i32
  }
  func.func @transform_10(%arg0: i32) -> (i32, i32) {
    %c0_i32 = arith.constant 0 : i32
    %c0_i32_0 = arith.constant 0 : i32
    %c0_i32_1 = arith.constant 0 : i32
    return %c0_i32, %c0_i32_0 : i32, i32
  }
  func.func @transform_11(%arg0: i32) -> (i32, i32, i32) {
    %c0_i32 = arith.constant 0 : i32
    %c0_i32_0 = arith.constant 0 : i32
    %c0_i32_1 = arith.constant 0 : i32
    %c0_i32_2 = arith.constant 0 : i32
    return %c0_i32, %c0_i32_0, %c0_i32_1 : i32, i32, i32
  }
  func.func @transform_12(%arg0: i32) -> (i32, i32, i32) {
    %c0_i32 = arith.constant 0 : i32
    %c0_i32_0 = arith.constant 0 : i32
    %c0_i32_1 = arith.constant 0 : i32
    %c0_i32_2 = arith.constant 0 : i32
    return %c0_i32, %c0_i32_0, %c0_i32_1 : i32, i32, i32
  }
  func.func @transform_13(%arg0: i32) -> (i32, i32, i32) {
    %c0_i32 = arith.constant 0 : i32
    %c0_i32_0 = arith.constant 0 : i32
    %c0_i32_1 = arith.constant 0 : i32
    %c0_i32_2 = arith.constant 0 : i32
    return %c0_i32, %c0_i32_0, %c0_i32_1 : i32, i32, i32
  }
  func.func @transform_14(%arg0: i32) -> (i32, i32) {
    %c0_i32 = arith.constant 0 : i32
    %c0_i32_0 = arith.constant 0 : i32
    %c0_i32_1 = arith.constant 0 : i32
    return %c0_i32, %c0_i32_0 : i32, i32
  }
  func.func @transform_15(%arg0: i32) -> (i32, i32, i32) {
    %c0_i32 = arith.constant 0 : i32
    %c0_i32_0 = arith.constant 0 : i32
    %c0_i32_1 = arith.constant 0 : i32
    %c0_i32_2 = arith.constant 0 : i32
    return %c0_i32, %c0_i32_0, %c0_i32_1 : i32, i32, i32
  }
  func.func @transform_16(%arg0: i32) -> (i32, i32, i32) {
    %c0_i32 = arith.constant 0 : i32
    %c0_i32_0 = arith.constant 0 : i32
    %c0_i32_1 = arith.constant 0 : i32
    %c0_i32_2 = arith.constant 0 : i32
    return %c0_i32, %c0_i32_0, %c0_i32_1 : i32, i32, i32
  }
  func.func @transform_17(%arg0: i32) -> (i32, i32, i32) {
    %c0_i32 = arith.constant 0 : i32
    %c0_i32_0 = arith.constant 0 : i32
    %c0_i32_1 = arith.constant 0 : i32
    %c0_i32_2 = arith.constant 0 : i32
    return %c0_i32, %c0_i32_0, %c0_i32_1 : i32, i32, i32
  }
  func.func @transform_18(%arg0: i32) -> (i32, i32) {
    %c0_i32 = arith.constant 0 : i32
    %c0_i32_0 = arith.constant 0 : i32
    %c0_i32_1 = arith.constant 0 : i32
    return %c0_i32, %c0_i32_0 : i32, i32
  }
  func.func @transform_19(%arg0: i32) -> (i32, i32) {
    %c0_i32 = arith.constant 0 : i32
    %c0_i32_0 = arith.constant 0 : i32
    %c0_i32_1 = arith.constant 0 : i32
    return %c0_i32, %c0_i32_0 : i32, i32
  }
  func.func @transform_20(%arg0: i32) -> (i32, i32) {
    %c0_i32 = arith.constant 0 : i32
    %c0_i32_0 = arith.constant 0 : i32
    %c0_i32_1 = arith.constant 0 : i32
    return %c0_i32, %c0_i32_0 : i32, i32
  }
  func.func @transform_21(%arg0: i32) -> (i32, i32, i32) {
    %c0_i32 = arith.constant 0 : i32
    %c0_i32_0 = arith.constant 0 : i32
    %c0_i32_1 = arith.constant 0 : i32
    return %arg0, %c0_i32, %c0_i32_0 : i32, i32, i32
  }
}

</mosaic_0001>

<bundles_post_ra>
// kernel: branchnet_forward.1
= control target key start
LH: loop header
LB: loop body
LE: loop exit
PB: predicated region body
PF: predicated region fallthrough
CT: control target
= control target key end

     0   :  { %s7036_s0 = inlined_call_operand.vmem [shape: f32[1,64,1], index: 0, kind: input, shape index: {}]   ;;  %s7037_s1 = inlined_call_operand.vmem [shape: f32[3,1,32], index: 1, kind: input, shape index: {}]   ;;  %s7038_s2 = inlined_call_operand.vmem [shape: f32[3,32,32], index: 2, kind: input, shape index: {}]   ;;  %s7039_s3 = inlined_call_operand.vmem [shape: f32[3,1,32], index: 3, kind: input, shape index: {}]   ;;  %s7040_s4 = inlined_call_operand.vmem [shape: f32[1,32], index: 4, kind: input, shape index: {}]   ;;  %s7041_s5 = inlined_call_operand.hbm [shape: f32[3,32,32], index: 5, kind: input, shape index: {}]   ;;  %s7042_s6 = inlined_call_operand.hbm [shape: f32[3,32,32], index: 6, kind: input, shape index: {}]   ;;  %s7043_s7 = inlined_call_operand.vmem [shape: f32[3,1,32], index: 7, kind: input, shape index: {}]   ;;  %s7044_s8 = inlined_call_operand.vmem [shape: f32[1,32], index: 8, kind: input, shape index: {}]   ;;  %s7045_s9 = inlined_call_operand.hbm [shape: f32[32,32], index: 9, kind: input, shape index: {}]   ;;  %s7046_s10 = inlined_call_operand.hbm [shape: f32[1,32], index: 10, kind: input, shape index: {}]   ;;  %s7047_s11 = inlined_call_operand.hbm [shape: f32[3,32,32], index: 11, kind: input, shape index: {}]   ;;  %s7048_s12 = inlined_call_operand.hbm [shape: f32[3,32,32], index: 12, kind: input, shape index: {}]   ;;  %s7049_s13 = inlined_call_operand.hbm [shape: f32[3,1,32], index: 13, kind: input, shape index: {}]   ;;  %s7050_s14 = inlined_call_operand.vmem [shape: f32[1,32], index: 14, kind: input, shape index: {}]   ;;  %s7051_s15 = inlined_call_operand.hbm [shape: f32[3,32,32], index: 15, kind: input, shape index: {}]   ;;  %s7052_s16 = inlined_call_operand.hbm [shape: f32[3,32,32], index: 16, kind: input, shape index: {}]   ;;  %s7053_s17 = inlined_call_operand.hbm [shape: f32[3,1,32], index: 17, kind: input, shape index: {}]   ;;  %s7054_s18 = inlined_call_operand.hbm [shape: f32[1,32], index: 18, kind: input, shape index: {}]   ;;  %s7055_s19 = inlined_call_operand.vmem [shape: f32[1,32], index: 19, kind: input, shape index: {}]   ;;  %s7056_s20 = inlined_call_operand.<no memory space> [shape: f32[1,1], index: 20, kind: input, shape index: {}]   ;;  %s7057_s21 = inlined_call_operand.vmem [shape: f32[1,1,64], index: 21, kind: output, shape index: {}]  }
   0x1   :  { %7063 = sst [smem:[#allocation28_spill]] %s7036_s0  ;;  %v26_v0 = vstv %s7056_s20 }
   0x2   :  { %7064 = sst [smem:[#allocation29_spill]] %s7037_s1  ;;  %27 = vst [vmem:[#allocation4] sm:$0x1] %v26_v0 }
   0x3   :  { %7065 = sst [smem:[#allocation30_spill]] %s7038_s2 }
   0x4   :  { %7066 = sst [smem:[#allocation31_spill]] %s7039_s3 }
   0x5   :  { %7067 = sst [smem:[#allocation32_spill]] %s7040_s4 }
   0x6   :  { %7068 = sst [smem:[#allocation33_spill]] %s7041_s5 }
   0x7   :  { %28 = vsyncpa [#allocation6], 0 }
   0x8   :  { %29 = vsyncpa [#allocation8], 0 }
   0x9   :  { %30 = vsyncpa [#allocation11], 0 }
   0xa   :  { %31 = vsyncpa [#allocation14], 0 }
   0xb   :  { %32 = vsyncpa [#allocation17], 0 }
   0xc   :  { %33 = vsyncpa [#allocation20], 0  ;;  %s61_s3 = sshll.u32 %s7042_s6, 4  ;;  %s5560_s28 = smov [#allocation7]   ;;  %s62_s3 = int_to_ptr.hbm [resolvable:$true] %s61_s3 }
   0xd   :  { %s63_s29 = sshll.u32 %s5560_s28, 4  ;;  %s92_s30 = sshll.u32 %s7046_s10, 4  ;;  %s64_s29 = int_to_ptr.vmem [resolvable:$true] %s63_s29  ;;  %s93_s30 = int_to_ptr.hbm [resolvable:$true] %s92_s30 }
   0xe   :  { %s5561_s20 = smov 128   ;;  %s5562_s5 = smov 8  }
   0xf   :  { %69 = dma.hbm_to_vmem [thread:$0]  %s62_s3, 1536, %s64_s29, [#allocation8], %s5561_s20, %s5561_s20, %s5562_s5  }
  0x10   :  { %s5563_s22 = smov [#allocation10]   ;;  %s115_s6 = sshll.u32 %s7048_s12, 4  ;;  %s116_s6 = int_to_ptr.hbm [resolvable:$true] %s115_s6 }
  0x11   :  { %s94_s23 = sshll.u32 %s5563_s22, 4  ;;  %s143_s10 = sshll.u32 %s7051_s15, 4  ;;  %s95_s23 = int_to_ptr.vmem [resolvable:$true] %s94_s23  ;;  %s144_s10 = int_to_ptr.hbm [resolvable:$true] %s143_s10 }
  0x12   :  { %97 = dma.hbm_to_vmem [thread:$0]  %s93_s30, 16, %s95_s23, [#allocation11]  }
  0x13   :  { %s5564_s26 = smov [#allocation13]   ;;  %s5565_s3 = smov [#allocation16]  }
  0x14   :  { %s117_s27 = sshll.u32 %s5564_s26, 4  ;;  %s145_s28 = sshll.u32 %s5565_s3, 4  ;;  %s118_s27 = int_to_ptr.vmem [resolvable:$true] %s117_s27  ;;  %s146_s28 = int_to_ptr.vmem [resolvable:$true] %s145_s28 }
  0x15   :  { %123 = dma.hbm_to_vmem [thread:$0]  %s116_s6, 1536, %s118_s27, [#allocation14], %s5561_s20, %s5561_s20, %s5562_s5  }
  0x16   :  { %151 = dma.hbm_to_vmem [thread:$0]  %s144_s10, 1536, %s146_s28, [#allocation17], %s5561_s20, %s5561_s20, %s5562_s5  }
  0x17   :  { %s169_s0 = sshll.u32 %s7053_s17, 4  ;;  %s5566_s15 = smov [#allocation19]   ;;  %s170_s0 = int_to_ptr.hbm [resolvable:$true] %s169_s0 }
  0x18   :  { %s171_s4 = sshll.u32 %s5566_s15, 4  ;;  %s7069_s23 = sld [smem:[#allocation33_spill]]  ;;  %s172_s4 = int_to_ptr.vmem [resolvable:$true] %s171_s4 }
  0x19   :  { %s5567_s24 = smov 16   ;;  %s5568_s6 = smov 1  }
  0x1a   :  { %177 = dma.hbm_to_vmem [thread:$0]  %s170_s0, 48, %s172_s4, [#allocation20], %s5567_s24, %s5567_s24, %s5568_s6  }
  0x1b   :  { %s5569_s2 = smov [#allocation5]   ;;  %s78_s17 = sshll.u32 %s7045_s9, 4  ;;  %s79_s17 = int_to_ptr.hbm [resolvable:$true] %s78_s17 }
  0x1c   :  { %s50_s25 = sshll.u32 %s5569_s2, 4  ;;  %s102_s28 = sshll.u32 %s7047_s11, 4  ;;  %s51_s25 = int_to_ptr.vmem [resolvable:$true] %s50_s25  ;;  %s103_s28 = int_to_ptr.hbm [resolvable:$true] %s102_s28 }
  0x1d   :  { %s5570_s12 = smov [#allocation9]   ;;  %s5571_s0 = smov [#allocation12]  }
  0x1e   :  { %s48_s1 = sshll.u32 %s7069_s23, 4  ;;  %s80_s29 = sshll.u32 %s5570_s12, 4  ;;  %s49_s1 = int_to_ptr.hbm [resolvable:$true] %s48_s1  ;;  %s81_s29 = int_to_ptr.vmem [resolvable:$true] %s80_s29 }
  0x1f   :  { %56 = dma.hbm_to_vmem [thread:$0]  %s49_s1, 1536, %s51_s25, [#allocation6], %s5561_s20, %s5561_s20, %s5562_s5  }
  0x20   :  { %86 = dma.hbm_to_vmem [thread:$0]  %s79_s17, 512, %s81_s29, [#allocation8], %s5561_s20, %s5561_s20, %s5562_s5  }
  0x21   :  { %s104_s9 = sshll.u32 %s5571_s0, 4  ;;  %s128_s30 = sshll.u32 %s7049_s13, 4  ;;  %s105_s9 = int_to_ptr.vmem [resolvable:$true] %s104_s9  ;;  %s129_s30 = int_to_ptr.hbm [resolvable:$true] %s128_s30 }
  0x22   :  { %110 = dma.hbm_to_vmem [thread:$0]  %s103_s28, 1536, %s105_s9, [#allocation11], %s5561_s20, %s5561_s20, %s5562_s5  }
  0x23   :  { %s156_s23 = sshll.u32 %s7052_s16, 4  ;;  %s5572_s1 = smov [#allocation15]   ;;  %s157_s23 = int_to_ptr.hbm [resolvable:$true] %s156_s23 }
  0x24   :  { %s130_s2 = sshll.u32 %s5572_s1, 4  ;;  %s5573_s25 = smov [#allocation18]   ;;  %s131_s2 = int_to_ptr.vmem [resolvable:$true] %s130_s2 }
  0x25   :  { %136 = dma.hbm_to_vmem [thread:$0]  %s129_s30, 48, %s131_s2, [#allocation14], %s5567_s24, %s5567_s24, %s5568_s6  }
  0x26   :  { %s158_s13 = sshll.u32 %s5573_s25, 4  ;;  %s183_s17 = sshll.u32 %s7054_s18, 4  ;;  %s159_s13 = int_to_ptr.vmem [resolvable:$true] %s158_s13  ;;  %s184_s17 = int_to_ptr.hbm [resolvable:$true] %s183_s17 }
  0x27   :  { %164 = dma.hbm_to_vmem [thread:$0]  %s157_s23, 1536, %s159_s13, [#allocation17], %s5561_s20, %s5561_s20, %s5562_s5  }
  0x28   :  { %s5574_s16 = smov [#allocation21]  }
  0x29   :  { %s185_s27 = sshll.u32 %s5574_s16, 4  ;;  %s186_s27 = int_to_ptr.vmem [resolvable:$true] %s185_s27 }
  0x2a   :  { %188 = dma.hbm_to_vmem [thread:$0]  %s184_s17, 16, %s186_s27, [#allocation20]  }
  0x2b   :  { %5548 = dma.done.wait [#allocation6], 1536  }
  0x2c   :  { %5549 = vsyncadd [#allocation6], 4294965760 }
  0x2d   :  { %5550 = dma.done.wait [#allocation8], 2048  }
  0x2e   :  { %5551 = vsyncadd [#allocation8], 4294965248 }
  0x2f   :  { %5552 = dma.done.wait [#allocation11], 1552  }
  0x30   :  { %5553 = vsyncadd [#allocation11], 4294965744 }
  0x31   :  { %5554 = dma.done.wait [#allocation14], 1584  }
  0x32   :  { %5555 = vsyncadd [#allocation14], 4294965712 }
  0x33   :  { %5556 = dma.done.wait [#allocation17], 3072  }
  0x34   :  { %5557 = vsyncadd [#allocation17], 4294964224 }
  0x35   :  { %5558 = dma.done.wait [#allocation20], 64  }
  0x36   :  { %5559 = vsyncadd [#allocation20], 4294967232  ;;  %v5575_v1 = vmov 0   ;;  %s7070_s5 = sld [smem:[#allocation30_spill]]  ;;  %v5576_v13 = vmov 0.0   ;;  %vm309_vm0 = vcmask 261120  }
  0x37   :  { %4918 = vset.pattern.permute.xlu0 %v5575_v1  ;;  %4919 = vset.pattern.permute.xlu1 %v5575_v1  ;;  %s7071_s3 = sld [smem:[#allocation28_spill]] }
  0x38   :  { %4920 = vset.pattern.permute.xlu2 %v5575_v1  ;;  %s7072_s9 = sld [smem:[#allocation29_spill]] }
  0x39   :  { %s7073_s1 = sld [smem:[#allocation31_spill]] }
  0x3a   :  { %s7074_s16 = sld [smem:[#allocation32_spill]] }
  0x3c   :  { %v5753_v2 = vld [vmem:[%s7070_s5 + $0x18] sm:$0xff]  ;;  %v5761_v4 = vld [vmem:[%s7070_s5 + $0x10] sm:$0xff]  ;;  %v5767_v5 = vld [vmem:[%s7070_s5 + $0x8] sm:$0xff] }
  0x3d   :  { %v237_v3 = vld [vmem:[%s7071_s3] sm:$0xff]  ;;  %421 = vmatpush.msra.mxu1 %v5753_v2  ;;  %535 = vmatpush.msra.mxu3 %v5753_v2  ;;  %v5775_v6 = vld [vmem:[%s7070_s5 + $0x58] sm:$0xff]  ;;  %v5786_v8 = vld [vmem:[%s7070_s5 + $0x50] sm:$0xff] }
  0x3e   :  { %248 = vperm.xlu0 %4918, %v237_v3   ;;  %877 = vmatpush.msra.mxu0 %v5753_v2  ;;  %v5780_v7 = vld [vmem:[%s7070_s5] sm:$0xff]  ;;  %v5793_v9 = vld [vmem:[%s7070_s5 + $0x48] sm:$0xff]  ;;  %v5799_v10 = vld [vmem:[%s7070_s5 + $0x38] sm:$0xff] }
  0x3f   :  { %422 = vmatpush.msra.mxu1 %v5761_v4  ;;  %504 = vmatpush.msra.mxu2 %v5775_v6  ;;  %v238_v11 = vld [vmem:[%s7071_s3 + $0x8] sm:$0xff]  ;;  %v5810_v12 = vld [vmem:[%s7070_s5 + $0x40] sm:$0xff]  ;;  %v5817_v14 = vld [vmem:[%s7070_s5 + $0x30] sm:$0xff] }
  0x40   :  { %536 = vmatpush.msra.mxu3 %v5761_v4  ;;  %878 = vmatpush.msra.mxu0 %v5761_v4  ;;  %v5822_v15 = vld [vmem:[%s7070_s5 + $0x28] sm:$0xff]  ;;  %v5829_v16 = vld [vmem:[%s7070_s5 + $0x20] sm:$0xff]  ;;  %v243_v17 = vld [vmem:[%s7071_s3 + $0x30] sm:$0xff] }
  0x41   :  { %423 = vmatpush.msra.mxu1 %v5767_v5  ;;  %505 = vmatpush.msra.mxu2 %v5786_v8  ;;  %v5869_v18 = vld [vmem:[%s7072_s9] ss:$0 sm:$0xff]  ;;  %v5874_v19 = vld [vmem:[%s7072_s9 + $0x1] ss:$0 sm:$0xff]  ;;  %v5879_v20 = vld [vmem:[%s7072_s9 + $0x2] ss:$0 sm:$0xff] }
  0x42   :  { %537 = vmatpush.msra.mxu3 %v5767_v5  ;;  %879 = vmatpush.msra.mxu0 %v5767_v5  ;;  %v5884_v21 = vld [vmem:[%s7073_s1] ss:$0 sm:$0xff]  ;;  %v5889_v22 = vld [vmem:[%s7073_s1 + $0x1] ss:$0 sm:$0xff]  ;;  %v5894_v23 = vld [vmem:[%s7073_s1 + $0x2] ss:$0 sm:$0xff] }
  0x43   :  { %424 = vmatpush.msra.mxu1 %v5780_v7  ;;  %506 = vmatpush.msra.mxu2 %v5793_v9  ;;  %v5926_v59 = vld [vmem:[%s7074_s16] ss:$0 sm:$0xff] }
  0x44   :  { %425 = vmatmul.f32.vlgmr.msra.gmra.mxu1 %v5576_v13  ;;  %538 = vmatpush.msra.mxu3 %v5780_v7 }
  0x45   :  { %441 = vmatpush.msrb.mxu1 %v5799_v10  ;;  %507 = vmatpush.msra.mxu2 %v5810_v12 }
  0x46   :  { %253 = vperm.xlu0 %4918, %v238_v11   ;;  %508 = vmatmul.f32.vlgmr.msra.gmra.mxu2 %v5576_v13 }
  0x47   :  { %442 = vmatpush.msrb.mxu1 %v5817_v14  ;;  %555 = vmatpush.msrb.mxu2 %v5799_v10 }
  0x48   :  { %669 = vmatpush.msrb.mxu3 %v5799_v10  ;;  %880 = vmatpush.msra.mxu0 %v5780_v7 }
  0x49   :  { %443 = vmatpush.msrb.mxu1 %v5822_v15  ;;  %556 = vmatpush.msrb.mxu2 %v5817_v14 }
  0x4a   :  { %670 = vmatpush.msrb.mxu3 %v5817_v14  ;;  %1011 = vmatpush.msrb.mxu0 %v5799_v10 }
  0x4b   :  { %444 = vmatpush.msrb.mxu1 %v5829_v16  ;;  %557 = vmatpush.msrb.mxu2 %v5822_v15 }
  0x4c   :  { %445 = vmatmul.f32.vlgmr.msrb.gmra.mxu1 %v5576_v13  ;;  %671 = vmatpush.msrb.mxu3 %v5822_v15 }
  0x4d   :  { %618 = vmatpush.msra.mxu1 %v5775_v6  ;;  %558 = vmatpush.msrb.mxu2 %v5829_v16 }
  0x4e   :  { %278 = vperm.xlu0 %4918, %v243_v17   ;;  %672 = vmatpush.msrb.mxu3 %v5829_v16 }
  0x4f   :  { %619 = vmatpush.msra.mxu1 %v5786_v8  ;;  %649 = vmatpush.msra.mxu2 %v5753_v2 }
  0x50   :  { %1012 = vmatpush.msrb.mxu0 %v5817_v14 }
  0x51   :  { %620 = vmatpush.msra.mxu1 %v5793_v9  ;;  %650 = vmatpush.msra.mxu2 %v5761_v4 }
  0x52   :  { %1013 = vmatpush.msrb.mxu0 %v5822_v15 }
  0x53   :  { %621 = vmatpush.msra.mxu1 %v5810_v12  ;;  %651 = vmatpush.msra.mxu2 %v5767_v5 }
  0x54   :  { %1014 = vmatpush.msrb.mxu0 %v5829_v16 }
  0x55   :  { %763 = vmatpush.msrb.mxu1 %v5753_v2  ;;  %652 = vmatpush.msra.mxu2 %v5780_v7 }
  0x57   :  { %764 = vmatpush.msrb.mxu1 %v5761_v4 }
  0x59   :  { %765 = vmatpush.msrb.mxu1 %v5767_v5 }
  0x5b   :  { %766 = vmatpush.msrb.mxu1 %v5780_v7 }
  0xb0   :  { %v249_v24 = vpop.permute.xlu0 %248 }
  0xb1   :  { %v289_v25 = vmul.f32 %v5869_v18, %v249_v24  ;;  %v323_v26 = vmul.f32 %v5874_v19, %v249_v24  ;;  %v358_v27 = vmul.f32 %v5879_v20, %v249_v24 }
  0xb3   :  { %v301_v28 = vadd.f32 %v5884_v21, %v289_v25  ;;  %v336_v29 = vadd.f32 %v5889_v22, %v323_v26  ;;  %v371_v30 = vadd.f32 %v5894_v23, %v358_v27 }
  0xb5   :  { %310 = vst.msk [vmem:[#allocation3] sm:$0xff] %vm309_vm0, %v301_v28 }
  0xb6   :  { %345 = vst.msk [vmem:[#allocation3 + $0x40] sm:$0xff] %vm309_vm0, %v336_v29 }
  0xb7   :  { %380 = vst.msk [vmem:[#allocation3 + $0x80] sm:$0xff] %vm309_vm0, %v371_v30 }
  0xb8   :  { %v254_v31 = vpop.permute.xlu0 %253 }
  0xb9   :  { %v290_v32 = vmul.f32 %v5869_v18, %v254_v31  ;;  %v324_v33 = vmul.f32 %v5874_v19, %v254_v31  ;;  %v359_v34 = vmul.f32 %v5879_v20, %v254_v31 }
  0xbb   :  { %v302_v35 = vadd.f32 %v5884_v21, %v290_v32  ;;  %v337_v36 = vadd.f32 %v5889_v22, %v324_v33  ;;  %v372_v37 = vadd.f32 %v5894_v23, %v359_v34 }
  0xbc   :  { %v449_v39 = vld [vmem:[#allocation3] sm:$0xff] }
  0xbd   :  { %311 = vst.msk [vmem:[#allocation3 + $0x8] sm:$0xff] %vm309_vm0, %v302_v35  ;;  %v450_v50 = vld [vmem:[#allocation3 + $0x40] sm:$0xff] }
  0xbe   :  { %346 = vst.msk [vmem:[#allocation3 + $0x48] sm:$0xff] %vm309_vm0, %v337_v36  ;;  %v451_v30 = vld [vmem:[#allocation3 + $0x80] sm:$0xff] }
  0xbf   :  { %381 = vst.msk [vmem:[#allocation3 + $0x88] sm:$0xff] %vm309_vm0, %v372_v37 }
  0xc0   :  { %v279_v38 = vpop.permute.xlu0 %278 }
  0xc1   :  { %v295_v40 = vmul.f32 %v5869_v18, %v279_v38  ;;  %v329_v41 = vmul.f32 %v5874_v19, %v279_v38  ;;  %v364_v42 = vmul.f32 %v5879_v20, %v279_v38  ;;  %v426_v43 = vpop.f32.mrf.mxu1 }
  0xc2   :  { %v452_v47 = vadd.f32 %v449_v39, %v426_v43  ;;  %v239_v43 = vld [vmem:[%s7071_s3 + $0x10] sm:$0xff] }
  0xc3   :  { %v307_v44 = vadd.f32 %v5884_v21, %v295_v40  ;;  %v342_v45 = vadd.f32 %v5889_v22, %v329_v41  ;;  %v377_v46 = vadd.f32 %v5894_v23, %v364_v42  ;;  %258 = vperm.xlu1 %4919, %v239_v43  }
  0xc4   :  { %v4690_v48 = vmul.f32 -1.442695, %v452_v47 }
  0xc5   :  { %316 = vst.msk [vmem:[#allocation3 + $0x30] sm:$0xff] %vm309_vm0, %v307_v44  ;;  %v564_v47 = vld [vmem:[#allocation3 + $0x48] sm:$0xff] }
  0xc6   :  { %351 = vst.msk [vmem:[#allocation3 + $0x70] sm:$0xff] %vm309_vm0, %v342_v45  ;;  %4941 = vpow2.f32 %v4690_v48  ;;  %v563_v45 = vld [vmem:[#allocation3 + $0x8] sm:$0xff] }
  0xc7   :  { %386 = vst.msk [vmem:[#allocation3 + $0xb0] sm:$0xff] %vm309_vm0, %v377_v46 }
  0xc9   :  { %v446_v49 = vpop.f32.mrf.mxu1  ;;  %v509_v62 = vpop.f32.mrf.mxu2 }
  0xca   :  { %v472_v51 = vadd.f32 %v450_v50, %v446_v49  ;;  %v510_v3 = vadd.f32 %v5926_v59, %v509_v62 }
  0xcc   :  { %v4942_v52 = vpop.eup %4941  ;;  %v4691_v53 = vmul.f32 -1.442695, %v472_v51 }
  0xcd   :  { %v456_v54 = vadd.f32 1.0, %v4942_v52  ;;  %v240_v52 = vld [vmem:[%s7071_s3 + $0x18] sm:$0xff] }
  0xce   :  { %4943 = vpow2.f32 %v4691_v53  ;;  %263 = vperm.xlu1 %4919, %v240_v52  }
  0xcf   :  { %4945 = vrcp.f32 %v456_v54  ;;  %v468_v61 = vand.u32 2147483648, %v456_v54  ;;  %v466_v0 = vand.u32 2147483647, %v456_v54  ;;  %vm462_vm2 = vweird.f32 %v456_v54 }
  0xd1   :  { %v469_v17 = vor.u32 1.1754944e-38, %v468_v61  ;;  %vm467_vm4 = vcmp.eq.f32.partialorder %v466_v0, 8.507059e+37 }
  0xd4   :  { %v4944_v55 = vpop.eup %4943 }
  0xd5   :  { %v4946_v56 = vpop.eup %4945  ;;  %v476_v57 = vadd.f32 1.0, %v4944_v55 }
  0xd6   :  { %v458_v58 = vmul.f32 %v4946_v56, %v456_v54  ;;  %vm463_vm1 = vweird.f32 %v4946_v56 }
  0xd7   :  { %4947 = vrcp.f32 %v476_v57  ;;  %vm464_vm3 = vmor %vm462_vm2, %vm463_vm1  ;;  %v488_v29 = vand.u32 2147483648, %v476_v57  ;;  %v486_v32 = vand.u32 2147483647, %v476_v57  ;;  %vm482_vm6 = vweird.f32 %v476_v57 }
  0xd8   :  { %v459_v60 = vsub.f32 1.0, %v458_v58 }
  0xd9   :  { %v489_v35 = vor.u32 1.1754944e-38, %v488_v29  ;;  %vm487_vm8 = vcmp.eq.f32.partialorder %v486_v32, 8.507059e+37 }
  0xda   :  { %v460_v63 = vmul.f32 %v4946_v56, %v459_v60 }
  0xdc   :  { %v461_v1 = vadd.f32 %v4946_v56, %v460_v63 }
  0xdd   :  { %v4948_v11 = vpop.eup %4947 }
  0xde   :  { %v478_v24 = vmul.f32 %v4948_v11, %v476_v57  ;;  %v465_v25 = vsel %vm464_vm3, %v4946_v56, %v461_v1  ;;  %vm483_vm5 = vweird.f32 %v4948_v11  ;;  %v244_v57 = vld [vmem:[%s7071_s3 + $0x38] sm:$0xff] }
  0xdf   :  { %v470_v26 = vsel %vm467_vm4, %v469_v17, %v465_v25  ;;  %vm484_vm7 = vmor %vm482_vm6, %vm483_vm5  ;;  %283 = vperm.xlu1 %4919, %v244_v57  }
  0xe0   :  { %v479_v27 = vsub.f32 1.0, %v478_v24  ;;  %v512_v28 = vmul.f32 %v510_v3, %v470_v26 }
  0xe2   :  { %v480_v31 = vmul.f32 %v4948_v11, %v479_v27  ;;  %v513_v33 = vadd.f32 %v512_v28, %v451_v30 }
  0xe4   :  { %v481_v34 = vadd.f32 %v4948_v11, %v480_v31  ;;  %4949 = vtanh.f32 %v513_v33 }
  0xe6   :  { %v485_v36 = vsel %vm484_vm7, %v4948_v11, %v481_v34  ;;  %v565_v34 = vld [vmem:[#allocation3 + $0x88] sm:$0xff] }
  0xe7   :  { %v490_v37 = vsel %vm487_vm8, %v489_v35, %v485_v36 }
  0xe8   :  { %v515_v38 = vsub.f32 1.0, %v490_v37  ;;  %v517_v41 = vmul.f32 0.0, %v490_v37 }
  0xea   :  { %v4950_v39 = vpop.eup %4949 }
  0xeb   :  { %v516_v40 = vmul.f32 %v4950_v39, %v515_v38 }
  0xed   :  { %v5929_v42 = vadd.f32 %v517_v41, %v516_v40 }
  0xef   :  { %519 = vst.msk [vmem:[#allocation2] sm:$0xff] %vm309_vm0, %v5929_v42  ;;  %4692 = vmatmul.msk.f32.vlgmr.msra.gmra.mxu3 %vm309_vm0, %v5929_v42  ;;  %4693 = vmatmul.msk.f32.vlgmr.msrb.gmra.mxu2 %vm309_vm0, %v5929_v42 }
  0xf0   :  { %4696 = vmatmul.msk.f32.vlgmr.msra.gmra.mxu1 %vm309_vm0, %v5929_v42  ;;  %732 = vmatpush.msra.mxu3 %v5775_v6 }
  0xf1   :  { %783 = vmatpush.msrb.mxu2 %v5799_v10  ;;  %897 = vmatpush.msra.mxu1 %v5799_v10 }
  0xf2   :  { %733 = vmatpush.msra.mxu3 %v5786_v8 }
  0xf3   :  { %784 = vmatpush.msrb.mxu2 %v5817_v14  ;;  %898 = vmatpush.msra.mxu1 %v5817_v14 }
  0xf4   :  { %734 = vmatpush.msra.mxu3 %v5793_v9 }
  0xf5   :  { %785 = vmatpush.msrb.mxu2 %v5822_v15  ;;  %899 = vmatpush.msra.mxu1 %v5822_v15 }
  0xf6   :  { %735 = vmatpush.msra.mxu3 %v5810_v12 }
  0xf7   :  { %786 = vmatpush.msrb.mxu2 %v5829_v16  ;;  %900 = vmatpush.msra.mxu1 %v5829_v16 }
 0x16d   :  { %v623_v17 = vpop.f32.mrf.mxu1 }
 0x16e   :  { %v624_v27 = vadd.f32 %v5926_v59, %v623_v17 }
 0x172   :  { %v540_v44 = vpop.f32.mrf.mxu3  ;;  %v560_v46 = vpop.f32.mrf.mxu2 }
 0x173   :  { %v566_v48 = vadd.f32 %v563_v45, %v540_v44  ;;  %v586_v49 = vadd.f32 %v564_v47, %v560_v46 }
 0x175   :  { %v4694_v50 = vmul.f32 -1.442695, %v566_v48  ;;  %v4695_v51 = vmul.f32 -1.442695, %v586_v49 }
 0x177   :  { %4951 = vpow2.f32 %v4694_v50 }
 0x178   :  { %4953 = vpow2.f32 %v4695_v51 }
 0x17d   :  { %v4952_v53 = vpop.eup %4951 }
 0x17e   :  { %v4954_v54 = vpop.eup %4953  ;;  %v570_v55 = vadd.f32 1.0, %v4952_v53 }
 0x17f   :  { %v590_v56 = vadd.f32 1.0, %v4954_v54 }
 0x180   :  { %4955 = vrcp.f32 %v570_v55  ;;  %v582_v0 = vand.u32 2147483648, %v570_v55  ;;  %v580_v11 = vand.u32 2147483647, %v570_v55  ;;  %vm576_vm10 = vweird.f32 %v570_v55 }
 0x181   :  { %4957 = vrcp.f32 %v590_v56  ;;  %v602_v32 = vand.u32 2147483648, %v590_v56  ;;  %vm596_vm14 = vweird.f32 %v590_v56  ;;  %v600_v33 = vand.u32 2147483647, %v590_v56 }
 0x182   :  { %v583_v26 = vor.u32 1.1754944e-38, %v582_v0  ;;  %vm581_vm12 = vcmp.eq.f32.partialorder %v580_v11, 8.507059e+37 }
 0x183   :  { %v603_v37 = vor.u32 1.1754944e-38, %v602_v32  ;;  %vm601_vm1 = vcmp.eq.f32.partialorder %v600_v33, 8.507059e+37 }
 0x186   :  { %v4956_v58 = vpop.eup %4955 }
 0x187   :  { %v4958_v60 = vpop.eup %4957  ;;  %v572_v61 = vmul.f32 %v4956_v58, %v570_v55  ;;  %vm577_vm9 = vweird.f32 %v4956_v58 }
 0x188   :  { %v592_v62 = vmul.f32 %v4958_v60, %v590_v56  ;;  %vm578_vm11 = vmor %vm576_vm10, %vm577_vm9  ;;  %vm597_vm13 = vweird.f32 %v4958_v60 }
 0x189   :  { %v573_v63 = vsub.f32 1.0, %v572_v61  ;;  %vm598_vm15 = vmor %vm596_vm14, %vm597_vm13 }
 0x18a   :  { %v593_v1 = vsub.f32 1.0, %v592_v62 }
 0x18b   :  { %v574_v3 = vmul.f32 %v4956_v58, %v573_v63 }
 0x18c   :  { %v594_v24 = vmul.f32 %v4958_v60, %v593_v1 }
 0x18d   :  { %v575_v25 = vadd.f32 %v4956_v58, %v574_v3 }
 0x18e   :  { %v595_v30 = vadd.f32 %v4958_v60, %v594_v24 }
 0x18f   :  { %v579_v28 = vsel %vm578_vm11, %v4956_v58, %v575_v25 }
 0x190   :  { %v584_v29 = vsel %vm581_vm12, %v583_v26, %v579_v28  ;;  %v599_v36 = vsel %vm598_vm15, %v4958_v60, %v595_v30 }
 0x191   :  { %v626_v31 = vmul.f32 %v624_v27, %v584_v29  ;;  %v604_v38 = vsel %vm601_vm1, %v603_v37, %v599_v36 }
 0x192   :  { %v629_v39 = vsub.f32 1.0, %v604_v38  ;;  %v631_v43 = vmul.f32 %v604_v38, %v5929_v42  ;;  %v259_v42 = vpop.permute.xlu1 %258 }
 0x193   :  { %v627_v35 = vadd.f32 %v626_v31, %v565_v34  ;;  %v291_v45 = vmul.f32 %v5869_v18, %v259_v42  ;;  %v325_v46 = vmul.f32 %v5874_v19, %v259_v42  ;;  %v360_v47 = vmul.f32 %v5879_v20, %v259_v42 }
 0x195   :  { %4959 = vtanh.f32 %v627_v35  ;;  %v303_v48 = vadd.f32 %v5884_v21, %v291_v45  ;;  %v338_v49 = vadd.f32 %v5889_v22, %v325_v46  ;;  %v373_v50 = vadd.f32 %v5894_v23, %v360_v47 }
 0x197   :  { %312 = vst.msk [vmem:[#allocation3 + $0x10] sm:$0xff] %vm309_vm0, %v303_v48 }
 0x198   :  { %347 = vst.msk [vmem:[#allocation3 + $0x50] sm:$0xff] %vm309_vm0, %v338_v49 }
 0x199   :  { %382 = vst.msk [vmem:[#allocation3 + $0x90] sm:$0xff] %vm309_vm0, %v373_v50 }
 0x19a   :  { %v264_v51 = vpop.permute.xlu1 %263 }
 0x19b   :  { %v4960_v40 = vpop.eup %4959  ;;  %v292_v52 = vmul.f32 %v5869_v18, %v264_v51  ;;  %v326_v53 = vmul.f32 %v5874_v19, %v264_v51  ;;  %v361_v54 = vmul.f32 %v5879_v20, %v264_v51 }
 0x19c   :  { %v630_v41 = vmul.f32 %v4960_v40, %v629_v39 }
 0x19d   :  { %v304_v55 = vadd.f32 %v5884_v21, %v292_v52  ;;  %v339_v56 = vadd.f32 %v5889_v22, %v326_v53  ;;  %v374_v57 = vadd.f32 %v5894_v23, %v361_v54 }
 0x19e   :  { %v5962_v44 = vadd.f32 %v631_v43, %v630_v41  ;;  %v677_v3 = vld [vmem:[#allocation3 + $0x10] sm:$0xff] }
 0x19f   :  { %313 = vst.msk [vmem:[#allocation3 + $0x18] sm:$0xff] %vm309_vm0, %v304_v55  ;;  %v678_v11 = vld [vmem:[#allocation3 + $0x50] sm:$0xff] }
 0x1a0   :  { %633 = vst.msk [vmem:[#allocation2 + $0x8] sm:$0xff] %vm309_vm0, %v5962_v44  ;;  %4697 = vmatmul.msk.f32.vlgmr.msra.gmra.mxu2 %vm309_vm0, %v5962_v44  ;;  %4698 = vmatmul.msk.f32.vlgmr.msrb.gmra.mxu3 %vm309_vm0, %v5962_v44  ;;  %v679_v54 = vld [vmem:[#allocation3 + $0x90] sm:$0xff] }
 0x1a1   :  { %846 = vmatpush.msrb.mxu3 %v5775_v6  ;;  %960 = vmatpush.msra.mxu2 %v5775_v6  ;;  %348 = vst.msk [vmem:[#allocation3 + $0x58] sm:$0xff] %vm309_vm0, %v339_v56 }
 0x1a2   :  { %383 = vst.msk [vmem:[#allocation3 + $0x98] sm:$0xff] %vm309_vm0, %v374_v57  ;;  %v284_v58 = vpop.permute.xlu1 %283 }
 0x1a3   :  { %847 = vmatpush.msrb.mxu3 %v5786_v8  ;;  %961 = vmatpush.msra.mxu2 %v5786_v8  ;;  %v296_v60 = vmul.f32 %v5869_v18, %v284_v58  ;;  %v330_v61 = vmul.f32 %v5874_v19, %v284_v58  ;;  %v365_v62 = vmul.f32 %v5879_v20, %v284_v58 }
 0x1a5   :  { %848 = vmatpush.msrb.mxu3 %v5793_v9  ;;  %962 = vmatpush.msra.mxu2 %v5793_v9  ;;  %v308_v63 = vadd.f32 %v5884_v21, %v296_v60  ;;  %v343_v0 = vadd.f32 %v5889_v22, %v330_v61  ;;  %v378_v1 = vadd.f32 %v5894_v23, %v365_v62 }
 0x1a7   :  { %849 = vmatpush.msrb.mxu3 %v5810_v12  ;;  %963 = vmatpush.msra.mxu2 %v5810_v12  ;;  %317 = vst.msk [vmem:[#allocation3 + $0x38] sm:$0xff] %vm309_vm0, %v308_v63 }
 0x1a8   :  { %4701 = vmatmul.msk.f32.vlgmr.msra.gmra.mxu3 %vm309_vm0, %v5962_v44  ;;  %352 = vst.msk [vmem:[#allocation3 + $0x78] sm:$0xff] %vm309_vm0, %v343_v0 }
 0x1a9   :  { %991 = vmatpush.msra.mxu3 %v5753_v2  ;;  %387 = vst.msk [vmem:[#allocation3 + $0xb8] sm:$0xff] %vm309_vm0, %v378_v1  ;;  %v791_v1 = vld [vmem:[#allocation3 + $0x18] sm:$0xff] }
 0x1ab   :  { %992 = vmatpush.msra.mxu3 %v5761_v4 }
 0x1ad   :  { %993 = vmatpush.msra.mxu3 %v5767_v5 }
 0x1af   :  { %994 = vmatpush.msra.mxu3 %v5780_v7 }
 0x223   :  { %v654_v17 = vpop.f32.mrf.mxu2  ;;  %v674_v24 = vpop.f32.mrf.mxu3 }
 0x224   :  { %v680_v25 = vadd.f32 %v677_v3, %v654_v17  ;;  %v700_v26 = vadd.f32 %v678_v11, %v674_v24  ;;  %v792_v24 = vld [vmem:[#allocation3 + $0x58] sm:$0xff] }
 0x226   :  { %v4699_v27 = vmul.f32 -1.442695, %v680_v25  ;;  %v4700_v28 = vmul.f32 -1.442695, %v700_v26 }
 0x228   :  { %4961 = vpow2.f32 %v4699_v27 }
 0x229   :  { %4963 = vpow2.f32 %v4700_v28 }
 0x22b   :  { %v737_v42 = vpop.f32.mrf.mxu3 }
 0x22c   :  { %v738_v48 = vadd.f32 %v5926_v59, %v737_v42 }
 0x22e   :  { %v4962_v29 = vpop.eup %4961 }
 0x22f   :  { %v4964_v30 = vpop.eup %4963  ;;  %v684_v31 = vadd.f32 1.0, %v4962_v29  ;;  %v241_v29 = vld [vmem:[%s7071_s3 + $0x20] sm:$0xff] }
 0x230   :  { %v704_v32 = vadd.f32 1.0, %v4964_v30  ;;  %268 = vperm.xlu2 %4920, %v241_v29  }
 0x231   :  { %4965 = vrcp.f32 %v684_v31  ;;  %v696_v39 = vand.u32 2147483648, %v684_v31  ;;  %v694_v41 = vand.u32 2147483647, %v684_v31  ;;  %vm690_vm3 = vweird.f32 %v684_v31 }
 0x232   :  { %4967 = vrcp.f32 %v704_v32  ;;  %v716_v51 = vand.u32 2147483648, %v704_v32  ;;  %vm710_vm7 = vweird.f32 %v704_v32  ;;  %v714_v53 = vand.u32 2147483647, %v704_v32 }
 0x233   :  { %v697_v46 = vor.u32 1.1754944e-38, %v696_v39  ;;  %vm695_vm5 = vcmp.eq.f32.partialorder %v694_v41, 8.507059e+37 }
 0x234   :  { %v717_v57 = vor.u32 1.1754944e-38, %v716_v51  ;;  %vm715_vm9 = vcmp.eq.f32.partialorder %v714_v53, 8.507059e+37 }
 0x237   :  { %v4966_v33 = vpop.eup %4965 }
 0x238   :  { %v4968_v34 = vpop.eup %4967  ;;  %v686_v35 = vmul.f32 %v4966_v33, %v684_v31  ;;  %vm691_vm2 = vweird.f32 %v4966_v33 }
 0x239   :  { %v706_v36 = vmul.f32 %v4968_v34, %v704_v32  ;;  %vm692_vm4 = vmor %vm690_vm3, %vm691_vm2  ;;  %vm711_vm6 = vweird.f32 %v4968_v34 }
 0x23a   :  { %v687_v37 = vsub.f32 1.0, %v686_v35  ;;  %vm712_vm8 = vmor %vm710_vm7, %vm711_vm6 }
 0x23b   :  { %v707_v38 = vsub.f32 1.0, %v706_v36 }
 0x23c   :  { %v688_v40 = vmul.f32 %v4966_v33, %v687_v37 }
 0x23d   :  { %v708_v43 = vmul.f32 %v4968_v34, %v707_v38 }
 0x23e   :  { %v689_v45 = vadd.f32 %v4966_v33, %v688_v40 }
 0x23f   :  { %v709_v49 = vadd.f32 %v4968_v34, %v708_v43 }
 0x240   :  { %v693_v47 = vsel %vm692_vm4, %v4966_v33, %v689_v45 }
 0x241   :  { %v698_v50 = vsel %vm695_vm5, %v697_v46, %v693_v47  ;;  %v713_v56 = vsel %vm712_vm8, %v4968_v34, %v709_v49  ;;  %v242_v34 = vld [vmem:[%s7071_s3 + $0x28] sm:$0xff] }
 0x242   :  { %v740_v52 = vmul.f32 %v738_v48, %v698_v50  ;;  %v718_v58 = vsel %vm715_vm9, %v717_v57, %v713_v56  ;;  %273 = vperm.xlu2 %4920, %v242_v34   ;;  %v4612_v48 = vld [vmem:[#allocation4] sm:$0x1] }
 0x243   :  { %v743_v60 = vsub.f32 1.0, %v718_v58  ;;  %v745_v63 = vmul.f32 %v718_v58, %v5962_v44 }
 0x244   :  { %v741_v55 = vadd.f32 %v740_v52, %v679_v54  ;;  %v793_v54 = vld [vmem:[#allocation3 + $0x98] sm:$0xff] }
 0x246   :  { %4969 = vtanh.f32 %v741_v55 }
 0x24a   :  { %4615 = vperm.xlu2 %4920, %v4612_v48  }
 0x24c   :  { %v4970_v61 = vpop.eup %4969 }
 0x24d   :  { %v744_v62 = vmul.f32 %v4970_v61, %v743_v60 }
 0x24f   :  { %v6013_v0 = vadd.f32 %v745_v63, %v744_v62 }
 0x251   :  { %747 = vst.msk [vmem:[#allocation2 + $0x10] sm:$0xff] %vm309_vm0, %v6013_v0  ;;  %4702 = vmatmul.msk.f32.vlgmr.msrb.gmra.mxu1 %vm309_vm0, %v6013_v0  ;;  %4703 = vmatmul.msk.f32.vlgmr.msrb.gmra.mxu2 %vm309_vm0, %v6013_v0 }
 0x252   :  { %4706 = vmatmul.msk.f32.vlgmr.msrb.gmra.mxu3 %vm309_vm0, %v6013_v0  ;;  %1074 = vmatpush.msrb.mxu1 %v5775_v6 }
 0x253   :  { %1105 = vmatpush.msrb.mxu2 %v5753_v2  ;;  %1125 = vmatpush.msrb.mxu3 %v5799_v10 }
 0x254   :  { %1075 = vmatpush.msrb.mxu1 %v5786_v8 }
 0x255   :  { %1106 = vmatpush.msrb.mxu2 %v5761_v4  ;;  %1126 = vmatpush.msrb.mxu3 %v5817_v14 }
 0x256   :  { %1076 = vmatpush.msrb.mxu1 %v5793_v9 }
 0x257   :  { %1107 = vmatpush.msrb.mxu2 %v5767_v5  ;;  %1127 = vmatpush.msrb.mxu3 %v5822_v15 }
 0x258   :  { %1077 = vmatpush.msrb.mxu1 %v5810_v12 }
 0x259   :  { %1108 = vmatpush.msrb.mxu2 %v5780_v7  ;;  %1128 = vmatpush.msrb.mxu3 %v5829_v16 }
 0x2ce   :  { %v768_v44 = vpop.f32.mrf.mxu1 }
 0x2cf   :  { %v794_v3 = vadd.f32 %v791_v1, %v768_v44 }
 0x2d1   :  { %v4704_v11 = vmul.f32 -1.442695, %v794_v3 }
 0x2d3   :  { %4971 = vpow2.f32 %v4704_v11 }
 0x2d4   :  { %v788_v17 = vpop.f32.mrf.mxu2 }
 0x2d5   :  { %v814_v25 = vadd.f32 %v792_v24, %v788_v17  ;;  %v851_v40 = vpop.f32.mrf.mxu3 }
 0x2d6   :  { %v852_v47 = vadd.f32 %v5926_v59, %v851_v40 }
 0x2d7   :  { %v4705_v26 = vmul.f32 -1.442695, %v814_v25 }
 0x2d9   :  { %v4972_v27 = vpop.eup %4971  ;;  %4973 = vpow2.f32 %v4705_v26 }
 0x2da   :  { %v798_v28 = vadd.f32 1.0, %v4972_v27 }
 0x2dc   :  { %4975 = vrcp.f32 %v798_v28  ;;  %v810_v36 = vand.u32 2147483648, %v798_v28  ;;  %v808_v38 = vand.u32 2147483647, %v798_v28  ;;  %vm804_vm11 = vweird.f32 %v798_v28 }
 0x2de   :  { %v811_v42 = vor.u32 1.1754944e-38, %v810_v36  ;;  %vm809_vm13 = vcmp.eq.f32.partialorder %v808_v38, 8.507059e+37 }
 0x2df   :  { %v4974_v30 = vpop.eup %4973 }
 0x2e0   :  { %v818_v31 = vadd.f32 1.0, %v4974_v30 }
 0x2e2   :  { %v4976_v32 = vpop.eup %4975  ;;  %4977 = vrcp.f32 %v818_v31  ;;  %v830_v51 = vand.u32 2147483648, %v818_v31  ;;  %v828_v53 = vand.u32 2147483647, %v818_v31  ;;  %vm824_vm15 = vweird.f32 %v818_v31 }
 0x2e3   :  { %v800_v33 = vmul.f32 %v4976_v32, %v798_v28  ;;  %vm805_vm10 = vweird.f32 %v4976_v32 }
 0x2e4   :  { %vm806_vm12 = vmor %vm804_vm11, %vm805_vm10  ;;  %v831_v57 = vor.u32 1.1754944e-38, %v830_v51  ;;  %vm829_vm2 = vcmp.eq.f32.partialorder %v828_v53, 8.507059e+37 }
 0x2e5   :  { %v801_v35 = vsub.f32 1.0, %v800_v33 }
 0x2e7   :  { %v802_v37 = vmul.f32 %v4976_v32, %v801_v35 }
 0x2e8   :  { %v4978_v39 = vpop.eup %4977 }
 0x2e9   :  { %v820_v41 = vmul.f32 %v4978_v39, %v818_v31  ;;  %v803_v43 = vadd.f32 %v4976_v32, %v802_v37  ;;  %vm825_vm14 = vweird.f32 %v4978_v39 }
 0x2ea   :  { %vm826_vm1 = vmor %vm824_vm15, %vm825_vm14 }
 0x2eb   :  { %v821_v45 = vsub.f32 1.0, %v820_v41  ;;  %v807_v46 = vsel %vm806_vm12, %v4976_v32, %v803_v43 }
 0x2ec   :  { %v812_v49 = vsel %vm809_vm13, %v811_v42, %v807_v46 }
 0x2ed   :  { %v822_v50 = vmul.f32 %v4978_v39, %v821_v45  ;;  %v854_v52 = vmul.f32 %v852_v47, %v812_v49 }
 0x2ef   :  { %v823_v55 = vadd.f32 %v4978_v39, %v822_v50  ;;  %v855_v56 = vadd.f32 %v854_v52, %v793_v54 }
 0x2f1   :  { %v827_v58 = vsel %vm826_vm1, %v4978_v39, %v823_v55  ;;  %4979 = vtanh.f32 %v855_v56 }
 0x2f2   :  { %v832_v60 = vsel %vm829_vm2, %v831_v57, %v827_v58 }
 0x2f3   :  { %v857_v61 = vsub.f32 1.0, %v832_v60  ;;  %v859_v44 = vmul.f32 %v832_v60, %v6013_v0 }
 0x2f7   :  { %v4980_v62 = vpop.eup %4979 }
 0x2f8   :  { %v858_v63 = vmul.f32 %v4980_v62, %v857_v61  ;;  %v5261_v61 = vld [vmem:[%s7070_s5 + $0x58] sm:$0xff]  ;;  %v5262_v62 = vld [vmem:[%s7070_s5 + $0x50] sm:$0xff] }
 0x2fa   :  { %v6043_v1 = vadd.f32 %v859_v44, %v858_v63  ;;  %v5263_v63 = vld [vmem:[%s7070_s5 + $0x48] sm:$0xff] }
 0x2fc   :  { %861 = vst.msk [vmem:[#allocation2 + $0x18] sm:$0xff] %vm309_vm0, %v6043_v1  ;;  %4707 = vmatmul.msk.f32.vlgmr.msra.gmra.mxu0 %vm309_vm0, %v6043_v1  ;;  %4708 = vmatmul.msk.f32.vlgmr.msra.gmra.mxu1 %vm309_vm0, %v6043_v1 }
 0x2fd   :  { %4711 = vmatmul.msk.f32.vlgmr.msra.gmra.mxu2 %vm309_vm0, %v6043_v1  ;;  %1188 = vmatpush.msra.mxu0 %v5775_v6 }
 0x2fe   :  { %1219 = vmatpush.msra.mxu1 %v5753_v2  ;;  %1239 = vmatpush.msra.mxu2 %v5799_v10  ;;  %v269_v2 = vpop.permute.xlu2 %268 }
 0x2ff   :  { %1189 = vmatpush.msra.mxu0 %v5786_v8  ;;  %v293_v6 = vmul.f32 %v5869_v18, %v269_v2  ;;  %v327_v8 = vmul.f32 %v5874_v19, %v269_v2 }
 0x300   :  { %1220 = vmatpush.msra.mxu1 %v5761_v4  ;;  %1240 = vmatpush.msra.mxu2 %v5817_v14  ;;  %v362_v4 = vmul.f32 %v5879_v20, %v269_v2 }
 0x301   :  { %1190 = vmatpush.msra.mxu0 %v5793_v9  ;;  %v305_v10 = vadd.f32 %v5884_v21, %v293_v6  ;;  %v340_v9 = vadd.f32 %v5889_v22, %v327_v8 }
 0x302   :  { %1221 = vmatpush.msra.mxu1 %v5767_v5  ;;  %1241 = vmatpush.msra.mxu2 %v5822_v15  ;;  %v375_v5 = vadd.f32 %v5894_v23, %v362_v4 }
 0x303   :  { %1191 = vmatpush.msra.mxu0 %v5810_v12  ;;  %314 = vst.msk [vmem:[#allocation3 + $0x20] sm:$0xff] %vm309_vm0, %v305_v10 }
 0x304   :  { %1222 = vmatpush.msra.mxu1 %v5780_v7  ;;  %1242 = vmatpush.msra.mxu2 %v5829_v16  ;;  %349 = vst.msk [vmem:[#allocation3 + $0x60] sm:$0xff] %vm309_vm0, %v340_v9 }
 0x305   :  { %384 = vst.msk [vmem:[#allocation3 + $0xa0] sm:$0xff] %vm309_vm0, %v375_v5 }
 0x306   :  { %v274_v7 = vpop.permute.xlu2 %273 }
 0x307   :  { %v294_v14 = vmul.f32 %v5869_v18, %v274_v7  ;;  %v328_v15 = vmul.f32 %v5874_v19, %v274_v7  ;;  %v363_v16 = vmul.f32 %v5879_v20, %v274_v7 }
 0x309   :  { %v306_v0 = vadd.f32 %v5884_v21, %v294_v14  ;;  %v341_v3 = vadd.f32 %v5889_v22, %v328_v15  ;;  %v376_v11 = vadd.f32 %v5894_v23, %v363_v16 }
 0x30a   :  { %v905_v17 = vld [vmem:[#allocation3 + $0x20] sm:$0xff] }
 0x30b   :  { %315 = vst.msk [vmem:[#allocation3 + $0x28] sm:$0xff] %vm309_vm0, %v306_v0  ;;  %v906_v24 = vld [vmem:[#allocation3 + $0x60] sm:$0xff] }
 0x30c   :  { %350 = vst.msk [vmem:[#allocation3 + $0x68] sm:$0xff] %vm309_vm0, %v341_v3  ;;  %v907_v50 = vld [vmem:[#allocation3 + $0xa0] sm:$0xff]  ;;  %v1328_v3 = vld [vmem:[#allocation5 + $0x10] sm:$0xff] }
 0x30d   :  { %385 = vst.msk [vmem:[#allocation3 + $0xa8] sm:$0xff] %vm309_vm0, %v376_v11  ;;  %v1329_v0 = vld [vmem:[#allocation5 + $0x18] sm:$0xff] }
 0x312   :  { %v1019_v4 = vld [vmem:[#allocation3 + $0x28] sm:$0xff] }
 0x379   :  { %v882_v25 = vpop.f32.mrf.mxu0  ;;  %v902_v18 = vpop.f32.mrf.mxu1 }
 0x37a   :  { %v908_v26 = vadd.f32 %v905_v17, %v882_v25  ;;  %v928_v19 = vadd.f32 %v906_v24, %v902_v18  ;;  %v1326_v17 = vld [vmem:[#allocation5] sm:$0xff] }
 0x37c   :  { %v4709_v27 = vmul.f32 -1.442695, %v908_v26  ;;  %v4710_v20 = vmul.f32 -1.442695, %v928_v19 }
 0x37e   :  { %4981 = vpow2.f32 %v4709_v27 }
 0x37f   :  { %4983 = vpow2.f32 %v4710_v20 }
 0x380   :  { %v965_v39 = vpop.f32.mrf.mxu2 }
 0x381   :  { %v966_v42 = vadd.f32 %v5926_v59, %v965_v39 }
 0x384   :  { %v4982_v21 = vpop.eup %4981 }
 0x385   :  { %v4984_v22 = vpop.eup %4983  ;;  %v912_v28 = vadd.f32 1.0, %v4982_v21 }
 0x386   :  { %v932_v23 = vadd.f32 1.0, %v4984_v22 }
 0x387   :  { %4985 = vrcp.f32 %v912_v28  ;;  %v924_v35 = vand.u32 2147483648, %v912_v28  ;;  %v922_v37 = vand.u32 2147483647, %v912_v28  ;;  %vm918_vm4 = vweird.f32 %v912_v28 }
 0x388   :  { %4987 = vrcp.f32 %v932_v23  ;;  %v944_v47 = vand.u32 2147483648, %v932_v23  ;;  %vm938_vm8 = vweird.f32 %v932_v23  ;;  %v942_v49 = vand.u32 2147483647, %v932_v23 }
 0x389   :  { %v925_v41 = vor.u32 1.1754944e-38, %v924_v35  ;;  %vm923_vm6 = vcmp.eq.f32.partialorder %v922_v37, 8.507059e+37 }
 0x38a   :  { %v945_v53 = vor.u32 1.1754944e-38, %v944_v47  ;;  %vm943_vm10 = vcmp.eq.f32.partialorder %v942_v49, 8.507059e+37  ;;  %v6121_v47 = vld [vmem:[#allocation2 + $0x8] sm:$0xff]  ;;  %v6129_v49 = vld [vmem:[#allocation2 + $0x18] sm:$0xff] }
 0x38d   :  { %v4986_v29 = vpop.eup %4985 }
 0x38e   :  { %v4988_v30 = vpop.eup %4987  ;;  %v914_v31 = vmul.f32 %v4986_v29, %v912_v28  ;;  %vm919_vm3 = vweird.f32 %v4986_v29 }
 0x38f   :  { %v934_v32 = vmul.f32 %v4988_v30, %v932_v23  ;;  %vm920_vm5 = vmor %vm918_vm4, %vm919_vm3  ;;  %vm939_vm7 = vweird.f32 %v4988_v30 }
 0x390   :  { %v915_v33 = vsub.f32 1.0, %v914_v31  ;;  %vm940_vm9 = vmor %vm938_vm8, %vm939_vm7 }
 0x391   :  { %v935_v34 = vsub.f32 1.0, %v934_v32 }
 0x392   :  { %v916_v36 = vmul.f32 %v4986_v29, %v915_v33 }
 0x393   :  { %v936_v38 = vmul.f32 %v4988_v30, %v935_v34 }
 0x394   :  { %v917_v40 = vadd.f32 %v4986_v29, %v916_v36  ;;  %v1021_v36 = vld [vmem:[#allocation3 + $0xa8] sm:$0xff] }
 0x395   :  { %v937_v45 = vadd.f32 %v4988_v30, %v936_v38 }
 0x396   :  { %v921_v43 = vsel %vm920_vm5, %v4986_v29, %v917_v40 }
 0x397   :  { %v926_v46 = vsel %vm923_vm6, %v925_v41, %v921_v43  ;;  %v941_v52 = vsel %vm940_vm9, %v4988_v30, %v937_v45 }
 0x398   :  { %v968_v48 = vmul.f32 %v966_v42, %v926_v46  ;;  %v946_v54 = vsel %vm943_vm10, %v945_v53, %v941_v52  ;;  %v6117_v46 = vld [vmem:[#allocation2] sm:$0xff] }
 0x399   :  { %v971_v55 = vsub.f32 1.0, %v946_v54  ;;  %v973_v58 = vmul.f32 %v946_v54, %v6043_v1  ;;  %v1020_v1 = vld [vmem:[#allocation3 + $0x68] sm:$0xff]  ;;  %v1133_v54 = vld [vmem:[#allocation3 + $0x30] sm:$0xff] }
 0x39a   :  { %v969_v51 = vadd.f32 %v968_v48, %v907_v50  ;;  %v6125_v48 = vld [vmem:[#allocation2 + $0x10] sm:$0xff] }
 0x39c   :  { %4989 = vtanh.f32 %v969_v51 }
 0x3a2   :  { %v4990_v56 = vpop.eup %4989 }
 0x3a3   :  { %v972_v57 = vmul.f32 %v4990_v56, %v971_v55  ;;  %v1134_v56 = vld [vmem:[#allocation3 + $0x70] sm:$0xff] }
 0x3a5   :  { %v6085_v60 = vadd.f32 %v973_v58, %v972_v57  ;;  %v6146_v57 = vld [vmem:[%s7043_s7] ss:$0 sm:$0xff] }
 0x3a7   :  { %975 = vst.msk [vmem:[#allocation2 + $0x20] sm:$0xff] %vm309_vm0, %v6085_v60  ;;  %4712 = vmatmul.msk.f32.vlgmr.msra.gmra.mxu3 %vm309_vm0, %v6085_v60  ;;  %4713 = vmatmul.msk.f32.vlgmr.msrb.gmra.mxu0 %vm309_vm0, %v6085_v60 }
 0x3a8   :  { %4716 = vmatmul.msk.f32.vlgmr.msrb.gmra.mxu1 %vm309_vm0, %v6085_v60  ;;  %1302 = vmatpush.msra.mxu3 %v5261_v61 }
 0x3a9   :  { %1370 = vmatpush.msrb.mxu0 %v1329_v0  ;;  %v6160_v0 = vld [vmem:[#allocation7 + $0x8] sm:$0xff] }
 0x3aa   :  { %1303 = vmatpush.msra.mxu3 %v5262_v62 }
 0x3ab   :  { %1371 = vmatpush.msrb.mxu0 %v1328_v3  ;;  %v1409_v3 = vld [vmem:[#allocation5 + $0x28] sm:$0xff] }
 0x3ac   :  { %1304 = vmatpush.msra.mxu3 %v5263_v63 }
 0x3ae   :  { %1305 = vmatpush.msra.mxu3 %v5810_v12  ;;  %v1327_v12 = vld [vmem:[#allocation5 + $0x8] sm:$0xff]  ;;  %v6133_v50 = vld [vmem:[#allocation2 + $0x20] sm:$0xff] }
 0x3af   :  { %1372 = vmatpush.msrb.mxu0 %v1327_v12  ;;  %v1468_v12 = vld [vmem:[#allocation5 + $0x48] sm:$0xff] }
 0x3b1   :  { %1373 = vmatpush.msrb.mxu0 %v1326_v17  ;;  %v6163_v17 = vld [vmem:[#allocation7] sm:$0xff] }
 0x424   :  { %v1016_v44 = vpop.f32.mrf.mxu0 }
 0x425   :  { %v1042_v2 = vadd.f32 %v1020_v1, %v1016_v44  ;;  %v1079_v22 = vpop.f32.mrf.mxu1 }
 0x426   :  { %v1080_v29 = vadd.f32 %v5926_v59, %v1079_v22 }
 0x427   :  { %v4715_v6 = vmul.f32 -1.442695, %v1042_v2 }
 0x429   :  { %4991 = vpow2.f32 %v4715_v6 }
 0x42a   :  { %v996_v8 = vpop.f32.mrf.mxu3 }
 0x42b   :  { %v1022_v10 = vadd.f32 %v1019_v4, %v996_v8 }
 0x42d   :  { %v4714_v9 = vmul.f32 -1.442695, %v1022_v10 }
 0x42f   :  { %v4992_v5 = vpop.eup %4991  ;;  %4993 = vpow2.f32 %v4714_v9  ;;  %v6155_v9 = vld [vmem:[#allocation7 + $0x18] sm:$0xff] }
 0x430   :  { %v1046_v7 = vadd.f32 1.0, %v4992_v5  ;;  %v1411_v5 = vld [vmem:[#allocation5 + $0x38] sm:$0xff] }
 0x431   :  { %1429 = vmatpush.msrb.mxu1 %v1411_v5  ;;  %v6214_v5 = vld [vmem:[#allocation7 + $0x28] sm:$0xff] }
 0x432   :  { %4995 = vrcp.f32 %v1046_v7  ;;  %v1058_v33 = vand.u32 2147483648, %v1046_v7  ;;  %vm1052_vm1 = vweird.f32 %v1046_v7  ;;  %v1056_v35 = vand.u32 2147483647, %v1046_v7 }
 0x434   :  { %v1059_v39 = vor.u32 1.1754944e-38, %v1058_v33  ;;  %vm1057_vm3 = vcmp.eq.f32.partialorder %v1056_v35, 8.507059e+37  ;;  %v6174_v35 = vld [vmem:[%s7074_s16] ss:$0 sm:$0xff] }
 0x435   :  { %v4994_v14 = vpop.eup %4993 }
 0x436   :  { %v1026_v15 = vadd.f32 1.0, %v4994_v14  ;;  %v6158_v14 = vld [vmem:[#allocation7 + $0x10] sm:$0xff] }
 0x438   :  { %4997 = vrcp.f32 %v1026_v15  ;;  %v4996_v16 = vpop.eup %4995  ;;  %v1038_v19 = vand.u32 2147483648, %v1026_v15  ;;  %v1036_v20 = vand.u32 2147483647, %v1026_v15  ;;  %vm1032_vm12 = vweird.f32 %v1026_v15 }
 0x439   :  { %v1048_v11 = vmul.f32 %v4996_v16, %v1046_v7  ;;  %vm1053_vm15 = vweird.f32 %v4996_v16  ;;  %v1470_v7 = vld [vmem:[#allocation5 + $0x58] sm:$0xff] }
 0x43a   :  { %v1039_v23 = vor.u32 1.1754944e-38, %v1038_v19  ;;  %vm1037_vm14 = vcmp.eq.f32.partialorder %v1036_v20, 8.507059e+37  ;;  %vm1054_vm2 = vmor %vm1052_vm1, %vm1053_vm15 }
 0x43b   :  { %v1049_v18 = vsub.f32 1.0, %v1048_v11 }
 0x43d   :  { %v1050_v21 = vmul.f32 %v4996_v16, %v1049_v18 }
 0x43e   :  { %v4998_v24 = vpop.eup %4997 }
 0x43f   :  { %v1028_v25 = vmul.f32 %v4998_v24, %v1026_v15  ;;  %vm1033_vm11 = vweird.f32 %v4998_v24  ;;  %v1051_v31 = vadd.f32 %v4996_v16, %v1050_v21  ;;  %v1410_v15 = vld [vmem:[#allocation5 + $0x30] sm:$0xff] }
 0x440   :  { %vm1034_vm13 = vmor %vm1032_vm12, %vm1033_vm11  ;;  %1430 = vmatpush.msrb.mxu1 %v1410_v15 }
 0x441   :  { %v1029_v26 = vsub.f32 1.0, %v1028_v25  ;;  %v1055_v38 = vsel %vm1054_vm2, %v4996_v16, %v1051_v31  ;;  %v1469_v16 = vld [vmem:[#allocation5 + $0x50] sm:$0xff] }
 0x442   :  { %v1060_v40 = vsel %vm1057_vm3, %v1059_v39, %v1055_v38  ;;  %1431 = vmatpush.msrb.mxu1 %v1409_v3  ;;  %v1248_v3 = vld [vmem:[#allocation3 + $0x78] sm:$0xff] }
 0x443   :  { %v1030_v27 = vmul.f32 %v4998_v24, %v1029_v26  ;;  %v1085_v41 = vsub.f32 1.0, %v1060_v40  ;;  %v1087_v42 = vmul.f32 %v1060_v40, %v6085_v60  ;;  %v1467_v26 = vld [vmem:[#allocation5 + $0x40] sm:$0xff] }
 0x445   :  { %v1031_v28 = vadd.f32 %v4998_v24, %v1030_v27 }
 0x447   :  { %v1035_v30 = vsel %vm1034_vm13, %v4998_v24, %v1031_v28  ;;  %v1408_v24 = vld [vmem:[#allocation5 + $0x20] sm:$0xff] }
 0x448   :  { %v1040_v32 = vsel %vm1037_vm14, %v1039_v23, %v1035_v30  ;;  %1432 = vmatpush.msrb.mxu1 %v1408_v24 }
 0x449   :  { %v1082_v34 = vmul.f32 %v1080_v29, %v1040_v32 }
 0x44b   :  { %v1083_v37 = vadd.f32 %v1082_v34, %v1021_v36 }
 0x44d   :  { %4999 = vtanh.f32 %v1083_v37 }
 0x453   :  { %v5000_v43 = vpop.eup %4999 }
 0x454   :  { %v1086_v59 = vmul.f32 %v5000_v43, %v1085_v41 }
 0x456   :  { %v6107_v45 = vadd.f32 %v1087_v42, %v1086_v59  ;;  %v1135_v59 = vld [vmem:[#allocation3 + $0xb0] sm:$0xff] }
 0x458   :  { %1089 = vst.msk [vmem:[#allocation2 + $0x28] sm:$0xff] %vm309_vm0, %v6107_v45  ;;  %4717 = vmatmul.msk.f32.vlgmr.msrb.gmra.mxu2 %vm309_vm0, %v6107_v45  ;;  %4718 = vmatmul.msk.f32.vlgmr.msrb.gmra.mxu3 %vm309_vm0, %v6107_v45 }
 0x459   :  { %4721 = vmatmul.msk.f32.vlgmr.msra.gmra.mxu0 %vm309_vm0, %v6107_v45  ;;  %1555 = vmatpush.msrb.mxu3 %v6155_v9 }
 0x45a   :  { %1488 = vmatpush.msrb.mxu2 %v1470_v7  ;;  %v6224_v7 = vld [vmem:[#allocation7 + $0x20] sm:$0xff] }
 0x45b   :  { %1556 = vmatpush.msrb.mxu3 %v6158_v14 }
 0x45c   :  { %1489 = vmatpush.msrb.mxu2 %v1469_v16  ;;  %v6286_v16 = vld [vmem:[%s7043_s7 + $0x1] ss:$0 sm:$0xff] }
 0x45d   :  { %1557 = vmatpush.msrb.mxu3 %v6160_v0 }
 0x45e   :  { %1490 = vmatpush.msrb.mxu2 %v1468_v12 }
 0x45f   :  { %v6137_v51 = vld [vmem:[#allocation2 + $0x28] sm:$0xff]  ;;  %1558 = vmatpush.msrb.mxu3 %v6163_v17 }
 0x460   :  { %1491 = vmatpush.msrb.mxu2 %v1467_v26 }
 0x461   :  { %4727 = vmatmul.msk.f32.vlgmr.msrb.gmra.mxu0 %vm309_vm0, %v6117_v46 }
 0x469   :  { %4728 = vmatmul.msk.f32.gmra.mxu0 %vm309_vm0, %v6121_v47 }
 0x471   :  { %4729 = vmatmul.msk.f32.gmra.mxu0 %vm309_vm0, %v6125_v48 }
 0x479   :  { %4730 = vmatmul.msk.f32.gmra.mxu0 %vm309_vm0, %v6129_v49 }
 0x481   :  { %4731 = vmatmul.msk.f32.gmra.mxu0 %vm309_vm0, %v6133_v50 }
 0x489   :  { %4732 = vmatmul.msk.f32.gmra.mxu0 %vm309_vm0, %v6137_v51 }
 0x4d6   :  { %v6141_v52 = vpop.f32.mrf.mxu0 }
 0x4d7   :  { %v1194_v36 = vadd.f32 %v6174_v35, %v6141_v52 }
 0x4db   :  { %v1110_v53 = vpop.f32.mrf.mxu2  ;;  %v1130_v55 = vpop.f32.mrf.mxu3 }
 0x4dc   :  { %v1136_v58 = vadd.f32 %v1133_v54, %v1110_v53  ;;  %v1156_v60 = vadd.f32 %v1134_v56, %v1130_v55 }
 0x4de   :  { %v4719_v61 = vmul.f32 -1.442695, %v1136_v58  ;;  %v4720_v62 = vmul.f32 -1.442695, %v1156_v60  ;;  %v1375_v63 = vpop.f32.mrf.mxu0  ;;  %v6184_v58 = vld [vmem:[#allocation7 + $0x58] sm:$0xff] }
 0x4df   :  { %v1376_v44 = vadd.f32 %v6146_v57, %v1375_v63  ;;  %1864 = vmatpush.msra.mxu0 %v6184_v58 }
 0x4e0   :  { %5001 = vpow2.f32 %v4719_v61  ;;  %v6187_v61 = vld [vmem:[#allocation7 + $0x50] sm:$0xff] }
 0x4e1   :  { %5003 = vpow2.f32 %v4720_v62  ;;  %1399 = vst.msk [vmem:[#allocation3] sm:$0xff] %vm309_vm0, %v1376_v44  ;;  %1865 = vmatpush.msra.mxu0 %v6187_v61 }
 0x4e6   :  { %v5002_v1 = vpop.eup %5001  ;;  %v1378_v2 = vpop.f32.mrf.mxu0 }
 0x4e7   :  { %v5004_v6 = vpop.eup %5003  ;;  %v1140_v8 = vadd.f32 1.0, %v5002_v1  ;;  %v1379_v4 = vadd.f32 %v6146_v57, %v1378_v2 }
 0x4e8   :  { %v6151_v10 = vadd.f32 1.0, %v5004_v6 }
 0x4e9   :  { %5005 = vrcp.f32 %v1140_v8  ;;  %1400 = vst.msk [vmem:[#allocation3 + $0x8] sm:$0xff] %vm309_vm0, %v1379_v4  ;;  %v1152_v22 = vand.u32 2147483648, %v1140_v8  ;;  %v1150_v29 = vand.u32 2147483647, %v1140_v8  ;;  %vm1146_vm5 = vweird.f32 %v1140_v8  ;;  %v6201_v4 = vld [vmem:[#allocation7 + $0x48] sm:$0xff] }
 0x4ea   :  { %5007 = vrcp.f32 %v6151_v10  ;;  %v1172_v41 = vand.u32 2147483648, %v6151_v10  ;;  %vm1166_vm9 = vweird.f32 %v6151_v10  ;;  %v1170_v43 = vand.u32 2147483647, %v6151_v10  ;;  %1866 = vmatpush.msra.mxu0 %v6201_v4 }
 0x4eb   :  { %v1153_v33 = vor.u32 1.1754944e-38, %v1152_v22  ;;  %vm1151_vm7 = vcmp.eq.f32.partialorder %v1150_v29, 8.507059e+37 }
 0x4ec   :  { %v1173_v54 = vor.u32 1.1754944e-38, %v1172_v41  ;;  %vm1171_vm11 = vcmp.eq.f32.partialorder %v1170_v43, 8.507059e+37 }
 0x4ee   :  { %v1381_v11 = vpop.f32.mrf.mxu0 }
 0x4ef   :  { %v5006_v25 = vpop.eup %5005  ;;  %v1382_v18 = vadd.f32 %v6146_v57, %v1381_v11 }
 0x4f0   :  { %v5008_v19 = vpop.eup %5007  ;;  %v1142_v27 = vmul.f32 %v5006_v25, %v1140_v8  ;;  %vm1147_vm4 = vweird.f32 %v5006_v25  ;;  %v6194_v8 = vld [vmem:[#allocation7 + $0x38] sm:$0xff] }
 0x4f1   :  { %v1162_v20 = vmul.f32 %v5008_v19, %v6151_v10  ;;  %1401 = vst.msk [vmem:[#allocation3 + $0x10] sm:$0xff] %vm309_vm0, %v1382_v18  ;;  %vm1148_vm6 = vmor %vm1146_vm5, %vm1147_vm4  ;;  %vm1167_vm8 = vweird.f32 %v5008_v19  ;;  %v6211_v10 = vld [vmem:[#allocation7 + $0x40] sm:$0xff] }
 0x4f2   :  { %v1143_v21 = vsub.f32 1.0, %v1142_v27  ;;  %vm1168_vm10 = vmor %vm1166_vm9, %vm1167_vm8  ;;  %1867 = vmatpush.msra.mxu0 %v6211_v10  ;;  %v6294_v27 = vld [vmem:[%s7043_s7 + $0x2] ss:$0 sm:$0xff] }
 0x4f3   :  { %v1163_v28 = vsub.f32 1.0, %v1162_v20 }
 0x4f4   :  { %v1144_v23 = vmul.f32 %v5006_v25, %v1143_v21  ;;  %2007 = vmatpush.msrb.mxu0 %v6155_v9 }
 0x4f5   :  { %v1164_v30 = vmul.f32 %v5008_v19, %v1163_v28 }
 0x4f6   :  { %v1145_v31 = vadd.f32 %v5006_v25, %v1144_v23  ;;  %v1384_v32 = vpop.f32.mrf.mxu0  ;;  %2008 = vmatpush.msrb.mxu0 %v6158_v14  ;;  %v1583_v23 = vld [vmem:[#allocation3] sm:$0xff] }
 0x4f7   :  { %v1385_v34 = vadd.f32 %v6146_v57, %v1384_v32  ;;  %v1165_v39 = vadd.f32 %v5008_v19, %v1164_v30 }
 0x4f8   :  { %v1149_v37 = vsel %vm1148_vm6, %v5006_v25, %v1145_v31  ;;  %2009 = vmatpush.msrb.mxu0 %v6160_v0 }
 0x4f9   :  { %v1154_v38 = vsel %vm1151_vm7, %v1153_v33, %v1149_v37  ;;  %1402 = vst.msk [vmem:[#allocation3 + $0x18] sm:$0xff] %vm309_vm0, %v1385_v34  ;;  %v1169_v53 = vsel %vm1168_vm10, %v5008_v19, %v1165_v39 }
 0x4fa   :  { %v1196_v40 = vmul.f32 %v1194_v36, %v1154_v38  ;;  %v1174_v56 = vsel %vm1171_vm11, %v1173_v54, %v1169_v53  ;;  %2010 = vmatpush.msrb.mxu0 %v6163_v17 }
 0x4fb   :  { %v1199_v60 = vsub.f32 1.0, %v1174_v56  ;;  %v1201_v44 = vmul.f32 %v1174_v56, %v6107_v45  ;;  %v6207_v45 = vld [vmem:[#allocation7 + $0x30] sm:$0xff] }
 0x4fc   :  { %v1197_v42 = vadd.f32 %v1196_v40, %v1135_v59 }
 0x4fe   :  { %v1387_v52 = vpop.f32.mrf.mxu0  ;;  %5009 = vtanh.f32 %v1197_v42 }
 0x4ff   :  { %v1388_v55 = vadd.f32 %v6146_v57, %v1387_v52 }
 0x501   :  { %1403 = vst.msk [vmem:[#allocation3 + $0x20] sm:$0xff] %vm309_vm0, %v1388_v55 }
 0x504   :  { %v5010_v62 = vpop.eup %5009 }
 0x505   :  { %v1200_v63 = vmul.f32 %v5010_v62, %v1199_v60 }
 0x506   :  { %v1390_v1 = vpop.f32.mrf.mxu0 }
 0x507   :  { %v1391_v2 = vadd.f32 %v6146_v57, %v1390_v1  ;;  %v6192_v6 = vadd.f32 %v1201_v44, %v1200_v63 }
 0x509   :  { %1404 = vst.msk [vmem:[#allocation3 + $0x28] sm:$0xff] %vm309_vm0, %v1391_v2  ;;  %4722 = vmatmul.msk.f32.vlgmr.msra.gmra.mxu1 %vm309_vm0, %v6192_v6  ;;  %4723 = vmatmul.msk.f32.vlgmr.msra.gmra.mxu2 %vm309_vm0, %v6192_v6 }
 0x50a   :  { %1203 = vst.msk [vmem:[#allocation2 + $0x30] sm:$0xff] %vm309_vm0, %v6192_v6  ;;  %4726 = vmatmul.msk.f32.vlgmr.msra.gmra.mxu3 %vm309_vm0, %v6192_v6  ;;  %1894 = vmatpush.msra.mxu1 %v6155_v9 }
 0x50b   :  { %1575 = vmatpush.msra.mxu3 %v6194_v8  ;;  %1914 = vmatpush.msra.mxu2 %v6194_v8 }
 0x50c   :  { %1895 = vmatpush.msra.mxu1 %v6158_v14 }
 0x50d   :  { %1576 = vmatpush.msra.mxu3 %v6207_v45  ;;  %1915 = vmatpush.msra.mxu2 %v6207_v45 }
 0x50e   :  { %1896 = vmatpush.msra.mxu1 %v6160_v0 }
 0x50f   :  { %1577 = vmatpush.msra.mxu3 %v6214_v5  ;;  %1916 = vmatpush.msra.mxu2 %v6214_v5 }
 0x510   :  { %1897 = vmatpush.msra.mxu1 %v6163_v17 }
 0x511   :  { %v1324_v15 = vld [vmem:[#allocation2 + $0x30] sm:$0xff]  ;;  %4736 = vmatmul.msk.f32.vlgmr.msrb.gmra.mxu1 %vm309_vm0, %v6117_v46  ;;  %4745 = vmatmul.msk.f32.vlgmr.msrb.gmra.mxu2 %vm309_vm0, %v6117_v46 }
 0x512   :  { %4733 = vmatmul.msk.f32.gmra.mxu0 %vm309_vm0, %v1324_v15  ;;  %1559 = vmatmul.f32.vlgmr.msrb.gmra.mxu3 %v5576_v13 }
 0x513   :  { %1578 = vmatpush.msra.mxu3 %v6224_v7  ;;  %1917 = vmatpush.msra.mxu2 %v6224_v7 }
 0x514   :  { %2027 = vmatpush.msrb.mxu1 %v6194_v8 }
 0x515   :  { %1638 = vmatpush.msrb.mxu3 %v6184_v58  ;;  %2090 = vmatpush.msrb.mxu2 %v6184_v58 }
 0x516   :  { %2028 = vmatpush.msrb.mxu1 %v6207_v45 }
 0x517   :  { %1639 = vmatpush.msrb.mxu3 %v6187_v61  ;;  %2091 = vmatpush.msrb.mxu2 %v6187_v61 }
 0x518   :  { %2029 = vmatpush.msrb.mxu1 %v6214_v5 }
 0x519   :  { %1640 = vmatpush.msrb.mxu3 %v6201_v4  ;;  %4737 = vmatmul.msk.f32.gmra.mxu1 %vm309_vm0, %v6121_v47 }
 0x51a   :  { %4746 = vmatmul.msk.f32.gmra.mxu2 %vm309_vm0, %v6121_v47  ;;  %1579 = vmatmul.f32.vlgmr.msra.gmra.mxu3 %v5576_v13  ;;  %v1247_v47 = vld [vmem:[#allocation3 + $0x38] sm:$0xff] }
 0x51b   :  { %1641 = vmatpush.msrb.mxu3 %v6211_v10  ;;  %2092 = vmatpush.msrb.mxu2 %v6201_v4 }
 0x51c   :  { %2030 = vmatpush.msrb.mxu1 %v6224_v7 }
 0x51d   :  { %1668 = vmatpush.msra.mxu3 %v6155_v9  ;;  %2093 = vmatpush.msrb.mxu2 %v6211_v10 }
 0x51f   :  { %1669 = vmatpush.msra.mxu3 %v6158_v14 }
 0x521   :  { %1670 = vmatpush.msra.mxu3 %v6160_v0  ;;  %4738 = vmatmul.msk.f32.gmra.mxu1 %vm309_vm0, %v6125_v48 }
 0x522   :  { %4747 = vmatmul.msk.f32.gmra.mxu2 %vm309_vm0, %v6125_v48  ;;  %1642 = vmatmul.f32.vlgmr.msrb.gmra.mxu3 %v5576_v13 }
 0x523   :  { %1671 = vmatpush.msra.mxu3 %v6163_v17 }
 0x525   :  { %1688 = vmatpush.msrb.mxu3 %v6194_v8 }
 0x527   :  { %1689 = vmatpush.msrb.mxu3 %v6207_v45 }
 0x529   :  { %1690 = vmatpush.msrb.mxu3 %v6214_v5  ;;  %4739 = vmatmul.msk.f32.gmra.mxu1 %vm309_vm0, %v6129_v49 }
 0x52a   :  { %4748 = vmatmul.msk.f32.gmra.mxu2 %vm309_vm0, %v6129_v49 }
 0x52b   :  { %1691 = vmatpush.msrb.mxu3 %v6224_v7 }
 0x531   :  { %4740 = vmatmul.msk.f32.gmra.mxu1 %vm309_vm0, %v6133_v50 }
 0x532   :  { %4749 = vmatmul.msk.f32.gmra.mxu2 %vm309_vm0, %v6133_v50 }
 0x539   :  { %4741 = vmatmul.msk.f32.gmra.mxu1 %vm309_vm0, %v6137_v51 }
 0x53a   :  { %4750 = vmatmul.msk.f32.gmra.mxu2 %vm309_vm0, %v6137_v51 }
 0x541   :  { %4742 = vmatmul.msk.f32.gmra.mxu1 %vm309_vm0, %v1324_v15 }
 0x542   :  { %4751 = vmatmul.msk.f32.gmra.mxu2 %vm309_vm0, %v1324_v15 }
 0x586   :  { %v1224_v46 = vpop.f32.mrf.mxu1 }
 0x587   :  { %v1250_v48 = vadd.f32 %v1247_v47, %v1224_v46 }
 0x589   :  { %v4724_v49 = vmul.f32 -1.442695, %v1250_v48 }
 0x58b   :  { %5011 = vpow2.f32 %v4724_v49 }
 0x58c   :  { %v1244_v50 = vpop.f32.mrf.mxu2 }
 0x58d   :  { %v1270_v12 = vadd.f32 %v1248_v3, %v1244_v50  ;;  %v1307_v11 = vpop.f32.mrf.mxu3 }
 0x58e   :  { %v1434_v24 = vpop.f32.mrf.mxu1  ;;  %v1308_v47 = vadd.f32 %v6174_v35, %v1307_v11 }
 0x58f   :  { %v4725_v51 = vmul.f32 -1.442695, %v1270_v12  ;;  %v1393_v25 = vpop.f32.mrf.mxu0  ;;  %v1435_v18 = vadd.f32 %v6286_v16, %v1434_v24 }
 0x590   :  { %v1394_v26 = vadd.f32 %v6146_v57, %v1393_v25  ;;  %v1249_v25 = vld [vmem:[#allocation3 + $0xb8] sm:$0xff] }
 0x591   :  { %v5012_v19 = vpop.eup %5011  ;;  %5013 = vpow2.f32 %v4725_v51  ;;  %1458 = vst.msk [vmem:[#allocation3 + $0x40] sm:$0xff] %vm309_vm0, %v1435_v18 }
 0x592   :  { %v1254_v20 = vadd.f32 1.0, %v5012_v19  ;;  %1405 = vst.msk [vmem:[#allocation3 + $0x30] sm:$0xff] %vm309_vm0, %v1394_v26 }
 0x594   :  { %5015 = vrcp.f32 %v1254_v20  ;;  %v1493_v21 = vpop.f32.mrf.mxu2  ;;  %v1266_v59 = vand.u32 2147483648, %v1254_v20  ;;  %v1264_v52 = vand.u32 2147483647, %v1254_v20  ;;  %vm1260_vm13 = vweird.f32 %v1254_v20 }
 0x595   :  { %v1494_v22 = vadd.f32 %v6294_v27, %v1493_v21  ;;  %v1560_v28 = vpop.f32.mrf.mxu3 }
 0x596   :  { %v1586_v29 = vadd.f32 %v1583_v23, %v1560_v28  ;;  %v1437_v30 = vpop.f32.mrf.mxu1  ;;  %v1267_v1 = vor.u32 1.1754944e-38, %v1266_v59  ;;  %vm1265_vm15 = vcmp.eq.f32.partialorder %v1264_v52, 8.507059e+37 }
 0x597   :  { %v5014_v31 = vpop.eup %5013  ;;  %1517 = vst.msk [vmem:[#allocation3 + $0x80] sm:$0xff] %vm309_vm0, %v1494_v22  ;;  %v1438_v32 = vadd.f32 %v6286_v16, %v1437_v30 }
 0x598   :  { %v1274_v33 = vadd.f32 1.0, %v5014_v31  ;;  %v4753_v34 = vmul.f32 -1.442695, %v1586_v29  ;;  %v1584_v43 = vld [vmem:[#allocation3 + $0x40] sm:$0xff] }
 0x599   :  { %1459 = vst.msk [vmem:[#allocation3 + $0x48] sm:$0xff] %vm309_vm0, %v1438_v32 }
 0x59a   :  { %v5016_v36 = vpop.eup %5015  ;;  %5017 = vrcp.f32 %v1274_v33  ;;  %v1286_v48 = vand.u32 2147483648, %v1274_v33  ;;  %v1284_v51 = vand.u32 2147483647, %v1274_v33  ;;  %vm1280_vm2 = vweird.f32 %v1274_v33 }
 0x59b   :  { %v1256_v37 = vmul.f32 %v5016_v36, %v1254_v20  ;;  %5019 = vpow2.f32 %v4753_v34  ;;  %vm1261_vm12 = vweird.f32 %v5016_v36  ;;  %v6318_v34 = vld [vmem:[%s7044_s8] ss:$0 sm:$0xff] }
 0x59c   :  { %vm1262_vm14 = vmor %vm1260_vm13, %vm1261_vm12  ;;  %v1287_v20 = vor.u32 1.1754944e-38, %v1286_v48  ;;  %vm1285_vm4 = vcmp.eq.f32.partialorder %v1284_v51, 8.507059e+37 }
 0x59d   :  { %v1496_v38 = vpop.f32.mrf.mxu2  ;;  %v1257_v39 = vsub.f32 1.0, %v1256_v37  ;;  %v1580_v41 = vpop.f32.mrf.mxu3 }
 0x59e   :  { %v1497_v40 = vadd.f32 %v6294_v27, %v1496_v38  ;;  %v1606_v42 = vadd.f32 %v1584_v43, %v1580_v41  ;;  %v1440_v53 = vpop.f32.mrf.mxu1 }
 0x59f   :  { %v1258_v54 = vmul.f32 %v5016_v36, %v1257_v39  ;;  %v1441_v55 = vadd.f32 %v6286_v16, %v1440_v53 }
 0x5a0   :  { %1518 = vst.msk [vmem:[#allocation3 + $0x88] sm:$0xff] %vm309_vm0, %v1497_v40  ;;  %v5018_v56 = vpop.eup %5017  ;;  %v4754_v60 = vmul.f32 -1.442695, %v1606_v42 }
 0x5a1   :  { %v5020_v62 = vpop.eup %5019  ;;  %v1276_v63 = vmul.f32 %v5018_v56, %v1274_v33  ;;  %v1259_v44 = vadd.f32 %v5016_v36, %v1258_v54  ;;  %1460 = vst.msk [vmem:[#allocation3 + $0x50] sm:$0xff] %vm309_vm0, %v1441_v55  ;;  %vm1281_vm1 = vweird.f32 %v5018_v56 }
 0x5a2   :  { %v6305_v2 = vadd.f32 1.0, %v5020_v62  ;;  %5021 = vpow2.f32 %v4754_v60  ;;  %vm1282_vm3 = vmor %vm1280_vm2, %vm1281_vm1 }
 0x5a3   :  { %v1277_v15 = vsub.f32 1.0, %v1276_v63  ;;  %v1263_v46 = vsel %vm1262_vm14, %v5016_v36, %v1259_v44 }
 0x5a4   :  { %v1268_v49 = vsel %vm1265_vm15, %v1267_v1, %v1263_v46  ;;  %5023 = vrcp.f32 %v6305_v2  ;;  %v1600_v39 = vand.u32 2147483647, %v6305_v2  ;;  %v1602_v40 = vand.u32 2147483648, %v6305_v2 }
 0x5a5   :  { %v1499_v50 = vpop.f32.mrf.mxu2  ;;  %v1278_v3 = vmul.f32 %v5018_v56, %v1277_v15  ;;  %v1310_v12 = vmul.f32 %v1308_v47, %v1268_v49  ;;  %v1643_v41 = vpop.f32.mrf.mxu3  ;;  %vm1596_vm6 = vweird.f32 %v6305_v2  ;;  %v1585_v49 = vld [vmem:[#allocation3 + $0x80] sm:$0xff] }
 0x5a6   :  { %v1500_v24 = vadd.f32 %v6294_v27, %v1499_v50  ;;  %v1443_v18 = vpop.f32.mrf.mxu1  ;;  %v1603_v60 = vor.u32 1.1754944e-38, %v1602_v40  ;;  %vm1601_vm8 = vcmp.eq.f32.partialorder %v1600_v39, 8.507059e+37  ;;  %v1696_v40 = vld [vmem:[#allocation3 + $0x8] sm:$0xff] }
 0x5a7   :  { %v1279_v26 = vadd.f32 %v5018_v56, %v1278_v3  ;;  %v1311_v19 = vadd.f32 %v1310_v12, %v1249_v25  ;;  %v1444_v35 = vadd.f32 %v6286_v16, %v1443_v18 }
 0x5a8   :  { %1519 = vst.msk [vmem:[#allocation3 + $0x90] sm:$0xff] %vm309_vm0, %v1500_v24  ;;  %v5022_v11 = vpop.eup %5021 }
 0x5a9   :  { %v1283_v21 = vsel %vm1282_vm3, %v5018_v56, %v1279_v26  ;;  %5025 = vtanh.f32 %v1311_v19  ;;  %v1610_v22 = vadd.f32 1.0, %v5022_v11  ;;  %1461 = vst.msk [vmem:[#allocation3 + $0x58] sm:$0xff] %vm309_vm0, %v1444_v35  ;;  %v1644_v56 = vadd.f32 %v6318_v34, %v1643_v41 }
 0x5aa   :  { %v5024_v28 = vpop.eup %5023  ;;  %v1288_v23 = vsel %vm1285_vm4, %v1287_v20, %v1283_v21 }
 0x5ab   :  { %5027 = vrcp.f32 %v1610_v22  ;;  %v1592_v30 = vmul.f32 %v5024_v28, %v6305_v2  ;;  %v1313_v32 = vsub.f32 1.0, %v1288_v23  ;;  %v1315_v59 = vmul.f32 %v1288_v23, %v6192_v6 }
 0x5ac   :  { %vm1597_vm5 = vweird.f32 %v5024_v28  ;;  %v1622_v44 = vand.u32 2147483648, %v1610_v22  ;;  %v1620_v2 = vand.u32 2147483647, %v1610_v22  ;;  %vm1616_vm10 = vweird.f32 %v1610_v22 }
 0x5ad   :  { %v1502_v29 = vpop.f32.mrf.mxu2  ;;  %v1593_v36 = vsub.f32 1.0, %v1592_v30  ;;  %vm1598_vm7 = vmor %vm1596_vm6, %vm1597_vm5 }
 0x5ae   :  { %v1503_v31 = vadd.f32 %v6294_v27, %v1502_v29  ;;  %v1446_v33 = vpop.f32.mrf.mxu1  ;;  %v1623_v24 = vor.u32 1.1754944e-38, %v1622_v44  ;;  %vm1621_vm12 = vcmp.eq.f32.partialorder %v1620_v2, 8.507059e+37 }
 0x5af   :  { %v5026_v37 = vpop.eup %5025  ;;  %v1447_v38 = vadd.f32 %v6286_v16, %v1446_v33  ;;  %v1594_v42 = vmul.f32 %v5024_v28, %v1593_v36 }
 0x5b0   :  { %1520 = vst.msk [vmem:[#allocation3 + $0x98] sm:$0xff] %vm309_vm0, %v1503_v31  ;;  %v1314_v43 = vmul.f32 %v5026_v37, %v1313_v32 }
 0x5b1   :  { %v5028_v53 = vpop.eup %5027  ;;  %1462 = vst.msk [vmem:[#allocation3 + $0x60] sm:$0xff] %vm309_vm0, %v1447_v38  ;;  %v1595_v55 = vadd.f32 %v5024_v28, %v1594_v42  ;;  %v1697_v42 = vld [vmem:[#allocation3 + $0x48] sm:$0xff] }
 0x5b2   :  { %v1316_v54 = vadd.f32 %v1315_v59, %v1314_v43  ;;  %v1612_v52 = vmul.f32 %v5028_v53, %v1610_v22  ;;  %vm1617_vm9 = vweird.f32 %v5028_v53 }
 0x5b3   :  { %v1599_v63 = vsel %vm1598_vm7, %v5024_v28, %v1595_v55  ;;  %vm1618_vm11 = vmor %vm1616_vm10, %vm1617_vm9 }
 0x5b4   :  { %1317 = vst.msk [vmem:[#allocation2 + $0x38] sm:$0xff] %vm309_vm0, %v1316_v54  ;;  %v1613_v62 = vsub.f32 1.0, %v1612_v52  ;;  %v1604_v1 = vsel %vm1601_vm8, %v1603_v60, %v1599_v63 }
 0x5b5   :  { %v1505_v6 = vpop.f32.mrf.mxu2  ;;  %v1646_v47 = vmul.f32 %v1644_v56, %v1604_v1 }
 0x5b6   :  { %v1506_v15 = vadd.f32 %v6294_v27, %v1505_v6  ;;  %v1614_v46 = vmul.f32 %v5028_v53, %v1613_v62  ;;  %v1449_v48 = vpop.f32.mrf.mxu1 }
 0x5b7   :  { %v1450_v50 = vadd.f32 %v6286_v16, %v1449_v48  ;;  %v1647_v12 = vadd.f32 %v1646_v47, %v1585_v49 }
 0x5b8   :  { %1521 = vst.msk [vmem:[#allocation3 + $0xa0] sm:$0xff] %vm309_vm0, %v1506_v15  ;;  %v1615_v3 = vadd.f32 %v5028_v53, %v1614_v46 }
 0x5b9   :  { %1463 = vst.msk [vmem:[#allocation3 + $0x68] sm:$0xff] %vm309_vm0, %v1450_v50  ;;  %5029 = vtanh.f32 %v1647_v12 }
 0x5ba   :  { %v1619_v51 = vsel %vm1618_vm11, %v5028_v53, %v1615_v3 }
 0x5bb   :  { %v1624_v25 = vsel %vm1621_vm12, %v1623_v24, %v1619_v51  ;;  %v1325_v18 = vld [vmem:[#allocation2 + $0x38] sm:$0xff]  ;;  %v1698_v24 = vld [vmem:[#allocation3 + $0x88] sm:$0xff] }
 0x5bc   :  { %4734 = vmatmul.msk.f32.gmra.mxu0 %vm309_vm0, %v1325_v18  ;;  %4743 = vmatmul.msk.f32.gmra.mxu1 %vm309_vm0, %v1325_v18  ;;  %v1649_v19 = vsub.f32 1.0, %v1624_v25  ;;  %v1651_v28 = vmul.f32 0.0, %v1624_v25 }
 0x5bd   :  { %v1508_v26 = vpop.f32.mrf.mxu2  ;;  %4752 = vmatmul.msk.f32.gmra.mxu2 %vm309_vm0, %v1325_v18 }
 0x5be   :  { %v1509_v35 = vadd.f32 %v6294_v27, %v1508_v26  ;;  %v1452_v11 = vpop.f32.mrf.mxu1 }
 0x5bf   :  { %v1453_v20 = vadd.f32 %v6286_v16, %v1452_v11  ;;  %v5030_v21 = vpop.eup %5029 }
 0x5c0   :  { %1522 = vst.msk [vmem:[#allocation3 + $0xa8] sm:$0xff] %vm309_vm0, %v1509_v35  ;;  %v1650_v22 = vmul.f32 %v5030_v21, %v1649_v19 }
 0x5c1   :  { %1464 = vst.msk [vmem:[#allocation3 + $0x70] sm:$0xff] %vm309_vm0, %v1453_v20 }
 0x5c2   :  { %v6340_v23 = vadd.f32 %v1651_v28, %v1650_v22 }
 0x5c4   :  { %4755 = vmatmul.msk.f32.vlgmr.msra.gmra.mxu3 %vm309_vm0, %v6340_v23 }
 0x5c5   :  { %v1511_v29 = vpop.f32.mrf.mxu2  ;;  %1751 = vmatpush.msra.mxu3 %v6184_v58 }
 0x5c6   :  { %v1512_v30 = vadd.f32 %v6294_v27, %v1511_v29 }
 0x5c7   :  { %1752 = vmatpush.msra.mxu3 %v6187_v61 }
 0x5c8   :  { %1523 = vst.msk [vmem:[#allocation3 + $0xb0] sm:$0xff] %vm309_vm0, %v1512_v30  ;;  %v1809_v30 = vld [vmem:[#allocation3 + $0x10] sm:$0xff] }
 0x5c9   :  { %1753 = vmatpush.msra.mxu3 %v6201_v4 }
 0x5cb   :  { %1754 = vmatpush.msra.mxu3 %v6211_v10 }
 0x5cc   :  { %4756 = vmatmul.msk.f32.vlgmr.msrb.gmra.mxu3 %vm309_vm0, %v6340_v23 }
 0x5cd   :  { %1781 = vmatpush.msrb.mxu3 %v6155_v9 }
 0x5cf   :  { %1782 = vmatpush.msrb.mxu3 %v6158_v14 }
 0x5d1   :  { %1783 = vmatpush.msrb.mxu3 %v6160_v0 }
 0x5d3   :  { %1784 = vmatpush.msrb.mxu3 %v6163_v17 }
 0x5d4   :  { %4759 = vmatmul.msk.f32.vlgmr.msra.gmra.mxu3 %vm309_vm0, %v6340_v23 }
 0x5d5   :  { %1801 = vmatpush.msra.mxu3 %v6194_v8 }
 0x5d7   :  { %1802 = vmatpush.msra.mxu3 %v6207_v45 }
 0x5d9   :  { %1803 = vmatpush.msra.mxu3 %v6214_v5 }
 0x5db   :  { %1804 = vmatpush.msra.mxu3 %v6224_v7 }
 0x639   :  { %v1396_v31 = vpop.f32.mrf.mxu0  ;;  %v1455_v32 = vpop.f32.mrf.mxu1 }
 0x63a   :  { %v1397_v33 = vadd.f32 %v6146_v57, %v1396_v31  ;;  %v1456_v36 = vadd.f32 %v6286_v16, %v1455_v32 }
 0x63c   :  { %1406 = vst.msk [vmem:[#allocation3 + $0x38] sm:$0xff] %vm309_vm0, %v1397_v33 }
 0x63d   :  { %1465 = vst.msk [vmem:[#allocation3 + $0x78] sm:$0xff] %vm309_vm0, %v1456_v36  ;;  %v1810_v36 = vld [vmem:[#allocation3 + $0x50] sm:$0xff] }
 0x640   :  { %v1514_v37 = vpop.f32.mrf.mxu2 }
 0x641   :  { %v1515_v38 = vadd.f32 %v6294_v27, %v1514_v37 }
 0x643   :  { %1524 = vst.msk [vmem:[#allocation3 + $0xb8] sm:$0xff] %vm309_vm0, %v1515_v38 }
 0x647   :  { %v1673_v39 = vpop.f32.mrf.mxu3 }
 0x648   :  { %v1699_v41 = vadd.f32 %v1696_v40, %v1673_v39 }
 0x64a   :  { %v4757_v43 = vmul.f32 -1.442695, %v1699_v41 }
 0x64c   :  { %5031 = vpow2.f32 %v4757_v43 }
 0x64f   :  { %v1693_v59 = vpop.f32.mrf.mxu3 }
 0x650   :  { %v1719_v53 = vadd.f32 %v1697_v42, %v1693_v59 }
 0x652   :  { %v5032_v57 = vpop.eup %5031  ;;  %v4758_v54 = vmul.f32 -1.442695, %v1719_v53 }
 0x653   :  { %v1703_v16 = vadd.f32 1.0, %v5032_v57 }
 0x654   :  { %5033 = vpow2.f32 %v4758_v54 }
 0x655   :  { %5035 = vrcp.f32 %v1703_v16  ;;  %v1715_v62 = vand.u32 2147483648, %v1703_v16  ;;  %v1713_v6 = vand.u32 2147483647, %v1703_v16  ;;  %vm1709_vm14 = vweird.f32 %v1703_v16 }
 0x657   :  { %v1756_v44 = vpop.f32.mrf.mxu3  ;;  %v1716_v46 = vor.u32 1.1754944e-38, %v1715_v62  ;;  %vm1714_vm1 = vcmp.eq.f32.partialorder %v1713_v6, 8.507059e+37 }
 0x658   :  { %v1757_v48 = vadd.f32 %v6318_v34, %v1756_v44 }
 0x65a   :  { %v5034_v52 = vpop.eup %5033 }
 0x65b   :  { %v5036_v55 = vpop.eup %5035  ;;  %v1723_v56 = vadd.f32 1.0, %v5034_v52 }
 0x65c   :  { %v1705_v60 = vmul.f32 %v5036_v55, %v1703_v16  ;;  %vm1710_vm13 = vweird.f32 %v5036_v55 }
 0x65d   :  { %5037 = vrcp.f32 %v1723_v56  ;;  %vm1711_vm15 = vmor %vm1709_vm14, %vm1710_vm13  ;;  %v1735_v12 = vand.u32 2147483648, %v1723_v56  ;;  %v1733_v25 = vand.u32 2147483647, %v1723_v56  ;;  %vm1729_vm3 = vweird.f32 %v1723_v56 }
 0x65e   :  { %v1706_v27 = vsub.f32 1.0, %v1705_v60 }
 0x65f   :  { %v1736_v19 = vor.u32 1.1754944e-38, %v1735_v12  ;;  %vm1734_vm5 = vcmp.eq.f32.partialorder %v1733_v25, 8.507059e+37 }
 0x660   :  { %v1707_v63 = vmul.f32 %v5036_v55, %v1706_v27 }
 0x662   :  { %v1708_v1 = vadd.f32 %v5036_v55, %v1707_v63 }
 0x663   :  { %v5038_v15 = vpop.eup %5037 }
 0x664   :  { %v1725_v2 = vmul.f32 %v5038_v15, %v1723_v56  ;;  %v1712_v47 = vsel %vm1711_vm15, %v5036_v55, %v1708_v1  ;;  %vm1730_vm2 = vweird.f32 %v5038_v15 }
 0x665   :  { %v1717_v49 = vsel %vm1714_vm1, %v1716_v46, %v1712_v47  ;;  %vm1731_vm4 = vmor %vm1729_vm3, %vm1730_vm2  ;;  %v1811_v46 = vld [vmem:[#allocation3 + $0x90] sm:$0xff] }
 0x666   :  { %v1726_v50 = vsub.f32 1.0, %v1725_v2  ;;  %v1759_v3 = vmul.f32 %v1757_v48, %v1717_v49 }
 0x668   :  { %v1727_v51 = vmul.f32 %v5038_v15, %v1726_v50  ;;  %v1760_v18 = vadd.f32 %v1759_v3, %v1698_v24 }
 0x66a   :  { %v1728_v26 = vadd.f32 %v5038_v15, %v1727_v51  ;;  %5039 = vtanh.f32 %v1760_v18 }
 0x66c   :  { %v1732_v35 = vsel %vm1731_vm4, %v5038_v15, %v1728_v26 }
 0x66d   :  { %v1737_v11 = vsel %vm1734_vm5, %v1736_v19, %v1732_v35  ;;  %v1922_v19 = vld [vmem:[#allocation3 + $0x18] sm:$0xff] }
 0x66e   :  { %v1762_v20 = vsub.f32 1.0, %v1737_v11  ;;  %v1764_v28 = vmul.f32 %v1737_v11, %v6340_v23 }
 0x670   :  { %v5040_v21 = vpop.eup %5039 }
 0x671   :  { %v1763_v22 = vmul.f32 %v5040_v21, %v1762_v20  ;;  %v1923_v20 = vld [vmem:[#allocation3 + $0x58] sm:$0xff] }
 0x673   :  { %v6370_v29 = vadd.f32 %v1764_v28, %v1763_v22 }
 0x675   :  { %4760 = vmatmul.msk.f32.vlgmr.msrb.gmra.mxu3 %vm309_vm0, %v6370_v29  ;;  %4764 = vmatmul.msk.f32.vlgmr.msra.gmra.mxu0 %vm309_vm0, %v6370_v29 }
 0x676   :  { %1977 = vmatpush.msrb.mxu3 %v6184_v58  ;;  %2140 = vmatpush.msra.mxu0 %v6194_v8 }
 0x678   :  { %1978 = vmatpush.msrb.mxu3 %v6187_v61  ;;  %2141 = vmatpush.msra.mxu0 %v6207_v45 }
 0x67a   :  { %1979 = vmatpush.msrb.mxu3 %v6201_v4  ;;  %2142 = vmatpush.msra.mxu0 %v6214_v5 }
 0x67c   :  { %1980 = vmatpush.msrb.mxu3 %v6211_v10  ;;  %2143 = vmatpush.msra.mxu0 %v6224_v7 }
 0x67d   :  { %4761 = vmatmul.msk.f32.vlgmr.msra.gmra.mxu3 %vm309_vm0, %v6370_v29 }
 0x67e   :  { %2120 = vmatpush.msra.mxu3 %v6155_v9 }
 0x680   :  { %2121 = vmatpush.msra.mxu3 %v6158_v14 }
 0x682   :  { %2122 = vmatpush.msra.mxu3 %v6160_v0 }
 0x684   :  { %2123 = vmatpush.msra.mxu3 %v6163_v17 }
 0x6f2   :  { %v1869_v52 = vpop.f32.mrf.mxu0 }
 0x6f3   :  { %v1870_v27 = vadd.f32 %v6318_v34, %v1869_v52 }
 0x6f8   :  { %v1786_v23 = vpop.f32.mrf.mxu3 }
 0x6f9   :  { %v1812_v31 = vadd.f32 %v1809_v30, %v1786_v23 }
 0x6fb   :  { %v4762_v32 = vmul.f32 -1.442695, %v1812_v31 }
 0x6fd   :  { %5041 = vpow2.f32 %v4762_v32 }
 0x700   :  { %v1806_v33 = vpop.f32.mrf.mxu3 }
 0x701   :  { %v1832_v37 = vadd.f32 %v1810_v36, %v1806_v33 }
 0x703   :  { %v5042_v38 = vpop.eup %5041  ;;  %v4763_v39 = vmul.f32 -1.442695, %v1832_v37 }
 0x704   :  { %v1816_v40 = vadd.f32 1.0, %v5042_v38 }
 0x705   :  { %5043 = vpow2.f32 %v4763_v39 }
 0x706   :  { %5045 = vrcp.f32 %v1816_v40  ;;  %v1828_v57 = vand.u32 2147483648, %v1816_v40  ;;  %v1826_v16 = vand.u32 2147483647, %v1816_v40  ;;  %vm1822_vm7 = vweird.f32 %v1816_v40 }
 0x708   :  { %v1829_v60 = vor.u32 1.1754944e-38, %v1828_v57  ;;  %vm1827_vm9 = vcmp.eq.f32.partialorder %v1826_v16, 8.507059e+37 }
 0x70b   :  { %v5044_v41 = vpop.eup %5043 }
 0x70c   :  { %v5046_v43 = vpop.eup %5045  ;;  %v1836_v59 = vadd.f32 1.0, %v5044_v41 }
 0x70d   :  { %v1818_v42 = vmul.f32 %v5046_v43, %v1816_v40  ;;  %vm1823_vm6 = vweird.f32 %v5046_v43 }
 0x70e   :  { %5047 = vrcp.f32 %v1836_v59  ;;  %vm1824_vm8 = vmor %vm1822_vm7, %vm1823_vm6  ;;  %v1848_v15 = vand.u32 2147483648, %v1836_v59  ;;  %v1846_v47 = vand.u32 2147483647, %v1836_v59  ;;  %vm1842_vm11 = vweird.f32 %v1836_v59 }
 0x70f   :  { %v1819_v53 = vsub.f32 1.0, %v1818_v42 }
 0x710   :  { %v1849_v50 = vor.u32 1.1754944e-38, %v1848_v15  ;;  %vm1847_vm13 = vcmp.eq.f32.partialorder %v1846_v47, 8.507059e+37  ;;  %v5266_v47 = vld [vmem:[#allocation7 + $0x10] sm:$0xff] }
 0x711   :  { %v1820_v54 = vmul.f32 %v5046_v43, %v1819_v53 }
 0x713   :  { %v1821_v55 = vadd.f32 %v5046_v43, %v1820_v54 }
 0x714   :  { %v5048_v56 = vpop.eup %5047 }
 0x715   :  { %v1825_v62 = vsel %vm1824_vm8, %v5046_v43, %v1821_v55  ;;  %v1838_v63 = vmul.f32 %v5048_v56, %v1836_v59  ;;  %vm1843_vm10 = vweird.f32 %v5048_v56  ;;  %v1924_v55 = vld [vmem:[#allocation3 + $0x98] sm:$0xff] }
 0x716   :  { %v1830_v6 = vsel %vm1827_vm9, %v1829_v60, %v1825_v62  ;;  %vm1844_vm12 = vmor %vm1842_vm11, %vm1843_vm10 }
 0x717   :  { %v1872_v44 = vmul.f32 %v1870_v27, %v1830_v6  ;;  %v1839_v1 = vsub.f32 1.0, %v1838_v63 }
 0x719   :  { %v1840_v2 = vmul.f32 %v5048_v56, %v1839_v1  ;;  %v1873_v48 = vadd.f32 %v1872_v44, %v1811_v46 }
 0x71b   :  { %v1841_v49 = vadd.f32 %v5048_v56, %v1840_v2  ;;  %5049 = vtanh.f32 %v1873_v48  ;;  %v5265_v2 = vld [vmem:[#allocation7 + $0x18] sm:$0xff]  ;;  %v5267_v48 = vld [vmem:[#allocation7 + $0x8] sm:$0xff] }
 0x71d   :  { %v1845_v3 = vsel %vm1844_vm12, %v5048_v56, %v1841_v49  ;;  %v5268_v49 = vld [vmem:[#allocation7] sm:$0xff] }
 0x71e   :  { %v1850_v12 = vsel %vm1847_vm13, %v1849_v50, %v1845_v3 }
 0x71f   :  { %v1875_v24 = vsub.f32 1.0, %v1850_v12  ;;  %v1877_v18 = vmul.f32 %v1850_v12, %v6370_v29 }
 0x721   :  { %v5050_v51 = vpop.eup %5049 }
 0x722   :  { %v1876_v25 = vmul.f32 %v5050_v51, %v1875_v24 }
 0x724   :  { %v6392_v26 = vadd.f32 %v1877_v18, %v1876_v25 }
 0x726   :  { %4765 = vmatmul.msk.f32.vlgmr.msra.gmra.mxu1 %vm309_vm0, %v6392_v26  ;;  %4766 = vmatmul.msk.f32.vlgmr.msra.gmra.mxu2 %vm309_vm0, %v6392_v26 }
 0x727   :  { %4769 = vmatmul.msk.f32.vlgmr.msrb.gmra.mxu3 %vm309_vm0, %v6392_v26  ;;  %2203 = vmatpush.msra.mxu1 %v6184_v58 }
 0x728   :  { %2233 = vmatpush.msra.mxu2 %v6155_v9  ;;  %2253 = vmatpush.msrb.mxu3 %v6194_v8 }
 0x729   :  { %2204 = vmatpush.msra.mxu1 %v6187_v61 }
 0x72a   :  { %2234 = vmatpush.msra.mxu2 %v6158_v14  ;;  %2254 = vmatpush.msrb.mxu3 %v6207_v45 }
 0x72b   :  { %2205 = vmatpush.msra.mxu1 %v6201_v4 }
 0x72c   :  { %2235 = vmatpush.msra.mxu2 %v6160_v0  ;;  %2255 = vmatpush.msrb.mxu3 %v6214_v5 }
 0x72d   :  { %2206 = vmatpush.msra.mxu1 %v6211_v10 }
 0x72e   :  { %2236 = vmatpush.msra.mxu2 %v6163_v17  ;;  %2256 = vmatpush.msrb.mxu3 %v6224_v7 }
 0x7a3   :  { %v1899_v9 = vpop.f32.mrf.mxu1 }
 0x7a4   :  { %v1925_v35 = vadd.f32 %v1922_v19, %v1899_v9 }
 0x7a6   :  { %v4767_v11 = vmul.f32 -1.442695, %v1925_v35 }
 0x7a8   :  { %5051 = vpow2.f32 %v4767_v11 }
 0x7a9   :  { %v1919_v14 = vpop.f32.mrf.mxu2 }
 0x7aa   :  { %v1945_v21 = vadd.f32 %v1923_v20, %v1919_v14  ;;  %v1982_v38 = vpop.f32.mrf.mxu3 }
 0x7ab   :  { %v1983_v42 = vadd.f32 %v6318_v34, %v1982_v38 }
 0x7ac   :  { %v4768_v22 = vmul.f32 -1.442695, %v1945_v21 }
 0x7ae   :  { %v5052_v28 = vpop.eup %5051  ;;  %5053 = vpow2.f32 %v4768_v22 }
 0x7af   :  { %v1929_v0 = vadd.f32 1.0, %v5052_v28 }
 0x7b1   :  { %5055 = vrcp.f32 %v1929_v0  ;;  %v1941_v32 = vand.u32 2147483648, %v1929_v0  ;;  %v1939_v36 = vand.u32 2147483647, %v1929_v0  ;;  %vm1935_vm15 = vweird.f32 %v1929_v0 }
 0x7b3   :  { %v1942_v41 = vor.u32 1.1754944e-38, %v1941_v32  ;;  %vm1940_vm2 = vcmp.eq.f32.partialorder %v1939_v36, 8.507059e+37 }
 0x7b4   :  { %v5054_v29 = vpop.eup %5053 }
 0x7b5   :  { %v1949_v23 = vadd.f32 1.0, %v5054_v29 }
 0x7b7   :  { %v5056_v30 = vpop.eup %5055  ;;  %5057 = vrcp.f32 %v1949_v23  ;;  %v1961_v54 = vand.u32 2147483648, %v1949_v23  ;;  %v1959_v52 = vand.u32 2147483647, %v1949_v23  ;;  %vm1955_vm4 = vweird.f32 %v1949_v23 }
 0x7b8   :  { %v1931_v17 = vmul.f32 %v5056_v30, %v1929_v0  ;;  %vm1936_vm14 = vweird.f32 %v5056_v30 }
 0x7b9   :  { %vm1937_vm1 = vmor %vm1935_vm15, %vm1936_vm14  ;;  %v1962_v27 = vor.u32 1.1754944e-38, %v1961_v54  ;;  %vm1960_vm6 = vcmp.eq.f32.partialorder %v1959_v52, 8.507059e+37  ;;  %v5271_v54 = vld [vmem:[#allocation7 + $0x48] sm:$0xff] }
 0x7ba   :  { %v1932_v31 = vsub.f32 1.0, %v1931_v17 }
 0x7bc   :  { %v1933_v33 = vmul.f32 %v5056_v30, %v1932_v31 }
 0x7bd   :  { %v5058_v37 = vpop.eup %5057 }
 0x7be   :  { %v1951_v39 = vmul.f32 %v5058_v37, %v1949_v23  ;;  %v1934_v40 = vadd.f32 %v5056_v30, %v1933_v33  ;;  %vm1956_vm3 = vweird.f32 %v5058_v37  ;;  %v2037_v33 = vld [vmem:[#allocation3 + $0xa0] sm:$0xff] }
 0x7bf   :  { %vm1957_vm5 = vmor %vm1955_vm4, %vm1956_vm3 }
 0x7c0   :  { %v1952_v43 = vsub.f32 1.0, %v1951_v39  ;;  %v1938_v59 = vsel %vm1937_vm1, %v5056_v30, %v1934_v40 }
 0x7c1   :  { %v1943_v53 = vsel %vm1940_vm2, %v1942_v41, %v1938_v59 }
 0x7c2   :  { %v1953_v57 = vmul.f32 %v5058_v37, %v1952_v43  ;;  %v1985_v16 = vmul.f32 %v1983_v42, %v1943_v53  ;;  %v5269_v53 = vld [vmem:[#allocation7 + $0x58] sm:$0xff] }
 0x7c4   :  { %v1954_v56 = vadd.f32 %v5058_v37, %v1953_v57  ;;  %v1986_v60 = vadd.f32 %v1985_v16, %v1924_v55  ;;  %v5270_v57 = vld [vmem:[#allocation7 + $0x50] sm:$0xff]  ;;  %v5272_v16 = vld [vmem:[#allocation7 + $0x40] sm:$0xff] }
 0x7c5   :  { %v2149_v55 = vld [vmem:[#allocation3 + $0x68] sm:$0xff] }
 0x7c6   :  { %v1958_v62 = vsel %vm1957_vm5, %v5058_v37, %v1954_v56  ;;  %5059 = vtanh.f32 %v1986_v60 }
 0x7c7   :  { %v1963_v63 = vsel %vm1960_vm6, %v1962_v27, %v1958_v62  ;;  %v2148_v62 = vld [vmem:[#allocation3 + $0x28] sm:$0xff] }
 0x7c8   :  { %v1988_v6 = vsub.f32 1.0, %v1963_v63  ;;  %v1990_v15 = vmul.f32 %v1963_v63, %v6392_v26 }
 0x7cc   :  { %v5060_v44 = vpop.eup %5059 }
 0x7cd   :  { %v1989_v1 = vmul.f32 %v5060_v44, %v1988_v6 }
 0x7cf   :  { %v6414_v46 = vadd.f32 %v1990_v15, %v1989_v1 }
 0x7d1   :  { %4770 = vmatmul.msk.f32.vlgmr.msrb.gmra.mxu0 %vm309_vm0, %v6414_v46  ;;  %4771 = vmatmul.msk.f32.vlgmr.msrb.gmra.mxu1 %vm309_vm0, %v6414_v46 }
 0x7d2   :  { %4774 = vmatmul.msk.f32.vlgmr.msrb.gmra.mxu2 %vm309_vm0, %v6414_v46  ;;  %2316 = vmatpush.msrb.mxu0 %v6184_v58 }
 0x7d3   :  { %2346 = vmatpush.msrb.mxu1 %v5265_v2  ;;  %2366 = vmatpush.msrb.mxu2 %v6194_v8  ;;  %v2035_v8 = vld [vmem:[#allocation3 + $0x20] sm:$0xff] }
 0x7d4   :  { %2317 = vmatpush.msrb.mxu0 %v6187_v61  ;;  %v2036_v61 = vld [vmem:[#allocation3 + $0x60] sm:$0xff] }
 0x7d5   :  { %2347 = vmatpush.msrb.mxu1 %v5266_v47  ;;  %2367 = vmatpush.msrb.mxu2 %v6207_v45 }
 0x7d6   :  { %2318 = vmatpush.msrb.mxu0 %v6201_v4 }
 0x7d7   :  { %2348 = vmatpush.msrb.mxu1 %v5267_v48  ;;  %2368 = vmatpush.msrb.mxu2 %v6214_v5 }
 0x7d8   :  { %2319 = vmatpush.msrb.mxu0 %v6211_v10 }
 0x7d9   :  { %2349 = vmatpush.msrb.mxu1 %v5268_v49  ;;  %2369 = vmatpush.msrb.mxu2 %v6224_v7 }
 0x84e   :  { %v2012_v58 = vpop.f32.mrf.mxu0  ;;  %v2032_v50 = vpop.f32.mrf.mxu1 }
 0x84f   :  { %v2038_v3 = vadd.f32 %v2035_v8, %v2012_v58  ;;  %v2058_v12 = vadd.f32 %v2036_v61, %v2032_v50 }
 0x851   :  { %v4772_v24 = vmul.f32 -1.442695, %v2038_v3  ;;  %v4773_v45 = vmul.f32 -1.442695, %v2058_v12 }
 0x853   :  { %5061 = vpow2.f32 %v4772_v24 }
 0x854   :  { %5063 = vpow2.f32 %v4773_v45 }
 0x855   :  { %v2095_v21 = vpop.f32.mrf.mxu2 }
 0x856   :  { %v2096_v29 = vadd.f32 %v6318_v34, %v2095_v21 }
 0x859   :  { %v5062_v4 = vpop.eup %5061 }
 0x85a   :  { %v5064_v51 = vpop.eup %5063  ;;  %v2042_v25 = vadd.f32 1.0, %v5062_v4 }
 0x85b   :  { %v2062_v5 = vadd.f32 1.0, %v5064_v51 }
 0x85c   :  { %5065 = vrcp.f32 %v2042_v25  ;;  %v2054_v35 = vand.u32 2147483648, %v2042_v25  ;;  %v2052_v14 = vand.u32 2147483647, %v2042_v25  ;;  %vm2048_vm8 = vweird.f32 %v2042_v25 }
 0x85d   :  { %5067 = vrcp.f32 %v2062_v5  ;;  %v2074_v17 = vand.u32 2147483648, %v2062_v5  ;;  %vm2068_vm12 = vweird.f32 %v2062_v5  ;;  %v2072_v32 = vand.u32 2147483647, %v2062_v5 }
 0x85e   :  { %v2055_v28 = vor.u32 1.1754944e-38, %v2054_v35  ;;  %vm2053_vm10 = vcmp.eq.f32.partialorder %v2052_v14, 8.507059e+37 }
 0x85f   :  { %v2075_v38 = vor.u32 1.1754944e-38, %v2074_v17  ;;  %vm2073_vm14 = vcmp.eq.f32.partialorder %v2072_v32, 8.507059e+37  ;;  %v2262_v17 = vld [vmem:[#allocation3 + $0x70] sm:$0xff] }
 0x862   :  { %v5066_v10 = vpop.eup %5065 }
 0x863   :  { %v5068_v18 = vpop.eup %5067  ;;  %v2044_v26 = vmul.f32 %v5066_v10, %v2042_v25  ;;  %vm2049_vm7 = vweird.f32 %v5066_v10 }
 0x864   :  { %v2064_v7 = vmul.f32 %v5068_v18, %v2062_v5  ;;  %vm2050_vm9 = vmor %vm2048_vm8, %vm2049_vm7  ;;  %vm2069_vm11 = vweird.f32 %v5068_v18 }
 0x865   :  { %v2045_v9 = vsub.f32 1.0, %v2044_v26  ;;  %vm2070_vm13 = vmor %vm2068_vm12, %vm2069_vm11 }
 0x866   :  { %v2065_v19 = vsub.f32 1.0, %v2064_v7 }
 0x867   :  { %v2046_v11 = vmul.f32 %v5066_v10, %v2045_v9  ;;  %v2150_v9 = vld [vmem:[#allocation3 + $0xa8] sm:$0xff] }
 0x868   :  { %v2066_v20 = vmul.f32 %v5068_v18, %v2065_v19 }
 0x869   :  { %v2047_v22 = vadd.f32 %v5066_v10, %v2046_v11 }
 0x86a   :  { %v2067_v23 = vadd.f32 %v5068_v18, %v2066_v20 }
 0x86b   :  { %v2051_v0 = vsel %vm2050_vm9, %v5066_v10, %v2047_v22 }
 0x86c   :  { %v2056_v30 = vsel %vm2053_vm10, %v2055_v28, %v2051_v0  ;;  %v2071_v37 = vsel %vm2070_vm13, %v5068_v18, %v2067_v23  ;;  %v2261_v23 = vld [vmem:[#allocation3 + $0x30] sm:$0xff] }
 0x86d   :  { %v2098_v31 = vmul.f32 %v2096_v29, %v2056_v30  ;;  %v2076_v39 = vsel %vm2073_vm14, %v2075_v38, %v2071_v37 }
 0x86e   :  { %v2101_v40 = vsub.f32 1.0, %v2076_v39  ;;  %v2103_v59 = vmul.f32 %v2076_v39, %v6414_v46 }
 0x86f   :  { %v2099_v36 = vadd.f32 %v2098_v31, %v2037_v33 }
 0x871   :  { %5069 = vtanh.f32 %v2099_v36 }
 0x877   :  { %v5070_v41 = vpop.eup %5069 }
 0x878   :  { %v2102_v43 = vmul.f32 %v5070_v41, %v2101_v40 }
 0x87a   :  { %v6432_v42 = vadd.f32 %v2103_v59, %v2102_v43 }
 0x87c   :  { %4775 = vmatmul.msk.f32.vlgmr.msra.gmra.mxu3 %vm309_vm0, %v6432_v42  ;;  %4776 = vmatmul.msk.f32.vlgmr.msra.gmra.mxu0 %vm309_vm0, %v6432_v42 }
 0x87d   :  { %4779 = vmatmul.msk.f32.vlgmr.msra.gmra.mxu1 %vm309_vm0, %v6432_v42  ;;  %2429 = vmatpush.msra.mxu3 %v5269_v53 }
 0x87f   :  { %2430 = vmatpush.msra.mxu3 %v5270_v57 }
 0x881   :  { %2431 = vmatpush.msra.mxu3 %v5271_v54 }
 0x883   :  { %2432 = vmatpush.msra.mxu3 %v5272_v16 }
 0x8f9   :  { %v2145_v52 = vpop.f32.mrf.mxu0 }
 0x8fa   :  { %v2171_v56 = vadd.f32 %v2149_v55, %v2145_v52  ;;  %v2208_v24 = vpop.f32.mrf.mxu1 }
 0x8fb   :  { %v2209_v51 = vadd.f32 %v6318_v34, %v2208_v24  ;;  %v2374_v24 = vld [vmem:[#allocation3 + $0x38] sm:$0xff] }
 0x8fc   :  { %v4778_v60 = vmul.f32 -1.442695, %v2171_v56 }
 0x8fe   :  { %5071 = vpow2.f32 %v4778_v60 }
 0x8ff   :  { %v2125_v27 = vpop.f32.mrf.mxu3 }
 0x900   :  { %v2151_v63 = vadd.f32 %v2148_v62, %v2125_v27 }
 0x902   :  { %v4777_v6 = vmul.f32 -1.442695, %v2151_v63 }
 0x904   :  { %v5072_v44 = vpop.eup %5071  ;;  %5073 = vpow2.f32 %v4777_v6 }
 0x905   :  { %v2175_v1 = vadd.f32 1.0, %v5072_v44 }
 0x907   :  { %5075 = vrcp.f32 %v2175_v1  ;;  %v2187_v18 = vand.u32 2147483648, %v2175_v1  ;;  %vm2181_vm5 = vweird.f32 %v2175_v1  ;;  %v2185_v7 = vand.u32 2147483647, %v2175_v1 }
 0x909   :  { %v2188_v11 = vor.u32 1.1754944e-38, %v2187_v18  ;;  %vm2186_vm7 = vcmp.eq.f32.partialorder %v2185_v7, 8.507059e+37  ;;  %v2445_v7 = vld [vmem:[#allocation9 + $0x8] sm:$0xff] }
 0x90a   :  { %v5074_v15 = vpop.eup %5073 }
 0x90b   :  { %v2155_v46 = vadd.f32 1.0, %v5074_v15 }
 0x90d   :  { %5077 = vrcp.f32 %v2155_v46  ;;  %v5076_v2 = vpop.eup %5075  ;;  %v2167_v50 = vand.u32 2147483648, %v2155_v46  ;;  %v2165_v3 = vand.u32 2147483647, %v2155_v46  ;;  %vm2161_vm1 = vweird.f32 %v2155_v46 }
 0x90e   :  { %v2177_v47 = vmul.f32 %v5076_v2, %v2175_v1  ;;  %vm2182_vm4 = vweird.f32 %v5076_v2 }
 0x90f   :  { %v2168_v4 = vor.u32 1.1754944e-38, %v2167_v50  ;;  %vm2166_vm3 = vcmp.eq.f32.partialorder %v2165_v3, 8.507059e+37  ;;  %vm2183_vm6 = vmor %vm2181_vm5, %vm2182_vm4 }
 0x910   :  { %v2178_v58 = vsub.f32 1.0, %v2177_v47 }
 0x912   :  { %v2179_v12 = vmul.f32 %v5076_v2, %v2178_v58 }
 0x913   :  { %v5078_v48 = vpop.eup %5077 }
 0x914   :  { %v2157_v49 = vmul.f32 %v5078_v48, %v2155_v46  ;;  %vm2162_vm15 = vweird.f32 %v5078_v48  ;;  %v2180_v5 = vadd.f32 %v5076_v2, %v2179_v12 }
 0x915   :  { %vm2163_vm2 = vmor %vm2161_vm1, %vm2162_vm15 }
 0x916   :  { %v2158_v8 = vsub.f32 1.0, %v2157_v49  ;;  %v2184_v35 = vsel %vm2183_vm6, %v5076_v2, %v2180_v5  ;;  %v2263_v2 = vld [vmem:[#allocation3 + $0xb0] sm:$0xff] }
 0x917   :  { %v2189_v14 = vsel %vm2186_vm7, %v2188_v11, %v2184_v35  ;;  %v2478_v11 = vld [vmem:[#allocation12 + $0x18] sm:$0xff] }
 0x918   :  { %v2159_v61 = vmul.f32 %v5078_v48, %v2158_v8  ;;  %v2214_v20 = vsub.f32 1.0, %v2189_v14  ;;  %v2216_v28 = vmul.f32 %v2189_v14, %v6432_v42  ;;  %v2510_v14 = vld [vmem:[#allocation12 + $0x38] sm:$0xff]  ;;  %2498 = vmatpush.msra.mxu1 %v2478_v11 }
 0x91a   :  { %v2160_v45 = vadd.f32 %v5078_v48, %v2159_v61 }
 0x91c   :  { %v2164_v25 = vsel %vm2163_vm2, %v5078_v48, %v2160_v45 }
 0x91d   :  { %v2169_v10 = vsel %vm2166_vm3, %v2168_v4, %v2164_v25  ;;  %v2375_v25 = vld [vmem:[#allocation3 + $0x78] sm:$0xff] }
 0x91e   :  { %v2211_v26 = vmul.f32 %v2209_v51, %v2169_v10  ;;  %v2447_v10 = vld [vmem:[#allocation9 + $0x18] sm:$0xff] }
 0x91f   :  { %2467 = vmatpush.msra.mxu0 %v2447_v10  ;;  %v6501_v10 = vld [vmem:[#allocation13 + $0x40] sm:$0xff] }
 0x920   :  { %v2212_v19 = vadd.f32 %v2211_v26, %v2150_v9  ;;  %v2446_v26 = vld [vmem:[#allocation9 + $0x10] sm:$0xff] }
 0x921   :  { %2468 = vmatpush.msra.mxu0 %v2446_v26 }
 0x922   :  { %5079 = vtanh.f32 %v2212_v19  ;;  %v2444_v19 = vld [vmem:[#allocation9] sm:$0xff] }
 0x923   :  { %2469 = vmatpush.msra.mxu0 %v2445_v7 }
 0x925   :  { %2470 = vmatpush.msra.mxu0 %v2444_v19 }
 0x928   :  { %v5080_v21 = vpop.eup %5079 }
 0x929   :  { %v2215_v22 = vmul.f32 %v5080_v21, %v2214_v20  ;;  %v2540_v20 = vld [vmem:[#allocation12 + $0x58] sm:$0xff]  ;;  %v2477_v21 = vld [vmem:[#allocation12 + $0x10] sm:$0xff] }
 0x92a   :  { %2499 = vmatpush.msra.mxu1 %v2477_v21 }
 0x92b   :  { %v2217_v0 = vadd.f32 %v2216_v28, %v2215_v22  ;;  %v6454_v22 = vld [vmem:[#allocation13 + $0x18] sm:$0xff]  ;;  %v2509_v28 = vld [vmem:[#allocation12 + $0x30] sm:$0xff] }
 0x92d   :  { %4780 = vmatmul.msk.f32.vlgmr.msra.gmra.mxu2 %vm309_vm0, %v2217_v0  ;;  %4781 = vmatmul.msk.f32.vlgmr.msrb.gmra.mxu3 %vm309_vm0, %v2217_v0 }
 0x92e   :  { %4784 = vmatmul.msk.f32.vlgmr.msrb.gmra.mxu0 %vm309_vm0, %v2217_v0  ;;  %2528 = vmatpush.msra.mxu2 %v2510_v14 }
 0x92f   :  { %2558 = vmatpush.msrb.mxu3 %v2540_v20  ;;  %2596 = vmatpush.msrb.mxu0 %v6454_v22  ;;  %v4934_v20 = vld [vmem:[#allocation15 + $0x1] ss:$0 sm:$0xff] }
 0x930   :  { %2529 = vmatpush.msra.mxu2 %v2509_v28 }
 0x9ab   :  { %v2321_v55 = vpop.f32.mrf.mxu0 }
 0x9ac   :  { %v2322_v62 = vadd.f32 %v6318_v34, %v2321_v55 }
 0x9b0   :  { %v2238_v29 = vpop.f32.mrf.mxu2  ;;  %v2258_v30 = vpop.f32.mrf.mxu3 }
 0x9b1   :  { %v2264_v31 = vadd.f32 %v2261_v23, %v2238_v29  ;;  %v2284_v32 = vadd.f32 %v2262_v17, %v2258_v30  ;;  %v2476_v29 = vld [vmem:[#allocation12 + $0x8] sm:$0xff]  ;;  %v6457_v23 = vld [vmem:[#allocation13 + $0x10] sm:$0xff] }
 0x9b2   :  { %2597 = vmatpush.msrb.mxu0 %v6457_v23  ;;  %2500 = vmatpush.msra.mxu1 %v2476_v29 }
 0x9b3   :  { %v4782_v33 = vmul.f32 -1.442695, %v2264_v31  ;;  %v4783_v36 = vmul.f32 -1.442695, %v2284_v32 }
 0x9b5   :  { %5081 = vpow2.f32 %v4782_v33 }
 0x9b6   :  { %5083 = vpow2.f32 %v4783_v36 }
 0x9bb   :  { %v5082_v37 = vpop.eup %5081 }
 0x9bc   :  { %v5084_v38 = vpop.eup %5083  ;;  %v2268_v39 = vadd.f32 1.0, %v5082_v37 }
 0x9bd   :  { %v2288_v40 = vadd.f32 1.0, %v5084_v38 }
 0x9be   :  { %5085 = vrcp.f32 %v2268_v39  ;;  %v2280_v57 = vand.u32 2147483648, %v2268_v39  ;;  %v2278_v52 = vand.u32 2147483647, %v2268_v39  ;;  %vm2274_vm9 = vweird.f32 %v2268_v39 }
 0x9bf   :  { %5087 = vrcp.f32 %v2288_v40  ;;  %v2300_v15 = vand.u32 2147483648, %v2288_v40  ;;  %vm2294_vm13 = vweird.f32 %v2288_v40  ;;  %v2298_v46 = vand.u32 2147483647, %v2288_v40 }
 0x9c0   :  { %v2281_v27 = vor.u32 1.1754944e-38, %v2280_v57  ;;  %vm2279_vm11 = vcmp.eq.f32.partialorder %v2278_v52, 8.507059e+37  ;;  %v5273_v57 = vld [vmem:[%s7044_s8] ss:$0 sm:$0xff] }
 0x9c1   :  { %v2301_v49 = vor.u32 1.1754944e-38, %v2300_v15  ;;  %vm2299_vm15 = vcmp.eq.f32.partialorder %v2298_v46, 8.507059e+37 }
 0x9c4   :  { %v5086_v41 = vpop.eup %5085 }
 0x9c5   :  { %v5088_v43 = vpop.eup %5087  ;;  %v2270_v59 = vmul.f32 %v5086_v41, %v2268_v39  ;;  %vm2275_vm8 = vweird.f32 %v5086_v41 }
 0x9c6   :  { %v2290_v42 = vmul.f32 %v5088_v43, %v2288_v40  ;;  %vm2276_vm10 = vmor %vm2274_vm9, %vm2275_vm8  ;;  %vm2295_vm12 = vweird.f32 %v5088_v43 }
 0x9c7   :  { %v2271_v53 = vsub.f32 1.0, %v2270_v59  ;;  %vm2296_vm14 = vmor %vm2294_vm13, %vm2295_vm12 }
 0x9c8   :  { %v2291_v54 = vsub.f32 1.0, %v2290_v42 }
 0x9c9   :  { %v2272_v16 = vmul.f32 %v5086_v41, %v2271_v53 }
 0x9ca   :  { %v2292_v56 = vmul.f32 %v5088_v43, %v2291_v54 }
 0x9cb   :  { %v2273_v60 = vadd.f32 %v5086_v41, %v2272_v16 }
 0x9cc   :  { %v2293_v44 = vadd.f32 %v5088_v43, %v2292_v56 }
 0x9cd   :  { %v2277_v63 = vsel %vm2276_vm10, %v5086_v41, %v2273_v60 }
 0x9ce   :  { %v2282_v6 = vsel %vm2279_vm11, %v2281_v27, %v2277_v63  ;;  %v2297_v48 = vsel %vm2296_vm14, %v5088_v43, %v2293_v44  ;;  %v2376_v27 = vld [vmem:[#allocation3 + $0xb8] sm:$0xff] }
 0x9cf   :  { %v2324_v1 = vmul.f32 %v2322_v62, %v2282_v6  ;;  %v2302_v58 = vsel %vm2299_vm15, %v2301_v49, %v2297_v48  ;;  %v2508_v49 = vld [vmem:[#allocation12 + $0x28] sm:$0xff] }
 0x9d0   :  { %v2327_v8 = vsub.f32 1.0, %v2302_v58  ;;  %v2329_v61 = vmul.f32 %v2302_v58, %v2217_v0  ;;  %v2539_v0 = vld [vmem:[#allocation12 + $0x50] sm:$0xff]  ;;  %v2538_v58 = vld [vmem:[#allocation12 + $0x48] sm:$0xff]  ;;  %2530 = vmatpush.msra.mxu2 %v2508_v49 }
 0x9d1   :  { %v2325_v47 = vadd.f32 %v2324_v1, %v2263_v2  ;;  %2559 = vmatpush.msrb.mxu3 %v2539_v0 }
 0x9d3   :  { %5089 = vtanh.f32 %v2325_v47  ;;  %2560 = vmatpush.msrb.mxu3 %v2538_v58 }
 0x9d9   :  { %v5090_v50 = vpop.eup %5089 }
 0x9da   :  { %v2328_v34 = vmul.f32 %v5090_v50, %v2327_v8  ;;  %v2475_v8 = vld [vmem:[#allocation12] sm:$0xff]  ;;  %v6465_v50 = vld [vmem:[#allocation13 + $0x8] sm:$0xff] }
 0x9db   :  { %2501 = vmatpush.msra.mxu1 %v2475_v8  ;;  %2598 = vmatpush.msrb.mxu0 %v6465_v50 }
 0x9dc   :  { %v6446_v3 = vadd.f32 %v2329_v61, %v2328_v34  ;;  %v2507_v34 = vld [vmem:[#allocation12 + $0x20] sm:$0xff] }
 0x9dd   :  { %v2537_v61 = vld [vmem:[#allocation12 + $0x40] sm:$0xff]  ;;  %2531 = vmatpush.msra.mxu2 %v2507_v34 }
 0x9de   :  { %4785 = vmatmul.msk.f32.vlgmr.msrb.gmra.mxu1 %vm309_vm0, %v6446_v3  ;;  %4786 = vmatmul.msk.f32.vlgmr.msrb.gmra.mxu2 %vm309_vm0, %v6446_v3 }
 0x9df   :  { %4789 = vmatmul.msk.f32.vlgmr.msra.gmra.mxu3 %vm309_vm0, %v6446_v3 }
 0x9e0   :  { %2561 = vmatpush.msrb.mxu3 %v2537_v61 }
 0x9e2   :  { %2707 = vmatpush.msra.mxu3 %v6454_v22 }
 0x9e4   :  { %2708 = vmatpush.msra.mxu3 %v6457_v23 }
 0x9e6   :  { %2709 = vmatpush.msra.mxu3 %v6465_v50 }
 0xa5b   :  { %v2351_v12 = vpop.f32.mrf.mxu1 }
 0xa5c   :  { %v2377_v45 = vadd.f32 %v2374_v24, %v2351_v12  ;;  %v6468_v12 = vld [vmem:[#allocation13] sm:$0xff]  ;;  %v6472_v24 = vld [vmem:[#allocation13 + $0x30] sm:$0xff] }
 0xa5d   :  { %2599 = vmatpush.msrb.mxu0 %v6468_v12  ;;  %2710 = vmatpush.msra.mxu3 %v6468_v12 }
 0xa5e   :  { %v4787_v4 = vmul.f32 -1.442695, %v2377_v45  ;;  %v6478_v45 = vld [vmem:[#allocation13 + $0x28] sm:$0xff] }
 0xa60   :  { %5091 = vpow2.f32 %v4787_v4  ;;  %v6483_v4 = vld [vmem:[#allocation13 + $0x20] sm:$0xff] }
 0xa61   :  { %v2371_v51 = vpop.f32.mrf.mxu2 }
 0xa62   :  { %v2397_v5 = vadd.f32 %v2375_v25, %v2371_v51  ;;  %v2434_v40 = vpop.f32.mrf.mxu3  ;;  %v6490_v51 = vld [vmem:[#allocation13 + $0x58] sm:$0xff]  ;;  %v6492_v25 = vld [vmem:[#allocation13 + $0x50] sm:$0xff] }
 0xa63   :  { %v2435_v54 = vadd.f32 %v5273_v57, %v2434_v40  ;;  %2676 = vmatpush.msrb.mxu2 %v6490_v51  ;;  %v4935_v57 = vld [vmem:[#allocation15 + $0x2] ss:$0 sm:$0xff] }
 0xa64   :  { %v4788_v18 = vmul.f32 -1.442695, %v2397_v5  ;;  %v6496_v5 = vld [vmem:[#allocation13 + $0x48] sm:$0xff] }
 0xa65   :  { %2677 = vmatpush.msrb.mxu2 %v6492_v25 }
 0xa66   :  { %v5092_v9 = vpop.eup %5091  ;;  %5093 = vpow2.f32 %v4788_v18  ;;  %v4932_v18 = vld [vmem:[#allocation10] ss:$0 sm:$0xff] }
 0xa67   :  { %v2381_v35 = vadd.f32 1.0, %v5092_v9  ;;  %2678 = vmatpush.msrb.mxu2 %v6496_v5  ;;  %v4933_v9 = vld [vmem:[#allocation15] ss:$0 sm:$0xff] }
 0xa69   :  { %5095 = vrcp.f32 %v2381_v35  ;;  %v2393_v36 = vand.u32 2147483648, %v2381_v35  ;;  %v2391_v38 = vand.u32 2147483647, %v2381_v35  ;;  %vm2387_vm2 = vweird.f32 %v2381_v35  ;;  %2679 = vmatpush.msrb.mxu2 %v6501_v10 }
 0xa6b   :  { %v2394_v59 = vor.u32 1.1754944e-38, %v2393_v36  ;;  %vm2392_vm4 = vcmp.eq.f32.partialorder %v2391_v38, 8.507059e+37 }
 0xa6c   :  { %v5094_v30 = vpop.eup %5093 }
 0xa6d   :  { %v2401_v17 = vadd.f32 1.0, %v5094_v30 }
 0xa6f   :  { %v5096_v31 = vpop.eup %5095  ;;  %5097 = vrcp.f32 %v2401_v17  ;;  %v2413_v55 = vand.u32 2147483648, %v2401_v17  ;;  %v2411_v60 = vand.u32 2147483647, %v2401_v17  ;;  %vm2407_vm6 = vweird.f32 %v2401_v17 }
 0xa70   :  { %v2383_v32 = vmul.f32 %v5096_v31, %v2381_v35  ;;  %vm2388_vm1 = vweird.f32 %v5096_v31 }
 0xa71   :  { %vm2389_vm3 = vmor %vm2387_vm2, %vm2388_vm1  ;;  %v2414_v6 = vor.u32 1.1754944e-38, %v2413_v55  ;;  %vm2412_vm8 = vcmp.eq.f32.partialorder %v2411_v60, 8.507059e+37 }
 0xa72   :  { %v2384_v33 = vsub.f32 1.0, %v2383_v32 }
 0xa74   :  { %v2385_v37 = vmul.f32 %v5096_v31, %v2384_v33 }
 0xa75   :  { %v5098_v39 = vpop.eup %5097 }
 0xa76   :  { %v2403_v41 = vmul.f32 %v5098_v39, %v2401_v17  ;;  %v2386_v43 = vadd.f32 %v5096_v31, %v2385_v37  ;;  %vm2408_vm5 = vweird.f32 %v5098_v39 }
 0xa77   :  { %vm2409_vm7 = vmor %vm2407_vm6, %vm2408_vm5 }
 0xa78   :  { %v2404_v42 = vsub.f32 1.0, %v2403_v41  ;;  %v2390_v53 = vsel %vm2389_vm3, %v5096_v31, %v2386_v43 }
 0xa79   :  { %v2395_v16 = vsel %vm2392_vm4, %v2394_v59, %v2390_v53 }
 0xa7a   :  { %v2405_v52 = vmul.f32 %v5098_v39, %v2404_v42  ;;  %v2437_v56 = vmul.f32 %v2435_v54, %v2395_v16 }
 0xa7c   :  { %v2406_v62 = vadd.f32 %v5098_v39, %v2405_v52  ;;  %v2438_v63 = vadd.f32 %v2437_v56, %v2376_v27 }
 0xa7e   :  { %v2410_v44 = vsel %vm2409_vm7, %v5098_v39, %v2406_v62  ;;  %5099 = vtanh.f32 %v2438_v63  ;;  %v6542_v39 = vld [vmem:[%s7050_s14] ss:$0 sm:$0xff] }
 0xa7f   :  { %v2415_v1 = vsel %vm2412_vm8, %v2414_v6, %v2410_v44 }
 0xa80   :  { %v2440_v15 = vsub.f32 1.0, %v2415_v1  ;;  %v2442_v47 = vmul.f32 %v2415_v1, %v6446_v3  ;;  %v6470_v3 = vld [vmem:[#allocation13 + $0x38] sm:$0xff] }
 0xa81   :  { %2616 = vmatpush.msrb.mxu1 %v6470_v3 }
 0xa83   :  { %2617 = vmatpush.msrb.mxu1 %v6472_v24 }
 0xa84   :  { %v5100_v46 = vpop.eup %5099 }
 0xa85   :  { %v2441_v2 = vmul.f32 %v5100_v46, %v2440_v15  ;;  %2618 = vmatpush.msrb.mxu1 %v6478_v45 }
 0xa87   :  { %v2443_v48 = vadd.f32 %v2442_v47, %v2441_v2  ;;  %2619 = vmatpush.msrb.mxu1 %v6483_v4 }
 0xa89   :  { %4790 = vmatmul.msk.f32.vlgmr.msra.gmra.mxu0 %vm309_vm0, %v2443_v48 }
 0xa8a   :  { %2727 = vmatpush.msra.mxu0 %v6470_v3 }
 0xa8c   :  { %2728 = vmatpush.msra.mxu0 %v6472_v24 }
 0xa8e   :  { %2729 = vmatpush.msra.mxu0 %v6478_v45 }
 0xa90   :  { %2730 = vmatpush.msra.mxu0 %v6483_v4 }
 0xa91   :  { %2600 = vmatmul.f32.vlgmr.msrb.gmra.mxu0 %v5576_v13 }
 0xa92   :  { %2898 = vmatpush.msrb.mxu0 %v6490_v51 }
 0xa94   :  { %2899 = vmatpush.msrb.mxu0 %v6492_v25 }
 0xa96   :  { %2900 = vmatpush.msrb.mxu0 %v6496_v5 }
 0xa98   :  { %2901 = vmatpush.msrb.mxu0 %v6501_v10 }
 0xb06   :  { %v2472_v26 = vpop.f32.mrf.mxu0 }
 0xb07   :  { %v2473_v7 = vadd.f32 %v4932_v18, %v2472_v26 }
 0xb09   :  { %4791 = vmatmul.msk.f32.vlgmr.msra.gmra.mxu1 %vm309_vm0, %v2473_v7  ;;  %4792 = vmatmul.msk.f32.vlgmr.msra.gmra.mxu2 %vm309_vm0, %v2473_v7 }
 0xb0a   :  { %4793 = vmatmul.msk.f32.vlgmr.msrb.gmra.mxu3 %vm309_vm0, %v2473_v7  ;;  %2787 = vmatpush.msra.mxu1 %v6490_v51 }
 0xb0b   :  { %2818 = vmatpush.msra.mxu2 %v6454_v22  ;;  %2838 = vmatpush.msrb.mxu3 %v6470_v3 }
 0xb0c   :  { %2788 = vmatpush.msra.mxu1 %v6492_v25 }
 0xb0d   :  { %2819 = vmatpush.msra.mxu2 %v6457_v23  ;;  %2839 = vmatpush.msrb.mxu3 %v6472_v24 }
 0xb0e   :  { %2789 = vmatpush.msra.mxu1 %v6496_v5  ;;  %v2601_v35 = vpop.f32.mrf.mxu0 }
 0xb0f   :  { %2820 = vmatpush.msra.mxu2 %v6465_v50  ;;  %2840 = vmatpush.msrb.mxu3 %v6478_v45 }
 0xb10   :  { %2790 = vmatpush.msra.mxu1 %v6501_v10 }
 0xb11   :  { %2620 = vmatmul.f32.vlgmr.msrb.gmra.mxu1 %v5576_v13  ;;  %2680 = vmatmul.f32.vlgmr.msrb.gmra.mxu2 %v5576_v13 }
 0xb12   :  { %2821 = vmatpush.msra.mxu2 %v6468_v12  ;;  %2841 = vmatpush.msrb.mxu3 %v6483_v4 }
 0xb13   :  { %2929 = vmatpush.msrb.mxu1 %v6454_v22 }
 0xb14   :  { %2949 = vmatpush.msrb.mxu2 %v6470_v3 }
 0xb15   :  { %2930 = vmatpush.msrb.mxu1 %v6457_v23 }
 0xb16   :  { %2950 = vmatpush.msrb.mxu2 %v6472_v24 }
 0xb17   :  { %2931 = vmatpush.msrb.mxu1 %v6465_v50 }
 0xb18   :  { %2951 = vmatpush.msrb.mxu2 %v6478_v45 }
 0xb19   :  { %2932 = vmatpush.msrb.mxu1 %v6468_v12 }
 0xb1a   :  { %2952 = vmatpush.msrb.mxu2 %v6483_v4 }
 0xb86   :  { %v2503_v19 = vpop.f32.mrf.mxu1 }
 0xb87   :  { %v6533_v11 = vadd.f32 %v4933_v9, %v2503_v19 }
 0xb89   :  { %v2624_v14 = vadd.f32 %v2601_v35, %v6533_v11 }
 0xb8b   :  { %v4794_v21 = vmul.f32 -1.442695, %v2624_v14 }
 0xb8c   :  { %v2533_v28 = vpop.f32.mrf.mxu2 }
 0xb8d   :  { %5101 = vpow2.f32 %v4794_v21  ;;  %v6536_v0 = vadd.f32 %v4934_v20, %v2533_v28  ;;  %v2563_v54 = vpop.f32.mrf.mxu3 }
 0xb8e   :  { %v2621_v29 = vpop.f32.mrf.mxu1  ;;  %v6545_v62 = vadd.f32 %v4935_v57, %v2563_v54 }
 0xb8f   :  { %v2644_v30 = vadd.f32 %v2621_v29, %v6536_v0 }
 0xb91   :  { %v4795_v17 = vmul.f32 -1.442695, %v2644_v30 }
 0xb93   :  { %v5102_v31 = vpop.eup %5101  ;;  %5103 = vpow2.f32 %v4795_v17 }
 0xb94   :  { %v2628_v32 = vadd.f32 1.0, %v5102_v31  ;;  %v2681_v43 = vpop.f32.mrf.mxu2 }
 0xb95   :  { %v2682_v55 = vadd.f32 %v6542_v39, %v2681_v43 }
 0xb96   :  { %5105 = vrcp.f32 %v2628_v32  ;;  %v2640_v41 = vand.u32 2147483648, %v2628_v32  ;;  %v2638_v42 = vand.u32 2147483647, %v2628_v32  ;;  %vm2634_vm10 = vweird.f32 %v2628_v32 }
 0xb98   :  { %v2641_v56 = vor.u32 1.1754944e-38, %v2640_v41  ;;  %vm2639_vm12 = vcmp.eq.f32.partialorder %v2638_v42, 8.507059e+37 }
 0xb99   :  { %v5104_v33 = vpop.eup %5103 }
 0xb9a   :  { %v2648_v36 = vadd.f32 1.0, %v5104_v33 }
 0xb9c   :  { %v5106_v37 = vpop.eup %5105  ;;  %5107 = vrcp.f32 %v2648_v36  ;;  %v2660_v44 = vand.u32 2147483648, %v2648_v36  ;;  %v2658_v15 = vand.u32 2147483647, %v2648_v36  ;;  %vm2654_vm14 = vweird.f32 %v2648_v36 }
 0xb9d   :  { %v2630_v38 = vmul.f32 %v5106_v37, %v2628_v32  ;;  %vm2635_vm9 = vweird.f32 %v5106_v37 }
 0xb9e   :  { %vm2636_vm11 = vmor %vm2634_vm10, %vm2635_vm9  ;;  %v2661_v47 = vor.u32 1.1754944e-38, %v2660_v44  ;;  %vm2659_vm1 = vcmp.eq.f32.partialorder %v2658_v15, 8.507059e+37 }
 0xb9f   :  { %v2631_v40 = vsub.f32 1.0, %v2630_v38 }
 0xba1   :  { %v2632_v59 = vmul.f32 %v5106_v37, %v2631_v40 }
 0xba2   :  { %v5108_v53 = vpop.eup %5107 }
 0xba3   :  { %v2650_v16 = vmul.f32 %v5108_v53, %v2648_v36  ;;  %v2633_v52 = vadd.f32 %v5106_v37, %v2632_v59  ;;  %vm2655_vm13 = vweird.f32 %v5108_v53 }
 0xba4   :  { %vm2656_vm15 = vmor %vm2654_vm14, %vm2655_vm13 }
 0xba5   :  { %v2651_v60 = vsub.f32 1.0, %v2650_v16  ;;  %v2637_v27 = vsel %vm2636_vm11, %v5106_v37, %v2633_v52 }
 0xba6   :  { %v2642_v63 = vsel %vm2639_vm12, %v2641_v56, %v2637_v27 }
 0xba7   :  { %v2652_v6 = vmul.f32 %v5108_v53, %v2651_v60  ;;  %v2684_v1 = vmul.f32 %v2682_v55, %v2642_v63 }
 0xba9   :  { %v2653_v46 = vadd.f32 %v5108_v53, %v2652_v6  ;;  %v2685_v2 = vadd.f32 %v2684_v1, %v6545_v62 }
 0xbab   :  { %v2657_v48 = vsel %vm2656_vm15, %v5108_v53, %v2653_v46  ;;  %5109 = vtanh.f32 %v2685_v2 }
 0xbac   :  { %v2662_v49 = vsel %vm2659_vm1, %v2661_v47, %v2657_v48 }
 0xbad   :  { %v2687_v58 = vsub.f32 1.0, %v2662_v49  ;;  %v2689_v61 = vmul.f32 0.0, %v2662_v49 }
 0xbb1   :  { %v5110_v8 = vpop.eup %5109 }
 0xbb2   :  { %v2688_v34 = vmul.f32 %v5110_v8, %v2687_v58 }
 0xbb4   :  { %v6548_v18 = vadd.f32 %v2689_v61, %v2688_v34 }
 0xbb6   :  { %2691 = vst.msk [vmem:[#allocation2] sm:$0xff] %vm309_vm0, %v6548_v18  ;;  %4796 = vmatmul.msk.f32.vlgmr.msra.gmra.mxu3 %vm309_vm0, %v6548_v18  ;;  %4797 = vmatmul.msk.f32.vlgmr.msra.gmra.mxu0 %vm309_vm0, %v6548_v18 }
 0xbb7   :  { %4800 = vmatmul.msk.f32.vlgmr.msra.gmra.mxu1 %vm309_vm0, %v6548_v18  ;;  %3009 = vmatpush.msra.mxu3 %v6490_v51 }
 0xbb8   :  { %3040 = vmatpush.msra.mxu0 %v6454_v22  ;;  %3060 = vmatpush.msra.mxu1 %v6470_v3 }
 0xbb9   :  { %3010 = vmatpush.msra.mxu3 %v6492_v25 }
 0xbba   :  { %3041 = vmatpush.msra.mxu0 %v6457_v23  ;;  %3061 = vmatpush.msra.mxu1 %v6472_v24 }
 0xbbb   :  { %3011 = vmatpush.msra.mxu3 %v6496_v5 }
 0xbbc   :  { %3042 = vmatpush.msra.mxu0 %v6465_v50  ;;  %3062 = vmatpush.msra.mxu1 %v6478_v45 }
 0xbbd   :  { %3012 = vmatpush.msra.mxu3 %v6501_v10 }
 0xbbe   :  { %3043 = vmatpush.msra.mxu0 %v6468_v12  ;;  %3063 = vmatpush.msra.mxu1 %v6483_v4 }
 0xc33   :  { %v2732_v26 = vpop.f32.mrf.mxu0 }
 0xc34   :  { %v2755_v7 = vadd.f32 %v2732_v26, %v6536_v0  ;;  %v2792_v43 = vpop.f32.mrf.mxu1 }
 0xc35   :  { %v2793_v53 = vadd.f32 %v6542_v39, %v2792_v43 }
 0xc36   :  { %v4799_v9 = vmul.f32 -1.442695, %v2755_v7 }
 0xc38   :  { %5111 = vpow2.f32 %v4799_v9 }
 0xc39   :  { %v2712_v19 = vpop.f32.mrf.mxu3 }
 0xc3a   :  { %v2735_v35 = vadd.f32 %v2712_v19, %v6533_v11 }
 0xc3c   :  { %v4798_v14 = vmul.f32 -1.442695, %v2735_v35 }
 0xc3e   :  { %v5112_v20 = vpop.eup %5111  ;;  %5113 = vpow2.f32 %v4798_v14 }
 0xc3f   :  { %v2759_v21 = vadd.f32 1.0, %v5112_v20 }
 0xc41   :  { %5115 = vrcp.f32 %v2759_v21  ;;  %v2771_v52 = vand.u32 2147483648, %v2759_v21  ;;  %vm2765_vm7 = vweird.f32 %v2759_v21  ;;  %v2769_v56 = vand.u32 2147483647, %v2759_v21 }
 0xc43   :  { %v2772_v63 = vor.u32 1.1754944e-38, %v2771_v52  ;;  %vm2770_vm9 = vcmp.eq.f32.partialorder %v2769_v56, 8.507059e+37 }
 0xc44   :  { %v5114_v28 = vpop.eup %5113 }
 0xc45   :  { %v2739_v29 = vadd.f32 1.0, %v5114_v28 }
 0xc47   :  { %5117 = vrcp.f32 %v2739_v29  ;;  %v5116_v30 = vpop.eup %5115  ;;  %v2751_v37 = vand.u32 2147483648, %v2739_v29  ;;  %v2749_v40 = vand.u32 2147483647, %v2739_v29  ;;  %vm2745_vm3 = vweird.f32 %v2739_v29 }
 0xc48   :  { %v2761_v17 = vmul.f32 %v5116_v30, %v2759_v21  ;;  %vm2766_vm6 = vweird.f32 %v5116_v30 }
 0xc49   :  { %v2752_v42 = vor.u32 1.1754944e-38, %v2751_v37  ;;  %vm2750_vm5 = vcmp.eq.f32.partialorder %v2749_v40, 8.507059e+37  ;;  %vm2767_vm8 = vmor %vm2765_vm7, %vm2766_vm6 }
 0xc4a   :  { %v2762_v33 = vsub.f32 1.0, %v2761_v17 }
 0xc4c   :  { %v2763_v41 = vmul.f32 %v5116_v30, %v2762_v33 }
 0xc4d   :  { %v5118_v31 = vpop.eup %5117 }
 0xc4e   :  { %v2741_v32 = vmul.f32 %v5118_v31, %v2739_v29  ;;  %vm2746_vm2 = vweird.f32 %v5118_v31  ;;  %v2764_v54 = vadd.f32 %v5116_v30, %v2763_v41 }
 0xc4f   :  { %vm2747_vm4 = vmor %vm2745_vm3, %vm2746_vm2 }
 0xc50   :  { %v2742_v36 = vsub.f32 1.0, %v2741_v32  ;;  %v2768_v27 = vsel %vm2767_vm8, %v5116_v30, %v2764_v54 }
 0xc51   :  { %v2773_v6 = vsel %vm2770_vm9, %v2772_v63, %v2768_v27 }
 0xc52   :  { %v2743_v38 = vmul.f32 %v5118_v31, %v2742_v36  ;;  %v2798_v44 = vsub.f32 1.0, %v2773_v6  ;;  %v2800_v46 = vmul.f32 %v2773_v6, %v6548_v18 }
 0xc54   :  { %v2744_v59 = vadd.f32 %v5118_v31, %v2743_v38 }
 0xc56   :  { %v2748_v57 = vsel %vm2747_vm4, %v5118_v31, %v2744_v59 }
 0xc57   :  { %v2753_v16 = vsel %vm2750_vm5, %v2752_v42, %v2748_v57 }
 0xc58   :  { %v2795_v55 = vmul.f32 %v2793_v53, %v2753_v16 }
 0xc5a   :  { %v2796_v60 = vadd.f32 %v2795_v55, %v6545_v62 }
 0xc5c   :  { %5119 = vtanh.f32 %v2796_v60 }
 0xc62   :  { %v5120_v1 = vpop.eup %5119 }
 0xc63   :  { %v2799_v15 = vmul.f32 %v5120_v1, %v2798_v44 }
 0xc65   :  { %v6575_v2 = vadd.f32 %v2800_v46, %v2799_v15 }
 0xc67   :  { %2802 = vst.msk [vmem:[#allocation2 + $0x8] sm:$0xff] %vm309_vm0, %v6575_v2  ;;  %4801 = vmatmul.msk.f32.vlgmr.msra.gmra.mxu2 %vm309_vm0, %v6575_v2  ;;  %4802 = vmatmul.msk.f32.vlgmr.msrb.gmra.mxu3 %vm309_vm0, %v6575_v2 }
 0xc68   :  { %4805 = vmatmul.msk.f32.vlgmr.msrb.gmra.mxu0 %vm309_vm0, %v6575_v2  ;;  %3120 = vmatpush.msra.mxu2 %v6490_v51 }
 0xc69   :  { %3151 = vmatpush.msrb.mxu3 %v6454_v22  ;;  %3171 = vmatpush.msrb.mxu0 %v6470_v3 }
 0xc6a   :  { %3121 = vmatpush.msra.mxu2 %v6492_v25 }
 0xc6b   :  { %3152 = vmatpush.msrb.mxu3 %v6457_v23  ;;  %3172 = vmatpush.msrb.mxu0 %v6472_v24 }
 0xc6c   :  { %3122 = vmatpush.msra.mxu2 %v6496_v5 }
 0xc6d   :  { %3153 = vmatpush.msrb.mxu3 %v6465_v50  ;;  %3173 = vmatpush.msrb.mxu0 %v6478_v45 }
 0xc6e   :  { %3123 = vmatpush.msra.mxu2 %v6501_v10 }
 0xc6f   :  { %3154 = vmatpush.msrb.mxu3 %v6468_v12  ;;  %3174 = vmatpush.msrb.mxu0 %v6483_v4 }
 0xce5   :  { %v2903_v17 = vpop.f32.mrf.mxu0 }
 0xce6   :  { %v2904_v36 = vadd.f32 %v6542_v39, %v2903_v17 }
 0xcea   :  { %v2823_v47 = vpop.f32.mrf.mxu2  ;;  %v2843_v48 = vpop.f32.mrf.mxu3 }
 0xceb   :  { %v2846_v49 = vadd.f32 %v2823_v47, %v6533_v11  ;;  %v2866_v58 = vadd.f32 %v2843_v48, %v6536_v0 }
 0xced   :  { %v4803_v8 = vmul.f32 -1.442695, %v2846_v49  ;;  %v4804_v34 = vmul.f32 -1.442695, %v2866_v58 }
 0xcef   :  { %5121 = vpow2.f32 %v4803_v8 }
 0xcf0   :  { %5123 = vpow2.f32 %v4804_v34 }
 0xcf5   :  { %v5122_v61 = vpop.eup %5121 }
 0xcf6   :  { %v5124_v18 = vpop.eup %5123  ;;  %v2850_v26 = vadd.f32 1.0, %v5122_v61 }
 0xcf7   :  { %v2870_v7 = vadd.f32 1.0, %v5124_v18 }
 0xcf8   :  { %5125 = vrcp.f32 %v2850_v26  ;;  %v2862_v21 = vand.u32 2147483648, %v2850_v26  ;;  %v2860_v30 = vand.u32 2147483647, %v2850_v26  ;;  %vm2856_vm11 = vweird.f32 %v2850_v26 }
 0xcf9   :  { %5127 = vrcp.f32 %v2870_v7  ;;  %v2882_v43 = vand.u32 2147483648, %v2870_v7  ;;  %vm2876_vm15 = vweird.f32 %v2870_v7  ;;  %v2880_v59 = vand.u32 2147483647, %v2870_v7 }
 0xcfa   :  { %v2863_v33 = vor.u32 1.1754944e-38, %v2862_v21  ;;  %vm2861_vm13 = vcmp.eq.f32.partialorder %v2860_v30, 8.507059e+37 }
 0xcfb   :  { %v2883_v57 = vor.u32 1.1754944e-38, %v2882_v43  ;;  %vm2881_vm2 = vcmp.eq.f32.partialorder %v2880_v59, 8.507059e+37 }
 0xcfe   :  { %v5126_v9 = vpop.eup %5125 }
 0xcff   :  { %v5128_v19 = vpop.eup %5127  ;;  %v2852_v35 = vmul.f32 %v5126_v9, %v2850_v26  ;;  %vm2857_vm10 = vweird.f32 %v5126_v9 }
 0xd00   :  { %v2872_v14 = vmul.f32 %v5128_v19, %v2870_v7  ;;  %vm2858_vm12 = vmor %vm2856_vm11, %vm2857_vm10  ;;  %vm2877_vm14 = vweird.f32 %v5128_v19 }
 0xd01   :  { %v2853_v20 = vsub.f32 1.0, %v2852_v35  ;;  %vm2878_vm1 = vmor %vm2876_vm15, %vm2877_vm14 }
 0xd02   :  { %v2873_v28 = vsub.f32 1.0, %v2872_v14 }
 0xd03   :  { %v2854_v29 = vmul.f32 %v5126_v9, %v2853_v20 }
 0xd04   :  { %v2874_v31 = vmul.f32 %v5128_v19, %v2873_v28 }
 0xd05   :  { %v2855_v32 = vadd.f32 %v5126_v9, %v2854_v29 }
 0xd06   :  { %v2875_v40 = vadd.f32 %v5128_v19, %v2874_v31 }
 0xd07   :  { %v2859_v37 = vsel %vm2858_vm12, %v5126_v9, %v2855_v32 }
 0xd08   :  { %v2864_v38 = vsel %vm2861_vm13, %v2863_v33, %v2859_v37  ;;  %v2879_v53 = vsel %vm2878_vm1, %v5128_v19, %v2875_v40 }
 0xd09   :  { %v2906_v41 = vmul.f32 %v2904_v36, %v2864_v38  ;;  %v2884_v54 = vsel %vm2881_vm2, %v2883_v57, %v2879_v53 }
 0xd0a   :  { %v2909_v16 = vsub.f32 1.0, %v2884_v54  ;;  %v2911_v56 = vmul.f32 %v2884_v54, %v6575_v2 }
 0xd0b   :  { %v2907_v42 = vadd.f32 %v2906_v41, %v6545_v62 }
 0xd0d   :  { %5129 = vtanh.f32 %v2907_v42 }
 0xd13   :  { %v5130_v52 = vpop.eup %5129 }
 0xd14   :  { %v2910_v55 = vmul.f32 %v5130_v52, %v2909_v16 }
 0xd16   :  { %v6602_v60 = vadd.f32 %v2911_v56, %v2910_v55 }
 0xd18   :  { %2913 = vst.msk [vmem:[#allocation2 + $0x10] sm:$0xff] %vm309_vm0, %v6602_v60  ;;  %4806 = vmatmul.msk.f32.vlgmr.msrb.gmra.mxu1 %vm309_vm0, %v6602_v60  ;;  %4807 = vmatmul.msk.f32.vlgmr.msrb.gmra.mxu2 %vm309_vm0, %v6602_v60 }
 0xd19   :  { %4810 = vmatmul.msk.f32.vlgmr.msra.gmra.mxu3 %vm309_vm0, %v6602_v60  ;;  %3231 = vmatpush.msrb.mxu1 %v6490_v51 }
 0xd1a   :  { %3262 = vmatpush.msrb.mxu2 %v6454_v22  ;;  %3282 = vmatpush.msra.mxu3 %v6470_v3 }
 0xd1b   :  { %3232 = vmatpush.msrb.mxu1 %v6492_v25 }
 0xd1c   :  { %3263 = vmatpush.msrb.mxu2 %v6457_v23  ;;  %3283 = vmatpush.msra.mxu3 %v6472_v24 }
 0xd1d   :  { %3233 = vmatpush.msrb.mxu1 %v6496_v5 }
 0xd1e   :  { %3264 = vmatpush.msrb.mxu2 %v6465_v50  ;;  %3284 = vmatpush.msra.mxu3 %v6478_v45 }
 0xd1f   :  { %3234 = vmatpush.msrb.mxu1 %v6501_v10 }
 0xd20   :  { %3265 = vmatpush.msrb.mxu2 %v6468_v12  ;;  %3285 = vmatpush.msra.mxu3 %v6483_v4 }
 0xd95   :  { %v2934_v27 = vpop.f32.mrf.mxu1 }
 0xd96   :  { %v2957_v63 = vadd.f32 %v2934_v27, %v6533_v11 }
 0xd98   :  { %v4808_v6 = vmul.f32 -1.442695, %v2957_v63 }
 0xd9a   :  { %5131 = vpow2.f32 %v4808_v6 }
 0xd9b   :  { %v2954_v44 = vpop.f32.mrf.mxu2 }
 0xd9c   :  { %v2977_v1 = vadd.f32 %v2954_v44, %v6536_v0  ;;  %v3014_v7 = vpop.f32.mrf.mxu3 }
 0xd9d   :  { %v3015_v21 = vadd.f32 %v6542_v39, %v3014_v7 }
 0xd9e   :  { %v4809_v15 = vmul.f32 -1.442695, %v2977_v1 }
 0xda0   :  { %v5132_v46 = vpop.eup %5131  ;;  %5133 = vpow2.f32 %v4809_v15 }
 0xda1   :  { %v2961_v2 = vadd.f32 1.0, %v5132_v46 }
 0xda3   :  { %5135 = vrcp.f32 %v2961_v2  ;;  %v2973_v34 = vand.u32 2147483648, %v2961_v2  ;;  %v2971_v18 = vand.u32 2147483647, %v2961_v2  ;;  %vm2967_vm4 = vweird.f32 %v2961_v2 }
 0xda5   :  { %v2974_v35 = vor.u32 1.1754944e-38, %v2973_v34  ;;  %vm2972_vm6 = vcmp.eq.f32.partialorder %v2971_v18, 8.507059e+37 }
 0xda6   :  { %v5134_v47 = vpop.eup %5133 }
 0xda7   :  { %v2981_v48 = vadd.f32 1.0, %v5134_v47 }
 0xda9   :  { %v5136_v49 = vpop.eup %5135  ;;  %5137 = vrcp.f32 %v2981_v48  ;;  %v2993_v30 = vand.u32 2147483648, %v2981_v48  ;;  %v2991_v31 = vand.u32 2147483647, %v2981_v48  ;;  %vm2987_vm8 = vweird.f32 %v2981_v48 }
 0xdaa   :  { %v2963_v58 = vmul.f32 %v5136_v49, %v2961_v2  ;;  %vm2968_vm3 = vweird.f32 %v5136_v49 }
 0xdab   :  { %vm2969_vm5 = vmor %vm2967_vm4, %vm2968_vm3  ;;  %v2994_v36 = vor.u32 1.1754944e-38, %v2993_v30  ;;  %vm2992_vm10 = vcmp.eq.f32.partialorder %v2991_v31, 8.507059e+37 }
 0xdac   :  { %v2964_v8 = vsub.f32 1.0, %v2963_v58 }
 0xdae   :  { %v2965_v61 = vmul.f32 %v5136_v49, %v2964_v8 }
 0xdaf   :  { %v5138_v26 = vpop.eup %5137 }
 0xdb0   :  { %v2983_v9 = vmul.f32 %v5138_v26, %v2981_v48  ;;  %v2966_v19 = vadd.f32 %v5136_v49, %v2965_v61  ;;  %vm2988_vm7 = vweird.f32 %v5138_v26 }
 0xdb1   :  { %vm2989_vm9 = vmor %vm2987_vm8, %vm2988_vm7 }
 0xdb2   :  { %v2984_v14 = vsub.f32 1.0, %v2983_v9  ;;  %v2970_v20 = vsel %vm2969_vm5, %v5136_v49, %v2966_v19 }
 0xdb3   :  { %v2975_v28 = vsel %vm2972_vm6, %v2974_v35, %v2970_v20 }
 0xdb4   :  { %v2985_v29 = vmul.f32 %v5138_v26, %v2984_v14  ;;  %v3017_v17 = vmul.f32 %v3015_v21, %v2975_v28 }
 0xdb6   :  { %v2986_v32 = vadd.f32 %v5138_v26, %v2985_v29  ;;  %v3018_v33 = vadd.f32 %v3017_v17, %v6545_v62 }
 0xdb8   :  { %v2990_v37 = vsel %vm2989_vm9, %v5138_v26, %v2986_v32  ;;  %5139 = vtanh.f32 %v3018_v33 }
 0xdb9   :  { %v2995_v38 = vsel %vm2992_vm10, %v2994_v36, %v2990_v37  ;;  %v3479_v37 = vld [vmem:[#allocation16 + $0x10] sm:$0xff] }
 0xdba   :  { %v3020_v40 = vsub.f32 1.0, %v2995_v38  ;;  %v3022_v59 = vmul.f32 %v2995_v38, %v6602_v60 }
 0xdbe   :  { %v5140_v41 = vpop.eup %5139 }
 0xdbf   :  { %v3021_v43 = vmul.f32 %v5140_v41, %v3020_v40  ;;  %v3477_v40 = vld [vmem:[#allocation16] sm:$0xff] }
 0xdc1   :  { %v6629_v42 = vadd.f32 %v3022_v59, %v3021_v43 }
 0xdc3   :  { %3024 = vst.msk [vmem:[#allocation2 + $0x18] sm:$0xff] %vm309_vm0, %v6629_v42  ;;  %4811 = vmatmul.msk.f32.vlgmr.msra.gmra.mxu0 %vm309_vm0, %v6629_v42  ;;  %4812 = vmatmul.msk.f32.vlgmr.msra.gmra.mxu1 %vm309_vm0, %v6629_v42 }
 0xdc4   :  { %4815 = vmatmul.msk.f32.vlgmr.msra.gmra.mxu2 %vm309_vm0, %v6629_v42  ;;  %3342 = vmatpush.msra.mxu0 %v6490_v51 }
 0xdc5   :  { %3373 = vmatpush.msra.mxu1 %v6454_v22  ;;  %3393 = vmatpush.msra.mxu2 %v6470_v3 }
 0xdc6   :  { %3343 = vmatpush.msra.mxu0 %v6492_v25 }
 0xdc7   :  { %3374 = vmatpush.msra.mxu1 %v6457_v23  ;;  %3394 = vmatpush.msra.mxu2 %v6472_v24 }
 0xdc8   :  { %3344 = vmatpush.msra.mxu0 %v6496_v5 }
 0xdc9   :  { %3375 = vmatpush.msra.mxu1 %v6465_v50  ;;  %3395 = vmatpush.msra.mxu2 %v6478_v45 }
 0xdca   :  { %3345 = vmatpush.msra.mxu0 %v6501_v10 }
 0xdcb   :  { %3376 = vmatpush.msra.mxu1 %v6468_v12  ;;  %3396 = vmatpush.msra.mxu2 %v6483_v4 }
 0xe40   :  { %v3045_v22 = vpop.f32.mrf.mxu0  ;;  %v3065_v3 = vpop.f32.mrf.mxu1 }
 0xe41   :  { %v3068_v53 = vadd.f32 %v3045_v22, %v6533_v11  ;;  %v3088_v23 = vadd.f32 %v3065_v3, %v6536_v0 }
 0xe43   :  { %v4813_v57 = vmul.f32 -1.442695, %v3068_v53  ;;  %v4814_v24 = vmul.f32 -1.442695, %v3088_v23 }
 0xe45   :  { %5141 = vpow2.f32 %v4813_v57 }
 0xe46   :  { %5143 = vpow2.f32 %v4814_v24 }
 0xe47   :  { %v3125_v1 = vpop.f32.mrf.mxu2 }
 0xe48   :  { %v3126_v47 = vadd.f32 %v6542_v39, %v3125_v1 }
 0xe4b   :  { %v5142_v54 = vpop.eup %5141 }
 0xe4c   :  { %v5144_v50 = vpop.eup %5143  ;;  %v3072_v16 = vadd.f32 1.0, %v5142_v54 }
 0xe4d   :  { %v3092_v45 = vadd.f32 1.0, %v5144_v50 }
 0xe4e   :  { %5145 = vrcp.f32 %v3072_v16  ;;  %v3084_v27 = vand.u32 2147483648, %v3072_v16  ;;  %v3082_v6 = vand.u32 2147483647, %v3072_v16  ;;  %vm3078_vm12 = vweird.f32 %v3072_v16 }
 0xe4f   :  { %5147 = vrcp.f32 %v3092_v45  ;;  %v3104_v58 = vand.u32 2147483648, %v3092_v45  ;;  %vm3098_vm1 = vweird.f32 %v3092_v45  ;;  %v3102_v34 = vand.u32 2147483647, %v3092_v45 }
 0xe50   :  { %v3085_v46 = vor.u32 1.1754944e-38, %v3084_v27  ;;  %vm3083_vm14 = vcmp.eq.f32.partialorder %v3082_v6, 8.507059e+37 }
 0xe51   :  { %v3105_v26 = vor.u32 1.1754944e-38, %v3104_v58  ;;  %vm3103_vm3 = vcmp.eq.f32.partialorder %v3102_v34, 8.507059e+37 }
 0xe54   :  { %v5146_v52 = vpop.eup %5145 }
 0xe55   :  { %v5148_v12 = vpop.eup %5147  ;;  %v3074_v55 = vmul.f32 %v5146_v52, %v3072_v16  ;;  %vm3079_vm11 = vweird.f32 %v5146_v52 }
 0xe56   :  { %v3094_v4 = vmul.f32 %v5148_v12, %v3092_v45  ;;  %vm3080_vm13 = vmor %vm3078_vm12, %vm3079_vm11  ;;  %vm3099_vm15 = vweird.f32 %v5148_v12 }
 0xe57   :  { %v3075_v56 = vsub.f32 1.0, %v3074_v55  ;;  %vm3100_vm2 = vmor %vm3098_vm1, %vm3099_vm15 }
 0xe58   :  { %v3095_v60 = vsub.f32 1.0, %v3094_v4 }
 0xe59   :  { %v3076_v63 = vmul.f32 %v5146_v52, %v3075_v56 }
 0xe5a   :  { %v3096_v44 = vmul.f32 %v5148_v12, %v3095_v60 }
 0xe5b   :  { %v3077_v15 = vadd.f32 %v5146_v52, %v3076_v63 }
 0xe5c   :  { %v3097_v48 = vadd.f32 %v5148_v12, %v3096_v44 }
 0xe5d   :  { %v3081_v2 = vsel %vm3080_vm13, %v5146_v52, %v3077_v15 }
 0xe5e   :  { %v3086_v49 = vsel %vm3083_vm14, %v3085_v46, %v3081_v2  ;;  %v3101_v18 = vsel %vm3100_vm2, %v5148_v12, %v3097_v48  ;;  %v6685_v2 = vld [vmem:[#allocation2] sm:$0xff]  ;;  %v6693_v48 = vld [vmem:[#allocation2 + $0x10] sm:$0xff] }
 0xe5f   :  { %v3128_v8 = vmul.f32 %v3126_v47, %v3086_v49  ;;  %v3106_v7 = vsel %vm3103_vm3, %v3105_v26, %v3101_v18  ;;  %v6689_v47 = vld [vmem:[#allocation2 + $0x8] sm:$0xff]  ;;  %v6697_v49 = vld [vmem:[#allocation2 + $0x18] sm:$0xff]  ;;  %v6711_v26 = vld [vmem:[#allocation19] ss:$0 sm:$0xff] }
 0xe60   :  { %v3131_v9 = vsub.f32 1.0, %v3106_v7  ;;  %v3133_v14 = vmul.f32 %v3106_v7, %v6629_v42 }
 0xe61   :  { %v3129_v61 = vadd.f32 %v3128_v8, %v6545_v62 }
 0xe63   :  { %5149 = vtanh.f32 %v3129_v61 }
 0xe69   :  { %v5150_v19 = vpop.eup %5149 }
 0xe6a   :  { %v3132_v35 = vmul.f32 %v5150_v19, %v3131_v9 }
 0xe6c   :  { %v6656_v20 = vadd.f32 %v3133_v14, %v3132_v35 }
 0xe6e   :  { %3135 = vst.msk [vmem:[#allocation2 + $0x20] sm:$0xff] %vm309_vm0, %v6656_v20  ;;  %4816 = vmatmul.msk.f32.vlgmr.msrb.gmra.mxu3 %vm309_vm0, %v6656_v20  ;;  %4817 = vmatmul.msk.f32.vlgmr.msrb.gmra.mxu0 %vm309_vm0, %v6656_v20 }
 0xe6f   :  { %4820 = vmatmul.msk.f32.vlgmr.msrb.gmra.mxu1 %vm309_vm0, %v6656_v20  ;;  %3453 = vmatpush.msrb.mxu3 %v6490_v51 }
 0xe71   :  { %3454 = vmatpush.msrb.mxu3 %v6492_v25 }
 0xe73   :  { %3455 = vmatpush.msrb.mxu3 %v6496_v5  ;;  %v3480_v5 = vld [vmem:[#allocation16 + $0x18] sm:$0xff] }
 0xe74   :  { %3521 = vmatpush.msrb.mxu0 %v3480_v5  ;;  %v3620_v5 = vld [vmem:[#allocation16 + $0x50] sm:$0xff] }
 0xe75   :  { %3456 = vmatpush.msrb.mxu3 %v6501_v10  ;;  %v3478_v10 = vld [vmem:[#allocation16 + $0x8] sm:$0xff]  ;;  %v6701_v58 = vld [vmem:[#allocation2 + $0x20] sm:$0xff] }
 0xe76   :  { %3522 = vmatpush.msrb.mxu0 %v3479_v37  ;;  %v6727_v37 = vld [vmem:[#allocation18 + $0x8] sm:$0xff] }
 0xe78   :  { %3523 = vmatpush.msrb.mxu0 %v3478_v10  ;;  %v3560_v10 = vld [vmem:[#allocation16 + $0x28] sm:$0xff] }
 0xe7a   :  { %3524 = vmatpush.msrb.mxu0 %v3477_v40 }
 0xeeb   :  { %v3176_v21 = vpop.f32.mrf.mxu0 }
 0xeec   :  { %v3199_v28 = vadd.f32 %v3176_v21, %v6536_v0  ;;  %v3236_v57 = vpop.f32.mrf.mxu1 }
 0xeed   :  { %v3237_v50 = vadd.f32 %v6542_v39, %v3236_v57 }
 0xeee   :  { %v4819_v29 = vmul.f32 -1.442695, %v3199_v28 }
 0xef0   :  { %5151 = vpow2.f32 %v4819_v29 }
 0xef1   :  { %v3156_v30 = vpop.f32.mrf.mxu3 }
 0xef2   :  { %v3179_v17 = vadd.f32 %v3156_v30, %v6533_v11 }
 0xef4   :  { %v4818_v31 = vmul.f32 -1.442695, %v3179_v17 }
 0xef6   :  { %v5152_v32 = vpop.eup %5151  ;;  %5153 = vpow2.f32 %v4818_v31 }
 0xef7   :  { %v3203_v33 = vadd.f32 1.0, %v5152_v32  ;;  %v6722_v32 = vld [vmem:[#allocation18 + $0x18] sm:$0xff] }
 0xef9   :  { %5155 = vrcp.f32 %v3203_v33  ;;  %v3215_v12 = vand.u32 2147483648, %v3203_v33  ;;  %vm3209_vm9 = vweird.f32 %v3203_v33  ;;  %v3213_v4 = vand.u32 2147483647, %v3203_v33 }
 0xefb   :  { %v3216_v27 = vor.u32 1.1754944e-38, %v3215_v12  ;;  %vm3214_vm11 = vcmp.eq.f32.partialorder %v3213_v4, 8.507059e+37 }
 0xefc   :  { %v5154_v51 = vpop.eup %5153 }
 0xefd   :  { %v3183_v36 = vadd.f32 1.0, %v5154_v51  ;;  %v3621_v51 = vld [vmem:[#allocation16 + $0x58] sm:$0xff] }
 0xeff   :  { %5157 = vrcp.f32 %v3183_v36  ;;  %v5156_v25 = vpop.eup %5155  ;;  %v3195_v22 = vand.u32 2147483648, %v3183_v36  ;;  %v3193_v53 = vand.u32 2147483647, %v3183_v36  ;;  %vm3189_vm5 = vweird.f32 %v3183_v36 }
 0xf00   :  { %v3205_v38 = vmul.f32 %v5156_v25, %v3203_v33  ;;  %vm3210_vm8 = vweird.f32 %v5156_v25  ;;  %v3562_v33 = vld [vmem:[#allocation16 + $0x38] sm:$0xff] }
 0xf01   :  { %v3196_v54 = vor.u32 1.1754944e-38, %v3195_v22  ;;  %vm3194_vm7 = vcmp.eq.f32.partialorder %v3193_v53, 8.507059e+37  ;;  %vm3211_vm10 = vmor %vm3209_vm9, %vm3210_vm8  ;;  %3580 = vmatpush.msrb.mxu1 %v3562_v33  ;;  %v3618_v22 = vld [vmem:[#allocation16 + $0x40] sm:$0xff] }
 0xf02   :  { %v3206_v59 = vsub.f32 1.0, %v3205_v38  ;;  %v3619_v38 = vld [vmem:[#allocation16 + $0x48] sm:$0xff]  ;;  %v6774_v33 = vld [vmem:[#allocation18 + $0x40] sm:$0xff] }
 0xf04   :  { %v3207_v23 = vmul.f32 %v5156_v25, %v3206_v59 }
 0xf05   :  { %v5158_v41 = vpop.eup %5157 }
 0xf06   :  { %v3185_v43 = vmul.f32 %v5158_v41, %v3183_v36  ;;  %vm3190_vm4 = vweird.f32 %v5158_v41  ;;  %v3208_v45 = vadd.f32 %v5156_v25, %v3207_v23  ;;  %v6725_v36 = vld [vmem:[#allocation18 + $0x10] sm:$0xff] }
 0xf07   :  { %vm3191_vm6 = vmor %vm3189_vm5, %vm3190_vm4 }
 0xf08   :  { %v3186_v42 = vsub.f32 1.0, %v3185_v43  ;;  %v3212_v60 = vsel %vm3211_vm10, %v5156_v25, %v3208_v45  ;;  %v3561_v25 = vld [vmem:[#allocation16 + $0x30] sm:$0xff]  ;;  %v3559_v43 = vld [vmem:[#allocation16 + $0x20] sm:$0xff] }
 0xf09   :  { %v3217_v63 = vsel %vm3214_vm11, %v3216_v27, %v3212_v60  ;;  %3581 = vmatpush.msrb.mxu1 %v3561_v25  ;;  %v6787_v25 = vld [vmem:[#allocation18 + $0x20] sm:$0xff] }
 0xf0a   :  { %v3187_v3 = vmul.f32 %v5158_v41, %v3186_v42  ;;  %v3242_v6 = vsub.f32 1.0, %v3217_v63  ;;  %v3244_v15 = vmul.f32 %v3217_v63, %v6656_v20 }
 0xf0b   :  { %3582 = vmatpush.msrb.mxu1 %v3560_v10 }
 0xf0c   :  { %v3188_v24 = vadd.f32 %v5158_v41, %v3187_v3 }
 0xf0d   :  { %3583 = vmatpush.msrb.mxu1 %v3559_v43 }
 0xf0e   :  { %v3192_v16 = vsel %vm3191_vm6, %v5158_v41, %v3188_v24  ;;  %v6730_v41 = vld [vmem:[#allocation18] sm:$0xff] }
 0xf0f   :  { %v3197_v52 = vsel %vm3194_vm7, %v3196_v54, %v3192_v16 }
 0xf10   :  { %v3239_v55 = vmul.f32 %v3237_v50, %v3197_v52 }
 0xf12   :  { %v3240_v56 = vadd.f32 %v3239_v55, %v6545_v62 }
 0xf14   :  { %5159 = vtanh.f32 %v3240_v56 }
 0xf1a   :  { %v5160_v44 = vpop.eup %5159 }
 0xf1b   :  { %v3243_v1 = vmul.f32 %v5160_v44, %v3242_v6 }
 0xf1d   :  { %v6675_v46 = vadd.f32 %v3244_v15, %v3243_v1 }
 0xf1f   :  { %3246 = vst.msk [vmem:[#allocation2 + $0x28] sm:$0xff] %vm309_vm0, %v6675_v46  ;;  %4821 = vmatmul.msk.f32.vlgmr.msrb.gmra.mxu2 %vm309_vm0, %v6675_v46  ;;  %4822 = vmatmul.msk.f32.vlgmr.msra.gmra.mxu3 %vm309_vm0, %v6675_v46 }
 0xf20   :  { %4825 = vmatmul.msk.f32.vlgmr.msra.gmra.mxu0 %vm309_vm0, %v6675_v46  ;;  %3706 = vmatpush.msra.mxu3 %v6722_v32 }
 0xf21   :  { %3639 = vmatpush.msrb.mxu2 %v3621_v51  ;;  %v6777_v51 = vld [vmem:[#allocation18 + $0x28] sm:$0xff] }
 0xf22   :  { %3707 = vmatpush.msra.mxu3 %v6725_v36 }
 0xf23   :  { %3640 = vmatpush.msrb.mxu2 %v3620_v5 }
 0xf24   :  { %3708 = vmatpush.msra.mxu3 %v6727_v37 }
 0xf25   :  { %3641 = vmatpush.msrb.mxu2 %v3619_v38 }
 0xf26   :  { %v6705_v8 = vld [vmem:[#allocation2 + $0x28] sm:$0xff]  ;;  %3709 = vmatpush.msra.mxu3 %v6730_v41 }
 0xf27   :  { %3642 = vmatpush.msrb.mxu2 %v3618_v22 }
 0xf28   :  { %4831 = vmatmul.msk.f32.vlgmr.msrb.gmra.mxu0 %vm309_vm0, %v6685_v2 }
 0xf30   :  { %4832 = vmatmul.msk.f32.gmra.mxu0 %vm309_vm0, %v6689_v47 }
 0xf38   :  { %4833 = vmatmul.msk.f32.gmra.mxu0 %vm309_vm0, %v6693_v48 }
 0xf40   :  { %4834 = vmatmul.msk.f32.gmra.mxu0 %vm309_vm0, %v6697_v49 }
 0xf48   :  { %4835 = vmatmul.msk.f32.gmra.mxu0 %vm309_vm0, %v6701_v58 }
 0xf50   :  { %4836 = vmatmul.msk.f32.gmra.mxu0 %vm309_vm0, %v6705_v8 }
 0xf9d   :  { %v6709_v34 = vpop.f32.mrf.mxu0 }
 0xf9e   :  { %v3348_v56 = vadd.f32 %v6542_v39, %v6709_v34 }
 0xfa2   :  { %v3267_v61 = vpop.f32.mrf.mxu2  ;;  %v3287_v18 = vpop.f32.mrf.mxu3 }
 0xfa3   :  { %v3290_v7 = vadd.f32 %v3267_v61, %v6533_v11  ;;  %v3310_v9 = vadd.f32 %v3287_v18, %v6536_v0 }
 0xfa5   :  { %v4823_v19 = vmul.f32 -1.442695, %v3290_v7  ;;  %v4824_v35 = vmul.f32 -1.442695, %v3310_v9  ;;  %v3526_v14 = vpop.f32.mrf.mxu0  ;;  %v6747_v9 = vld [vmem:[#allocation18 + $0x58] sm:$0xff] }
 0xfa6   :  { %v3527_v20 = vadd.f32 %v6711_v26, %v3526_v14  ;;  %4017 = vmatpush.msra.mxu0 %v6747_v9 }
 0xfa7   :  { %5161 = vpow2.f32 %v4823_v19 }
 0xfa8   :  { %5163 = vpow2.f32 %v4824_v35  ;;  %3550 = vst.msk [vmem:[#allocation3] sm:$0xff] %vm309_vm0, %v3527_v20  ;;  %v6750_v35 = vld [vmem:[#allocation18 + $0x50] sm:$0xff] }
 0xfa9   :  { %4018 = vmatpush.msra.mxu0 %v6750_v35 }
 0xfad   :  { %v5162_v21 = vpop.eup %5161  ;;  %v3529_v28 = vpop.f32.mrf.mxu0 }
 0xfae   :  { %v5164_v29 = vpop.eup %5163  ;;  %v3294_v30 = vadd.f32 1.0, %v5162_v21  ;;  %v3530_v17 = vadd.f32 %v6711_v26, %v3529_v28 }
 0xfaf   :  { %v6718_v31 = vadd.f32 1.0, %v5164_v29 }
 0xfb0   :  { %5165 = vrcp.f32 %v3294_v30  ;;  %3551 = vst.msk [vmem:[#allocation3 + $0x8] sm:$0xff] %vm309_vm0, %v3530_v17  ;;  %v3306_v24 = vand.u32 2147483648, %v3294_v30  ;;  %v3304_v16 = vand.u32 2147483647, %v3294_v30  ;;  %vm3300_vm13 = vweird.f32 %v3294_v30  ;;  %v6757_v17 = vld [vmem:[#allocation18 + $0x38] sm:$0xff] }
 0xfb1   :  { %5167 = vrcp.f32 %v6718_v31  ;;  %v3326_v44 = vand.u32 2147483648, %v6718_v31  ;;  %vm3320_vm2 = vweird.f32 %v6718_v31  ;;  %v3324_v1 = vand.u32 2147483647, %v6718_v31 }
 0xfb2   :  { %v3307_v55 = vor.u32 1.1754944e-38, %v3306_v24  ;;  %vm3305_vm15 = vcmp.eq.f32.partialorder %v3304_v16, 8.507059e+37 }
 0xfb3   :  { %v3327_v39 = vor.u32 1.1754944e-38, %v3326_v44  ;;  %vm3325_vm4 = vcmp.eq.f32.partialorder %v3324_v1, 8.507059e+37 }
 0xfb5   :  { %v3532_v40 = vpop.f32.mrf.mxu0 }
 0xfb6   :  { %v5166_v59 = vpop.eup %5165  ;;  %v3533_v42 = vadd.f32 %v6711_v26, %v3532_v40 }
 0xfb7   :  { %v5168_v3 = vpop.eup %5167  ;;  %v3296_v53 = vmul.f32 %v5166_v59, %v3294_v30  ;;  %vm3301_vm12 = vweird.f32 %v5166_v59 }
 0xfb8   :  { %v3316_v23 = vmul.f32 %v5168_v3, %v6718_v31  ;;  %3552 = vst.msk [vmem:[#allocation3 + $0x10] sm:$0xff] %vm309_vm0, %v3533_v42  ;;  %vm3302_vm14 = vmor %vm3300_vm13, %vm3301_vm12  ;;  %vm3321_vm1 = vweird.f32 %v5168_v3  ;;  %v6764_v31 = vld [vmem:[#allocation18 + $0x48] sm:$0xff] }
 0xfb9   :  { %v3297_v57 = vsub.f32 1.0, %v3296_v53  ;;  %vm3322_vm3 = vmor %vm3320_vm2, %vm3321_vm1  ;;  %4019 = vmatpush.msra.mxu0 %v6764_v31 }
 0xfba   :  { %v3317_v54 = vsub.f32 1.0, %v3316_v23  ;;  %v3734_v23 = vld [vmem:[#allocation3] sm:$0xff] }
 0xfbb   :  { %v3298_v50 = vmul.f32 %v5166_v59, %v3297_v57  ;;  %4020 = vmatpush.msra.mxu0 %v6774_v33 }
 0xfbc   :  { %v3318_v45 = vmul.f32 %v5168_v3, %v3317_v54 }
 0xfbd   :  { %v3299_v52 = vadd.f32 %v5166_v59, %v3298_v50  ;;  %v3535_v12 = vpop.f32.mrf.mxu0  ;;  %4162 = vmatpush.msrb.mxu0 %v6722_v32 }
 0xfbe   :  { %v3536_v4 = vadd.f32 %v6711_v26, %v3535_v12  ;;  %v3319_v63 = vadd.f32 %v5168_v3, %v3318_v45 }
 0xfbf   :  { %v3303_v60 = vsel %vm3302_vm14, %v5166_v59, %v3299_v52  ;;  %4163 = vmatpush.msrb.mxu0 %v6725_v36 }
 0xfc0   :  { %v3308_v27 = vsel %vm3305_vm15, %v3307_v55, %v3303_v60  ;;  %3553 = vst.msk [vmem:[#allocation3 + $0x18] sm:$0xff] %vm309_vm0, %v3536_v4  ;;  %v3323_v61 = vsel %vm3322_vm3, %v5168_v3, %v3319_v63 }
 0xfc1   :  { %v3350_v6 = vmul.f32 %v3348_v56, %v3308_v27  ;;  %v3328_v7 = vsel %vm3325_vm4, %v3327_v39, %v3323_v61  ;;  %4164 = vmatpush.msrb.mxu0 %v6727_v37 }
 0xfc2   :  { %v3353_v19 = vsub.f32 1.0, %v3328_v7  ;;  %v3355_v21 = vmul.f32 %v3328_v7, %v6675_v46  ;;  %v6770_v46 = vld [vmem:[#allocation18 + $0x30] sm:$0xff] }
 0xfc3   :  { %v3351_v15 = vadd.f32 %v3350_v6, %v6545_v62  ;;  %4165 = vmatpush.msrb.mxu0 %v6730_v41 }
 0xfc5   :  { %5169 = vtanh.f32 %v3351_v15  ;;  %v3538_v34 = vpop.f32.mrf.mxu0 }
 0xfc6   :  { %v3539_v18 = vadd.f32 %v6711_v26, %v3538_v34 }
 0xfc8   :  { %3554 = vst.msk [vmem:[#allocation3 + $0x20] sm:$0xff] %vm309_vm0, %v3539_v18 }
 0xfcb   :  { %v5170_v14 = vpop.eup %5169 }
 0xfcc   :  { %v3354_v20 = vmul.f32 %v5170_v14, %v3353_v19 }
 0xfcd   :  { %v3541_v28 = vpop.f32.mrf.mxu0 }
 0xfce   :  { %v3542_v29 = vadd.f32 %v6711_v26, %v3541_v28  ;;  %v6755_v30 = vadd.f32 %v3355_v21, %v3354_v20 }
 0xfd0   :  { %3555 = vst.msk [vmem:[#allocation3 + $0x28] sm:$0xff] %vm309_vm0, %v3542_v29  ;;  %4826 = vmatmul.msk.f32.vlgmr.msra.gmra.mxu1 %vm309_vm0, %v6755_v30  ;;  %4827 = vmatmul.msk.f32.vlgmr.msra.gmra.mxu2 %vm309_vm0, %v6755_v30  ;;  %v5274_v29 = vld [vmem:[%s7050_s14] ss:$0 sm:$0xff] }
 0xfd1   :  { %3357 = vst.msk [vmem:[#allocation2 + $0x30] sm:$0xff] %vm309_vm0, %v6755_v30  ;;  %4830 = vmatmul.msk.f32.vlgmr.msrb.gmra.mxu3 %vm309_vm0, %v6755_v30  ;;  %4048 = vmatpush.msra.mxu1 %v6722_v32 }
 0xfd2   :  { %3726 = vmatpush.msrb.mxu3 %v6757_v17  ;;  %4068 = vmatpush.msra.mxu2 %v6757_v17 }
 0xfd3   :  { %4049 = vmatpush.msra.mxu1 %v6725_v36 }
 0xfd4   :  { %3727 = vmatpush.msrb.mxu3 %v6770_v46  ;;  %4069 = vmatpush.msra.mxu2 %v6770_v46 }
 0xfd5   :  { %4050 = vmatpush.msra.mxu1 %v6727_v37 }
 0xfd6   :  { %3728 = vmatpush.msrb.mxu3 %v6777_v51  ;;  %4070 = vmatpush.msra.mxu2 %v6777_v51 }
 0xfd7   :  { %4051 = vmatpush.msra.mxu1 %v6730_v41 }
 0xfd8   :  { %v3475_v5 = vld [vmem:[#allocation2 + $0x30] sm:$0xff]  ;;  %4839 = vmatmul.msk.f32.vlgmr.msrb.gmra.mxu1 %vm309_vm0, %v6685_v2  ;;  %4847 = vmatmul.msk.f32.vlgmr.msrb.gmra.mxu2 %vm309_vm0, %v6685_v2 }
 0xfd9   :  { %4837 = vmatmul.msk.f32.gmra.mxu0 %vm309_vm0, %v3475_v5  ;;  %3710 = vmatmul.f32.vlgmr.msra.gmra.mxu3 %v5576_v13 }
 0xfda   :  { %3729 = vmatpush.msrb.mxu3 %v6787_v25  ;;  %4071 = vmatpush.msra.mxu2 %v6787_v25 }
 0xfdb   :  { %4182 = vmatpush.msrb.mxu1 %v6757_v17 }
 0xfdc   :  { %3789 = vmatpush.msra.mxu3 %v6747_v9  ;;  %4245 = vmatpush.msrb.mxu2 %v6747_v9 }
 0xfdd   :  { %4183 = vmatpush.msrb.mxu1 %v6770_v46 }
 0xfde   :  { %3790 = vmatpush.msra.mxu3 %v6750_v35  ;;  %4246 = vmatpush.msrb.mxu2 %v6750_v35 }
 0xfdf   :  { %4184 = vmatpush.msrb.mxu1 %v6777_v51 }
 0xfe0   :  { %3791 = vmatpush.msra.mxu3 %v6764_v31  ;;  %4840 = vmatmul.msk.f32.gmra.mxu1 %vm309_vm0, %v6689_v47 }
 0xfe1   :  { %4848 = vmatmul.msk.f32.gmra.mxu2 %vm309_vm0, %v6689_v47  ;;  %3730 = vmatmul.f32.vlgmr.msrb.gmra.mxu3 %v5576_v13 }
 0xfe2   :  { %3792 = vmatpush.msra.mxu3 %v6774_v33  ;;  %4247 = vmatpush.msrb.mxu2 %v6764_v31 }
 0xfe3   :  { %4185 = vmatpush.msrb.mxu1 %v6787_v25 }
 0xfe4   :  { %3820 = vmatpush.msrb.mxu3 %v6722_v32  ;;  %4248 = vmatpush.msrb.mxu2 %v6774_v33 }
 0xfe6   :  { %3821 = vmatpush.msrb.mxu3 %v6725_v36 }
 0xfe8   :  { %3822 = vmatpush.msrb.mxu3 %v6727_v37  ;;  %4841 = vmatmul.msk.f32.gmra.mxu1 %vm309_vm0, %v6693_v48 }
 0xfe9   :  { %4849 = vmatmul.msk.f32.gmra.mxu2 %vm309_vm0, %v6693_v48  ;;  %3793 = vmatmul.f32.vlgmr.msra.gmra.mxu3 %v5576_v13  ;;  %v6847_v48 = vld [vmem:[#allocation19 + $0x1] ss:$0 sm:$0xff] }
 0xfea   :  { %3823 = vmatpush.msrb.mxu3 %v6730_v41 }
 0xfec   :  { %3840 = vmatpush.msra.mxu3 %v6757_v17 }
 0xfee   :  { %3841 = vmatpush.msra.mxu3 %v6770_v46 }
 0xff0   :  { %3842 = vmatpush.msra.mxu3 %v6777_v51  ;;  %4842 = vmatmul.msk.f32.gmra.mxu1 %vm309_vm0, %v6697_v49 }
 0xff1   :  { %4850 = vmatmul.msk.f32.gmra.mxu2 %vm309_vm0, %v6697_v49 }
 0xff2   :  { %3843 = vmatpush.msra.mxu3 %v6787_v25 }
 0xff8   :  { %4843 = vmatmul.msk.f32.gmra.mxu1 %vm309_vm0, %v6701_v58 }
 0xff9   :  { %4851 = vmatmul.msk.f32.gmra.mxu2 %vm309_vm0, %v6701_v58 }
0x1000   :  { %4844 = vmatmul.msk.f32.gmra.mxu1 %vm309_vm0, %v6705_v8 }
0x1001   :  { %4852 = vmatmul.msk.f32.gmra.mxu2 %vm309_vm0, %v6705_v8 }
0x1008   :  { %4845 = vmatmul.msk.f32.gmra.mxu1 %vm309_vm0, %v3475_v5 }
0x1009   :  { %4853 = vmatmul.msk.f32.gmra.mxu2 %vm309_vm0, %v3475_v5 }
0x104d   :  { %v3378_v13 = vpop.f32.mrf.mxu1 }
0x104e   :  { %v3401_v2 = vadd.f32 %v3378_v13, %v6533_v11  ;;  %v6853_v11 = vld [vmem:[#allocation19 + $0x2] ss:$0 sm:$0xff] }
0x1050   :  { %v4828_v47 = vmul.f32 -1.442695, %v3401_v2 }
0x1052   :  { %5171 = vpow2.f32 %v4828_v47 }
0x1053   :  { %v3398_v49 = vpop.f32.mrf.mxu2 }
0x1054   :  { %v3421_v58 = vadd.f32 %v3398_v49, %v6536_v0  ;;  %v3458_v10 = vpop.f32.mrf.mxu3 }
0x1055   :  { %v3585_v38 = vpop.f32.mrf.mxu1  ;;  %v3459_v5 = vadd.f32 %v5274_v29, %v3458_v10 }
0x1056   :  { %v4829_v40 = vmul.f32 -1.442695, %v3421_v58  ;;  %v3544_v43 = vpop.f32.mrf.mxu0  ;;  %v3586_v8 = vadd.f32 %v6847_v48, %v3585_v38 }
0x1057   :  { %v3545_v59 = vadd.f32 %v6711_v26, %v3544_v43 }
0x1058   :  { %v5172_v42 = vpop.eup %5171  ;;  %5173 = vpow2.f32 %v4829_v40  ;;  %3609 = vst.msk [vmem:[#allocation3 + $0x40] sm:$0xff] %vm309_vm0, %v3586_v8 }
0x1059   :  { %v3405_v22 = vadd.f32 1.0, %v5172_v42  ;;  %3556 = vst.msk [vmem:[#allocation3 + $0x30] sm:$0xff] %vm309_vm0, %v3545_v59 }
0x105b   :  { %5175 = vrcp.f32 %v3405_v22  ;;  %v3644_v3 = vpop.f32.mrf.mxu2  ;;  %v3417_v63 = vand.u32 2147483648, %v3405_v22  ;;  %v3415_v15 = vand.u32 2147483647, %v3405_v22  ;;  %vm3411_vm6 = vweird.f32 %v3405_v22 }
0x105c   :  { %v3645_v0 = vadd.f32 %v6853_v11, %v3644_v3  ;;  %v3711_v53 = vpop.f32.mrf.mxu3 }
0x105d   :  { %v3737_v57 = vadd.f32 %v3734_v23, %v3711_v53  ;;  %v3588_v24 = vpop.f32.mrf.mxu1  ;;  %v3418_v14 = vor.u32 1.1754944e-38, %v3417_v63  ;;  %vm3416_vm8 = vcmp.eq.f32.partialorder %v3415_v15, 8.507059e+37 }
0x105e   :  { %v5174_v54 = vpop.eup %5173  ;;  %3668 = vst.msk [vmem:[#allocation3 + $0x80] sm:$0xff] %vm309_vm0, %v3645_v0  ;;  %v3589_v50 = vadd.f32 %v6847_v48, %v3588_v24 }
0x105f   :  { %v3425_v16 = vadd.f32 1.0, %v5174_v54  ;;  %v4855_v45 = vmul.f32 -1.442695, %v3737_v57  ;;  %v3735_v27 = vld [vmem:[#allocation3 + $0x40] sm:$0xff] }
0x1060   :  { %3610 = vst.msk [vmem:[#allocation3 + $0x48] sm:$0xff] %vm309_vm0, %v3589_v50 }
0x1061   :  { %v5176_v52 = vpop.eup %5175  ;;  %5177 = vrcp.f32 %v3425_v16  ;;  %v3437_v13 = vand.u32 2147483648, %v3425_v16  ;;  %v3435_v40 = vand.u32 2147483647, %v3425_v16  ;;  %vm3431_vm10 = vweird.f32 %v3425_v16 }
0x1062   :  { %v3407_v12 = vmul.f32 %v5176_v52, %v3405_v22  ;;  %5179 = vpow2.f32 %v4855_v45  ;;  %vm3412_vm5 = vweird.f32 %v5176_v52 }
0x1063   :  { %vm3413_vm7 = vmor %vm3411_vm6, %vm3412_vm5  ;;  %v3438_v22 = vor.u32 1.1754944e-38, %v3437_v13  ;;  %vm3436_vm12 = vcmp.eq.f32.partialorder %v3435_v40, 8.507059e+37 }
0x1064   :  { %v3647_v55 = vpop.f32.mrf.mxu2  ;;  %v3408_v4 = vsub.f32 1.0, %v3407_v12  ;;  %v3731_v60 = vpop.f32.mrf.mxu3 }
0x1065   :  { %v3648_v56 = vadd.f32 %v6853_v11, %v3647_v55  ;;  %v3757_v6 = vadd.f32 %v3735_v27, %v3731_v60  ;;  %v3591_v44 = vpop.f32.mrf.mxu1 }
0x1066   :  { %v3409_v1 = vmul.f32 %v5176_v52, %v3408_v4  ;;  %v3592_v61 = vadd.f32 %v6847_v48, %v3591_v44 }
0x1067   :  { %3669 = vst.msk [vmem:[#allocation3 + $0x88] sm:$0xff] %vm309_vm0, %v3648_v56  ;;  %v5178_v39 = vpop.eup %5177  ;;  %v4856_v34 = vmul.f32 -1.442695, %v3757_v6 }
0x1068   :  { %v5180_v18 = vpop.eup %5179  ;;  %v3427_v7 = vmul.f32 %v5178_v39, %v3425_v16  ;;  %v3410_v19 = vadd.f32 %v5176_v52, %v3409_v1  ;;  %3611 = vst.msk [vmem:[#allocation3 + $0x50] sm:$0xff] %vm309_vm0, %v3592_v61  ;;  %vm3432_vm9 = vweird.f32 %v5178_v39  ;;  %v6877_v16 = vld [vmem:[#allocation21] ss:$0 sm:$0xff] }
0x1069   :  { %v6864_v20 = vadd.f32 1.0, %v5180_v18  ;;  %5181 = vpow2.f32 %v4856_v34  ;;  %vm3433_vm11 = vmor %vm3431_vm10, %vm3432_vm9 }
0x106a   :  { %v3428_v21 = vsub.f32 1.0, %v3427_v7  ;;  %v3414_v28 = vsel %vm3413_vm7, %v5176_v52, %v3410_v19 }
0x106b   :  { %v3419_v2 = vsel %vm3416_vm8, %v3418_v14, %v3414_v28  ;;  %5183 = vrcp.f32 %v6864_v20  ;;  %v3751_v55 = vand.u32 2147483647, %v6864_v20  ;;  %v3753_v4 = vand.u32 2147483648, %v6864_v20 }
0x106c   :  { %v3650_v47 = vpop.f32.mrf.mxu2  ;;  %v3429_v49 = vmul.f32 %v5178_v39, %v3428_v21  ;;  %v3461_v58 = vmul.f32 %v3459_v5, %v3419_v2  ;;  %v3794_v56 = vpop.f32.mrf.mxu3  ;;  %vm3747_vm14 = vweird.f32 %v6864_v20  ;;  %v3736_v5 = vld [vmem:[#allocation3 + $0x80] sm:$0xff] }
0x106d   :  { %v3651_v38 = vadd.f32 %v6853_v11, %v3650_v47  ;;  %v3594_v43 = vpop.f32.mrf.mxu1  ;;  %v3795_v61 = vadd.f32 %v6877_v16, %v3794_v56  ;;  %vm3752_vm1 = vcmp.eq.f32.partialorder %v3751_v55, 8.507059e+37  ;;  %v3848_v55 = vld [vmem:[#allocation3 + $0x8] sm:$0xff] }
0x106e   :  { %v3430_v8 = vadd.f32 %v5178_v39, %v3429_v49  ;;  %v3462_v59 = vadd.f32 %v3461_v58, %v6545_v62  ;;  %v3595_v10 = vadd.f32 %v6847_v48, %v3594_v43 }
0x106f   :  { %3670 = vst.msk [vmem:[#allocation3 + $0x90] sm:$0xff] %vm309_vm0, %v3651_v38  ;;  %v5182_v42 = vpop.eup %5181 }
0x1070   :  { %v3434_v3 = vsel %vm3433_vm11, %v5178_v39, %v3430_v8  ;;  %5185 = vtanh.f32 %v3462_v59  ;;  %v3761_v0 = vadd.f32 1.0, %v5182_v42  ;;  %3612 = vst.msk [vmem:[#allocation3 + $0x58] sm:$0xff] %vm309_vm0, %v3595_v10  ;;  %v3754_v39 = vor.u32 1.1754944e-38, %v3753_v4 }
0x1071   :  { %v5184_v53 = vpop.eup %5183  ;;  %v3439_v23 = vsel %vm3436_vm12, %v3438_v22, %v3434_v3 }
0x1072   :  { %5187 = vrcp.f32 %v3761_v0  ;;  %v3743_v24 = vmul.f32 %v5184_v53, %v6864_v20  ;;  %v3464_v54 = vsub.f32 1.0, %v3439_v23  ;;  %v3466_v27 = vmul.f32 %v3439_v23, %v6755_v30 }
0x1073   :  { %vm3748_vm13 = vweird.f32 %v5184_v53  ;;  %v3773_v7 = vand.u32 2147483648, %v3761_v0  ;;  %v3771_v20 = vand.u32 2147483647, %v3761_v0  ;;  %vm3767_vm3 = vweird.f32 %v3761_v0 }
0x1074   :  { %v3653_v57 = vpop.f32.mrf.mxu2  ;;  %v3744_v45 = vsub.f32 1.0, %v3743_v24  ;;  %vm3749_vm15 = vmor %vm3747_vm14, %vm3748_vm13 }
0x1075   :  { %v3654_v62 = vadd.f32 %v6853_v11, %v3653_v57  ;;  %v3597_v50 = vpop.f32.mrf.mxu1  ;;  %v3774_v49 = vor.u32 1.1754944e-38, %v3773_v7  ;;  %vm3772_vm5 = vcmp.eq.f32.partialorder %v3771_v20, 8.507059e+37 }
0x1076   :  { %v5186_v52 = vpop.eup %5185  ;;  %v3598_v12 = vadd.f32 %v6847_v48, %v3597_v50  ;;  %v3745_v63 = vmul.f32 %v5184_v53, %v3744_v45 }
0x1077   :  { %3671 = vst.msk [vmem:[#allocation3 + $0x98] sm:$0xff] %vm309_vm0, %v3654_v62  ;;  %v3465_v60 = vmul.f32 %v5186_v52, %v3464_v54 }
0x1078   :  { %v5188_v6 = vpop.eup %5187  ;;  %3613 = vst.msk [vmem:[#allocation3 + $0x60] sm:$0xff] %vm309_vm0, %v3598_v12  ;;  %v3746_v15 = vadd.f32 %v5184_v53, %v3745_v63 }
0x1079   :  { %v3467_v44 = vadd.f32 %v3466_v27, %v3465_v60  ;;  %v3763_v1 = vmul.f32 %v5188_v6, %v3761_v0  ;;  %vm3768_vm2 = vweird.f32 %v5188_v6  ;;  %v3849_v27 = vld [vmem:[#allocation3 + $0x48] sm:$0xff] }
0x107a   :  { %v3750_v18 = vsel %vm3749_vm15, %v5184_v53, %v3746_v15  ;;  %vm3769_vm4 = vmor %vm3767_vm3, %vm3768_vm2 }
0x107b   :  { %3468 = vst.msk [vmem:[#allocation2 + $0x38] sm:$0xff] %vm309_vm0, %v3467_v44  ;;  %v3764_v34 = vsub.f32 1.0, %v3763_v1  ;;  %v3755_v19 = vsel %vm3752_vm1, %v3754_v39, %v3750_v18 }
0x107c   :  { %v3656_v30 = vpop.f32.mrf.mxu2  ;;  %v3797_v28 = vmul.f32 %v3795_v61, %v3755_v19 }
0x107d   :  { %v3657_v14 = vadd.f32 %v6853_v11, %v3656_v30  ;;  %v3765_v21 = vmul.f32 %v5188_v6, %v3764_v34  ;;  %v3600_v29 = vpop.f32.mrf.mxu1 }
0x107e   :  { %v3601_v13 = vadd.f32 %v6847_v48, %v3600_v29  ;;  %v3798_v47 = vadd.f32 %v3797_v28, %v3736_v5 }
0x107f   :  { %3672 = vst.msk [vmem:[#allocation3 + $0xa0] sm:$0xff] %vm309_vm0, %v3657_v14  ;;  %v3766_v2 = vadd.f32 %v5188_v6, %v3765_v21 }
0x1080   :  { %3614 = vst.msk [vmem:[#allocation3 + $0x68] sm:$0xff] %vm309_vm0, %v3601_v13  ;;  %5189 = vtanh.f32 %v3798_v47  ;;  %v3850_v47 = vld [vmem:[#allocation3 + $0x88] sm:$0xff] }
0x1081   :  { %v3770_v58 = vsel %vm3769_vm4, %v5188_v6, %v3766_v2 }
0x1082   :  { %v3775_v38 = vsel %vm3772_vm5, %v3774_v49, %v3770_v58  ;;  %v3476_v40 = vld [vmem:[#allocation2 + $0x38] sm:$0xff] }
0x1083   :  { %4838 = vmatmul.msk.f32.gmra.mxu0 %vm309_vm0, %v3476_v40  ;;  %4846 = vmatmul.msk.f32.gmra.mxu1 %vm309_vm0, %v3476_v40  ;;  %v3800_v8 = vsub.f32 1.0, %v3775_v38  ;;  %v3802_v0 = vmul.f32 0.0, %v3775_v38 }
0x1084   :  { %v3659_v43 = vpop.f32.mrf.mxu2  ;;  %4854 = vmatmul.msk.f32.gmra.mxu2 %vm309_vm0, %v3476_v40 }
0x1085   :  { %v3660_v59 = vadd.f32 %v6853_v11, %v3659_v43  ;;  %v3603_v10 = vpop.f32.mrf.mxu1 }
0x1086   :  { %v3604_v42 = vadd.f32 %v6847_v48, %v3603_v10  ;;  %v5190_v22 = vpop.eup %5189 }
0x1087   :  { %3673 = vst.msk [vmem:[#allocation3 + $0xa8] sm:$0xff] %vm309_vm0, %v3660_v59  ;;  %v3801_v3 = vmul.f32 %v5190_v22, %v3800_v8 }
0x1088   :  { %3615 = vst.msk [vmem:[#allocation3 + $0x70] sm:$0xff] %vm309_vm0, %v3604_v42 }
0x1089   :  { %v6899_v53 = vadd.f32 %v3802_v0, %v3801_v3 }
0x108b   :  { %3804 = vst.msk [vmem:[#allocation2] sm:$0xff] %vm309_vm0, %v6899_v53  ;;  %4857 = vmatmul.msk.f32.vlgmr.msrb.gmra.mxu3 %vm309_vm0, %v6899_v53 }
0x108c   :  { %v3662_v23 = vpop.f32.mrf.mxu2  ;;  %3903 = vmatpush.msrb.mxu3 %v6747_v9 }
0x108d   :  { %v3663_v57 = vadd.f32 %v6853_v11, %v3662_v23  ;;  %v3962_v23 = vld [vmem:[#allocation3 + $0x10] sm:$0xff] }
0x108e   :  { %3904 = vmatpush.msrb.mxu3 %v6750_v35 }
0x108f   :  { %3674 = vst.msk [vmem:[#allocation3 + $0xb0] sm:$0xff] %vm309_vm0, %v3663_v57 }
0x1090   :  { %3905 = vmatpush.msrb.mxu3 %v6764_v31 }
0x1092   :  { %3906 = vmatpush.msrb.mxu3 %v6774_v33 }
0x1093   :  { %4858 = vmatmul.msk.f32.vlgmr.msra.gmra.mxu3 %vm309_vm0, %v6899_v53 }
0x1094   :  { %3934 = vmatpush.msra.mxu3 %v6722_v32 }
0x1096   :  { %3935 = vmatpush.msra.mxu3 %v6725_v36 }
0x1098   :  { %3936 = vmatpush.msra.mxu3 %v6727_v37 }
0x109a   :  { %3937 = vmatpush.msra.mxu3 %v6730_v41 }
0x109b   :  { %4861 = vmatmul.msk.f32.vlgmr.msrb.gmra.mxu3 %vm309_vm0, %v6899_v53 }
0x109c   :  { %3954 = vmatpush.msrb.mxu3 %v6757_v17 }
0x109e   :  { %3955 = vmatpush.msrb.mxu3 %v6770_v46 }
0x10a0   :  { %3956 = vmatpush.msrb.mxu3 %v6777_v51 }
0x10a2   :  { %3957 = vmatpush.msrb.mxu3 %v6787_v25 }
0x1100   :  { %v3547_v24 = vpop.f32.mrf.mxu0  ;;  %v3606_v62 = vpop.f32.mrf.mxu1 }
0x1101   :  { %v3548_v54 = vadd.f32 %v6711_v26, %v3547_v24  ;;  %v3607_v50 = vadd.f32 %v6847_v48, %v3606_v62 }
0x1103   :  { %3557 = vst.msk [vmem:[#allocation3 + $0x38] sm:$0xff] %vm309_vm0, %v3548_v54  ;;  %v3963_v54 = vld [vmem:[#allocation3 + $0x50] sm:$0xff] }
0x1104   :  { %3616 = vst.msk [vmem:[#allocation3 + $0x78] sm:$0xff] %vm309_vm0, %v3607_v50 }
0x1107   :  { %v3665_v45 = vpop.f32.mrf.mxu2 }
0x1108   :  { %v3666_v52 = vadd.f32 %v6853_v11, %v3665_v45 }
0x110a   :  { %3675 = vst.msk [vmem:[#allocation3 + $0xb8] sm:$0xff] %vm309_vm0, %v3666_v52 }
0x110e   :  { %v3825_v12 = vpop.f32.mrf.mxu3 }
0x110f   :  { %v3851_v4 = vadd.f32 %v3848_v55, %v3825_v12 }
0x1111   :  { %v4859_v56 = vmul.f32 -1.442695, %v3851_v4 }
0x1113   :  { %5191 = vpow2.f32 %v4859_v56 }
0x1116   :  { %v3845_v60 = vpop.f32.mrf.mxu3 }
0x1117   :  { %v3871_v63 = vadd.f32 %v3849_v27, %v3845_v60 }
0x1119   :  { %v5192_v26 = vpop.eup %5191  ;;  %v4860_v6 = vmul.f32 -1.442695, %v3871_v63 }
0x111a   :  { %v3855_v48 = vadd.f32 1.0, %v5192_v26 }
0x111b   :  { %5193 = vpow2.f32 %v4860_v6 }
0x111c   :  { %5195 = vrcp.f32 %v3855_v48  ;;  %v3867_v39 = vand.u32 2147483648, %v3855_v48  ;;  %v3865_v18 = vand.u32 2147483647, %v3855_v48  ;;  %vm3861_vm7 = vweird.f32 %v3855_v48 }
0x111e   :  { %v3908_v30 = vpop.f32.mrf.mxu3  ;;  %v3868_v14 = vor.u32 1.1754944e-38, %v3867_v39  ;;  %vm3866_vm9 = vcmp.eq.f32.partialorder %v3865_v18, 8.507059e+37 }
0x111f   :  { %v3909_v28 = vadd.f32 %v6877_v16, %v3908_v30 }
0x1121   :  { %v5194_v44 = vpop.eup %5193 }
0x1122   :  { %v5196_v1 = vpop.eup %5195  ;;  %v3875_v15 = vadd.f32 1.0, %v5194_v44 }
0x1123   :  { %v3857_v61 = vmul.f32 %v5196_v1, %v3855_v48  ;;  %vm3862_vm6 = vweird.f32 %v5196_v1 }
0x1124   :  { %5197 = vrcp.f32 %v3875_v15  ;;  %vm3863_vm8 = vmor %vm3861_vm7, %vm3862_vm6  ;;  %v3887_v2 = vand.u32 2147483648, %v3875_v15  ;;  %v3885_v58 = vand.u32 2147483647, %v3875_v15  ;;  %vm3881_vm11 = vweird.f32 %v3875_v15 }
0x1125   :  { %v3858_v11 = vsub.f32 1.0, %v3857_v61 }
0x1126   :  { %v3888_v43 = vor.u32 1.1754944e-38, %v3887_v2  ;;  %vm3886_vm13 = vcmp.eq.f32.partialorder %v3885_v58, 8.507059e+37 }
0x1127   :  { %v3859_v34 = vmul.f32 %v5196_v1, %v3858_v11 }
0x1129   :  { %v3860_v7 = vadd.f32 %v5196_v1, %v3859_v34 }
0x112a   :  { %v5198_v19 = vpop.eup %5197 }
0x112b   :  { %v3877_v21 = vmul.f32 %v5198_v19, %v3875_v15  ;;  %v3864_v20 = vsel %vm3863_vm8, %v5196_v1, %v3860_v7  ;;  %vm3882_vm10 = vweird.f32 %v5198_v19  ;;  %v3964_v7 = vld [vmem:[#allocation3 + $0x90] sm:$0xff] }
0x112c   :  { %v3869_v29 = vsel %vm3866_vm9, %v3868_v14, %v3864_v20  ;;  %vm3883_vm12 = vmor %vm3881_vm11, %vm3882_vm10 }
0x112d   :  { %v3878_v5 = vsub.f32 1.0, %v3877_v21  ;;  %v3911_v13 = vmul.f32 %v3909_v28, %v3869_v29 }
0x112f   :  { %v3879_v49 = vmul.f32 %v5198_v19, %v3878_v5  ;;  %v3912_v38 = vadd.f32 %v3911_v13, %v3850_v47 }
0x1131   :  { %v3880_v40 = vadd.f32 %v5198_v19, %v3879_v49  ;;  %5199 = vtanh.f32 %v3912_v38 }
0x1133   :  { %v3884_v8 = vsel %vm3883_vm12, %v5198_v19, %v3880_v40  ;;  %v4076_v40 = vld [vmem:[#allocation3 + $0x18] sm:$0xff] }
0x1134   :  { %v3889_v59 = vsel %vm3886_vm13, %v3888_v43, %v3884_v8 }
0x1135   :  { %v3914_v10 = vsub.f32 1.0, %v3889_v59  ;;  %v3916_v3 = vmul.f32 %v3889_v59, %v6899_v53  ;;  %v4077_v59 = vld [vmem:[#allocation3 + $0x58] sm:$0xff] }
0x1137   :  { %v5200_v42 = vpop.eup %5199 }
0x1138   :  { %v3915_v22 = vmul.f32 %v5200_v42, %v3914_v10 }
0x113a   :  { %v6931_v0 = vadd.f32 %v3916_v3, %v3915_v22 }
0x113c   :  { %3918 = vst.msk [vmem:[#allocation2 + $0x8] sm:$0xff] %vm309_vm0, %v6931_v0  ;;  %4862 = vmatmul.msk.f32.vlgmr.msra.gmra.mxu3 %vm309_vm0, %v6931_v0  ;;  %4866 = vmatmul.msk.f32.vlgmr.msra.gmra.mxu0 %vm309_vm0, %v6931_v0 }
0x113d   :  { %4131 = vmatpush.msra.mxu3 %v6747_v9  ;;  %4296 = vmatpush.msra.mxu0 %v6757_v17 }
0x113f   :  { %4132 = vmatpush.msra.mxu3 %v6750_v35  ;;  %4297 = vmatpush.msra.mxu0 %v6770_v46 }
0x1141   :  { %4133 = vmatpush.msra.mxu3 %v6764_v31  ;;  %4298 = vmatpush.msra.mxu0 %v6777_v51 }
0x1143   :  { %4134 = vmatpush.msra.mxu3 %v6774_v33  ;;  %4299 = vmatpush.msra.mxu0 %v6787_v25 }
0x1144   :  { %4863 = vmatmul.msk.f32.vlgmr.msrb.gmra.mxu3 %vm309_vm0, %v6931_v0 }
0x1145   :  { %4276 = vmatpush.msrb.mxu3 %v6722_v32 }
0x1147   :  { %4277 = vmatpush.msrb.mxu3 %v6725_v36 }
0x1149   :  { %4278 = vmatpush.msrb.mxu3 %v6727_v37 }
0x114b   :  { %4279 = vmatpush.msrb.mxu3 %v6730_v41 }
0x11b9   :  { %v4022_v48 = vpop.f32.mrf.mxu0 }
0x11ba   :  { %v4023_v61 = vadd.f32 %v6877_v16, %v4022_v48  ;;  %v4078_v48 = vld [vmem:[#allocation3 + $0x98] sm:$0xff] }
0x11bf   :  { %v3939_v53 = vpop.f32.mrf.mxu3 }
0x11c0   :  { %v3965_v57 = vadd.f32 %v3962_v23, %v3939_v53 }
0x11c2   :  { %v4864_v24 = vmul.f32 -1.442695, %v3965_v57 }
0x11c4   :  { %5201 = vpow2.f32 %v4864_v24 }
0x11c7   :  { %v3959_v62 = vpop.f32.mrf.mxu3 }
0x11c8   :  { %v3985_v50 = vadd.f32 %v3963_v54, %v3959_v62 }
0x11ca   :  { %v5202_v45 = vpop.eup %5201  ;;  %v4865_v52 = vmul.f32 -1.442695, %v3985_v50 }
0x11cb   :  { %v3969_v12 = vadd.f32 1.0, %v5202_v45 }
0x11cc   :  { %5203 = vpow2.f32 %v4865_v52 }
0x11cd   :  { %5205 = vrcp.f32 %v3969_v12  ;;  %v3981_v63 = vand.u32 2147483648, %v3969_v12  ;;  %v3979_v6 = vand.u32 2147483647, %v3969_v12  ;;  %vm3975_vm15 = vweird.f32 %v3969_v12 }
0x11cf   :  { %v3982_v15 = vor.u32 1.1754944e-38, %v3981_v63  ;;  %vm3980_vm2 = vcmp.eq.f32.partialorder %v3979_v6, 8.507059e+37 }
0x11d2   :  { %v5204_v55 = vpop.eup %5203 }
0x11d3   :  { %v5206_v4 = vpop.eup %5205  ;;  %v3989_v56 = vadd.f32 1.0, %v5204_v55 }
0x11d4   :  { %v3971_v60 = vmul.f32 %v5206_v4, %v3969_v12  ;;  %vm3976_vm14 = vweird.f32 %v5206_v4 }
0x11d5   :  { %5207 = vrcp.f32 %v3989_v56  ;;  %vm3977_vm1 = vmor %vm3975_vm15, %vm3976_vm14  ;;  %v4001_v19 = vand.u32 2147483648, %v3989_v56  ;;  %v3999_v20 = vand.u32 2147483647, %v3989_v56  ;;  %vm3995_vm4 = vweird.f32 %v3989_v56 }
0x11d6   :  { %v3972_v27 = vsub.f32 1.0, %v3971_v60 }
0x11d7   :  { %v4002_v29 = vor.u32 1.1754944e-38, %v4001_v19  ;;  %vm4000_vm6 = vcmp.eq.f32.partialorder %v3999_v20, 8.507059e+37  ;;  %v5275_v19 = vld [vmem:[#allocation18 + $0x18] sm:$0xff]  ;;  %v5278_v20 = vld [vmem:[#allocation18] sm:$0xff] }
0x11d8   :  { %v3973_v26 = vmul.f32 %v5206_v4, %v3972_v27 }
0x11da   :  { %v3974_v44 = vadd.f32 %v5206_v4, %v3973_v26 }
0x11db   :  { %v5208_v1 = vpop.eup %5207 }
0x11dc   :  { %v3978_v11 = vsel %vm3977_vm1, %v5206_v4, %v3974_v44  ;;  %v3991_v39 = vmul.f32 %v5208_v1, %v3989_v56  ;;  %vm3996_vm3 = vweird.f32 %v5208_v1 }
0x11dd   :  { %v3983_v34 = vsel %vm3980_vm2, %v3982_v15, %v3978_v11  ;;  %vm3997_vm5 = vmor %vm3995_vm4, %vm3996_vm3 }
0x11de   :  { %v4025_v18 = vmul.f32 %v4023_v61, %v3983_v34  ;;  %v3992_v30 = vsub.f32 1.0, %v3991_v39 }
0x11e0   :  { %v4026_v14 = vadd.f32 %v4025_v18, %v3964_v7  ;;  %v3993_v21 = vmul.f32 %v5208_v1, %v3992_v30 }
0x11e2   :  { %5209 = vtanh.f32 %v4026_v14  ;;  %v3994_v28 = vadd.f32 %v5208_v1, %v3993_v21  ;;  %v5276_v14 = vld [vmem:[#allocation18 + $0x10] sm:$0xff]  ;;  %v5277_v21 = vld [vmem:[#allocation18 + $0x8] sm:$0xff] }
0x11e4   :  { %v3998_v5 = vsel %vm3997_vm5, %v5208_v1, %v3994_v28 }
0x11e5   :  { %v4003_v13 = vsel %vm4000_vm6, %v4002_v29, %v3998_v5 }
0x11e6   :  { %v4028_v2 = vsub.f32 1.0, %v4003_v13  ;;  %v4030_v58 = vmul.f32 %v4003_v13, %v6931_v0 }
0x11e8   :  { %v5210_v47 = vpop.eup %5209 }
0x11e9   :  { %v4029_v49 = vmul.f32 %v5210_v47, %v4028_v2 }
0x11eb   :  { %v6955_v38 = vadd.f32 %v4030_v58, %v4029_v49 }
0x11ed   :  { %4032 = vst.msk [vmem:[#allocation2 + $0x10] sm:$0xff] %vm309_vm0, %v6955_v38  ;;  %4867 = vmatmul.msk.f32.vlgmr.msra.gmra.mxu1 %vm309_vm0, %v6955_v38  ;;  %4868 = vmatmul.msk.f32.vlgmr.msra.gmra.mxu2 %vm309_vm0, %v6955_v38 }
0x11ee   :  { %4871 = vmatmul.msk.f32.vlgmr.msra.gmra.mxu3 %vm309_vm0, %v6955_v38  ;;  %4359 = vmatpush.msra.mxu1 %v6747_v9 }
0x11ef   :  { %4390 = vmatpush.msra.mxu2 %v6722_v32  ;;  %4410 = vmatpush.msra.mxu3 %v6757_v17 }
0x11f0   :  { %4360 = vmatpush.msra.mxu1 %v6750_v35 }
0x11f1   :  { %4391 = vmatpush.msra.mxu2 %v6725_v36  ;;  %4411 = vmatpush.msra.mxu3 %v6770_v46 }
0x11f2   :  { %4361 = vmatpush.msra.mxu1 %v6764_v31 }
0x11f3   :  { %4392 = vmatpush.msra.mxu2 %v6727_v37  ;;  %4412 = vmatpush.msra.mxu3 %v6777_v51 }
0x11f4   :  { %4362 = vmatpush.msra.mxu1 %v6774_v33 }
0x11f5   :  { %4393 = vmatpush.msra.mxu2 %v6730_v41  ;;  %4413 = vmatpush.msra.mxu3 %v6787_v25 }
0x126a   :  { %v4053_v32 = vpop.f32.mrf.mxu1 }
0x126b   :  { %v4079_v43 = vadd.f32 %v4076_v40, %v4053_v32 }
0x126d   :  { %v4869_v8 = vmul.f32 -1.442695, %v4079_v43 }
0x126f   :  { %5211 = vpow2.f32 %v4869_v8 }
0x1270   :  { %v4073_v36 = vpop.f32.mrf.mxu2 }
0x1271   :  { %v4099_v10 = vadd.f32 %v4077_v59, %v4073_v36  ;;  %v4136_v50 = vpop.f32.mrf.mxu3 }
0x1272   :  { %v4137_v56 = vadd.f32 %v6877_v16, %v4136_v50 }
0x1273   :  { %v4870_v42 = vmul.f32 -1.442695, %v4099_v10 }
0x1275   :  { %v5212_v22 = vpop.eup %5211  ;;  %5213 = vpow2.f32 %v4870_v42 }
0x1276   :  { %v4083_v37 = vadd.f32 1.0, %v5212_v22 }
0x1278   :  { %5215 = vrcp.f32 %v4083_v37  ;;  %v4095_v57 = vand.u32 2147483648, %v4083_v37  ;;  %v4093_v62 = vand.u32 2147483647, %v4083_v37  ;;  %vm4089_vm8 = vweird.f32 %v4083_v37 }
0x127a   :  { %v4096_v12 = vor.u32 1.1754944e-38, %v4095_v57  ;;  %vm4094_vm10 = vcmp.eq.f32.partialorder %v4093_v62, 8.507059e+37  ;;  %v4192_v57 = vld [vmem:[#allocation3 + $0xa0] sm:$0xff] }
0x127b   :  { %v5214_v3 = vpop.eup %5213 }
0x127c   :  { %v4103_v0 = vadd.f32 1.0, %v5214_v3 }
0x127e   :  { %v5216_v53 = vpop.eup %5215  ;;  %5217 = vrcp.f32 %v4103_v0  ;;  %v4115_v63 = vand.u32 2147483648, %v4103_v0  ;;  %v4113_v6 = vand.u32 2147483647, %v4103_v0  ;;  %vm4109_vm12 = vweird.f32 %v4103_v0 }
0x127f   :  { %v4085_v41 = vmul.f32 %v5216_v53, %v4083_v37  ;;  %vm4090_vm7 = vweird.f32 %v5216_v53 }
0x1280   :  { %vm4091_vm9 = vmor %vm4089_vm8, %vm4090_vm7  ;;  %v4116_v15 = vor.u32 1.1754944e-38, %v4115_v63  ;;  %vm4114_vm14 = vcmp.eq.f32.partialorder %v4113_v6, 8.507059e+37  ;;  %v5282_v63 = vld [vmem:[#allocation18 + $0x40] sm:$0xff] }
0x1281   :  { %v4086_v23 = vsub.f32 1.0, %v4085_v41  ;;  %v4305_v6 = vld [vmem:[#allocation3 + $0x68] sm:$0xff] }
0x1283   :  { %v4087_v24 = vmul.f32 %v5216_v53, %v4086_v23 }
0x1284   :  { %v5218_v54 = vpop.eup %5217 }
0x1285   :  { %v4105_v45 = vmul.f32 %v5218_v54, %v4103_v0  ;;  %v4088_v52 = vadd.f32 %v5216_v53, %v4087_v24  ;;  %vm4110_vm11 = vweird.f32 %v5218_v54 }
0x1286   :  { %vm4111_vm13 = vmor %vm4109_vm12, %vm4110_vm11 }
0x1287   :  { %v4106_v55 = vsub.f32 1.0, %v4105_v45  ;;  %v4092_v4 = vsel %vm4091_vm9, %v5216_v53, %v4088_v52 }
0x1288   :  { %v4097_v60 = vsel %vm4094_vm10, %v4096_v12, %v4092_v4 }
0x1289   :  { %v4107_v27 = vmul.f32 %v5218_v54, %v4106_v55  ;;  %v4139_v26 = vmul.f32 %v4137_v56, %v4097_v60  ;;  %v5279_v56 = vld [vmem:[#allocation18 + $0x58] sm:$0xff]  ;;  %v5280_v60 = vld [vmem:[#allocation18 + $0x50] sm:$0xff] }
0x128b   :  { %v4108_v44 = vadd.f32 %v5218_v54, %v4107_v27  ;;  %v4140_v1 = vadd.f32 %v4139_v26, %v4078_v48  ;;  %v5281_v27 = vld [vmem:[#allocation18 + $0x48] sm:$0xff] }
0x128d   :  { %v4112_v61 = vsel %vm4111_vm13, %v5218_v54, %v4108_v44  ;;  %5219 = vtanh.f32 %v4140_v1 }
0x128e   :  { %v4117_v11 = vsel %vm4114_vm14, %v4116_v15, %v4112_v61  ;;  %v4304_v15 = vld [vmem:[#allocation3 + $0x28] sm:$0xff] }
0x128f   :  { %v4142_v39 = vsub.f32 1.0, %v4117_v11  ;;  %v4144_v30 = vmul.f32 %v4117_v11, %v6955_v38 }
0x1293   :  { %v5220_v34 = vpop.eup %5219 }
0x1294   :  { %v4143_v18 = vmul.f32 %v5220_v34, %v4142_v39 }
0x1296   :  { %v6979_v7 = vadd.f32 %v4144_v30, %v4143_v18 }
0x1298   :  { %4146 = vst.msk [vmem:[#allocation2 + $0x18] sm:$0xff] %vm309_vm0, %v6979_v7  ;;  %4872 = vmatmul.msk.f32.vlgmr.msrb.gmra.mxu0 %vm309_vm0, %v6979_v7  ;;  %4873 = vmatmul.msk.f32.vlgmr.msrb.gmra.mxu1 %vm309_vm0, %v6979_v7 }
0x1299   :  { %4876 = vmatmul.msk.f32.vlgmr.msrb.gmra.mxu2 %vm309_vm0, %v6979_v7  ;;  %4473 = vmatpush.msrb.mxu0 %v6747_v9 }
0x129a   :  { %4504 = vmatpush.msrb.mxu1 %v5275_v19  ;;  %4524 = vmatpush.msrb.mxu2 %v6757_v17  ;;  %v4190_v17 = vld [vmem:[#allocation3 + $0x20] sm:$0xff] }
0x129b   :  { %4474 = vmatpush.msrb.mxu0 %v6750_v35  ;;  %v4191_v35 = vld [vmem:[#allocation3 + $0x60] sm:$0xff] }
0x129c   :  { %4505 = vmatpush.msrb.mxu1 %v5276_v14  ;;  %4525 = vmatpush.msrb.mxu2 %v6770_v46 }
0x129d   :  { %4475 = vmatpush.msrb.mxu0 %v6764_v31 }
0x129e   :  { %4506 = vmatpush.msrb.mxu1 %v5277_v21  ;;  %4526 = vmatpush.msrb.mxu2 %v6777_v51 }
0x129f   :  { %4476 = vmatpush.msrb.mxu0 %v6774_v33 }
0x12a0   :  { %4507 = vmatpush.msrb.mxu1 %v5278_v20  ;;  %4527 = vmatpush.msrb.mxu2 %v6787_v25 }
0x1315   :  { %v4167_v9 = vpop.f32.mrf.mxu0  ;;  %v4187_v28 = vpop.f32.mrf.mxu1 }
0x1316   :  { %v4193_v29 = vadd.f32 %v4190_v17, %v4167_v9  ;;  %v4213_v5 = vadd.f32 %v4191_v35, %v4187_v28 }
0x1318   :  { %v4874_v13 = vmul.f32 -1.442695, %v4193_v29  ;;  %v4875_v46 = vmul.f32 -1.442695, %v4213_v5 }
0x131a   :  { %5221 = vpow2.f32 %v4874_v13 }
0x131b   :  { %5223 = vpow2.f32 %v4875_v46 }
0x131c   :  { %v4250_v59 = vpop.f32.mrf.mxu2 }
0x131d   :  { %v4251_v37 = vadd.f32 %v6877_v16, %v4250_v59 }
0x1320   :  { %v5222_v31 = vpop.eup %5221 }
0x1321   :  { %v5224_v2 = vpop.eup %5223  ;;  %v4197_v47 = vadd.f32 1.0, %v5222_v31 }
0x1322   :  { %v4217_v51 = vadd.f32 1.0, %v5224_v2 }
0x1323   :  { %5225 = vrcp.f32 %v4197_v47  ;;  %v4209_v40 = vand.u32 2147483648, %v4197_v47  ;;  %v4207_v8 = vand.u32 2147483647, %v4197_v47  ;;  %vm4203_vm1 = vweird.f32 %v4197_v47 }
0x1324   :  { %5227 = vrcp.f32 %v4217_v51  ;;  %v4229_v53 = vand.u32 2147483648, %v4217_v51  ;;  %vm4223_vm5 = vweird.f32 %v4217_v51  ;;  %v4227_v23 = vand.u32 2147483647, %v4217_v51 }
0x1325   :  { %v4210_v42 = vor.u32 1.1754944e-38, %v4209_v40  ;;  %vm4208_vm3 = vcmp.eq.f32.partialorder %v4207_v8, 8.507059e+37 }
0x1326   :  { %v4230_v54 = vor.u32 1.1754944e-38, %v4229_v53  ;;  %vm4228_vm7 = vcmp.eq.f32.partialorder %v4227_v23, 8.507059e+37 }
0x1329   :  { %v5226_v33 = vpop.eup %5225 }
0x132a   :  { %v5228_v49 = vpop.eup %5227  ;;  %v4199_v58 = vmul.f32 %v5226_v33, %v4197_v47  ;;  %vm4204_vm15 = vweird.f32 %v5226_v33 }
0x132b   :  { %v4219_v25 = vmul.f32 %v5228_v49, %v4217_v51  ;;  %vm4205_vm2 = vmor %vm4203_vm1, %vm4204_vm15  ;;  %vm4224_vm4 = vweird.f32 %v5228_v49 }
0x132c   :  { %v4200_v38 = vsub.f32 1.0, %v4199_v58  ;;  %vm4225_vm6 = vmor %vm4223_vm5, %vm4224_vm4 }
0x132d   :  { %v4220_v32 = vsub.f32 1.0, %v4219_v25  ;;  %v4306_v25 = vld [vmem:[#allocation3 + $0xa8] sm:$0xff] }
0x132e   :  { %v4201_v43 = vmul.f32 %v5226_v33, %v4200_v38 }
0x132f   :  { %v4221_v36 = vmul.f32 %v5228_v49, %v4220_v32 }
0x1330   :  { %v4202_v10 = vadd.f32 %v5226_v33, %v4201_v43 }
0x1331   :  { %v4222_v3 = vadd.f32 %v5228_v49, %v4221_v36 }
0x1332   :  { %v4206_v22 = vsel %vm4205_vm2, %v5226_v33, %v4202_v10 }
0x1333   :  { %v4211_v0 = vsel %vm4208_vm3, %v4210_v42, %v4206_v22  ;;  %v4226_v62 = vsel %vm4225_vm6, %v5228_v49, %v4222_v3 }
0x1334   :  { %v4253_v41 = vmul.f32 %v4251_v37, %v4211_v0  ;;  %v4231_v50 = vsel %vm4228_vm7, %v4230_v54, %v4226_v62  ;;  %v4418_v37 = vld [vmem:[#allocation3 + $0x30] sm:$0xff] }
0x1335   :  { %v4256_v45 = vsub.f32 1.0, %v4231_v50  ;;  %v4258_v55 = vmul.f32 %v4231_v50, %v6979_v7  ;;  %v4419_v0 = vld [vmem:[#allocation3 + $0x70] sm:$0xff] }
0x1336   :  { %v4254_v24 = vadd.f32 %v4253_v41, %v4192_v57 }
0x1338   :  { %5229 = vtanh.f32 %v4254_v24 }
0x133e   :  { %v5230_v52 = vpop.eup %5229 }
0x133f   :  { %v4257_v12 = vmul.f32 %v5230_v52, %v4256_v45 }
0x1341   :  { %v6999_v4 = vadd.f32 %v4258_v55, %v4257_v12 }
0x1343   :  { %4260 = vst.msk [vmem:[#allocation2 + $0x20] sm:$0xff] %vm309_vm0, %v6999_v4  ;;  %4877 = vmatmul.msk.f32.vlgmr.msrb.gmra.mxu3 %vm309_vm0, %v6999_v4  ;;  %4878 = vmatmul.msk.f32.vlgmr.msra.gmra.mxu0 %vm309_vm0, %v6999_v4 }
0x1344   :  { %4881 = vmatmul.msk.f32.vlgmr.msra.gmra.mxu1 %vm309_vm0, %v6999_v4  ;;  %4587 = vmatpush.msrb.mxu3 %v5279_v56 }
0x1346   :  { %4588 = vmatpush.msrb.mxu3 %v5280_v60 }
0x1348   :  { %4589 = vmatpush.msrb.mxu3 %v5281_v27 }
0x134a   :  { %4590 = vmatpush.msrb.mxu3 %v5282_v63 }
0x13c0   :  { %v4301_v26 = vpop.f32.mrf.mxu0 }
0x13c1   :  { %v4327_v48 = vadd.f32 %v4305_v6, %v4301_v26  ;;  %v4364_v5 = vpop.f32.mrf.mxu1 }
0x13c2   :  { %v4365_v31 = vadd.f32 %v6877_v16, %v4364_v5 }
0x13c3   :  { %v4880_v44 = vmul.f32 -1.442695, %v4327_v48 }
0x13c5   :  { %5231 = vpow2.f32 %v4880_v44 }
0x13c6   :  { %v4281_v1 = vpop.f32.mrf.mxu3 }
0x13c7   :  { %v4307_v61 = vadd.f32 %v4304_v15, %v4281_v1 }
0x13c9   :  { %v4879_v11 = vmul.f32 -1.442695, %v4307_v61 }
0x13cb   :  { %v5232_v39 = vpop.eup %5231  ;;  %5233 = vpow2.f32 %v4879_v11 }
0x13cc   :  { %v4331_v34 = vadd.f32 1.0, %v5232_v39 }
0x13ce   :  { %5235 = vrcp.f32 %v4331_v34  ;;  %v4343_v33 = vand.u32 2147483648, %v4331_v34  ;;  %vm4337_vm13 = vweird.f32 %v4331_v34  ;;  %v4341_v58 = vand.u32 2147483647, %v4331_v34 }
0x13d0   :  { %v4344_v40 = vor.u32 1.1754944e-38, %v4343_v33  ;;  %vm4342_vm15 = vcmp.eq.f32.partialorder %v4341_v58, 8.507059e+37 }
0x13d1   :  { %v5234_v18 = vpop.eup %5233 }
0x13d2   :  { %v4311_v30 = vadd.f32 1.0, %v5234_v18  ;;  %v4420_v18 = vld [vmem:[#allocation3 + $0xb0] sm:$0xff] }
0x13d4   :  { %5237 = vrcp.f32 %v4311_v30  ;;  %v5236_v7 = vpop.eup %5235  ;;  %v4323_v17 = vand.u32 2147483648, %v4311_v30  ;;  %v4321_v35 = vand.u32 2147483647, %v4311_v30  ;;  %vm4317_vm9 = vweird.f32 %v4311_v30 }
0x13d5   :  { %v4333_v19 = vmul.f32 %v5236_v7, %v4331_v34  ;;  %vm4338_vm12 = vweird.f32 %v5236_v7 }
0x13d6   :  { %v4324_v46 = vor.u32 1.1754944e-38, %v4323_v17  ;;  %vm4322_vm11 = vcmp.eq.f32.partialorder %v4321_v35, 8.507059e+37  ;;  %vm4339_vm14 = vmor %vm4337_vm13, %vm4338_vm12 }
0x13d7   :  { %v4334_v20 = vsub.f32 1.0, %v4333_v19 }
0x13d9   :  { %v4335_v29 = vmul.f32 %v5236_v7, %v4334_v20 }
0x13da   :  { %v5238_v14 = vpop.eup %5237 }
0x13db   :  { %v4313_v21 = vmul.f32 %v5238_v14, %v4311_v30  ;;  %vm4318_vm8 = vweird.f32 %v5238_v14  ;;  %v4336_v47 = vadd.f32 %v5236_v7, %v4335_v29  ;;  %v4532_v29 = vld [vmem:[#allocation3 + $0x38] sm:$0xff] }
0x13dc   :  { %vm4319_vm10 = vmor %vm4317_vm9, %vm4318_vm8 }
0x13dd   :  { %v4314_v9 = vsub.f32 1.0, %v4313_v21  ;;  %v4340_v32 = vsel %vm4339_vm14, %v5236_v7, %v4336_v47 }
0x13de   :  { %v4345_v43 = vsel %vm4342_vm15, %v4344_v40, %v4340_v32 }
0x13df   :  { %v4315_v28 = vmul.f32 %v5238_v14, %v4314_v9  ;;  %v4370_v8 = vsub.f32 1.0, %v4345_v43  ;;  %v4372_v10 = vmul.f32 %v4345_v43, %v6999_v4 }
0x13e1   :  { %v4316_v13 = vadd.f32 %v5238_v14, %v4315_v28 }
0x13e3   :  { %v4320_v2 = vsel %vm4319_vm10, %v5238_v14, %v4316_v13 }
0x13e4   :  { %v4325_v51 = vsel %vm4322_vm11, %v4324_v46, %v4320_v2 }
0x13e5   :  { %v4367_v49 = vmul.f32 %v4365_v31, %v4325_v51  ;;  %v4533_v31 = vld [vmem:[#allocation3 + $0x78] sm:$0xff] }
0x13e7   :  { %v4368_v38 = vadd.f32 %v4367_v49, %v4306_v25 }
0x13e9   :  { %5239 = vtanh.f32 %v4368_v38 }
0x13ef   :  { %v5240_v36 = vpop.eup %5239 }
0x13f0   :  { %v4371_v59 = vmul.f32 %v5240_v36, %v4370_v8 }
0x13f2   :  { %v4373_v42 = vadd.f32 %v4372_v10, %v4371_v59 }
0x13f4   :  { %4374 = vst.msk [vmem:[#allocation2 + $0x28] sm:$0xff] %vm309_vm0, %v4373_v42  ;;  %4882 = vmatmul.msk.f32.vlgmr.msra.gmra.mxu2 %vm309_vm0, %v4373_v42  ;;  %4883 = vmatmul.msk.f32.vlgmr.msra.gmra.mxu3 %vm309_vm0, %v4373_v42 }
0x13f5   :  { %4886 = vmatmul.msk.f32.vlgmr.msrb.gmra.mxu0 %vm309_vm0, %v4373_v42 }
0x1472   :  { %v4478_v26 = vpop.f32.mrf.mxu0 }
0x1473   :  { %v4479_v1 = vadd.f32 %v6877_v16, %v4478_v26 }
0x1477   :  { %v4395_v22 = vpop.f32.mrf.mxu2  ;;  %v4415_v3 = vpop.f32.mrf.mxu3 }
0x1478   :  { %v4421_v53 = vadd.f32 %v4418_v37, %v4395_v22  ;;  %v4441_v41 = vadd.f32 %v4419_v0, %v4415_v3  ;;  %v5283_v0 = vld [vmem:[#allocation21] ss:$0 sm:$0xff] }
0x147a   :  { %v4884_v23 = vmul.f32 -1.442695, %v4421_v53  ;;  %v4885_v57 = vmul.f32 -1.442695, %v4441_v41 }
0x147c   :  { %5241 = vpow2.f32 %v4884_v23 }
0x147d   :  { %5243 = vpow2.f32 %v4885_v57 }
0x1482   :  { %v5242_v24 = vpop.eup %5241 }
0x1483   :  { %v5244_v62 = vpop.eup %5243  ;;  %v4425_v54 = vadd.f32 1.0, %v5242_v24 }
0x1484   :  { %v4445_v50 = vadd.f32 1.0, %v5244_v62 }
0x1485   :  { %5245 = vrcp.f32 %v4425_v54  ;;  %v4437_v56 = vand.u32 2147483648, %v4425_v54  ;;  %v4435_v63 = vand.u32 2147483647, %v4425_v54  ;;  %vm4431_vm2 = vweird.f32 %v4425_v54 }
0x1486   :  { %5247 = vrcp.f32 %v4445_v50  ;;  %v4457_v34 = vand.u32 2147483648, %v4445_v50  ;;  %vm4451_vm6 = vweird.f32 %v4445_v50  ;;  %v4455_v30 = vand.u32 2147483647, %v4445_v50 }
0x1487   :  { %v4438_v44 = vor.u32 1.1754944e-38, %v4437_v56  ;;  %vm4436_vm4 = vcmp.eq.f32.partialorder %v4435_v63, 8.507059e+37 }
0x1488   :  { %v4458_v14 = vor.u32 1.1754944e-38, %v4457_v34  ;;  %vm4456_vm8 = vcmp.eq.f32.partialorder %v4455_v30, 8.507059e+37  ;;  %v4616_v34 = vpop.permute.xlu2 %4615 }
0x148b   :  { %v5246_v45 = vpop.eup %5245 }
0x148c   :  { %v5248_v52 = vpop.eup %5247  ;;  %v4427_v12 = vmul.f32 %v5246_v45, %v4425_v54  ;;  %vm4432_vm1 = vweird.f32 %v5246_v45  ;;  %v4534_v54 = vld [vmem:[#allocation3 + $0xb8] sm:$0xff] }
0x148d   :  { %v4447_v55 = vmul.f32 %v5248_v52, %v4445_v50  ;;  %vm4433_vm3 = vmor %vm4431_vm2, %vm4432_vm1  ;;  %vm4452_vm5 = vweird.f32 %v5248_v52  ;;  %vm4666_vm2 = vcmask 516096  }
0x148e   :  { %v4428_v4 = vsub.f32 1.0, %v4427_v12  ;;  %vm4453_vm7 = vmor %vm4451_vm6, %vm4452_vm5 }
0x148f   :  { %v4448_v60 = vsub.f32 1.0, %v4447_v55 }
0x1490   :  { %v4429_v27 = vmul.f32 %v5246_v45, %v4428_v4 }
0x1491   :  { %v4449_v6 = vmul.f32 %v5248_v52, %v4448_v60 }
0x1492   :  { %v4430_v48 = vadd.f32 %v5246_v45, %v4429_v27 }
0x1493   :  { %v4450_v11 = vadd.f32 %v5248_v52, %v4449_v6 }
0x1494   :  { %v4434_v15 = vsel %vm4433_vm3, %v5246_v45, %v4430_v48  ;;  %v4609_v48 = vld [vmem:[#allocation2 + $0x28] sm:$0xff] }
0x1495   :  { %v4439_v61 = vsel %vm4436_vm4, %v4438_v44, %v4434_v15  ;;  %v4454_v19 = vsel %vm4453_vm7, %v5248_v52, %v4450_v11  ;;  %v4608_v44 = vld [vmem:[#allocation2 + $0x20] sm:$0xff]  ;;  %v4606_v15 = vld [vmem:[#allocation2 + $0x10] sm:$0xff] }
0x1496   :  { %v4481_v39 = vmul.f32 %v4479_v1, %v4439_v61  ;;  %v4459_v21 = vsel %vm4456_vm8, %v4458_v14, %v4454_v19  ;;  %v4607_v1 = vld [vmem:[#allocation2 + $0x18] sm:$0xff]  ;;  %v4605_v61 = vld [vmem:[#allocation2 + $0x8] sm:$0xff]  ;;  %v4604_v11 = vld [vmem:[#allocation2] sm:$0xff] }
0x1497   :  { %v4484_v20 = vsub.f32 1.0, %v4459_v21  ;;  %v4486_v17 = vmul.f32 %v4459_v21, %v4373_v42 }
0x1498   :  { %v4482_v7 = vadd.f32 %v4481_v39, %v4420_v18  ;;  %v4603_v39 = vld [vmem:[%s7055_s19] sm:$0x1]  ;;  %v4618_v18 = vperm.slane %v4616_v34, 0 }
0x149a   :  { %5249 = vtanh.f32 %v4482_v7 }
0x14a0   :  { %v5250_v9 = vpop.eup %5249 }
0x14a1   :  { %v4485_v16 = vmul.f32 %v5250_v9, %v4484_v20 }
0x14a3   :  { %v4487_v28 = vadd.f32 %v4486_v17, %v4485_v16 }
0x14a5   :  { %4488 = vst.msk [vmem:[#allocation2 + $0x30] sm:$0xff] %vm309_vm0, %v4487_v28  ;;  %4887 = vmatmul.msk.f32.vlgmr.msrb.gmra.mxu1 %vm309_vm0, %v4487_v28  ;;  %4888 = vmatmul.msk.f32.vlgmr.msrb.gmra.mxu2 %vm309_vm0, %v4487_v28 }
0x14a6   :  { %4891 = vmatmul.msk.f32.vlgmr.msrb.gmra.mxu3 %vm309_vm0, %v4487_v28 }
0x14ac   :  { %v4610_v6 = vld [vmem:[#allocation2 + $0x30] sm:$0xff] }
0x1522   :  { %v4509_v35 = vpop.f32.mrf.mxu1 }
0x1523   :  { %v4535_v5 = vadd.f32 %v4532_v29, %v4509_v35 }
0x1525   :  { %v4889_v13 = vmul.f32 -1.442695, %v4535_v5 }
0x1527   :  { %5251 = vpow2.f32 %v4889_v13 }
0x1528   :  { %v4529_v46 = vpop.f32.mrf.mxu2 }
0x1529   :  { %v4555_v2 = vadd.f32 %v4533_v31, %v4529_v46  ;;  %v4592_v59 = vpop.f32.mrf.mxu3 }
0x152a   :  { %v4593_v53 = vadd.f32 %v5283_v0, %v4592_v59 }
0x152b   :  { %v4890_v47 = vmul.f32 -1.442695, %v4555_v2 }
0x152d   :  { %v5252_v51 = vpop.eup %5251  ;;  %5253 = vpow2.f32 %v4890_v47 }
0x152e   :  { %v4539_v33 = vadd.f32 1.0, %v5252_v51 }
0x1530   :  { %5255 = vrcp.f32 %v4539_v33  ;;  %v4551_v40 = vand.u32 2147483648, %v4539_v33  ;;  %v4549_v8 = vand.u32 2147483647, %v4539_v33  ;;  %vm4545_vm10 = vweird.f32 %v4539_v33 }
0x1532   :  { %v4552_v22 = vor.u32 1.1754944e-38, %v4551_v40  ;;  %vm4550_vm12 = vcmp.eq.f32.partialorder %v4549_v8, 8.507059e+37 }
0x1533   :  { %v5254_v49 = vpop.eup %5253 }
0x1534   :  { %v4559_v58 = vadd.f32 1.0, %v5254_v49 }
0x1536   :  { %v5256_v25 = vpop.eup %5255  ;;  %5257 = vrcp.f32 %v4559_v58  ;;  %v4571_v57 = vand.u32 2147483648, %v4559_v58  ;;  %v4569_v62 = vand.u32 2147483647, %v4559_v58  ;;  %vm4565_vm14 = vweird.f32 %v4559_v58 }
0x1537   :  { %v4541_v38 = vmul.f32 %v5256_v25, %v4539_v33  ;;  %vm4546_vm9 = vweird.f32 %v5256_v25 }
0x1538   :  { %vm4547_vm11 = vmor %vm4545_vm10, %vm4546_vm9  ;;  %v4572_v52 = vor.u32 1.1754944e-38, %v4571_v57  ;;  %vm4570_vm1 = vcmp.eq.f32.partialorder %v4569_v62, 8.507059e+37 }
0x1539   :  { %v4542_v32 = vsub.f32 1.0, %v4541_v38 }
0x153b   :  { %v4543_v43 = vmul.f32 %v5256_v25, %v4542_v32 }
0x153c   :  { %v5258_v36 = vpop.eup %5257 }
0x153d   :  { %v4561_v10 = vmul.f32 %v5258_v36, %v4559_v58  ;;  %v4544_v42 = vadd.f32 %v5256_v25, %v4543_v43  ;;  %vm4566_vm13 = vweird.f32 %v5258_v36 }
0x153e   :  { %vm4567_vm15 = vmor %vm4565_vm14, %vm4566_vm13 }
0x153f   :  { %v4562_v37 = vsub.f32 1.0, %v4561_v10  ;;  %v4548_v3 = vsel %vm4547_vm11, %v5256_v25, %v4544_v42 }
0x1540   :  { %v4553_v41 = vsel %vm4550_vm12, %v4552_v22, %v4548_v3 }
0x1541   :  { %v4563_v23 = vmul.f32 %v5258_v36, %v4562_v37  ;;  %v4595_v24 = vmul.f32 %v4593_v53, %v4553_v41 }
0x1543   :  { %v4564_v50 = vadd.f32 %v5258_v36, %v4563_v23  ;;  %v4596_v45 = vadd.f32 %v4595_v24, %v4534_v54 }
0x1545   :  { %v4568_v12 = vsel %vm4567_vm15, %v5258_v36, %v4564_v50  ;;  %5259 = vtanh.f32 %v4596_v45 }
0x1546   :  { %v4573_v55 = vsel %vm4570_vm1, %v4572_v52, %v4568_v12 }
0x1547   :  { %v4598_v4 = vsub.f32 1.0, %v4573_v55  ;;  %v4600_v27 = vmul.f32 %v4573_v55, %v4487_v28 }
0x154b   :  { %v5260_v56 = vpop.eup %5259 }
0x154c   :  { %v4599_v60 = vmul.f32 %v5260_v56, %v4598_v4 }
0x154e   :  { %v4601_v63 = vadd.f32 %v4600_v27, %v4599_v60 }
0x1550   :  { %4602 = vst.msk [vmem:[#allocation2 + $0x38] sm:$0xff] %vm309_vm0, %v4601_v63 }
0x1557   :  { %v4611_v26 = vld [vmem:[#allocation2 + $0x38] sm:$0xff] }
0x1558   :  { %4892 = vmatpush.xpose.msk.msra.mxu0 %vm309_vm0, %v4611_v26 }
0x155c   :  { %4893 = vmatpush.xpose.msk.msra.mxu0 %vm309_vm0, %v4610_v6 }
0x1560   :  { %4894 = vmatpush.xpose.msk.msra.mxu0 %vm309_vm0, %v4609_v48 }
0x1564   :  { %4895 = vmatpush.xpose.msk.msra.mxu0 %vm309_vm0, %v4608_v44 }
0x1568   :  { %4896 = vmatpush.xpose.msk.msra.mxu0 %vm309_vm0, %v4607_v1 }
0x156c   :  { %4897 = vmatpush.xpose.msk.msra.mxu0 %vm309_vm0, %v4606_v15 }
0x1570   :  { %4898 = vmatpush.xpose.msk.msra.mxu0 %vm309_vm0, %v4605_v61 }
0x1574   :  { %4899 = vmatpush.xpose.msk.msra.mxu0 %vm309_vm0, %v4604_v11 }
0x1577   :  { %4900 = vmatmul.msk.f32.vlgmr.msra.gmra.mxu0 %vm309_vm0, %v4603_v39 }
0x15f4   :  { %v4663_v30 = vpop.f32.mrf.mxu0 }
0x15f5   :  { %v4664_v7 = vadd.f32 %v4663_v30, %v4618_v18 }
0x15f7   :  { %4667 = vst.msk [vmem:[%s7057_s21] sm:$0x1] %vm4666_vm2, %v4664_v7 }
0x15f8   :  { %4672 = vsyncpa [#allocation6], 1 }
0x15f9   :  { %4673 = vsyncpa [#allocation8], 1 }
0x15fa   :  { %4674 = vsyncpa [#allocation11], 1 }
0x15fb   :  { %4675 = vsyncpa [#allocation14], 1 }
0x15fc   :  { %4676 = vsyncpa [#allocation17], 1 }
0x15fd   :  { %4677 = vsyncpa [#allocation20], 1 }

</bundles_post_ra>
